<compile_context>
chip_gen: v7x
topology: tpu7x:2x2x1
jax: 0.10.0
libtpu: 0.0.40
codegen_flags: <defaults>
</compile_context>

<pallas_src>
import jax
import jax.numpy as jnp
from jax.experimental import pallas as pl
from jax.experimental.pallas import tpu as pltpu

_VMEM = pl.BlockSpec(memory_space=pltpu.MemorySpace.VMEM)
_VMEM_LIMIT = 32 * 1024 * 1024


def _cp(**kw):
    return pltpu.CompilerParams(vmem_limit_bytes=_VMEM_LIMIT, **kw)


def _mm(a, b):
    """MXU matmul with f32 accumulation (inputs already bf16 where possible)."""
    return jnp.dot(a, b, preferred_element_type=jnp.float32)


def _lstm_cell(g, c, H):
    """g: [B, 4H] pre-activation gates (PyTorch order i, f, g, o); c: [B, H] f32."""
    i = jax.nn.sigmoid(g[:, 0 * H:1 * H])
    f = jax.nn.sigmoid(g[:, 1 * H:2 * H])
    gg = jnp.tanh(g[:, 2 * H:3 * H])
    o = jax.nn.sigmoid(g[:, 3 * H:4 * H])
    c_new = f * c + i * gg
    h_new = o * jnp.tanh(c_new)
    return h_new, c_new


# ---------------- bidirectional encoder: one body, interleaved chains ----------------

def _make_bilstm_kernel(T, B, H):
    H4 = 4 * H

    def kernel(x_ref, h0_ref, c0_ref, wih_ref, whhf_ref, whhb_ref, b_ref,
               hT_ref, cT_ref):
        # Hoisted input projection for BOTH directions in one MXU pass: [T*B, 8H].
        gx = _mm(x_ref[...], wih_ref[...]) + b_ref[...]
        gxf = gx[:, :H4]
        gxb = gx[:, H4:]
        whhf = whhf_ref[...]                 # [H, 4H] bf16
        whhb = whhb_ref[...]
        hf, cf = h0_ref[0], c0_ref[0]
        hb, cb = h0_ref[1], c0_ref[1]
        # Fully unrolled; the two independent chains interleave per step -> 2x ILP
        # on the latency-bound recurrence even on a single TensorCore.
        for t in range(T):
            rf = t * B
            rb = (T - 1 - t) * B             # bwd direction reads reversed rows
            gf = gxf[rf:rf + B] + _mm(hf.astype(jnp.bfloat16), whhf)
            gb = gxb[rb:rb + B] + _mm(hb.astype(jnp.bfloat16), whhb)
            hf, cf = _lstm_cell(gf, cf, H)
            hb, cb = _lstm_cell(gb, cb, H)
        hT_ref[0] = hf
        hT_ref[1] = hb
        cT_ref[0] = cf
        cT_ref[1] = cb
    return kernel


def bilstm_encoder(p, x_btf, state):
    """1-layer bidirectional LSTM.  Only (h_n, c_n) are produced; the per-timestep
    sequence output is dead in RVAE and never stored."""
    B, T, In = x_btf.shape
    H = p['whh_f'].shape[0]
    x_tm = jnp.transpose(x_btf, (1, 0, 2)).reshape(T * B, In).astype(jnp.bfloat16)
    if state is None:
        h0 = jnp.zeros((2, B, H), jnp.float32)
        c0 = jnp.zeros((2, B, H), jnp.float32)
    else:
        h0, c0 = state
    hT, cT = pl.pallas_call(
        _make_bilstm_kernel(T, B, H),
        out_shape=(jax.ShapeDtypeStruct((2, B, H), jnp.float32),
                   jax.ShapeDtypeStruct((2, B, H), jnp.float32)),
        in_specs=[_VMEM] * 7,
        out_specs=(_VMEM, _VMEM),
        compiler_params=_cp(),
    )(x_tm, h0, c0, p['wih'], p['whh_f'], p['whh_b'], p['b'])
    return hT, cT


# --------- decoder: fused latent + 2 interleaved LSTM layers (one kernel) ------------

def _make_decoder_kernel(T, B, H, L):
    def kernel(x_ref, hT2_ref, h0_ref, c0_ref,
               wmulv_ref, bmulv_ref, eps_ref,
               wihx0_ref, wihz0_ref, b0_ref, whh0_ref,
               wih1_ref, b1_ref, whh1_ref,
               out1_ref, hT_ref, cT_ref, mu_ref, std_ref, kld_ref):
        # ---- latent: mu / logvar / reparam / KLD with ONE MXU push ----
        ctx = jnp.concatenate([hT2_ref[0], hT2_ref[1]], axis=1)          # [B, 2H]
        mlv = _mm(ctx.astype(jnp.bfloat16), wmulv_ref[...]) + bmulv_ref[...]
        mu = mlv[:, :L]
        lv = mlv[:, L:]
        std = jnp.exp(0.5 * lv)
        z = eps_ref[...] * std + mu
        mu_ref[...] = mu
        std_ref[...] = std
        per_ex = jnp.sum(lv - mu * mu - jnp.exp(lv) + 1.0, axis=1, keepdims=True)
        kld_ref[...] = -0.5 * jnp.mean(per_ex, axis=0, keepdims=True)

        # ---- layer-0 hoisted word-emb projection; z enters as a broadcast row ----
        gx0 = _mm(x_ref[...], wihx0_ref[...])                            # [T*B, 4H]
        zb0 = _mm(z.astype(jnp.bfloat16), wihz0_ref[...]) + b0_ref[...]  # [B, 4H]

        whh0 = whh0_ref[...]
        wih1 = wih1_ref[...]
        whh1 = whh1_ref[...]
        b1 = b1_ref[...]

        h0, c0 = h0_ref[0], c0_ref[0]
        h1, c1 = h0_ref[1], c0_ref[1]
        y1 = []
        for t in range(T):
            r = t * B
            # layer 0, step t: one lane-dense [B,H]x[H,4H] push
            g0 = gx0[r:r + B] + zb0 + _mm(h0.astype(jnp.bfloat16), whh0)
            h0, c0 = _lstm_cell(g0, c0, H)
            # layer 1, step t: input projection taken from the register-resident h0,
            # so the two chains software-pipeline across the unrolled steps.
            y0b = h0.astype(jnp.bfloat16)
            g1 = b1 + _mm(y0b, wih1) + _mm(h1.astype(jnp.bfloat16), whh1)
            h1, c1 = _lstm_cell(g1, c1, H)
            y1.append(h1)
        # ONE store of the whole sequence (lane-concatenated [B, T*H] slab); reshaping
        # this to batch-major [B*T, H] host-side is free, so logits never get transposed.
        out1_ref[...] = jnp.concatenate(y1, axis=1).astype(out1_ref.dtype)
        hT_ref[0] = h0
        hT_ref[1] = h1
        cT_ref[0] = c0
        cT_ref[1] = c1
    return kernel


# ----------------------- lane-dense, vocab-tiled fc linear ---------------------------

def _linear_tiled_kernel(x_ref, w_ref, b_ref, o_ref):
    o_ref[...] = _mm(x_ref[...], w_ref[...]) + b_ref[...]


def linear_tiled(x, w_t, b_row):
    """x: [M, K] bf16; w_t: [K, Npad] bf16; b_row: [1, Npad] f32, Npad % 128 == 0."""
    M, K = x.shape
    N = w_t.shape[1]
    tn = next(t for t in (2048, 1024, 512, 256, 128) if N % t == 0)
    cost = pl.CostEstimate(flops=2 * M * K * N, transcendentals=0,
                           bytes_accessed=M * K * 2 + K * N * 2 + M * N * 4)
    return pl.pallas_call(
        _linear_tiled_kernel,
        out_shape=jax.ShapeDtypeStruct((M, N), jnp.float32),
        grid=(N // tn,),
        in_specs=[pl.BlockSpec((M, K), lambda j: (0, 0)),
                  pl.BlockSpec((K, tn), lambda j: (0, j)),
                  pl.BlockSpec((1, tn), lambda j: (0, j))],
        out_specs=pl.BlockSpec((M, tn), lambda j: (0, j)),
        compiler_params=_cp(dimension_semantics=("parallel",)),
        cost_estimate=cost,
    )(x, w_t, b_row)


def decoder_forward(dec_p, lat_p, dec_word_emb, hT2, drop_prob, initial_state, eps,
                    dropout_rng=None):
    B, T, E2 = dec_word_emb.shape
    H = dec_p['whh0'].shape[0]
    L = dec_p['wihz0'].shape[0]
    x = dec_word_emb
    if drop_prob > 0.0:
        keep = 1.0 - drop_prob
        mask = jax.random.bernoulli(dropout_rng, keep, x.shape).astype(x.dtype)
        x = x * mask / keep
    x_tm = jnp.transpose(x, (1, 0, 2)).reshape(T * B, E2).astype(jnp.bfloat16)
    h0, c0 = initial_state

    out1, hT, cT, mu, std, kld = pl.pallas_call(
        _make_decoder_kernel(T, B, H, L),
        out_shape=(jax.ShapeDtypeStruct((B, T * H), jnp.bfloat16),
                   jax.ShapeDtypeStruct((2, B, H), jnp.float32),
                   jax.ShapeDtypeStruct((2, B, H), jnp.float32),
                   jax.ShapeDtypeStruct((B, L), jnp.float32),
                   jax.ShapeDtypeStruct((B, L), jnp.float32),
                   jax.ShapeDtypeStruct((1, 1), jnp.float32)),
        in_specs=[_VMEM] * 14,
        out_specs=(_VMEM,) * 6,
        compiler_params=_cp(),
    )(x_tm, hT2, h0, c0, lat_p['wmulv'], lat_p['bmulv'], eps,
      dec_p['wihx0'], dec_p['wihz0'], dec_p['b0'], dec_p['whh0'],
      dec_p['wih1'], dec_p['b1'], dec_p['whh1'])

    out1_bm = out1.reshape(B * T, H)                         # batch-major, free reshape
    logits_pad = linear_tiled(out1_bm, dec_p['fcw'], dec_p['fcb'])
    V = dec_p['fc_out_dim']
    Vpad = dec_p['fcw'].shape[1]
    logits = logits_pad.reshape(B, T, Vpad)[:, :, :V]
    return logits, (hT, cT), mu, std, kld[0, 0]


# ------------------------------ TDNN (char CNN) kernel -------------------------------

def _make_tdnn_kernel(N, L, kspecs):
    nk = len(kspecs)

    def kernel(x_ref, *rest):
        w_refs = rest[:nk]
        o_ref = rest[nk]
        feats = []
        for (kW, D), w_ref in zip(kspecs, w_refs):
            L_out = L - kW + 1
            # conv1d as kW shifted-slab accumulating matmuls (no im2col in HBM)
            acc = _mm(x_ref[0:L_out * N, :], w_ref[0])
            for dw in range(1, kW):
                acc = acc + _mm(x_ref[dw * N:(dw + L_out) * N, :], w_ref[dw])
            y = jnp.maximum(acc, 0.0)                        # ReLU
            best = y[0:N]
            for j in range(1, L_out):                        # max over time
                best = jnp.maximum(best, y[j * N:(j + 1) * N])
            feats.append(best)
        o_ref[...] = jnp.concatenate(feats, axis=1)          # single fused store
    return kernel


def tdnn(char_emb, tdnn_w, kspecs):
    """char_emb: [B, T, L, C] -> [B, T, sum_depth] (per-word char CNN, fused widths)."""
    B, T, L, C = char_emb.shape
    N = B * T
    sum_depth = sum(d for _, d in kspecs)
    x = char_emb.reshape(N, L, C).transpose(1, 0, 2).reshape(L * N, C).astype(jnp.bfloat16)
    feats = pl.pallas_call(
        _make_tdnn_kernel(N, L, kspecs),
        out_shape=jax.ShapeDtypeStruct((N, sum_depth), jnp.float32),
        in_specs=[_VMEM] * (1 + len(kspecs)),
        out_specs=_VMEM,
        compiler_params=_cp(),
    )(x, *tdnn_w)
    return feats.reshape(B, T, sum_depth)


# ---------------------------------- model glue ---------------------------------------

def embedding_forward(p, word_ids, char_ids):
    we = jnp.take(p['word_embed'], word_ids, axis=0)          # [B, T, E]
    ce = jnp.take(p['char_embed'], char_ids, axis=0)          # [B, T, L, Cc]
    tf = tdnn(ce, p['tdnn_w'], p['tdnn_spec'])                # [B, T, sum_depth]
    return jnp.concatenate([we, tf], axis=2)


def rvae_forward(p, drop_prob,
                 encoder_word_input, encoder_character_input,
                 encoder_word_input_2, encoder_character_input_2,
                 decoder_word_input_2, eps, dropout_rng=None):
    """RVAE.forward with z=None (training path)."""
    enc_in = embedding_forward(p['embedding'], encoder_word_input,
                               encoder_character_input)
    enc_in_2 = embedding_forward(p['embedding_2'], encoder_word_input_2,
                                 encoder_character_input_2)

    hT1, cT1 = bilstm_encoder(p['encoder'], enc_in, None)
    # Reference plumbing: encoder-1's [2(dir),B,H] final state is reused both as
    # encoder-2's initial state and as the 2-layer decoder's initial state.
    State = (hT1, cT1)
    hT2, _ = bilstm_encoder(p['encoder_2'], enc_in_2, State)

    dec_word_emb = jnp.take(p['embedding_2']['word_embed'],
                            decoder_word_input_2, axis=0)
    out, final_state, mu, std, kld = decoder_forward(
        p['decoder'], p['latent'], dec_word_emb, hT2, drop_prob, State, eps,
        dropout_rng)
    return out, final_state, kld, mu, std


# ------------------------------ parameter construction -------------------------------
# Weights are generated in torch layout and packed ONCE into kernel layout:
# W_ih^T / W_hh^T (contiguous [*, 4H], PyTorch gate order i,f,g,o), combined biases,
# fused per-direction / mu|logvar matrices, lane-dense padded fc -- all matmul weights
# stored as bf16 in HBM.

def _normal(key, shape, scale=0.1):
    return scale * jax.random.normal(key, shape, dtype=jnp.float32)


def pack_lstm(w_ih, w_hh, b_ih, b_hh):
    """torch (w_ih [4H,In], w_hh [4H,H], b [4H]) ->
       (W_ih^T bf16 [In,4H], W_hh^T bf16 [H,4H], combined bias f32 [1,4H])."""
    wih_t = w_ih.T.astype(jnp.bfloat16)
    whh_t = w_hh.T.astype(jnp.bfloat16)
    b = (b_ih + b_hh).reshape(1, -1).astype(jnp.float32)
    return wih_t, whh_t, b


def init_embedding(key, vocab, embed, char_vocab, char_embed, kernels):
    ks = jax.random.split(key, 2 + len(kernels))
    # torch conv1d weight [D, C, kW] -> kernel layout [kW, C, D], bf16
    tdnn_w = tuple(
        jnp.transpose(_normal(ks[2 + i], (d, char_embed, kW), 0.05),
                      (2, 1, 0)).astype(jnp.bfloat16)
        for i, (kW, d) in enumerate(kernels))
    return dict(word_embed=_normal(ks[0], (vocab, embed), 1.0),
                char_embed=_normal(ks[1], (char_vocab, char_embed), 1.0),
                tdnn_w=tdnn_w, tdnn_spec=tuple(kernels))


def init_bilstm(key, in_dim, H):
    ks = jax.random.split(key, 8)
    packs = []
    for d in range(2):
        packs.append(pack_lstm(_normal(ks[4 * d + 0], (4 * H, in_dim)),
                               _normal(ks[4 * d + 1], (4 * H, H)),
                               _normal(ks[4 * d + 2], (4 * H,)),
                               _normal(ks[4 * d + 3], (4 * H,))))
    return dict(wih=jnp.concatenate([packs[0][0], packs[1][0]], axis=1),  # [In, 8H]
                whh_f=packs[0][1], whh_b=packs[1][1],                     # [H, 4H] each
                b=jnp.concatenate([packs[0][2], packs[1][2]], axis=1))    # [1, 8H]


def init_decoder(key, word_embed, latent, H, vocab, vpad):
    ks = jax.random.split(key, 10)
    in_dim = word_embed + latent                       # torch concat order: [emb | z]
    wih0, whh0, b0 = pack_lstm(_normal(ks[0], (4 * H, in_dim)),
                               _normal(ks[1], (4 * H, H)),
                               _normal(ks[2], (4 * H,)), _normal(ks[3], (4 * H,)))
    wih1, whh1, b1 = pack_lstm(_normal(ks[4], (4 * H, H)),
                               _normal(ks[5], (4 * H, H)),
                               _normal(ks[6], (4 * H,)), _normal(ks[7], (4 * H,)))
    fc_w = _normal(ks[8], (vocab, H))
    fc_b = _normal(ks[9], (vocab,))
    fcw = (jnp.zeros((H, vpad), jnp.float32).at[:, :vocab].set(fc_w.T)
           .astype(jnp.bfloat16))                                         # lane-dense pad
    fcb = jnp.zeros((1, vpad), jnp.float32).at[0, :vocab].set(fc_b)
    return dict(wihx0=wih0[:word_embed], wihz0=wih0[word_embed:],
                b0=b0, whh0=whh0, wih1=wih1, b1=b1, whh1=whh1,
                fcw=fcw, fcb=fcb, fc_out_dim=vocab)


def init_latent(key, H2, L):
    k1, k2, k3, k4 = jax.random.split(key, 4)
    w_mu, b_mu = _normal(k1, (L, H2)), _normal(k2, (L,))
    w_lv, b_lv = _normal(k3, (L, H2)), _normal(k4, (L,))
    wmulv = jnp.concatenate([w_mu.T, w_lv.T], axis=1).astype(jnp.bfloat16)  # [2H, 2L]
    bmulv = jnp.concatenate([b_mu, b_lv]).reshape(1, 2 * L).astype(jnp.float32)
    return dict(wmulv=wmulv, bmulv=bmulv)


# --------------------------------------- main -----------------------------------------

if __name__ == "__main__":
    B = 2
    SEQ_ENC, SEQ_ENC2, SEQ_DEC = 8, 8, 8
    WORD_VOCAB, WORD_VOCAB_2 = 24, 24
    WORD_EMBED, WORD_EMBED_2 = 16, 16
    CHAR_VOCAB, CHAR_EMBED, MAX_WORD_LEN = 12, 8, 6
    KERNELS = [(2, 4), (3, 6)]                 # (kW, out_dim); sum_depth = 10
    SUM_DEPTH = sum(d for _, d in KERNELS)
    ENC_RNN = 32                               # encoder_rnn_size (4H = 128, lane-dense)
    DEC_RNN = 32                               # decoder_rnn_size == encoder_rnn_size
    LATENT = 16                                # latent_variable_size
    VOCAB_PAD = 128                            # lane-dense vocab padding for the fc

    key = jax.random.PRNGKey(0)
    keys = jax.random.split(key, 10)

    params_tree = dict(
        embedding=init_embedding(keys[0], WORD_VOCAB, WORD_EMBED,
                                 CHAR_VOCAB, CHAR_EMBED, KERNELS),
        embedding_2=init_embedding(keys[1], WORD_VOCAB_2, WORD_EMBED_2,
                                   CHAR_VOCAB, CHAR_EMBED, KERNELS),
        encoder=init_bilstm(keys[2], WORD_EMBED + SUM_DEPTH, ENC_RNN),
        encoder_2=init_bilstm(keys[3], WORD_EMBED_2 + SUM_DEPTH, ENC_RNN),
        latent=init_latent(keys[4], 2 * ENC_RNN, LATENT),
        decoder=init_decoder(keys[6], WORD_EMBED_2, LATENT, DEC_RNN,
                             WORD_VOCAB_2, VOCAB_PAD),
    )

    dkeys = jax.random.split(keys[7], 6)
    enc_w = jax.random.randint(dkeys[0], (B, SEQ_ENC), 0, WORD_VOCAB)
    enc_c = jax.random.randint(dkeys[1], (B, SEQ_ENC, MAX_WORD_LEN), 0, CHAR_VOCAB)
    enc_w2 = jax.random.randint(dkeys[2], (B, SEQ_ENC2), 0, WORD_VOCAB_2)
    enc_c2 = jax.random.randint(dkeys[3], (B, SEQ_ENC2, MAX_WORD_LEN), 0, CHAR_VOCAB)
    dec_w2 = jax.random.randint(dkeys[4], (B, SEQ_DEC), 0, WORD_VOCAB_2)
    # torch.randn([batch, latent]) equivalent (host-side noise fed into the kernel):
    eps = jax.random.normal(dkeys[5], (B, LATENT), dtype=jnp.float32)

    @jax.jit
    def fwd(ew, ec, ew2, ec2, dw2, eps_):
        return rvae_forward(params_tree, 0.0, ew, ec, ew2, ec2, dw2, eps_)

    out, final_state, kld, mu, std = fwd(enc_w, enc_c, enc_w2, enc_c2, dec_w2, eps)
    jax.block_until_ready((out, final_state, kld, mu, std))

    assert out.shape == (B, SEQ_DEC, WORD_VOCAB_2)
    assert final_state[0].shape == (2, B, DEC_RNN)
    assert final_state[1].shape == (2, B, DEC_RNN)
    assert mu.shape == (B, LATENT) and std.shape == (B, LATENT)
    assert kld.shape == ()
    # TODO(synk): trainer/validater/sample/sample_beam are host-side control loops
    # (beam bookkeeping, sampling) and are intentionally not kernelized.
    print("KERNEL_OK")
</pallas_src>

<mosaic_0001>
module attributes {stable_mosaic.version = 11 : i64} {
  func.func @kernel(%arg0: memref<96x8xbf16, #tpu.memory_space<vmem>>, %arg1: memref<2x8x4xbf16, #tpu.memory_space<vmem>>, %arg2: memref<3x8x6xbf16, #tpu.memory_space<vmem>>, %arg3: memref<16x10xf32, #tpu.memory_space<vmem>>) attributes {dimension_semantics = [], scalar_prefetch = 0 : i64, scratch_operands = 0 : i64, tpu.core_type = #tpu.core_type<tc>} {
    %c0 = arith.constant 0 : index
    %c0_0 = arith.constant 0 : index
    %0 = vector.load %arg0[%c0, %c0_0] : memref<96x8xbf16, #tpu.memory_space<vmem>>, vector<80x8xbf16>
    %c0_1 = arith.constant 0 : index
    %c0_2 = arith.constant 0 : index
    %c0_3 = arith.constant 0 : index
    %1 = vector.load %arg1[%c0_1, %c0_2, %c0_3] : memref<2x8x4xbf16, #tpu.memory_space<vmem>>, vector<1x8x4xbf16>
    %2 = vector.shape_cast %1 : vector<1x8x4xbf16> to vector<8x4xbf16>
    %cst = arith.constant dense<0.000000e+00> : vector<80x4xf32>
    %3 = tpu.matmul %0, %2, %cst {dimension_numbers = #tpu.dot_dimension_numbers<[1], [0], [0], [1], [0, 0, 1, 1], [], []>} : vector<80x8xbf16>, vector<8x4xbf16>, vector<80x4xf32> -> vector<80x4xf32>
    %c16 = arith.constant 16 : index
    %c0_4 = arith.constant 0 : index
    %4 = vector.load %arg0[%c16, %c0_4] : memref<96x8xbf16, #tpu.memory_space<vmem>>, vector<80x8xbf16>
    %c1 = arith.constant 1 : index
    %c0_5 = arith.constant 0 : index
    %c0_6 = arith.constant 0 : index
    %5 = vector.load %arg1[%c1, %c0_5, %c0_6] : memref<2x8x4xbf16, #tpu.memory_space<vmem>>, vector<1x8x4xbf16>
    %6 = vector.shape_cast %5 : vector<1x8x4xbf16> to vector<8x4xbf16>
    %cst_7 = arith.constant dense<0.000000e+00> : vector<80x4xf32>
    %7 = tpu.matmul %4, %6, %cst_7 {dimension_numbers = #tpu.dot_dimension_numbers<[1], [0], [0], [1], [0, 0, 1, 1], [], []>} : vector<80x8xbf16>, vector<8x4xbf16>, vector<80x4xf32> -> vector<80x4xf32>
    %8 = arith.addf %3, %7 : vector<80x4xf32>
    %cst_8 = arith.constant 0.000000e+00 : f32
    %9 = vector.broadcast %cst_8 : f32 to vector<80x4xf32>
    %10 = arith.maximumf %8, %9 : vector<80x4xf32>
    %11 = vector.extract_strided_slice %10 {offsets = [0, 0], sizes = [16, 4], strides = [1, 1]} : vector<80x4xf32> to vector<16x4xf32>
    %12 = vector.extract_strided_slice %10 {offsets = [16, 0], sizes = [16, 4], strides = [1, 1]} : vector<80x4xf32> to vector<16x4xf32>
    %13 = arith.maximumf %11, %12 : vector<16x4xf32>
    %14 = vector.extract_strided_slice %10 {offsets = [32, 0], sizes = [16, 4], strides = [1, 1]} : vector<80x4xf32> to vector<16x4xf32>
    %15 = arith.maximumf %13, %14 : vector<16x4xf32>
    %16 = vector.extract_strided_slice %10 {offsets = [48, 0], sizes = [16, 4], strides = [1, 1]} : vector<80x4xf32> to vector<16x4xf32>
    %17 = arith.maximumf %15, %16 : vector<16x4xf32>
    %18 = vector.extract_strided_slice %10 {offsets = [64, 0], sizes = [16, 4], strides = [1, 1]} : vector<80x4xf32> to vector<16x4xf32>
    %19 = arith.maximumf %17, %18 : vector<16x4xf32>
    %c0_9 = arith.constant 0 : index
    %c0_10 = arith.constant 0 : index
    %20 = vector.load %arg0[%c0_9, %c0_10] : memref<96x8xbf16, #tpu.memory_space<vmem>>, vector<64x8xbf16>
    %c0_11 = arith.constant 0 : index
    %c0_12 = arith.constant 0 : index
    %c0_13 = arith.constant 0 : index
    %21 = vector.load %arg2[%c0_11, %c0_12, %c0_13] : memref<3x8x6xbf16, #tpu.memory_space<vmem>>, vector<1x8x6xbf16>
    %22 = vector.shape_cast %21 : vector<1x8x6xbf16> to vector<8x6xbf16>
    %cst_14 = arith.constant dense<0.000000e+00> : vector<64x6xf32>
    %23 = tpu.matmul %20, %22, %cst_14 {dimension_numbers = #tpu.dot_dimension_numbers<[1], [0], [0], [1], [0, 0, 1, 1], [], []>} : vector<64x8xbf16>, vector<8x6xbf16>, vector<64x6xf32> -> vector<64x6xf32>
    %c16_15 = arith.constant 16 : index
    %c0_16 = arith.constant 0 : index
    %24 = vector.load %arg0[%c16_15, %c0_16] : memref<96x8xbf16, #tpu.memory_space<vmem>>, vector<64x8xbf16>
    %c1_17 = arith.constant 1 : index
    %c0_18 = arith.constant 0 : index
    %c0_19 = arith.constant 0 : index
    %25 = vector.load %arg2[%c1_17, %c0_18, %c0_19] : memref<3x8x6xbf16, #tpu.memory_space<vmem>>, vector<1x8x6xbf16>
    %26 = vector.shape_cast %25 : vector<1x8x6xbf16> to vector<8x6xbf16>
    %cst_20 = arith.constant dense<0.000000e+00> : vector<64x6xf32>
    %27 = tpu.matmul %24, %26, %cst_20 {dimension_numbers = #tpu.dot_dimension_numbers<[1], [0], [0], [1], [0, 0, 1, 1], [], []>} : vector<64x8xbf16>, vector<8x6xbf16>, vector<64x6xf32> -> vector<64x6xf32>
    %28 = arith.addf %23, %27 : vector<64x6xf32>
    %c32 = arith.constant 32 : index
    %c0_21 = arith.constant 0 : index
    %29 = vector.load %arg0[%c32, %c0_21] : memref<96x8xbf16, #tpu.memory_space<vmem>>, vector<64x8xbf16>
    %c2 = arith.constant 2 : index
    %c0_22 = arith.constant 0 : index
    %c0_23 = arith.constant 0 : index
    %30 = vector.load %arg2[%c2, %c0_22, %c0_23] : memref<3x8x6xbf16, #tpu.memory_space<vmem>>, vector<1x8x6xbf16>
    %31 = vector.shape_cast %30 : vector<1x8x6xbf16> to vector<8x6xbf16>
    %cst_24 = arith.constant dense<0.000000e+00> : vector<64x6xf32>
    %32 = tpu.matmul %29, %31, %cst_24 {dimension_numbers = #tpu.dot_dimension_numbers<[1], [0], [0], [1], [0, 0, 1, 1], [], []>} : vector<64x8xbf16>, vector<8x6xbf16>, vector<64x6xf32> -> vector<64x6xf32>
    %33 = arith.addf %28, %32 : vector<64x6xf32>
    %cst_25 = arith.constant 0.000000e+00 : f32
    %34 = vector.broadcast %cst_25 : f32 to vector<64x6xf32>
    %35 = arith.maximumf %33, %34 : vector<64x6xf32>
    %36 = vector.extract_strided_slice %35 {offsets = [0, 0], sizes = [16, 6], strides = [1, 1]} : vector<64x6xf32> to vector<16x6xf32>
    %37 = vector.extract_strided_slice %35 {offsets = [16, 0], sizes = [16, 6], strides = [1, 1]} : vector<64x6xf32> to vector<16x6xf32>
    %38 = arith.maximumf %36, %37 : vector<16x6xf32>
    %39 = vector.extract_strided_slice %35 {offsets = [32, 0], sizes = [16, 6], strides = [1, 1]} : vector<64x6xf32> to vector<16x6xf32>
    %40 = arith.maximumf %38, %39 : vector<16x6xf32>
    %41 = vector.extract_strided_slice %35 {offsets = [48, 0], sizes = [16, 6], strides = [1, 1]} : vector<64x6xf32> to vector<16x6xf32>
    %42 = arith.maximumf %40, %41 : vector<16x6xf32>
    %43 = tpu.concatenate %19, %42 in 1 : vector<16x4xf32>, vector<16x6xf32> -> vector<16x10xf32>
    %c0_26 = arith.constant 0 : index
    %c0_27 = arith.constant 0 : index
    %44 = vector.load %arg3[%c0_26, %c0_27] : memref<16x10xf32, #tpu.memory_space<vmem>>, vector<16x10xf32>
    tpu.vector_store %arg3[%c0_26, %c0_27], %43 {strides = array<i32>} : memref<16x10xf32, #tpu.memory_space<vmem>>, vector<16x10xf32>,
    return
  }
}

module attributes {stable_mosaic.version = 11 : i64} {
  func.func @kernel(%arg0: memref<16x26xbf16, #tpu.memory_space<vmem>>, %arg1: memref<2x2x32xf32, #tpu.memory_space<vmem>>, %arg2: memref<2x2x32xf32, #tpu.memory_space<vmem>>, %arg3: memref<26x256xbf16, #tpu.memory_space<vmem>>, %arg4: memref<32x128xbf16, #tpu.memory_space<vmem>>, %arg5: memref<32x128xbf16, #tpu.memory_space<vmem>>, %arg6: memref<1x256xf32, #tpu.memory_space<vmem>>, %arg7: memref<2x2x32xf32, #tpu.memory_space<vmem>>, %arg8: memref<2x2x32xf32, #tpu.memory_space<vmem>>) attributes {dimension_semantics = [], scalar_prefetch = 0 : i64, scratch_operands = 0 : i64, tpu.core_type = #tpu.core_type<tc>} {
    %c0 = arith.constant 0 : index
    %c0_0 = arith.constant 0 : index
    %0 = vector.load %arg0[%c0, %c0_0] : memref<16x26xbf16, #tpu.memory_space<vmem>>, vector<16x26xbf16>
    %c0_1 = arith.constant 0 : index
    %c0_2 = arith.constant 0 : index
    %1 = vector.load %arg3[%c0_1, %c0_2] : memref<26x256xbf16, #tpu.memory_space<vmem>>, vector<26x256xbf16>
    %cst = arith.constant dense<0.000000e+00> : vector<16x256xf32>
    %2 = tpu.matmul %0, %1, %cst {dimension_numbers = #tpu.dot_dimension_numbers<[1], [0], [0], [1], [0, 0, 1, 1], [], []>} : vector<16x26xbf16>, vector<26x256xbf16>, vector<16x256xf32> -> vector<16x256xf32>
    %c0_3 = arith.constant 0 : index
    %c0_4 = arith.constant 0 : index
    %3 = vector.load %arg6[%c0_3, %c0_4] : memref<1x256xf32, #tpu.memory_space<vmem>>, vector<1x256xf32>
    %4 = vector.broadcast %3 : vector<1x256xf32> to vector<16x256xf32>
    %5 = arith.addf %2, %4 : vector<16x256xf32>
    %6 = vector.extract_strided_slice %5 {offsets = [0, 0], sizes = [16, 128], strides = [1, 1]} : vector<16x256xf32> to vector<16x128xf32>
    %7 = vector.extract_strided_slice %5 {offsets = [0, 128], sizes = [16, 128], strides = [1, 1]} : vector<16x256xf32> to vector<16x128xf32>
    %c0_5 = arith.constant 0 : index
    %c0_6 = arith.constant 0 : index
    %8 = vector.load %arg4[%c0_5, %c0_6] : memref<32x128xbf16, #tpu.memory_space<vmem>>, vector<32x128xbf16>
    %c0_7 = arith.constant 0 : index
    %c0_8 = arith.constant 0 : index
    %9 = vector.load %arg5[%c0_7, %c0_8] : memref<32x128xbf16, #tpu.memory_space<vmem>>, vector<32x128xbf16>
    %c0_9 = arith.constant 0 : index
    %c0_10 = arith.constant 0 : index
    %c0_11 = arith.constant 0 : index
    %10 = vector.load %arg1[%c0_9, %c0_10, %c0_11] : memref<2x2x32xf32, #tpu.memory_space<vmem>>, vector<1x2x32xf32>
    %11 = vector.shape_cast %10 : vector<1x2x32xf32> to vector<2x32xf32>
    %c0_12 = arith.constant 0 : index
    %c0_13 = arith.constant 0 : index
    %c0_14 = arith.constant 0 : index
    %12 = vector.load %arg2[%c0_12, %c0_13, %c0_14] : memref<2x2x32xf32, #tpu.memory_space<vmem>>, vector<1x2x32xf32>
    %13 = vector.shape_cast %12 : vector<1x2x32xf32> to vector<2x32xf32>
    %c1 = arith.constant 1 : index
    %c0_15 = arith.constant 0 : index
    %c0_16 = arith.constant 0 : index
    %14 = vector.load %arg1[%c1, %c0_15, %c0_16] : memref<2x2x32xf32, #tpu.memory_space<vmem>>, vector<1x2x32xf32>
    %15 = vector.shape_cast %14 : vector<1x2x32xf32> to vector<2x32xf32>
    %c1_17 = arith.constant 1 : index
    %c0_18 = arith.constant 0 : index
    %c0_19 = arith.constant 0 : index
    %16 = vector.load %arg2[%c1_17, %c0_18, %c0_19] : memref<2x2x32xf32, #tpu.memory_space<vmem>>, vector<1x2x32xf32>
    %17 = vector.shape_cast %16 : vector<1x2x32xf32> to vector<2x32xf32>
    %18 = vector.extract_strided_slice %6 {offsets = [0, 0], sizes = [2, 128], strides = [1, 1]} : vector<16x128xf32> to vector<2x128xf32>
    %19 = arith.truncf %11 : vector<2x32xf32> to vector<2x32xbf16>
    %cst_20 = arith.constant dense<0.000000e+00> : vector<2x128xf32>
    %20 = tpu.matmul %19, %8, %cst_20 {dimension_numbers = #tpu.dot_dimension_numbers<[1], [0], [0], [1], [0, 0, 1, 1], [], []>} : vector<2x32xbf16>, vector<32x128xbf16>, vector<2x128xf32> -> vector<2x128xf32>
    %21 = arith.addf %18, %20 : vector<2x128xf32>
    %22 = vector.extract_strided_slice %7 {offsets = [14, 0], sizes = [2, 128], strides = [1, 1]} : vector<16x128xf32> to vector<2x128xf32>
    %23 = arith.truncf %15 : vector<2x32xf32> to vector<2x32xbf16>
    %cst_21 = arith.constant dense<0.000000e+00> : vector<2x128xf32>
    %24 = tpu.matmul %23, %9, %cst_21 {dimension_numbers = #tpu.dot_dimension_numbers<[1], [0], [0], [1], [0, 0, 1, 1], [], []>} : vector<2x32xbf16>, vector<32x128xbf16>, vector<2x128xf32> -> vector<2x128xf32>
    %25 = arith.addf %22, %24 : vector<2x128xf32>
    %26 = vector.extract_strided_slice %21 {offsets = [0, 0], sizes = [2, 32], strides = [1, 1]} : vector<2x128xf32> to vector<2x32xf32>
    %27 = arith.negf %26 : vector<2x32xf32>
    %28 = math.exp %27 : vector<2x32xf32>
    %cst_22 = arith.constant 1.000000e+00 : f32
    %29 = vector.broadcast %cst_22 : f32 to vector<2x32xf32>
    %30 = arith.addf %29, %28 : vector<2x32xf32>
    %31 = arith.divf %29, %30 : vector<2x32xf32>
    %32 = vector.extract_strided_slice %21 {offsets = [0, 32], sizes = [2, 32], strides = [1, 1]} : vector<2x128xf32> to vector<2x32xf32>
    %33 = arith.negf %32 : vector<2x32xf32>
    %34 = math.exp %33 : vector<2x32xf32>
    %cst_23 = arith.constant 1.000000e+00 : f32
    %35 = vector.broadcast %cst_23 : f32 to vector<2x32xf32>
    %36 = arith.addf %35, %34 : vector<2x32xf32>
    %37 = arith.divf %35, %36 : vector<2x32xf32>
    %38 = vector.extract_strided_slice %21 {offsets = [0, 64], sizes = [2, 32], strides = [1, 1]} : vector<2x128xf32> to vector<2x32xf32>
    %39 = math.tanh %38 : vector<2x32xf32>
    %40 = vector.extract_strided_slice %21 {offsets = [0, 96], sizes = [2, 32], strides = [1, 1]} : vector<2x128xf32> to vector<2x32xf32>
    %41 = arith.negf %40 : vector<2x32xf32>
    %42 = math.exp %41 : vector<2x32xf32>
    %cst_24 = arith.constant 1.000000e+00 : f32
    %43 = vector.broadcast %cst_24 : f32 to vector<2x32xf32>
    %44 = arith.addf %43, %42 : vector<2x32xf32>
    %45 = arith.divf %43, %44 : vector<2x32xf32>
    %46 = arith.mulf %37, %13 : vector<2x32xf32>
    %47 = arith.mulf %31, %39 : vector<2x32xf32>
    %48 = arith.addf %46, %47 : vector<2x32xf32>
    %49 = math.tanh %48 : vector<2x32xf32>
    %50 = arith.mulf %45, %49 : vector<2x32xf32>
    %51 = vector.extract_strided_slice %25 {offsets = [0, 0], sizes = [2, 32], strides = [1, 1]} : vector<2x128xf32> to vector<2x32xf32>
    %52 = arith.negf %51 : vector<2x32xf32>
    %53 = math.exp %52 : vector<2x32xf32>
    %cst_25 = arith.constant 1.000000e+00 : f32
    %54 = vector.broadcast %cst_25 : f32 to vector<2x32xf32>
    %55 = arith.addf %54, %53 : vector<2x32xf32>
    %56 = arith.divf %54, %55 : vector<2x32xf32>
    %57 = vector.extract_strided_slice %25 {offsets = [0, 32], sizes = [2, 32], strides = [1, 1]} : vector<2x128xf32> to vector<2x32xf32>
    %58 = arith.negf %57 : vector<2x32xf32>
    %59 = math.exp %58 : vector<2x32xf32>
    %cst_26 = arith.constant 1.000000e+00 : f32
    %60 = vector.broadcast %cst_26 : f32 to vector<2x32xf32>
    %61 = arith.addf %60, %59 : vector<2x32xf32>
    %62 = arith.divf %60, %61 : vector<2x32xf32>
    %63 = vector.extract_strided_slice %25 {offsets = [0, 64], sizes = [2, 32], strides = [1, 1]} : vector<2x128xf32> to vector<2x32xf32>
    %64 = math.tanh %63 : vector<2x32xf32>
    %65 = vector.extract_strided_slice %25 {offsets = [0, 96], sizes = [2, 32], strides = [1, 1]} : vector<2x128xf32> to vector<2x32xf32>
    %66 = arith.negf %65 : vector<2x32xf32>
    %67 = math.exp %66 : vector<2x32xf32>
    %cst_27 = arith.constant 1.000000e+00 : f32
    %68 = vector.broadcast %cst_27 : f32 to vector<2x32xf32>
    %69 = arith.addf %68, %67 : vector<2x32xf32>
    %70 = arith.divf %68, %69 : vector<2x32xf32>
    %71 = arith.mulf %62, %17 : vector<2x32xf32>
    %72 = arith.mulf %56, %64 : vector<2x32xf32>
    %73 = arith.addf %71, %72 : vector<2x32xf32>
    %74 = math.tanh %73 : vector<2x32xf32>
    %75 = arith.mulf %70, %74 : vector<2x32xf32>
    %76 = vector.extract_strided_slice %6 {offsets = [2, 0], sizes = [2, 128], strides = [1, 1]} : vector<16x128xf32> to vector<2x128xf32>
    %77 = arith.truncf %50 : vector<2x32xf32> to vector<2x32xbf16>
    %cst_28 = arith.constant dense<0.000000e+00> : vector<2x128xf32>
    %78 = tpu.matmul %77, %8, %cst_28 {dimension_numbers = #tpu.dot_dimension_numbers<[1], [0], [0], [1], [0, 0, 1, 1], [], []>} : vector<2x32xbf16>, vector<32x128xbf16>, vector<2x128xf32> -> vector<2x128xf32>
    %79 = arith.addf %76, %78 : vector<2x128xf32>
    %80 = vector.extract_strided_slice %7 {offsets = [12, 0], sizes = [2, 128], strides = [1, 1]} : vector<16x128xf32> to vector<2x128xf32>
    %81 = arith.truncf %75 : vector<2x32xf32> to vector<2x32xbf16>
    %cst_29 = arith.constant dense<0.000000e+00> : vector<2x128xf32>
    %82 = tpu.matmul %81, %9, %cst_29 {dimension_numbers = #tpu.dot_dimension_numbers<[1], [0], [0], [1], [0, 0, 1, 1], [], []>} : vector<2x32xbf16>, vector<32x128xbf16>, vector<2x128xf32> -> vector<2x128xf32>
    %83 = arith.addf %80, %82 : vector<2x128xf32>
    %84 = vector.extract_strided_slice %79 {offsets = [0, 0], sizes = [2, 32], strides = [1, 1]} : vector<2x128xf32> to vector<2x32xf32>
    %85 = arith.negf %84 : vector<2x32xf32>
    %86 = math.exp %85 : vector<2x32xf32>
    %cst_30 = arith.constant 1.000000e+00 : f32
    %87 = vector.broadcast %cst_30 : f32 to vector<2x32xf32>
    %88 = arith.addf %87, %86 : vector<2x32xf32>
    %89 = arith.divf %87, %88 : vector<2x32xf32>
    %90 = vector.extract_strided_slice %79 {offsets = [0, 32], sizes = [2, 32], strides = [1, 1]} : vector<2x128xf32> to vector<2x32xf32>
    %91 = arith.negf %90 : vector<2x32xf32>
    %92 = math.exp %91 : vector<2x32xf32>
    %cst_31 = arith.constant 1.000000e+00 : f32
    %93 = vector.broadcast %cst_31 : f32 to vector<2x32xf32>
    %94 = arith.addf %93, %92 : vector<2x32xf32>
    %95 = arith.divf %93, %94 : vector<2x32xf32>
    %96 = vector.extract_strided_slice %79 {offsets = [0, 64], sizes = [2, 32], strides = [1, 1]} : vector<2x128xf32> to vector<2x32xf32>
    %97 = math.tanh %96 : vector<2x32xf32>
    %98 = vector.extract_strided_slice %79 {offsets = [0, 96], sizes = [2, 32], strides = [1, 1]} : vector<2x128xf32> to vector<2x32xf32>
    %99 = arith.negf %98 : vector<2x32xf32>
    %100 = math.exp %99 : vector<2x32xf32>
    %cst_32 = arith.constant 1.000000e+00 : f32
    %101 = vector.broadcast %cst_32 : f32 to vector<2x32xf32>
    %102 = arith.addf %101, %100 : vector<2x32xf32>
    %103 = arith.divf %101, %102 : vector<2x32xf32>
    %104 = arith.mulf %95, %48 : vector<2x32xf32>
    %105 = arith.mulf %89, %97 : vector<2x32xf32>
    %106 = arith.addf %104, %105 : vector<2x32xf32>
    %107 = math.tanh %106 : vector<2x32xf32>
    %108 = arith.mulf %103, %107 : vector<2x32xf32>
    %109 = vector.extract_strided_slice %83 {offsets = [0, 0], sizes = [2, 32], strides = [1, 1]} : vector<2x128xf32> to vector<2x32xf32>
    %110 = arith.negf %109 : vector<2x32xf32>
    %111 = math.exp %110 : vector<2x32xf32>
    %cst_33 = arith.constant 1.000000e+00 : f32
    %112 = vector.broadcast %cst_33 : f32 to vector<2x32xf32>
    %113 = arith.addf %112, %111 : vector<2x32xf32>
    %114 = arith.divf %112, %113 : vector<2x32xf32>
    %115 = vector.extract_strided_slice %83 {offsets = [0, 32], sizes = [2, 32], strides = [1, 1]} : vector<2x128xf32> to vector<2x32xf32>
    %116 = arith.negf %115 : vector<2x32xf32>
    %117 = math.exp %116 : vector<2x32xf32>
    %cst_34 = arith.constant 1.000000e+00 : f32
    %118 = vector.broadcast %cst_34 : f32 to vector<2x32xf32>
    %119 = arith.addf %118, %117 : vector<2x32xf32>
    %120 = arith.divf %118, %119 : vector<2x32xf32>
    %121 = vector.extract_strided_slice %83 {offsets = [0, 64], sizes = [2, 32], strides = [1, 1]} : vector<2x128xf32> to vector<2x32xf32>
    %122 = math.tanh %121 : vector<2x32xf32>
    %123 = vector.extract_strided_slice %83 {offsets = [0, 96], sizes = [2, 32], strides = [1, 1]} : vector<2x128xf32> to vector<2x32xf32>
    %124 = arith.negf %123 : vector<2x32xf32>
    %125 = math.exp %124 : vector<2x32xf32>
    %cst_35 = arith.constant 1.000000e+00 : f32
    %126 = vector.broadcast %cst_35 : f32 to vector<2x32xf32>
    %127 = arith.addf %126, %125 : vector<2x32xf32>
    %128 = arith.divf %126, %127 : vector<2x32xf32>
    %129 = arith.mulf %120, %73 : vector<2x32xf32>
    %130 = arith.mulf %114, %122 : vector<2x32xf32>
    %131 = arith.addf %129, %130 : vector<2x32xf32>
    %132 = math.tanh %131 : vector<2x32xf32>
    %133 = arith.mulf %128, %132 : vector<2x32xf32>
    %134 = vector.extract_strided_slice %6 {offsets = [4, 0], sizes = [2, 128], strides = [1, 1]} : vector<16x128xf32> to vector<2x128xf32>
    %135 = arith.truncf %108 : vector<2x32xf32> to vector<2x32xbf16>
    %cst_36 = arith.constant dense<0.000000e+00> : vector<2x128xf32>
    %136 = tpu.matmul %135, %8, %cst_36 {dimension_numbers = #tpu.dot_dimension_numbers<[1], [0], [0], [1], [0, 0, 1, 1], [], []>} : vector<2x32xbf16>, vector<32x128xbf16>, vector<2x128xf32> -> vector<2x128xf32>
    %137 = arith.addf %134, %136 : vector<2x128xf32>
    %138 = vector.extract_strided_slice %7 {offsets = [10, 0], sizes = [2, 128], strides = [1, 1]} : vector<16x128xf32> to vector<2x128xf32>
    %139 = arith.truncf %133 : vector<2x32xf32> to vector<2x32xbf16>
    %cst_37 = arith.constant dense<0.000000e+00> : vector<2x128xf32>
    %140 = tpu.matmul %139, %9, %cst_37 {dimension_numbers = #tpu.dot_dimension_numbers<[1], [0], [0], [1], [0, 0, 1, 1], [], []>} : vector<2x32xbf16>, vector<32x128xbf16>, vector<2x128xf32> -> vector<2x128xf32>
    %141 = arith.addf %138, %140 : vector<2x128xf32>
    %142 = vector.extract_strided_slice %137 {offsets = [0, 0], sizes = [2, 32], strides = [1, 1]} : vector<2x128xf32> to vector<2x32xf32>
    %143 = arith.negf %142 : vector<2x32xf32>
    %144 = math.exp %143 : vector<2x32xf32>
    %cst_38 = arith.constant 1.000000e+00 : f32
    %145 = vector.broadcast %cst_38 : f32 to vector<2x32xf32>
    %146 = arith.addf %145, %144 : vector<2x32xf32>
    %147 = arith.divf %145, %146 : vector<2x32xf32>
    %148 = vector.extract_strided_slice %137 {offsets = [0, 32], sizes = [2, 32], strides = [1, 1]} : vector<2x128xf32> to vector<2x32xf32>
    %149 = arith.negf %148 : vector<2x32xf32>
    %150 = math.exp %149 : vector<2x32xf32>
    %cst_39 = arith.constant 1.000000e+00 : f32
    %151 = vector.broadcast %cst_39 : f32 to vector<2x32xf32>
    %152 = arith.addf %151, %150 : vector<2x32xf32>
    %153 = arith.divf %151, %152 : vector<2x32xf32>
    %154 = vector.extract_strided_slice %137 {offsets = [0, 64], sizes = [2, 32], strides = [1, 1]} : vector<2x128xf32> to vector<2x32xf32>
    %155 = math.tanh %154 : vector<2x32xf32>
    %156 = vector.extract_strided_slice %137 {offsets = [0, 96], sizes = [2, 32], strides = [1, 1]} : vector<2x128xf32> to vector<2x32xf32>
    %157 = arith.negf %156 : vector<2x32xf32>
    %158 = math.exp %157 : vector<2x32xf32>
    %cst_40 = arith.constant 1.000000e+00 : f32
    %159 = vector.broadcast %cst_40 : f32 to vector<2x32xf32>
    %160 = arith.addf %159, %158 : vector<2x32xf32>
    %161 = arith.divf %159, %160 : vector<2x32xf32>
    %162 = arith.mulf %153, %106 : vector<2x32xf32>
    %163 = arith.mulf %147, %155 : vector<2x32xf32>
    %164 = arith.addf %162, %163 : vector<2x32xf32>
    %165 = math.tanh %164 : vector<2x32xf32>
    %166 = arith.mulf %161, %165 : vector<2x32xf32>
    %167 = vector.extract_strided_slice %141 {offsets = [0, 0], sizes = [2, 32], strides = [1, 1]} : vector<2x128xf32> to vector<2x32xf32>
    %168 = arith.negf %167 : vector<2x32xf32>
    %169 = math.exp %168 : vector<2x32xf32>
    %cst_41 = arith.constant 1.000000e+00 : f32
    %170 = vector.broadcast %cst_41 : f32 to vector<2x32xf32>
    %171 = arith.addf %170, %169 : vector<2x32xf32>
    %172 = arith.divf %170, %171 : vector<2x32xf32>
    %173 = vector.extract_strided_slice %141 {offsets = [0, 32], sizes = [2, 32], strides = [1, 1]} : vector<2x128xf32> to vector<2x32xf32>
    %174 = arith.negf %173 : vector<2x32xf32>
    %175 = math.exp %174 : vector<2x32xf32>
    %cst_42 = arith.constant 1.000000e+00 : f32
    %176 = vector.broadcast %cst_42 : f32 to vector<2x32xf32>
    %177 = arith.addf %176, %175 : vector<2x32xf32>
    %178 = arith.divf %176, %177 : vector<2x32xf32>
    %179 = vector.extract_strided_slice %141 {offsets = [0, 64], sizes = [2, 32], strides = [1, 1]} : vector<2x128xf32> to vector<2x32xf32>
    %180 = math.tanh %179 : vector<2x32xf32>
    %181 = vector.extract_strided_slice %141 {offsets = [0, 96], sizes = [2, 32], strides = [1, 1]} : vector<2x128xf32> to vector<2x32xf32>
    %182 = arith.negf %181 : vector<2x32xf32>
    %183 = math.exp %182 : vector<2x32xf32>
    %cst_43 = arith.constant 1.000000e+00 : f32
    %184 = vector.broadcast %cst_43 : f32 to vector<2x32xf32>
    %185 = arith.addf %184, %183 : vector<2x32xf32>
    %186 = arith.divf %184, %185 : vector<2x32xf32>
    %187 = arith.mulf %178, %131 : vector<2x32xf32>
    %188 = arith.mulf %172, %180 : vector<2x32xf32>
    %189 = arith.addf %187, %188 : vector<2x32xf32>
    %190 = math.tanh %189 : vector<2x32xf32>
    %191 = arith.mulf %186, %190 : vector<2x32xf32>
    %192 = vector.extract_strided_slice %6 {offsets = [6, 0], sizes = [2, 128], strides = [1, 1]} : vector<16x128xf32> to vector<2x128xf32>
    %193 = arith.truncf %166 : vector<2x32xf32> to vector<2x32xbf16>
    %cst_44 = arith.constant dense<0.000000e+00> : vector<2x128xf32>
    %194 = tpu.matmul %193, %8, %cst_44 {dimension_numbers = #tpu.dot_dimension_numbers<[1], [0], [0], [1], [0, 0, 1, 1], [], []>} : vector<2x32xbf16>, vector<32x128xbf16>, vector<2x128xf32> -> vector<2x128xf32>
    %195 = arith.addf %192, %194 : vector<2x128xf32>
    %196 = vector.extract_strided_slice %7 {offsets = [8, 0], sizes = [2, 128], strides = [1, 1]} : vector<16x128xf32> to vector<2x128xf32>
    %197 = arith.truncf %191 : vector<2x32xf32> to vector<2x32xbf16>
    %cst_45 = arith.constant dense<0.000000e+00> : vector<2x128xf32>
    %198 = tpu.matmul %197, %9, %cst_45 {dimension_numbers = #tpu.dot_dimension_numbers<[1], [0], [0], [1], [0, 0, 1, 1], [], []>} : vector<2x32xbf16>, vector<32x128xbf16>, vector<2x128xf32> -> vector<2x128xf32>
    %199 = arith.addf %196, %198 : vector<2x128xf32>
    %200 = vector.extract_strided_slice %195 {offsets = [0, 0], sizes = [2, 32], strides = [1, 1]} : vector<2x128xf32> to vector<2x32xf32>
    %201 = arith.negf %200 : vector<2x32xf32>
    %202 = math.exp %201 : vector<2x32xf32>
    %cst_46 = arith.constant 1.000000e+00 : f32
    %203 = vector.broadcast %cst_46 : f32 to vector<2x32xf32>
    %204 = arith.addf %203, %202 : vector<2x32xf32>
    %205 = arith.divf %203, %204 : vector<2x32xf32>
    %206 = vector.extract_strided_slice %195 {offsets = [0, 32], sizes = [2, 32], strides = [1, 1]} : vector<2x128xf32> to vector<2x32xf32>
    %207 = arith.negf %206 : vector<2x32xf32>
    %208 = math.exp %207 : vector<2x32xf32>
    %cst_47 = arith.constant 1.000000e+00 : f32
    %209 = vector.broadcast %cst_47 : f32 to vector<2x32xf32>
    %210 = arith.addf %209, %208 : vector<2x32xf32>
    %211 = arith.divf %209, %210 : vector<2x32xf32>
    %212 = vector.extract_strided_slice %195 {offsets = [0, 64], sizes = [2, 32], strides = [1, 1]} : vector<2x128xf32> to vector<2x32xf32>
    %213 = math.tanh %212 : vector<2x32xf32>
    %214 = vector.extract_strided_slice %195 {offsets = [0, 96], sizes = [2, 32], strides = [1, 1]} : vector<2x128xf32> to vector<2x32xf32>
    %215 = arith.negf %214 : vector<2x32xf32>
    %216 = math.exp %215 : vector<2x32xf32>
    %cst_48 = arith.constant 1.000000e+00 : f32
    %217 = vector.broadcast %cst_48 : f32 to vector<2x32xf32>
    %218 = arith.addf %217, %216 : vector<2x32xf32>
    %219 = arith.divf %217, %218 : vector<2x32xf32>
    %220 = arith.mulf %211, %164 : vector<2x32xf32>
    %221 = arith.mulf %205, %213 : vector<2x32xf32>
    %222 = arith.addf %220, %221 : vector<2x32xf32>
    %223 = math.tanh %222 : vector<2x32xf32>
    %224 = arith.mulf %219, %223 : vector<2x32xf32>
    %225 = vector.extract_strided_slice %199 {offsets = [0, 0], sizes = [2, 32], strides = [1, 1]} : vector<2x128xf32> to vector<2x32xf32>
    %226 = arith.negf %225 : vector<2x32xf32>
    %227 = math.exp %226 : vector<2x32xf32>
    %cst_49 = arith.constant 1.000000e+00 : f32
    %228 = vector.broadcast %cst_49 : f32 to vector<2x32xf32>
    %229 = arith.addf %228, %227 : vector<2x32xf32>
    %230 = arith.divf %228, %229 : vector<2x32xf32>
    %231 = vector.extract_strided_slice %199 {offsets = [0, 32], sizes = [2, 32], strides = [1, 1]} : vector<2x128xf32> to vector<2x32xf32>
    %232 = arith.negf %231 : vector<2x32xf32>
    %233 = math.exp %232 : vector<2x32xf32>
    %cst_50 = arith.constant 1.000000e+00 : f32
    %234 = vector.broadcast %cst_50 : f32 to vector<2x32xf32>
    %235 = arith.addf %234, %233 : vector<2x32xf32>
    %236 = arith.divf %234, %235 : vector<2x32xf32>
    %237 = vector.extract_strided_slice %199 {offsets = [0, 64], sizes = [2, 32], strides = [1, 1]} : vector<2x128xf32> to vector<2x32xf32>
    %238 = math.tanh %237 : vector<2x32xf32>
    %239 = vector.extract_strided_slice %199 {offsets = [0, 96], sizes = [2, 32], strides = [1, 1]} : vector<2x128xf32> to vector<2x32xf32>
    %240 = arith.negf %239 : vector<2x32xf32>
    %241 = math.exp %240 : vector<2x32xf32>
    %cst_51 = arith.constant 1.000000e+00 : f32
    %242 = vector.broadcast %cst_51 : f32 to vector<2x32xf32>
    %243 = arith.addf %242, %241 : vector<2x32xf32>
    %244 = arith.divf %242, %243 : vector<2x32xf32>
    %245 = arith.mulf %236, %189 : vector<2x32xf32>
    %246 = arith.mulf %230, %238 : vector<2x32xf32>
    %247 = arith.addf %245, %246 : vector<2x32xf32>
    %248 = math.tanh %247 : vector<2x32xf32>
    %249 = arith.mulf %244, %248 : vector<2x32xf32>
    %250 = vector.extract_strided_slice %6 {offsets = [8, 0], sizes = [2, 128], strides = [1, 1]} : vector<16x128xf32> to vector<2x128xf32>
    %251 = arith.truncf %224 : vector<2x32xf32> to vector<2x32xbf16>
    %cst_52 = arith.constant dense<0.000000e+00> : vector<2x128xf32>
    %252 = tpu.matmul %251, %8, %cst_52 {dimension_numbers = #tpu.dot_dimension_numbers<[1], [0], [0], [1], [0, 0, 1, 1], [], []>} : vector<2x32xbf16>, vector<32x128xbf16>, vector<2x128xf32> -> vector<2x128xf32>
    %253 = arith.addf %250, %252 : vector<2x128xf32>
    %254 = vector.extract_strided_slice %7 {offsets = [6, 0], sizes = [2, 128], strides = [1, 1]} : vector<16x128xf32> to vector<2x128xf32>
    %255 = arith.truncf %249 : vector<2x32xf32> to vector<2x32xbf16>
    %cst_53 = arith.constant dense<0.000000e+00> : vector<2x128xf32>
    %256 = tpu.matmul %255, %9, %cst_53 {dimension_numbers = #tpu.dot_dimension_numbers<[1], [0], [0], [1], [0, 0, 1, 1], [], []>} : vector<2x32xbf16>, vector<32x128xbf16>, vector<2x128xf32> -> vector<2x128xf32>
    %257 = arith.addf %254, %256 : vector<2x128xf32>
    %258 = vector.extract_strided_slice %253 {offsets = [0, 0], sizes = [2, 32], strides = [1, 1]} : vector<2x128xf32> to vector<2x32xf32>
    %259 = arith.negf %258 : vector<2x32xf32>
    %260 = math.exp %259 : vector<2x32xf32>
    %cst_54 = arith.constant 1.000000e+00 : f32
    %261 = vector.broadcast %cst_54 : f32 to vector<2x32xf32>
    %262 = arith.addf %261, %260 : vector<2x32xf32>
    %263 = arith.divf %261, %262 : vector<2x32xf32>
    %264 = vector.extract_strided_slice %253 {offsets = [0, 32], sizes = [2, 32], strides = [1, 1]} : vector<2x128xf32> to vector<2x32xf32>
    %265 = arith.negf %264 : vector<2x32xf32>
    %266 = math.exp %265 : vector<2x32xf32>
    %cst_55 = arith.constant 1.000000e+00 : f32
    %267 = vector.broadcast %cst_55 : f32 to vector<2x32xf32>
    %268 = arith.addf %267, %266 : vector<2x32xf32>
    %269 = arith.divf %267, %268 : vector<2x32xf32>
    %270 = vector.extract_strided_slice %253 {offsets = [0, 64], sizes = [2, 32], strides = [1, 1]} : vector<2x128xf32> to vector<2x32xf32>
    %271 = math.tanh %270 : vector<2x32xf32>
    %272 = vector.extract_strided_slice %253 {offsets = [0, 96], sizes = [2, 32], strides = [1, 1]} : vector<2x128xf32> to vector<2x32xf32>
    %273 = arith.negf %272 : vector<2x32xf32>
    %274 = math.exp %273 : vector<2x32xf32>
    %cst_56 = arith.constant 1.000000e+00 : f32
    %275 = vector.broadcast %cst_56 : f32 to vector<2x32xf32>
    %276 = arith.addf %275, %274 : vector<2x32xf32>
    %277 = arith.divf %275, %276 : vector<2x32xf32>
    %278 = arith.mulf %269, %222 : vector<2x32xf32>
    %279 = arith.mulf %263, %271 : vector<2x32xf32>
    %280 = arith.addf %278, %279 : vector<2x32xf32>
    %281 = math.tanh %280 : vector<2x32xf32>
    %282 = arith.mulf %277, %281 : vector<2x32xf32>
    %283 = vector.extract_strided_slice %257 {offsets = [0, 0], sizes = [2, 32], strides = [1, 1]} : vector<2x128xf32> to vector<2x32xf32>
    %284 = arith.negf %283 : vector<2x32xf32>
    %285 = math.exp %284 : vector<2x32xf32>
    %cst_57 = arith.constant 1.000000e+00 : f32
    %286 = vector.broadcast %cst_57 : f32 to vector<2x32xf32>
    %287 = arith.addf %286, %285 : vector<2x32xf32>
    %288 = arith.divf %286, %287 : vector<2x32xf32>
    %289 = vector.extract_strided_slice %257 {offsets = [0, 32], sizes = [2, 32], strides = [1, 1]} : vector<2x128xf32> to vector<2x32xf32>
    %290 = arith.negf %289 : vector<2x32xf32>
    %291 = math.exp %290 : vector<2x32xf32>
    %cst_58 = arith.constant 1.000000e+00 : f32
    %292 = vector.broadcast %cst_58 : f32 to vector<2x32xf32>
    %293 = arith.addf %292, %291 : vector<2x32xf32>
    %294 = arith.divf %292, %293 : vector<2x32xf32>
    %295 = vector.extract_strided_slice %257 {offsets = [0, 64], sizes = [2, 32], strides = [1, 1]} : vector<2x128xf32> to vector<2x32xf32>
    %296 = math.tanh %295 : vector<2x32xf32>
    %297 = vector.extract_strided_slice %257 {offsets = [0, 96], sizes = [2, 32], strides = [1, 1]} : vector<2x128xf32> to vector<2x32xf32>
    %298 = arith.negf %297 : vector<2x32xf32>
    %299 = math.exp %298 : vector<2x32xf32>
    %cst_59 = arith.constant 1.000000e+00 : f32
    %300 = vector.broadcast %cst_59 : f32 to vector<2x32xf32>
    %301 = arith.addf %300, %299 : vector<2x32xf32>
    %302 = arith.divf %300, %301 : vector<2x32xf32>
    %303 = arith.mulf %294, %247 : vector<2x32xf32>
    %304 = arith.mulf %288, %296 : vector<2x32xf32>
    %305 = arith.addf %303, %304 : vector<2x32xf32>
    %306 = math.tanh %305 : vector<2x32xf32>
    %307 = arith.mulf %302, %306 : vector<2x32xf32>
    %308 = vector.extract_strided_slice %6 {offsets = [10, 0], sizes = [2, 128], strides = [1, 1]} : vector<16x128xf32> to vector<2x128xf32>
    %309 = arith.truncf %282 : vector<2x32xf32> to vector<2x32xbf16>
    %cst_60 = arith.constant dense<0.000000e+00> : vector<2x128xf32>
    %310 = tpu.matmul %309, %8, %cst_60 {dimension_numbers = #tpu.dot_dimension_numbers<[1], [0], [0], [1], [0, 0, 1, 1], [], []>} : vector<2x32xbf16>, vector<32x128xbf16>, vector<2x128xf32> -> vector<2x128xf32>
    %311 = arith.addf %308, %310 : vector<2x128xf32>
    %312 = vector.extract_strided_slice %7 {offsets = [4, 0], sizes = [2, 128], strides = [1, 1]} : vector<16x128xf32> to vector<2x128xf32>
    %313 = arith.truncf %307 : vector<2x32xf32> to vector<2x32xbf16>
    %cst_61 = arith.constant dense<0.000000e+00> : vector<2x128xf32>
    %314 = tpu.matmul %313, %9, %cst_61 {dimension_numbers = #tpu.dot_dimension_numbers<[1], [0], [0], [1], [0, 0, 1, 1], [], []>} : vector<2x32xbf16>, vector<32x128xbf16>, vector<2x128xf32> -> vector<2x128xf32>
    %315 = arith.addf %312, %314 : vector<2x128xf32>
    %316 = vector.extract_strided_slice %311 {offsets = [0, 0], sizes = [2, 32], strides = [1, 1]} : vector<2x128xf32> to vector<2x32xf32>
    %317 = arith.negf %316 : vector<2x32xf32>
    %318 = math.exp %317 : vector<2x32xf32>
    %cst_62 = arith.constant 1.000000e+00 : f32
    %319 = vector.broadcast %cst_62 : f32 to vector<2x32xf32>
    %320 = arith.addf %319, %318 : vector<2x32xf32>
    %321 = arith.divf %319, %320 : vector<2x32xf32>
    %322 = vector.extract_strided_slice %311 {offsets = [0, 32], sizes = [2, 32], strides = [1, 1]} : vector<2x128xf32> to vector<2x32xf32>
    %323 = arith.negf %322 : vector<2x32xf32>
    %324 = math.exp %323 : vector<2x32xf32>
    %cst_63 = arith.constant 1.000000e+00 : f32
    %325 = vector.broadcast %cst_63 : f32 to vector<2x32xf32>
    %326 = arith.addf %325, %324 : vector<2x32xf32>
    %327 = arith.divf %325, %326 : vector<2x32xf32>
    %328 = vector.extract_strided_slice %311 {offsets = [0, 64], sizes = [2, 32], strides = [1, 1]} : vector<2x128xf32> to vector<2x32xf32>
    %329 = math.tanh %328 : vector<2x32xf32>
    %330 = vector.extract_strided_slice %311 {offsets = [0, 96], sizes = [2, 32], strides = [1, 1]} : vector<2x128xf32> to vector<2x32xf32>
    %331 = arith.negf %330 : vector<2x32xf32>
    %332 = math.exp %331 : vector<2x32xf32>
    %cst_64 = arith.constant 1.000000e+00 : f32
    %333 = vector.broadcast %cst_64 : f32 to vector<2x32xf32>
    %334 = arith.addf %333, %332 : vector<2x32xf32>
    %335 = arith.divf %333, %334 : vector<2x32xf32>
    %336 = arith.mulf %327, %280 : vector<2x32xf32>
    %337 = arith.mulf %321, %329 : vector<2x32xf32>
    %338 = arith.addf %336, %337 : vector<2x32xf32>
    %339 = math.tanh %338 : vector<2x32xf32>
    %340 = arith.mulf %335, %339 : vector<2x32xf32>
    %341 = vector.extract_strided_slice %315 {offsets = [0, 0], sizes = [2, 32], strides = [1, 1]} : vector<2x128xf32> to vector<2x32xf32>
    %342 = arith.negf %341 : vector<2x32xf32>
    %343 = math.exp %342 : vector<2x32xf32>
    %cst_65 = arith.constant 1.000000e+00 : f32
    %344 = vector.broadcast %cst_65 : f32 to vector<2x32xf32>
    %345 = arith.addf %344, %343 : vector<2x32xf32>
    %346 = arith.divf %344, %345 : vector<2x32xf32>
    %347 = vector.extract_strided_slice %315 {offsets = [0, 32], sizes = [2, 32], strides = [1, 1]} : vector<2x128xf32> to vector<2x32xf32>
    %348 = arith.negf %347 : vector<2x32xf32>
    %349 = math.exp %348 : vector<2x32xf32>
    %cst_66 = arith.constant 1.000000e+00 : f32
    %350 = vector.broadcast %cst_66 : f32 to vector<2x32xf32>
    %351 = arith.addf %350, %349 : vector<2x32xf32>
    %352 = arith.divf %350, %351 : vector<2x32xf32>
    %353 = vector.extract_strided_slice %315 {offsets = [0, 64], sizes = [2, 32], strides = [1, 1]} : vector<2x128xf32> to vector<2x32xf32>
    %354 = math.tanh %353 : vector<2x32xf32>
    %355 = vector.extract_strided_slice %315 {offsets = [0, 96], sizes = [2, 32], strides = [1, 1]} : vector<2x128xf32> to vector<2x32xf32>
    %356 = arith.negf %355 : vector<2x32xf32>
    %357 = math.exp %356 : vector<2x32xf32>
    %cst_67 = arith.constant 1.000000e+00 : f32
    %358 = vector.broadcast %cst_67 : f32 to vector<2x32xf32>
    %359 = arith.addf %358, %357 : vector<2x32xf32>
    %360 = arith.divf %358, %359 : vector<2x32xf32>
    %361 = arith.mulf %352, %305 : vector<2x32xf32>
    %362 = arith.mulf %346, %354 : vector<2x32xf32>
    %363 = arith.addf %361, %362 : vector<2x32xf32>
    %364 = math.tanh %363 : vector<2x32xf32>
    %365 = arith.mulf %360, %364 : vector<2x32xf32>
    %366 = vector.extract_strided_slice %6 {offsets = [12, 0], sizes = [2, 128], strides = [1, 1]} : vector<16x128xf32> to vector<2x128xf32>
    %367 = arith.truncf %340 : vector<2x32xf32> to vector<2x32xbf16>
    %cst_68 = arith.constant dense<0.000000e+00> : vector<2x128xf32>
    %368 = tpu.matmul %367, %8, %cst_68 {dimension_numbers = #tpu.dot_dimension_numbers<[1], [0], [0], [1], [0, 0, 1, 1], [], []>} : vector<2x32xbf16>, vector<32x128xbf16>, vector<2x128xf32> -> vector<2x128xf32>
    %369 = arith.addf %366, %368 : vector<2x128xf32>
    %370 = vector.extract_strided_slice %7 {offsets = [2, 0], sizes = [2, 128], strides = [1, 1]} : vector<16x128xf32> to vector<2x128xf32>
    %371 = arith.truncf %365 : vector<2x32xf32> to vector<2x32xbf16>
    %cst_69 = arith.constant dense<0.000000e+00> : vector<2x128xf32>
    %372 = tpu.matmul %371, %9, %cst_69 {dimension_numbers = #tpu.dot_dimension_numbers<[1], [0], [0], [1], [0, 0, 1, 1], [], []>} : vector<2x32xbf16>, vector<32x128xbf16>, vector<2x128xf32> -> vector<2x128xf32>
    %373 = arith.addf %370, %372 : vector<2x128xf32>
    %374 = vector.extract_strided_slice %369 {offsets = [0, 0], sizes = [2, 32], strides = [1, 1]} : vector<2x128xf32> to vector<2x32xf32>
    %375 = arith.negf %374 : vector<2x32xf32>
    %376 = math.exp %375 : vector<2x32xf32>
    %cst_70 = arith.constant 1.000000e+00 : f32
    %377 = vector.broadcast %cst_70 : f32 to vector<2x32xf32>
    %378 = arith.addf %377, %376 : vector<2x32xf32>
    %379 = arith.divf %377, %378 : vector<2x32xf32>
    %380 = vector.extract_strided_slice %369 {offsets = [0, 32], sizes = [2, 32], strides = [1, 1]} : vector<2x128xf32> to vector<2x32xf32>
    %381 = arith.negf %380 : vector<2x32xf32>
    %382 = math.exp %381 : vector<2x32xf32>
    %cst_71 = arith.constant 1.000000e+00 : f32
    %383 = vector.broadcast %cst_71 : f32 to vector<2x32xf32>
    %384 = arith.addf %383, %382 : vector<2x32xf32>
    %385 = arith.divf %383, %384 : vector<2x32xf32>
    %386 = vector.extract_strided_slice %369 {offsets = [0, 64], sizes = [2, 32], strides = [1, 1]} : vector<2x128xf32> to vector<2x32xf32>
    %387 = math.tanh %386 : vector<2x32xf32>
    %388 = vector.extract_strided_slice %369 {offsets = [0, 96], sizes = [2, 32], strides = [1, 1]} : vector<2x128xf32> to vector<2x32xf32>
    %389 = arith.negf %388 : vector<2x32xf32>
    %390 = math.exp %389 : vector<2x32xf32>
    %cst_72 = arith.constant 1.000000e+00 : f32
    %391 = vector.broadcast %cst_72 : f32 to vector<2x32xf32>
    %392 = arith.addf %391, %390 : vector<2x32xf32>
    %393 = arith.divf %391, %392 : vector<2x32xf32>
    %394 = arith.mulf %385, %338 : vector<2x32xf32>
    %395 = arith.mulf %379, %387 : vector<2x32xf32>
    %396 = arith.addf %394, %395 : vector<2x32xf32>
    %397 = math.tanh %396 : vector<2x32xf32>
    %398 = arith.mulf %393, %397 : vector<2x32xf32>
    %399 = vector.extract_strided_slice %373 {offsets = [0, 0], sizes = [2, 32], strides = [1, 1]} : vector<2x128xf32> to vector<2x32xf32>
    %400 = arith.negf %399 : vector<2x32xf32>
    %401 = math.exp %400 : vector<2x32xf32>
    %cst_73 = arith.constant 1.000000e+00 : f32
    %402 = vector.broadcast %cst_73 : f32 to vector<2x32xf32>
    %403 = arith.addf %402, %401 : vector<2x32xf32>
    %404 = arith.divf %402, %403 : vector<2x32xf32>
    %405 = vector.extract_strided_slice %373 {offsets = [0, 32], sizes = [2, 32], strides = [1, 1]} : vector<2x128xf32> to vector<2x32xf32>
    %406 = arith.negf %405 : vector<2x32xf32>
    %407 = math.exp %406 : vector<2x32xf32>
    %cst_74 = arith.constant 1.000000e+00 : f32
    %408 = vector.broadcast %cst_74 : f32 to vector<2x32xf32>
    %409 = arith.addf %408, %407 : vector<2x32xf32>
    %410 = arith.divf %408, %409 : vector<2x32xf32>
    %411 = vector.extract_strided_slice %373 {offsets = [0, 64], sizes = [2, 32], strides = [1, 1]} : vector<2x128xf32> to vector<2x32xf32>
    %412 = math.tanh %411 : vector<2x32xf32>
    %413 = vector.extract_strided_slice %373 {offsets = [0, 96], sizes = [2, 32], strides = [1, 1]} : vector<2x128xf32> to vector<2x32xf32>
    %414 = arith.negf %413 : vector<2x32xf32>
    %415 = math.exp %414 : vector<2x32xf32>
    %cst_75 = arith.constant 1.000000e+00 : f32
    %416 = vector.broadcast %cst_75 : f32 to vector<2x32xf32>
    %417 = arith.addf %416, %415 : vector<2x32xf32>
    %418 = arith.divf %416, %417 : vector<2x32xf32>
    %419 = arith.mulf %410, %363 : vector<2x32xf32>
    %420 = arith.mulf %404, %412 : vector<2x32xf32>
    %421 = arith.addf %419, %420 : vector<2x32xf32>
    %422 = math.tanh %421 : vector<2x32xf32>
    %423 = arith.mulf %418, %422 : vector<2x32xf32>
    %424 = vector.extract_strided_slice %6 {offsets = [14, 0], sizes = [2, 128], strides = [1, 1]} : vector<16x128xf32> to vector<2x128xf32>
    %425 = arith.truncf %398 : vector<2x32xf32> to vector<2x32xbf16>
    %cst_76 = arith.constant dense<0.000000e+00> : vector<2x128xf32>
    %426 = tpu.matmul %425, %8, %cst_76 {dimension_numbers = #tpu.dot_dimension_numbers<[1], [0], [0], [1], [0, 0, 1, 1], [], []>} : vector<2x32xbf16>, vector<32x128xbf16>, vector<2x128xf32> -> vector<2x128xf32>
    %427 = arith.addf %424, %426 : vector<2x128xf32>
    %428 = vector.extract_strided_slice %7 {offsets = [0, 0], sizes = [2, 128], strides = [1, 1]} : vector<16x128xf32> to vector<2x128xf32>
    %429 = arith.truncf %423 : vector<2x32xf32> to vector<2x32xbf16>
    %cst_77 = arith.constant dense<0.000000e+00> : vector<2x128xf32>
    %430 = tpu.matmul %429, %9, %cst_77 {dimension_numbers = #tpu.dot_dimension_numbers<[1], [0], [0], [1], [0, 0, 1, 1], [], []>} : vector<2x32xbf16>, vector<32x128xbf16>, vector<2x128xf32> -> vector<2x128xf32>
    %431 = arith.addf %428, %430 : vector<2x128xf32>
    %432 = vector.extract_strided_slice %427 {offsets = [0, 0], sizes = [2, 32], strides = [1, 1]} : vector<2x128xf32> to vector<2x32xf32>
    %433 = arith.negf %432 : vector<2x32xf32>
    %434 = math.exp %433 : vector<2x32xf32>
    %cst_78 = arith.constant 1.000000e+00 : f32
    %435 = vector.broadcast %cst_78 : f32 to vector<2x32xf32>
    %436 = arith.addf %435, %434 : vector<2x32xf32>
    %437 = arith.divf %435, %436 : vector<2x32xf32>
    %438 = vector.extract_strided_slice %427 {offsets = [0, 32], sizes = [2, 32], strides = [1, 1]} : vector<2x128xf32> to vector<2x32xf32>
    %439 = arith.negf %438 : vector<2x32xf32>
    %440 = math.exp %439 : vector<2x32xf32>
    %cst_79 = arith.constant 1.000000e+00 : f32
    %441 = vector.broadcast %cst_79 : f32 to vector<2x32xf32>
    %442 = arith.addf %441, %440 : vector<2x32xf32>
    %443 = arith.divf %441, %442 : vector<2x32xf32>
    %444 = vector.extract_strided_slice %427 {offsets = [0, 64], sizes = [2, 32], strides = [1, 1]} : vector<2x128xf32> to vector<2x32xf32>
    %445 = math.tanh %444 : vector<2x32xf32>
    %446 = vector.extract_strided_slice %427 {offsets = [0, 96], sizes = [2, 32], strides = [1, 1]} : vector<2x128xf32> to vector<2x32xf32>
    %447 = arith.negf %446 : vector<2x32xf32>
    %448 = math.exp %447 : vector<2x32xf32>
    %cst_80 = arith.constant 1.000000e+00 : f32
    %449 = vector.broadcast %cst_80 : f32 to vector<2x32xf32>
    %450 = arith.addf %449, %448 : vector<2x32xf32>
    %451 = arith.divf %449, %450 : vector<2x32xf32>
    %452 = arith.mulf %443, %396 : vector<2x32xf32>
    %453 = arith.mulf %437, %445 : vector<2x32xf32>
    %454 = arith.addf %452, %453 : vector<2x32xf32>
    %455 = math.tanh %454 : vector<2x32xf32>
    %456 = arith.mulf %451, %455 : vector<2x32xf32>
    %457 = vector.extract_strided_slice %431 {offsets = [0, 0], sizes = [2, 32], strides = [1, 1]} : vector<2x128xf32> to vector<2x32xf32>
    %458 = arith.negf %457 : vector<2x32xf32>
    %459 = math.exp %458 : vector<2x32xf32>
    %cst_81 = arith.constant 1.000000e+00 : f32
    %460 = vector.broadcast %cst_81 : f32 to vector<2x32xf32>
    %461 = arith.addf %460, %459 : vector<2x32xf32>
    %462 = arith.divf %460, %461 : vector<2x32xf32>
    %463 = vector.extract_strided_slice %431 {offsets = [0, 32], sizes = [2, 32], strides = [1, 1]} : vector<2x128xf32> to vector<2x32xf32>
    %464 = arith.negf %463 : vector<2x32xf32>
    %465 = math.exp %464 : vector<2x32xf32>
    %cst_82 = arith.constant 1.000000e+00 : f32
    %466 = vector.broadcast %cst_82 : f32 to vector<2x32xf32>
    %467 = arith.addf %466, %465 : vector<2x32xf32>
    %468 = arith.divf %466, %467 : vector<2x32xf32>
    %469 = vector.extract_strided_slice %431 {offsets = [0, 64], sizes = [2, 32], strides = [1, 1]} : vector<2x128xf32> to vector<2x32xf32>
    %470 = math.tanh %469 : vector<2x32xf32>
    %471 = vector.extract_strided_slice %431 {offsets = [0, 96], sizes = [2, 32], strides = [1, 1]} : vector<2x128xf32> to vector<2x32xf32>
    %472 = arith.negf %471 : vector<2x32xf32>
    %473 = math.exp %472 : vector<2x32xf32>
    %cst_83 = arith.constant 1.000000e+00 : f32
    %474 = vector.broadcast %cst_83 : f32 to vector<2x32xf32>
    %475 = arith.addf %474, %473 : vector<2x32xf32>
    %476 = arith.divf %474, %475 : vector<2x32xf32>
    %477 = arith.mulf %468, %421 : vector<2x32xf32>
    %478 = arith.mulf %462, %470 : vector<2x32xf32>
    %479 = arith.addf %477, %478 : vector<2x32xf32>
    %480 = math.tanh %479 : vector<2x32xf32>
    %481 = arith.mulf %476, %480 : vector<2x32xf32>
    %c0_84 = arith.constant 0 : index
    %c0_85 = arith.constant 0 : index
    %c0_86 = arith.constant 0 : index
    %482 = vector.load %arg7[%c0_84, %c0_85, %c0_86] : memref<2x2x32xf32, #tpu.memory_space<vmem>>, vector<1x2x32xf32>
    %483 = vector.shape_cast %482 : vector<1x2x32xf32> to vector<2x32xf32>
    %484 = vector.shape_cast %456 : vector<2x32xf32> to vector<1x2x32xf32>
    tpu.vector_store %arg7[%c0_84, %c0_85, %c0_86], %484 {strides = array<i32>} : memref<2x2x32xf32, #tpu.memory_space<vmem>>, vector<1x2x32xf32>,
    %c1_87 = arith.constant 1 : index
    %c0_88 = arith.constant 0 : index
    %c0_89 = arith.constant 0 : index
    %485 = vector.load %arg7[%c1_87, %c0_88, %c0_89] : memref<2x2x32xf32, #tpu.memory_space<vmem>>, vector<1x2x32xf32>
    %486 = vector.shape_cast %485 : vector<1x2x32xf32> to vector<2x32xf32>
    %487 = vector.shape_cast %481 : vector<2x32xf32> to vector<1x2x32xf32>
    tpu.vector_store %arg7[%c1_87, %c0_88, %c0_89], %487 {strides = array<i32>} : memref<2x2x32xf32, #tpu.memory_space<vmem>>, vector<1x2x32xf32>,
    %c0_90 = arith.constant 0 : index
    %c0_91 = arith.constant 0 : index
    %c0_92 = arith.constant 0 : index
    %488 = vector.load %arg8[%c0_90, %c0_91, %c0_92] : memref<2x2x32xf32, #tpu.memory_space<vmem>>, vector<1x2x32xf32>
    %489 = vector.shape_cast %488 : vector<1x2x32xf32> to vector<2x32xf32>
    %490 = vector.shape_cast %454 : vector<2x32xf32> to vector<1x2x32xf32>
    tpu.vector_store %arg8[%c0_90, %c0_91, %c0_92], %490 {strides = array<i32>} : memref<2x2x32xf32, #tpu.memory_space<vmem>>, vector<1x2x32xf32>,
    %c1_93 = arith.constant 1 : index
    %c0_94 = arith.constant 0 : index
    %c0_95 = arith.constant 0 : index
    %491 = vector.load %arg8[%c1_93, %c0_94, %c0_95] : memref<2x2x32xf32, #tpu.memory_space<vmem>>, vector<1x2x32xf32>
    %492 = vector.shape_cast %491 : vector<1x2x32xf32> to vector<2x32xf32>
    %493 = vector.shape_cast %479 : vector<2x32xf32> to vector<1x2x32xf32>
    tpu.vector_store %arg8[%c1_93, %c0_94, %c0_95], %493 {strides = array<i32>} : memref<2x2x32xf32, #tpu.memory_space<vmem>>, vector<1x2x32xf32>,
    return
  }
}

module attributes {stable_mosaic.version = 11 : i64} {
  func.func @kernel(%arg0: memref<16x26xbf16, #tpu.memory_space<vmem>>, %arg1: memref<2x2x32xf32, #tpu.memory_space<vmem>>, %arg2: memref<2x2x32xf32, #tpu.memory_space<vmem>>, %arg3: memref<26x256xbf16, #tpu.memory_space<vmem>>, %arg4: memref<32x128xbf16, #tpu.memory_space<vmem>>, %arg5: memref<32x128xbf16, #tpu.memory_space<vmem>>, %arg6: memref<1x256xf32, #tpu.memory_space<vmem>>, %arg7: memref<2x2x32xf32, #tpu.memory_space<vmem>>, %arg8: memref<2x2x32xf32, #tpu.memory_space<vmem>>) attributes {dimension_semantics = [], scalar_prefetch = 0 : i64, scratch_operands = 0 : i64, tpu.core_type = #tpu.core_type<tc>} {
    %c0 = arith.constant 0 : index
    %c0_0 = arith.constant 0 : index
    %0 = vector.load %arg0[%c0, %c0_0] : memref<16x26xbf16, #tpu.memory_space<vmem>>, vector<16x26xbf16>
    %c0_1 = arith.constant 0 : index
    %c0_2 = arith.constant 0 : index
    %1 = vector.load %arg3[%c0_1, %c0_2] : memref<26x256xbf16, #tpu.memory_space<vmem>>, vector<26x256xbf16>
    %cst = arith.constant dense<0.000000e+00> : vector<16x256xf32>
    %2 = tpu.matmul %0, %1, %cst {dimension_numbers = #tpu.dot_dimension_numbers<[1], [0], [0], [1], [0, 0, 1, 1], [], []>} : vector<16x26xbf16>, vector<26x256xbf16>, vector<16x256xf32> -> vector<16x256xf32>
    %c0_3 = arith.constant 0 : index
    %c0_4 = arith.constant 0 : index
    %3 = vector.load %arg6[%c0_3, %c0_4] : memref<1x256xf32, #tpu.memory_space<vmem>>, vector<1x256xf32>
    %4 = vector.broadcast %3 : vector<1x256xf32> to vector<16x256xf32>
    %5 = arith.addf %2, %4 : vector<16x256xf32>
    %6 = vector.extract_strided_slice %5 {offsets = [0, 0], sizes = [16, 128], strides = [1, 1]} : vector<16x256xf32> to vector<16x128xf32>
    %7 = vector.extract_strided_slice %5 {offsets = [0, 128], sizes = [16, 128], strides = [1, 1]} : vector<16x256xf32> to vector<16x128xf32>
    %c0_5 = arith.constant 0 : index
    %c0_6 = arith.constant 0 : index
    %8 = vector.load %arg4[%c0_5, %c0_6] : memref<32x128xbf16, #tpu.memory_space<vmem>>, vector<32x128xbf16>
    %c0_7 = arith.constant 0 : index
    %c0_8 = arith.constant 0 : index
    %9 = vector.load %arg5[%c0_7, %c0_8] : memref<32x128xbf16, #tpu.memory_space<vmem>>, vector<32x128xbf16>
    %c0_9 = arith.constant 0 : index
    %c0_10 = arith.constant 0 : index
    %c0_11 = arith.constant 0 : index
    %10 = vector.load %arg1[%c0_9, %c0_10, %c0_11] : memref<2x2x32xf32, #tpu.memory_space<vmem>>, vector<1x2x32xf32>
    %11 = vector.shape_cast %10 : vector<1x2x32xf32> to vector<2x32xf32>
    %c0_12 = arith.constant 0 : index
    %c0_13 = arith.constant 0 : index
    %c0_14 = arith.constant 0 : index
    %12 = vector.load %arg2[%c0_12, %c0_13, %c0_14] : memref<2x2x32xf32, #tpu.memory_space<vmem>>, vector<1x2x32xf32>
    %13 = vector.shape_cast %12 : vector<1x2x32xf32> to vector<2x32xf32>
    %c1 = arith.constant 1 : index
    %c0_15 = arith.constant 0 : index
    %c0_16 = arith.constant 0 : index
    %14 = vector.load %arg1[%c1, %c0_15, %c0_16] : memref<2x2x32xf32, #tpu.memory_space<vmem>>, vector<1x2x32xf32>
    %15 = vector.shape_cast %14 : vector<1x2x32xf32> to vector<2x32xf32>
    %c1_17 = arith.constant 1 : index
    %c0_18 = arith.constant 0 : index
    %c0_19 = arith.constant 0 : index
    %16 = vector.load %arg2[%c1_17, %c0_18, %c0_19] : memref<2x2x32xf32, #tpu.memory_space<vmem>>, vector<1x2x32xf32>
    %17 = vector.shape_cast %16 : vector<1x2x32xf32> to vector<2x32xf32>
    %18 = vector.extract_strided_slice %6 {offsets = [0, 0], sizes = [2, 128], strides = [1, 1]} : vector<16x128xf32> to vector<2x128xf32>
    %19 = arith.truncf %11 : vector<2x32xf32> to vector<2x32xbf16>
    %cst_20 = arith.constant dense<0.000000e+00> : vector<2x128xf32>
    %20 = tpu.matmul %19, %8, %cst_20 {dimension_numbers = #tpu.dot_dimension_numbers<[1], [0], [0], [1], [0, 0, 1, 1], [], []>} : vector<2x32xbf16>, vector<32x128xbf16>, vector<2x128xf32> -> vector<2x128xf32>
    %21 = arith.addf %18, %20 : vector<2x128xf32>
    %22 = vector.extract_strided_slice %7 {offsets = [14, 0], sizes = [2, 128], strides = [1, 1]} : vector<16x128xf32> to vector<2x128xf32>
    %23 = arith.truncf %15 : vector<2x32xf32> to vector<2x32xbf16>
    %cst_21 = arith.constant dense<0.000000e+00> : vector<2x128xf32>
    %24 = tpu.matmul %23, %9, %cst_21 {dimension_numbers = #tpu.dot_dimension_numbers<[1], [0], [0], [1], [0, 0, 1, 1], [], []>} : vector<2x32xbf16>, vector<32x128xbf16>, vector<2x128xf32> -> vector<2x128xf32>
    %25 = arith.addf %22, %24 : vector<2x128xf32>
    %26 = vector.extract_strided_slice %21 {offsets = [0, 0], sizes = [2, 32], strides = [1, 1]} : vector<2x128xf32> to vector<2x32xf32>
    %27 = arith.negf %26 : vector<2x32xf32>
    %28 = math.exp %27 : vector<2x32xf32>
    %cst_22 = arith.constant 1.000000e+00 : f32
    %29 = vector.broadcast %cst_22 : f32 to vector<2x32xf32>
    %30 = arith.addf %29, %28 : vector<2x32xf32>
    %31 = arith.divf %29, %30 : vector<2x32xf32>
    %32 = vector.extract_strided_slice %21 {offsets = [0, 32], sizes = [2, 32], strides = [1, 1]} : vector<2x128xf32> to vector<2x32xf32>
    %33 = arith.negf %32 : vector<2x32xf32>
    %34 = math.exp %33 : vector<2x32xf32>
    %cst_23 = arith.constant 1.000000e+00 : f32
    %35 = vector.broadcast %cst_23 : f32 to vector<2x32xf32>
    %36 = arith.addf %35, %34 : vector<2x32xf32>
    %37 = arith.divf %35, %36 : vector<2x32xf32>
    %38 = vector.extract_strided_slice %21 {offsets = [0, 64], sizes = [2, 32], strides = [1, 1]} : vector<2x128xf32> to vector<2x32xf32>
    %39 = math.tanh %38 : vector<2x32xf32>
    %40 = vector.extract_strided_slice %21 {offsets = [0, 96], sizes = [2, 32], strides = [1, 1]} : vector<2x128xf32> to vector<2x32xf32>
    %41 = arith.negf %40 : vector<2x32xf32>
    %42 = math.exp %41 : vector<2x32xf32>
    %cst_24 = arith.constant 1.000000e+00 : f32
    %43 = vector.broadcast %cst_24 : f32 to vector<2x32xf32>
    %44 = arith.addf %43, %42 : vector<2x32xf32>
    %45 = arith.divf %43, %44 : vector<2x32xf32>
    %46 = arith.mulf %37, %13 : vector<2x32xf32>
    %47 = arith.mulf %31, %39 : vector<2x32xf32>
    %48 = arith.addf %46, %47 : vector<2x32xf32>
    %49 = math.tanh %48 : vector<2x32xf32>
    %50 = arith.mulf %45, %49 : vector<2x32xf32>
    %51 = vector.extract_strided_slice %25 {offsets = [0, 0], sizes = [2, 32], strides = [1, 1]} : vector<2x128xf32> to vector<2x32xf32>
    %52 = arith.negf %51 : vector<2x32xf32>
    %53 = math.exp %52 : vector<2x32xf32>
    %cst_25 = arith.constant 1.000000e+00 : f32
    %54 = vector.broadcast %cst_25 : f32 to vector<2x32xf32>
    %55 = arith.addf %54, %53 : vector<2x32xf32>
    %56 = arith.divf %54, %55 : vector<2x32xf32>
    %57 = vector.extract_strided_slice %25 {offsets = [0, 32], sizes = [2, 32], strides = [1, 1]} : vector<2x128xf32> to vector<2x32xf32>
    %58 = arith.negf %57 : vector<2x32xf32>
    %59 = math.exp %58 : vector<2x32xf32>
    %cst_26 = arith.constant 1.000000e+00 : f32
    %60 = vector.broadcast %cst_26 : f32 to vector<2x32xf32>
    %61 = arith.addf %60, %59 : vector<2x32xf32>
    %62 = arith.divf %60, %61 : vector<2x32xf32>
    %63 = vector.extract_strided_slice %25 {offsets = [0, 64], sizes = [2, 32], strides = [1, 1]} : vector<2x128xf32> to vector<2x32xf32>
    %64 = math.tanh %63 : vector<2x32xf32>
    %65 = vector.extract_strided_slice %25 {offsets = [0, 96], sizes = [2, 32], strides = [1, 1]} : vector<2x128xf32> to vector<2x32xf32>
    %66 = arith.negf %65 : vector<2x32xf32>
    %67 = math.exp %66 : vector<2x32xf32>
    %cst_27 = arith.constant 1.000000e+00 : f32
    %68 = vector.broadcast %cst_27 : f32 to vector<2x32xf32>
    %69 = arith.addf %68, %67 : vector<2x32xf32>
    %70 = arith.divf %68, %69 : vector<2x32xf32>
    %71 = arith.mulf %62, %17 : vector<2x32xf32>
    %72 = arith.mulf %56, %64 : vector<2x32xf32>
    %73 = arith.addf %71, %72 : vector<2x32xf32>
    %74 = math.tanh %73 : vector<2x32xf32>
    %75 = arith.mulf %70, %74 : vector<2x32xf32>
    %76 = vector.extract_strided_slice %6 {offsets = [2, 0], sizes = [2, 128], strides = [1, 1]} : vector<16x128xf32> to vector<2x128xf32>
    %77 = arith.truncf %50 : vector<2x32xf32> to vector<2x32xbf16>
    %cst_28 = arith.constant dense<0.000000e+00> : vector<2x128xf32>
    %78 = tpu.matmul %77, %8, %cst_28 {dimension_numbers = #tpu.dot_dimension_numbers<[1], [0], [0], [1], [0, 0, 1, 1], [], []>} : vector<2x32xbf16>, vector<32x128xbf16>, vector<2x128xf32> -> vector<2x128xf32>
    %79 = arith.addf %76, %78 : vector<2x128xf32>
    %80 = vector.extract_strided_slice %7 {offsets = [12, 0], sizes = [2, 128], strides = [1, 1]} : vector<16x128xf32> to vector<2x128xf32>
    %81 = arith.truncf %75 : vector<2x32xf32> to vector<2x32xbf16>
    %cst_29 = arith.constant dense<0.000000e+00> : vector<2x128xf32>
    %82 = tpu.matmul %81, %9, %cst_29 {dimension_numbers = #tpu.dot_dimension_numbers<[1], [0], [0], [1], [0, 0, 1, 1], [], []>} : vector<2x32xbf16>, vector<32x128xbf16>, vector<2x128xf32> -> vector<2x128xf32>
    %83 = arith.addf %80, %82 : vector<2x128xf32>
    %84 = vector.extract_strided_slice %79 {offsets = [0, 0], sizes = [2, 32], strides = [1, 1]} : vector<2x128xf32> to vector<2x32xf32>
    %85 = arith.negf %84 : vector<2x32xf32>
    %86 = math.exp %85 : vector<2x32xf32>
    %cst_30 = arith.constant 1.000000e+00 : f32
    %87 = vector.broadcast %cst_30 : f32 to vector<2x32xf32>
    %88 = arith.addf %87, %86 : vector<2x32xf32>
    %89 = arith.divf %87, %88 : vector<2x32xf32>
    %90 = vector.extract_strided_slice %79 {offsets = [0, 32], sizes = [2, 32], strides = [1, 1]} : vector<2x128xf32> to vector<2x32xf32>
    %91 = arith.negf %90 : vector<2x32xf32>
    %92 = math.exp %91 : vector<2x32xf32>
    %cst_31 = arith.constant 1.000000e+00 : f32
    %93 = vector.broadcast %cst_31 : f32 to vector<2x32xf32>
    %94 = arith.addf %93, %92 : vector<2x32xf32>
    %95 = arith.divf %93, %94 : vector<2x32xf32>
    %96 = vector.extract_strided_slice %79 {offsets = [0, 64], sizes = [2, 32], strides = [1, 1]} : vector<2x128xf32> to vector<2x32xf32>
    %97 = math.tanh %96 : vector<2x32xf32>
    %98 = vector.extract_strided_slice %79 {offsets = [0, 96], sizes = [2, 32], strides = [1, 1]} : vector<2x128xf32> to vector<2x32xf32>
    %99 = arith.negf %98 : vector<2x32xf32>
    %100 = math.exp %99 : vector<2x32xf32>
    %cst_32 = arith.constant 1.000000e+00 : f32
    %101 = vector.broadcast %cst_32 : f32 to vector<2x32xf32>
    %102 = arith.addf %101, %100 : vector<2x32xf32>
    %103 = arith.divf %101, %102 : vector<2x32xf32>
    %104 = arith.mulf %95, %48 : vector<2x32xf32>
    %105 = arith.mulf %89, %97 : vector<2x32xf32>
    %106 = arith.addf %104, %105 : vector<2x32xf32>
    %107 = math.tanh %106 : vector<2x32xf32>
    %108 = arith.mulf %103, %107 : vector<2x32xf32>
    %109 = vector.extract_strided_slice %83 {offsets = [0, 0], sizes = [2, 32], strides = [1, 1]} : vector<2x128xf32> to vector<2x32xf32>
    %110 = arith.negf %109 : vector<2x32xf32>
    %111 = math.exp %110 : vector<2x32xf32>
    %cst_33 = arith.constant 1.000000e+00 : f32
    %112 = vector.broadcast %cst_33 : f32 to vector<2x32xf32>
    %113 = arith.addf %112, %111 : vector<2x32xf32>
    %114 = arith.divf %112, %113 : vector<2x32xf32>
    %115 = vector.extract_strided_slice %83 {offsets = [0, 32], sizes = [2, 32], strides = [1, 1]} : vector<2x128xf32> to vector<2x32xf32>
    %116 = arith.negf %115 : vector<2x32xf32>
    %117 = math.exp %116 : vector<2x32xf32>
    %cst_34 = arith.constant 1.000000e+00 : f32
    %118 = vector.broadcast %cst_34 : f32 to vector<2x32xf32>
    %119 = arith.addf %118, %117 : vector<2x32xf32>
    %120 = arith.divf %118, %119 : vector<2x32xf32>
    %121 = vector.extract_strided_slice %83 {offsets = [0, 64], sizes = [2, 32], strides = [1, 1]} : vector<2x128xf32> to vector<2x32xf32>
    %122 = math.tanh %121 : vector<2x32xf32>
    %123 = vector.extract_strided_slice %83 {offsets = [0, 96], sizes = [2, 32], strides = [1, 1]} : vector<2x128xf32> to vector<2x32xf32>
    %124 = arith.negf %123 : vector<2x32xf32>
    %125 = math.exp %124 : vector<2x32xf32>
    %cst_35 = arith.constant 1.000000e+00 : f32
    %126 = vector.broadcast %cst_35 : f32 to vector<2x32xf32>
    %127 = arith.addf %126, %125 : vector<2x32xf32>
    %128 = arith.divf %126, %127 : vector<2x32xf32>
    %129 = arith.mulf %120, %73 : vector<2x32xf32>
    %130 = arith.mulf %114, %122 : vector<2x32xf32>
    %131 = arith.addf %129, %130 : vector<2x32xf32>
    %132 = math.tanh %131 : vector<2x32xf32>
    %133 = arith.mulf %128, %132 : vector<2x32xf32>
    %134 = vector.extract_strided_slice %6 {offsets = [4, 0], sizes = [2, 128], strides = [1, 1]} : vector<16x128xf32> to vector<2x128xf32>
    %135 = arith.truncf %108 : vector<2x32xf32> to vector<2x32xbf16>
    %cst_36 = arith.constant dense<0.000000e+00> : vector<2x128xf32>
    %136 = tpu.matmul %135, %8, %cst_36 {dimension_numbers = #tpu.dot_dimension_numbers<[1], [0], [0], [1], [0, 0, 1, 1], [], []>} : vector<2x32xbf16>, vector<32x128xbf16>, vector<2x128xf32> -> vector<2x128xf32>
    %137 = arith.addf %134, %136 : vector<2x128xf32>
    %138 = vector.extract_strided_slice %7 {offsets = [10, 0], sizes = [2, 128], strides = [1, 1]} : vector<16x128xf32> to vector<2x128xf32>
    %139 = arith.truncf %133 : vector<2x32xf32> to vector<2x32xbf16>
    %cst_37 = arith.constant dense<0.000000e+00> : vector<2x128xf32>
    %140 = tpu.matmul %139, %9, %cst_37 {dimension_numbers = #tpu.dot_dimension_numbers<[1], [0], [0], [1], [0, 0, 1, 1], [], []>} : vector<2x32xbf16>, vector<32x128xbf16>, vector<2x128xf32> -> vector<2x128xf32>
    %141 = arith.addf %138, %140 : vector<2x128xf32>
    %142 = vector.extract_strided_slice %137 {offsets = [0, 0], sizes = [2, 32], strides = [1, 1]} : vector<2x128xf32> to vector<2x32xf32>
    %143 = arith.negf %142 : vector<2x32xf32>
    %144 = math.exp %143 : vector<2x32xf32>
    %cst_38 = arith.constant 1.000000e+00 : f32
    %145 = vector.broadcast %cst_38 : f32 to vector<2x32xf32>
    %146 = arith.addf %145, %144 : vector<2x32xf32>
    %147 = arith.divf %145, %146 : vector<2x32xf32>
    %148 = vector.extract_strided_slice %137 {offsets = [0, 32], sizes = [2, 32], strides = [1, 1]} : vector<2x128xf32> to vector<2x32xf32>
    %149 = arith.negf %148 : vector<2x32xf32>
    %150 = math.exp %149 : vector<2x32xf32>
    %cst_39 = arith.constant 1.000000e+00 : f32
    %151 = vector.broadcast %cst_39 : f32 to vector<2x32xf32>
    %152 = arith.addf %151, %150 : vector<2x32xf32>
    %153 = arith.divf %151, %152 : vector<2x32xf32>
    %154 = vector.extract_strided_slice %137 {offsets = [0, 64], sizes = [2, 32], strides = [1, 1]} : vector<2x128xf32> to vector<2x32xf32>
    %155 = math.tanh %154 : vector<2x32xf32>
    %156 = vector.extract_strided_slice %137 {offsets = [0, 96], sizes = [2, 32], strides = [1, 1]} : vector<2x128xf32> to vector<2x32xf32>
    %157 = arith.negf %156 : vector<2x32xf32>
    %158 = math.exp %157 : vector<2x32xf32>
    %cst_40 = arith.constant 1.000000e+00 : f32
    %159 = vector.broadcast %cst_40 : f32 to vector<2x32xf32>
    %160 = arith.addf %159, %158 : vector<2x32xf32>
    %161 = arith.divf %159, %160 : vector<2x32xf32>
    %162 = arith.mulf %153, %106 : vector<2x32xf32>
    %163 = arith.mulf %147, %155 : vector<2x32xf32>
    %164 = arith.addf %162, %163 : vector<2x32xf32>
    %165 = math.tanh %164 : vector<2x32xf32>
    %166 = arith.mulf %161, %165 : vector<2x32xf32>
    %167 = vector.extract_strided_slice %141 {offsets = [0, 0], sizes = [2, 32], strides = [1, 1]} : vector<2x128xf32> to vector<2x32xf32>
    %168 = arith.negf %167 : vector<2x32xf32>
    %169 = math.exp %168 : vector<2x32xf32>
    %cst_41 = arith.constant 1.000000e+00 : f32
    %170 = vector.broadcast %cst_41 : f32 to vector<2x32xf32>
    %171 = arith.addf %170, %169 : vector<2x32xf32>
    %172 = arith.divf %170, %171 : vector<2x32xf32>
    %173 = vector.extract_strided_slice %141 {offsets = [0, 32], sizes = [2, 32], strides = [1, 1]} : vector<2x128xf32> to vector<2x32xf32>
    %174 = arith.negf %173 : vector<2x32xf32>
    %175 = math.exp %174 : vector<2x32xf32>
    %cst_42 = arith.constant 1.000000e+00 : f32
    %176 = vector.broadcast %cst_42 : f32 to vector<2x32xf32>
    %177 = arith.addf %176, %175 : vector<2x32xf32>
    %178 = arith.divf %176, %177 : vector<2x32xf32>
    %179 = vector.extract_strided_slice %141 {offsets = [0, 64], sizes = [2, 32], strides = [1, 1]} : vector<2x128xf32> to vector<2x32xf32>
    %180 = math.tanh %179 : vector<2x32xf32>
    %181 = vector.extract_strided_slice %141 {offsets = [0, 96], sizes = [2, 32], strides = [1, 1]} : vector<2x128xf32> to vector<2x32xf32>
    %182 = arith.negf %181 : vector<2x32xf32>
    %183 = math.exp %182 : vector<2x32xf32>
    %cst_43 = arith.constant 1.000000e+00 : f32
    %184 = vector.broadcast %cst_43 : f32 to vector<2x32xf32>
    %185 = arith.addf %184, %183 : vector<2x32xf32>
    %186 = arith.divf %184, %185 : vector<2x32xf32>
    %187 = arith.mulf %178, %131 : vector<2x32xf32>
    %188 = arith.mulf %172, %180 : vector<2x32xf32>
    %189 = arith.addf %187, %188 : vector<2x32xf32>
    %190 = math.tanh %189 : vector<2x32xf32>
    %191 = arith.mulf %186, %190 : vector<2x32xf32>
    %192 = vector.extract_strided_slice %6 {offsets = [6, 0], sizes = [2, 128], strides = [1, 1]} : vector<16x128xf32> to vector<2x128xf32>
    %193 = arith.truncf %166 : vector<2x32xf32> to vector<2x32xbf16>
    %cst_44 = arith.constant dense<0.000000e+00> : vector<2x128xf32>
    %194 = tpu.matmul %193, %8, %cst_44 {dimension_numbers = #tpu.dot_dimension_numbers<[1], [0], [0], [1], [0, 0, 1, 1], [], []>} : vector<2x32xbf16>, vector<32x128xbf16>, vector<2x128xf32> -> vector<2x128xf32>
    %195 = arith.addf %192, %194 : vector<2x128xf32>
    %196 = vector.extract_strided_slice %7 {offsets = [8, 0], sizes = [2, 128], strides = [1, 1]} : vector<16x128xf32> to vector<2x128xf32>
    %197 = arith.truncf %191 : vector<2x32xf32> to vector<2x32xbf16>
    %cst_45 = arith.constant dense<0.000000e+00> : vector<2x128xf32>
    %198 = tpu.matmul %197, %9, %cst_45 {dimension_numbers = #tpu.dot_dimension_numbers<[1], [0], [0], [1], [0, 0, 1, 1], [], []>} : vector<2x32xbf16>, vector<32x128xbf16>, vector<2x128xf32> -> vector<2x128xf32>
    %199 = arith.addf %196, %198 : vector<2x128xf32>
    %200 = vector.extract_strided_slice %195 {offsets = [0, 0], sizes = [2, 32], strides = [1, 1]} : vector<2x128xf32> to vector<2x32xf32>
    %201 = arith.negf %200 : vector<2x32xf32>
    %202 = math.exp %201 : vector<2x32xf32>
    %cst_46 = arith.constant 1.000000e+00 : f32
    %203 = vector.broadcast %cst_46 : f32 to vector<2x32xf32>
    %204 = arith.addf %203, %202 : vector<2x32xf32>
    %205 = arith.divf %203, %204 : vector<2x32xf32>
    %206 = vector.extract_strided_slice %195 {offsets = [0, 32], sizes = [2, 32], strides = [1, 1]} : vector<2x128xf32> to vector<2x32xf32>
    %207 = arith.negf %206 : vector<2x32xf32>
    %208 = math.exp %207 : vector<2x32xf32>
    %cst_47 = arith.constant 1.000000e+00 : f32
    %209 = vector.broadcast %cst_47 : f32 to vector<2x32xf32>
    %210 = arith.addf %209, %208 : vector<2x32xf32>
    %211 = arith.divf %209, %210 : vector<2x32xf32>
    %212 = vector.extract_strided_slice %195 {offsets = [0, 64], sizes = [2, 32], strides = [1, 1]} : vector<2x128xf32> to vector<2x32xf32>
    %213 = math.tanh %212 : vector<2x32xf32>
    %214 = vector.extract_strided_slice %195 {offsets = [0, 96], sizes = [2, 32], strides = [1, 1]} : vector<2x128xf32> to vector<2x32xf32>
    %215 = arith.negf %214 : vector<2x32xf32>
    %216 = math.exp %215 : vector<2x32xf32>
    %cst_48 = arith.constant 1.000000e+00 : f32
    %217 = vector.broadcast %cst_48 : f32 to vector<2x32xf32>
    %218 = arith.addf %217, %216 : vector<2x32xf32>
    %219 = arith.divf %217, %218 : vector<2x32xf32>
    %220 = arith.mulf %211, %164 : vector<2x32xf32>
    %221 = arith.mulf %205, %213 : vector<2x32xf32>
    %222 = arith.addf %220, %221 : vector<2x32xf32>
    %223 = math.tanh %222 : vector<2x32xf32>
    %224 = arith.mulf %219, %223 : vector<2x32xf32>
    %225 = vector.extract_strided_slice %199 {offsets = [0, 0], sizes = [2, 32], strides = [1, 1]} : vector<2x128xf32> to vector<2x32xf32>
    %226 = arith.negf %225 : vector<2x32xf32>
    %227 = math.exp %226 : vector<2x32xf32>
    %cst_49 = arith.constant 1.000000e+00 : f32
    %228 = vector.broadcast %cst_49 : f32 to vector<2x32xf32>
    %229 = arith.addf %228, %227 : vector<2x32xf32>
    %230 = arith.divf %228, %229 : vector<2x32xf32>
    %231 = vector.extract_strided_slice %199 {offsets = [0, 32], sizes = [2, 32], strides = [1, 1]} : vector<2x128xf32> to vector<2x32xf32>
    %232 = arith.negf %231 : vector<2x32xf32>
    %233 = math.exp %232 : vector<2x32xf32>
    %cst_50 = arith.constant 1.000000e+00 : f32
    %234 = vector.broadcast %cst_50 : f32 to vector<2x32xf32>
    %235 = arith.addf %234, %233 : vector<2x32xf32>
    %236 = arith.divf %234, %235 : vector<2x32xf32>
    %237 = vector.extract_strided_slice %199 {offsets = [0, 64], sizes = [2, 32], strides = [1, 1]} : vector<2x128xf32> to vector<2x32xf32>
    %238 = math.tanh %237 : vector<2x32xf32>
    %239 = vector.extract_strided_slice %199 {offsets = [0, 96], sizes = [2, 32], strides = [1, 1]} : vector<2x128xf32> to vector<2x32xf32>
    %240 = arith.negf %239 : vector<2x32xf32>
    %241 = math.exp %240 : vector<2x32xf32>
    %cst_51 = arith.constant 1.000000e+00 : f32
    %242 = vector.broadcast %cst_51 : f32 to vector<2x32xf32>
    %243 = arith.addf %242, %241 : vector<2x32xf32>
    %244 = arith.divf %242, %243 : vector<2x32xf32>
    %245 = arith.mulf %236, %189 : vector<2x32xf32>
    %246 = arith.mulf %230, %238 : vector<2x32xf32>
    %247 = arith.addf %245, %246 : vector<2x32xf32>
    %248 = math.tanh %247 : vector<2x32xf32>
    %249 = arith.mulf %244, %248 : vector<2x32xf32>
    %250 = vector.extract_strided_slice %6 {offsets = [8, 0], sizes = [2, 128], strides = [1, 1]} : vector<16x128xf32> to vector<2x128xf32>
    %251 = arith.truncf %224 : vector<2x32xf32> to vector<2x32xbf16>
    %cst_52 = arith.constant dense<0.000000e+00> : vector<2x128xf32>
    %252 = tpu.matmul %251, %8, %cst_52 {dimension_numbers = #tpu.dot_dimension_numbers<[1], [0], [0], [1], [0, 0, 1, 1], [], []>} : vector<2x32xbf16>, vector<32x128xbf16>, vector<2x128xf32> -> vector<2x128xf32>
    %253 = arith.addf %250, %252 : vector<2x128xf32>
    %254 = vector.extract_strided_slice %7 {offsets = [6, 0], sizes = [2, 128], strides = [1, 1]} : vector<16x128xf32> to vector<2x128xf32>
    %255 = arith.truncf %249 : vector<2x32xf32> to vector<2x32xbf16>
    %cst_53 = arith.constant dense<0.000000e+00> : vector<2x128xf32>
    %256 = tpu.matmul %255, %9, %cst_53 {dimension_numbers = #tpu.dot_dimension_numbers<[1], [0], [0], [1], [0, 0, 1, 1], [], []>} : vector<2x32xbf16>, vector<32x128xbf16>, vector<2x128xf32> -> vector<2x128xf32>
    %257 = arith.addf %254, %256 : vector<2x128xf32>
    %258 = vector.extract_strided_slice %253 {offsets = [0, 0], sizes = [2, 32], strides = [1, 1]} : vector<2x128xf32> to vector<2x32xf32>
    %259 = arith.negf %258 : vector<2x32xf32>
    %260 = math.exp %259 : vector<2x32xf32>
    %cst_54 = arith.constant 1.000000e+00 : f32
    %261 = vector.broadcast %cst_54 : f32 to vector<2x32xf32>
    %262 = arith.addf %261, %260 : vector<2x32xf32>
    %263 = arith.divf %261, %262 : vector<2x32xf32>
    %264 = vector.extract_strided_slice %253 {offsets = [0, 32], sizes = [2, 32], strides = [1, 1]} : vector<2x128xf32> to vector<2x32xf32>
    %265 = arith.negf %264 : vector<2x32xf32>
    %266 = math.exp %265 : vector<2x32xf32>
    %cst_55 = arith.constant 1.000000e+00 : f32
    %267 = vector.broadcast %cst_55 : f32 to vector<2x32xf32>
    %268 = arith.addf %267, %266 : vector<2x32xf32>
    %269 = arith.divf %267, %268 : vector<2x32xf32>
    %270 = vector.extract_strided_slice %253 {offsets = [0, 64], sizes = [2, 32], strides = [1, 1]} : vector<2x128xf32> to vector<2x32xf32>
    %271 = math.tanh %270 : vector<2x32xf32>
    %272 = vector.extract_strided_slice %253 {offsets = [0, 96], sizes = [2, 32], strides = [1, 1]} : vector<2x128xf32> to vector<2x32xf32>
    %273 = arith.negf %272 : vector<2x32xf32>
    %274 = math.exp %273 : vector<2x32xf32>
    %cst_56 = arith.constant 1.000000e+00 : f32
    %275 = vector.broadcast %cst_56 : f32 to vector<2x32xf32>
    %276 = arith.addf %275, %274 : vector<2x32xf32>
    %277 = arith.divf %275, %276 : vector<2x32xf32>
    %278 = arith.mulf %269, %222 : vector<2x32xf32>
    %279 = arith.mulf %263, %271 : vector<2x32xf32>
    %280 = arith.addf %278, %279 : vector<2x32xf32>
    %281 = math.tanh %280 : vector<2x32xf32>
    %282 = arith.mulf %277, %281 : vector<2x32xf32>
    %283 = vector.extract_strided_slice %257 {offsets = [0, 0], sizes = [2, 32], strides = [1, 1]} : vector<2x128xf32> to vector<2x32xf32>
    %284 = arith.negf %283 : vector<2x32xf32>
    %285 = math.exp %284 : vector<2x32xf32>
    %cst_57 = arith.constant 1.000000e+00 : f32
    %286 = vector.broadcast %cst_57 : f32 to vector<2x32xf32>
    %287 = arith.addf %286, %285 : vector<2x32xf32>
    %288 = arith.divf %286, %287 : vector<2x32xf32>
    %289 = vector.extract_strided_slice %257 {offsets = [0, 32], sizes = [2, 32], strides = [1, 1]} : vector<2x128xf32> to vector<2x32xf32>
    %290 = arith.negf %289 : vector<2x32xf32>
    %291 = math.exp %290 : vector<2x32xf32>
    %cst_58 = arith.constant 1.000000e+00 : f32
    %292 = vector.broadcast %cst_58 : f32 to vector<2x32xf32>
    %293 = arith.addf %292, %291 : vector<2x32xf32>
    %294 = arith.divf %292, %293 : vector<2x32xf32>
    %295 = vector.extract_strided_slice %257 {offsets = [0, 64], sizes = [2, 32], strides = [1, 1]} : vector<2x128xf32> to vector<2x32xf32>
    %296 = math.tanh %295 : vector<2x32xf32>
    %297 = vector.extract_strided_slice %257 {offsets = [0, 96], sizes = [2, 32], strides = [1, 1]} : vector<2x128xf32> to vector<2x32xf32>
    %298 = arith.negf %297 : vector<2x32xf32>
    %299 = math.exp %298 : vector<2x32xf32>
    %cst_59 = arith.constant 1.000000e+00 : f32
    %300 = vector.broadcast %cst_59 : f32 to vector<2x32xf32>
    %301 = arith.addf %300, %299 : vector<2x32xf32>
    %302 = arith.divf %300, %301 : vector<2x32xf32>
    %303 = arith.mulf %294, %247 : vector<2x32xf32>
    %304 = arith.mulf %288, %296 : vector<2x32xf32>
    %305 = arith.addf %303, %304 : vector<2x32xf32>
    %306 = math.tanh %305 : vector<2x32xf32>
    %307 = arith.mulf %302, %306 : vector<2x32xf32>
    %308 = vector.extract_strided_slice %6 {offsets = [10, 0], sizes = [2, 128], strides = [1, 1]} : vector<16x128xf32> to vector<2x128xf32>
    %309 = arith.truncf %282 : vector<2x32xf32> to vector<2x32xbf16>
    %cst_60 = arith.constant dense<0.000000e+00> : vector<2x128xf32>
    %310 = tpu.matmul %309, %8, %cst_60 {dimension_numbers = #tpu.dot_dimension_numbers<[1], [0], [0], [1], [0, 0, 1, 1], [], []>} : vector<2x32xbf16>, vector<32x128xbf16>, vector<2x128xf32> -> vector<2x128xf32>
    %311 = arith.addf %308, %310 : vector<2x128xf32>
    %312 = vector.extract_strided_slice %7 {offsets = [4, 0], sizes = [2, 128], strides = [1, 1]} : vector<16x128xf32> to vector<2x128xf32>
    %313 = arith.truncf %307 : vector<2x32xf32> to vector<2x32xbf16>
    %cst_61 = arith.constant dense<0.000000e+00> : vector<2x128xf32>
    %314 = tpu.matmul %313, %9, %cst_61 {dimension_numbers = #tpu.dot_dimension_numbers<[1], [0], [0], [1], [0, 0, 1, 1], [], []>} : vector<2x32xbf16>, vector<32x128xbf16>, vector<2x128xf32> -> vector<2x128xf32>
    %315 = arith.addf %312, %314 : vector<2x128xf32>
    %316 = vector.extract_strided_slice %311 {offsets = [0, 0], sizes = [2, 32], strides = [1, 1]} : vector<2x128xf32> to vector<2x32xf32>
    %317 = arith.negf %316 : vector<2x32xf32>
    %318 = math.exp %317 : vector<2x32xf32>
    %cst_62 = arith.constant 1.000000e+00 : f32
    %319 = vector.broadcast %cst_62 : f32 to vector<2x32xf32>
    %320 = arith.addf %319, %318 : vector<2x32xf32>
    %321 = arith.divf %319, %320 : vector<2x32xf32>
    %322 = vector.extract_strided_slice %311 {offsets = [0, 32], sizes = [2, 32], strides = [1, 1]} : vector<2x128xf32> to vector<2x32xf32>
    %323 = arith.negf %322 : vector<2x32xf32>
    %324 = math.exp %323 : vector<2x32xf32>
    %cst_63 = arith.constant 1.000000e+00 : f32
    %325 = vector.broadcast %cst_63 : f32 to vector<2x32xf32>
    %326 = arith.addf %325, %324 : vector<2x32xf32>
    %327 = arith.divf %325, %326 : vector<2x32xf32>
    %328 = vector.extract_strided_slice %311 {offsets = [0, 64], sizes = [2, 32], strides = [1, 1]} : vector<2x128xf32> to vector<2x32xf32>
    %329 = math.tanh %328 : vector<2x32xf32>
    %330 = vector.extract_strided_slice %311 {offsets = [0, 96], sizes = [2, 32], strides = [1, 1]} : vector<2x128xf32> to vector<2x32xf32>
    %331 = arith.negf %330 : vector<2x32xf32>
    %332 = math.exp %331 : vector<2x32xf32>
    %cst_64 = arith.constant 1.000000e+00 : f32
    %333 = vector.broadcast %cst_64 : f32 to vector<2x32xf32>
    %334 = arith.addf %333, %332 : vector<2x32xf32>
    %335 = arith.divf %333, %334 : vector<2x32xf32>
    %336 = arith.mulf %327, %280 : vector<2x32xf32>
    %337 = arith.mulf %321, %329 : vector<2x32xf32>
    %338 = arith.addf %336, %337 : vector<2x32xf32>
    %339 = math.tanh %338 : vector<2x32xf32>
    %340 = arith.mulf %335, %339 : vector<2x32xf32>
    %341 = vector.extract_strided_slice %315 {offsets = [0, 0], sizes = [2, 32], strides = [1, 1]} : vector<2x128xf32> to vector<2x32xf32>
    %342 = arith.negf %341 : vector<2x32xf32>
    %343 = math.exp %342 : vector<2x32xf32>
    %cst_65 = arith.constant 1.000000e+00 : f32
    %344 = vector.broadcast %cst_65 : f32 to vector<2x32xf32>
    %345 = arith.addf %344, %343 : vector<2x32xf32>
    %346 = arith.divf %344, %345 : vector<2x32xf32>
    %347 = vector.extract_strided_slice %315 {offsets = [0, 32], sizes = [2, 32], strides = [1, 1]} : vector<2x128xf32> to vector<2x32xf32>
    %348 = arith.negf %347 : vector<2x32xf32>
    %349 = math.exp %348 : vector<2x32xf32>
    %cst_66 = arith.constant 1.000000e+00 : f32
    %350 = vector.broadcast %cst_66 : f32 to vector<2x32xf32>
    %351 = arith.addf %350, %349 : vector<2x32xf32>
    %352 = arith.divf %350, %351 : vector<2x32xf32>
    %353 = vector.extract_strided_slice %315 {offsets = [0, 64], sizes = [2, 32], strides = [1, 1]} : vector<2x128xf32> to vector<2x32xf32>
    %354 = math.tanh %353 : vector<2x32xf32>
    %355 = vector.extract_strided_slice %315 {offsets = [0, 96], sizes = [2, 32], strides = [1, 1]} : vector<2x128xf32> to vector<2x32xf32>
    %356 = arith.negf %355 : vector<2x32xf32>
    %357 = math.exp %356 : vector<2x32xf32>
    %cst_67 = arith.constant 1.000000e+00 : f32
    %358 = vector.broadcast %cst_67 : f32 to vector<2x32xf32>
    %359 = arith.addf %358, %357 : vector<2x32xf32>
    %360 = arith.divf %358, %359 : vector<2x32xf32>
    %361 = arith.mulf %352, %305 : vector<2x32xf32>
    %362 = arith.mulf %346, %354 : vector<2x32xf32>
    %363 = arith.addf %361, %362 : vector<2x32xf32>
    %364 = math.tanh %363 : vector<2x32xf32>
    %365 = arith.mulf %360, %364 : vector<2x32xf32>
    %366 = vector.extract_strided_slice %6 {offsets = [12, 0], sizes = [2, 128], strides = [1, 1]} : vector<16x128xf32> to vector<2x128xf32>
    %367 = arith.truncf %340 : vector<2x32xf32> to vector<2x32xbf16>
    %cst_68 = arith.constant dense<0.000000e+00> : vector<2x128xf32>
    %368 = tpu.matmul %367, %8, %cst_68 {dimension_numbers = #tpu.dot_dimension_numbers<[1], [0], [0], [1], [0, 0, 1, 1], [], []>} : vector<2x32xbf16>, vector<32x128xbf16>, vector<2x128xf32> -> vector<2x128xf32>
    %369 = arith.addf %366, %368 : vector<2x128xf32>
    %370 = vector.extract_strided_slice %7 {offsets = [2, 0], sizes = [2, 128], strides = [1, 1]} : vector<16x128xf32> to vector<2x128xf32>
    %371 = arith.truncf %365 : vector<2x32xf32> to vector<2x32xbf16>
    %cst_69 = arith.constant dense<0.000000e+00> : vector<2x128xf32>
    %372 = tpu.matmul %371, %9, %cst_69 {dimension_numbers = #tpu.dot_dimension_numbers<[1], [0], [0], [1], [0, 0, 1, 1], [], []>} : vector<2x32xbf16>, vector<32x128xbf16>, vector<2x128xf32> -> vector<2x128xf32>
    %373 = arith.addf %370, %372 : vector<2x128xf32>
    %374 = vector.extract_strided_slice %369 {offsets = [0, 0], sizes = [2, 32], strides = [1, 1]} : vector<2x128xf32> to vector<2x32xf32>
    %375 = arith.negf %374 : vector<2x32xf32>
    %376 = math.exp %375 : vector<2x32xf32>
    %cst_70 = arith.constant 1.000000e+00 : f32
    %377 = vector.broadcast %cst_70 : f32 to vector<2x32xf32>
    %378 = arith.addf %377, %376 : vector<2x32xf32>
    %379 = arith.divf %377, %378 : vector<2x32xf32>
    %380 = vector.extract_strided_slice %369 {offsets = [0, 32], sizes = [2, 32], strides = [1, 1]} : vector<2x128xf32> to vector<2x32xf32>
    %381 = arith.negf %380 : vector<2x32xf32>
    %382 = math.exp %381 : vector<2x32xf32>
    %cst_71 = arith.constant 1.000000e+00 : f32
    %383 = vector.broadcast %cst_71 : f32 to vector<2x32xf32>
    %384 = arith.addf %383, %382 : vector<2x32xf32>
    %385 = arith.divf %383, %384 : vector<2x32xf32>
    %386 = vector.extract_strided_slice %369 {offsets = [0, 64], sizes = [2, 32], strides = [1, 1]} : vector<2x128xf32> to vector<2x32xf32>
    %387 = math.tanh %386 : vector<2x32xf32>
    %388 = vector.extract_strided_slice %369 {offsets = [0, 96], sizes = [2, 32], strides = [1, 1]} : vector<2x128xf32> to vector<2x32xf32>
    %389 = arith.negf %388 : vector<2x32xf32>
    %390 = math.exp %389 : vector<2x32xf32>
    %cst_72 = arith.constant 1.000000e+00 : f32
    %391 = vector.broadcast %cst_72 : f32 to vector<2x32xf32>
    %392 = arith.addf %391, %390 : vector<2x32xf32>
    %393 = arith.divf %391, %392 : vector<2x32xf32>
    %394 = arith.mulf %385, %338 : vector<2x32xf32>
    %395 = arith.mulf %379, %387 : vector<2x32xf32>
    %396 = arith.addf %394, %395 : vector<2x32xf32>
    %397 = math.tanh %396 : vector<2x32xf32>
    %398 = arith.mulf %393, %397 : vector<2x32xf32>
    %399 = vector.extract_strided_slice %373 {offsets = [0, 0], sizes = [2, 32], strides = [1, 1]} : vector<2x128xf32> to vector<2x32xf32>
    %400 = arith.negf %399 : vector<2x32xf32>
    %401 = math.exp %400 : vector<2x32xf32>
    %cst_73 = arith.constant 1.000000e+00 : f32
    %402 = vector.broadcast %cst_73 : f32 to vector<2x32xf32>
    %403 = arith.addf %402, %401 : vector<2x32xf32>
    %404 = arith.divf %402, %403 : vector<2x32xf32>
    %405 = vector.extract_strided_slice %373 {offsets = [0, 32], sizes = [2, 32], strides = [1, 1]} : vector<2x128xf32> to vector<2x32xf32>
    %406 = arith.negf %405 : vector<2x32xf32>
    %407 = math.exp %406 : vector<2x32xf32>
    %cst_74 = arith.constant 1.000000e+00 : f32
    %408 = vector.broadcast %cst_74 : f32 to vector<2x32xf32>
    %409 = arith.addf %408, %407 : vector<2x32xf32>
    %410 = arith.divf %408, %409 : vector<2x32xf32>
    %411 = vector.extract_strided_slice %373 {offsets = [0, 64], sizes = [2, 32], strides = [1, 1]} : vector<2x128xf32> to vector<2x32xf32>
    %412 = math.tanh %411 : vector<2x32xf32>
    %413 = vector.extract_strided_slice %373 {offsets = [0, 96], sizes = [2, 32], strides = [1, 1]} : vector<2x128xf32> to vector<2x32xf32>
    %414 = arith.negf %413 : vector<2x32xf32>
    %415 = math.exp %414 : vector<2x32xf32>
    %cst_75 = arith.constant 1.000000e+00 : f32
    %416 = vector.broadcast %cst_75 : f32 to vector<2x32xf32>
    %417 = arith.addf %416, %415 : vector<2x32xf32>
    %418 = arith.divf %416, %417 : vector<2x32xf32>
    %419 = arith.mulf %410, %363 : vector<2x32xf32>
    %420 = arith.mulf %404, %412 : vector<2x32xf32>
    %421 = arith.addf %419, %420 : vector<2x32xf32>
    %422 = math.tanh %421 : vector<2x32xf32>
    %423 = arith.mulf %418, %422 : vector<2x32xf32>
    %424 = vector.extract_strided_slice %6 {offsets = [14, 0], sizes = [2, 128], strides = [1, 1]} : vector<16x128xf32> to vector<2x128xf32>
    %425 = arith.truncf %398 : vector<2x32xf32> to vector<2x32xbf16>
    %cst_76 = arith.constant dense<0.000000e+00> : vector<2x128xf32>
    %426 = tpu.matmul %425, %8, %cst_76 {dimension_numbers = #tpu.dot_dimension_numbers<[1], [0], [0], [1], [0, 0, 1, 1], [], []>} : vector<2x32xbf16>, vector<32x128xbf16>, vector<2x128xf32> -> vector<2x128xf32>
    %427 = arith.addf %424, %426 : vector<2x128xf32>
    %428 = vector.extract_strided_slice %7 {offsets = [0, 0], sizes = [2, 128], strides = [1, 1]} : vector<16x128xf32> to vector<2x128xf32>
    %429 = arith.truncf %423 : vector<2x32xf32> to vector<2x32xbf16>
    %cst_77 = arith.constant dense<0.000000e+00> : vector<2x128xf32>
    %430 = tpu.matmul %429, %9, %cst_77 {dimension_numbers = #tpu.dot_dimension_numbers<[1], [0], [0], [1], [0, 0, 1, 1], [], []>} : vector<2x32xbf16>, vector<32x128xbf16>, vector<2x128xf32> -> vector<2x128xf32>
    %431 = arith.addf %428, %430 : vector<2x128xf32>
    %432 = vector.extract_strided_slice %427 {offsets = [0, 0], sizes = [2, 32], strides = [1, 1]} : vector<2x128xf32> to vector<2x32xf32>
    %433 = arith.negf %432 : vector<2x32xf32>
    %434 = math.exp %433 : vector<2x32xf32>
    %cst_78 = arith.constant 1.000000e+00 : f32
    %435 = vector.broadcast %cst_78 : f32 to vector<2x32xf32>
    %436 = arith.addf %435, %434 : vector<2x32xf32>
    %437 = arith.divf %435, %436 : vector<2x32xf32>
    %438 = vector.extract_strided_slice %427 {offsets = [0, 32], sizes = [2, 32], strides = [1, 1]} : vector<2x128xf32> to vector<2x32xf32>
    %439 = arith.negf %438 : vector<2x32xf32>
    %440 = math.exp %439 : vector<2x32xf32>
    %cst_79 = arith.constant 1.000000e+00 : f32
    %441 = vector.broadcast %cst_79 : f32 to vector<2x32xf32>
    %442 = arith.addf %441, %440 : vector<2x32xf32>
    %443 = arith.divf %441, %442 : vector<2x32xf32>
    %444 = vector.extract_strided_slice %427 {offsets = [0, 64], sizes = [2, 32], strides = [1, 1]} : vector<2x128xf32> to vector<2x32xf32>
    %445 = math.tanh %444 : vector<2x32xf32>
    %446 = vector.extract_strided_slice %427 {offsets = [0, 96], sizes = [2, 32], strides = [1, 1]} : vector<2x128xf32> to vector<2x32xf32>
    %447 = arith.negf %446 : vector<2x32xf32>
    %448 = math.exp %447 : vector<2x32xf32>
    %cst_80 = arith.constant 1.000000e+00 : f32
    %449 = vector.broadcast %cst_80 : f32 to vector<2x32xf32>
    %450 = arith.addf %449, %448 : vector<2x32xf32>
    %451 = arith.divf %449, %450 : vector<2x32xf32>
    %452 = arith.mulf %443, %396 : vector<2x32xf32>
    %453 = arith.mulf %437, %445 : vector<2x32xf32>
    %454 = arith.addf %452, %453 : vector<2x32xf32>
    %455 = math.tanh %454 : vector<2x32xf32>
    %456 = arith.mulf %451, %455 : vector<2x32xf32>
    %457 = vector.extract_strided_slice %431 {offsets = [0, 0], sizes = [2, 32], strides = [1, 1]} : vector<2x128xf32> to vector<2x32xf32>
    %458 = arith.negf %457 : vector<2x32xf32>
    %459 = math.exp %458 : vector<2x32xf32>
    %cst_81 = arith.constant 1.000000e+00 : f32
    %460 = vector.broadcast %cst_81 : f32 to vector<2x32xf32>
    %461 = arith.addf %460, %459 : vector<2x32xf32>
    %462 = arith.divf %460, %461 : vector<2x32xf32>
    %463 = vector.extract_strided_slice %431 {offsets = [0, 32], sizes = [2, 32], strides = [1, 1]} : vector<2x128xf32> to vector<2x32xf32>
    %464 = arith.negf %463 : vector<2x32xf32>
    %465 = math.exp %464 : vector<2x32xf32>
    %cst_82 = arith.constant 1.000000e+00 : f32
    %466 = vector.broadcast %cst_82 : f32 to vector<2x32xf32>
    %467 = arith.addf %466, %465 : vector<2x32xf32>
    %468 = arith.divf %466, %467 : vector<2x32xf32>
    %469 = vector.extract_strided_slice %431 {offsets = [0, 64], sizes = [2, 32], strides = [1, 1]} : vector<2x128xf32> to vector<2x32xf32>
    %470 = math.tanh %469 : vector<2x32xf32>
    %471 = vector.extract_strided_slice %431 {offsets = [0, 96], sizes = [2, 32], strides = [1, 1]} : vector<2x128xf32> to vector<2x32xf32>
    %472 = arith.negf %471 : vector<2x32xf32>
    %473 = math.exp %472 : vector<2x32xf32>
    %cst_83 = arith.constant 1.000000e+00 : f32
    %474 = vector.broadcast %cst_83 : f32 to vector<2x32xf32>
    %475 = arith.addf %474, %473 : vector<2x32xf32>
    %476 = arith.divf %474, %475 : vector<2x32xf32>
    %477 = arith.mulf %468, %421 : vector<2x32xf32>
    %478 = arith.mulf %462, %470 : vector<2x32xf32>
    %479 = arith.addf %477, %478 : vector<2x32xf32>
    %480 = math.tanh %479 : vector<2x32xf32>
    %481 = arith.mulf %476, %480 : vector<2x32xf32>
    %c0_84 = arith.constant 0 : index
    %c0_85 = arith.constant 0 : index
    %c0_86 = arith.constant 0 : index
    %482 = vector.load %arg7[%c0_84, %c0_85, %c0_86] : memref<2x2x32xf32, #tpu.memory_space<vmem>>, vector<1x2x32xf32>
    %483 = vector.shape_cast %482 : vector<1x2x32xf32> to vector<2x32xf32>
    %484 = vector.shape_cast %456 : vector<2x32xf32> to vector<1x2x32xf32>
    tpu.vector_store %arg7[%c0_84, %c0_85, %c0_86], %484 {strides = array<i32>} : memref<2x2x32xf32, #tpu.memory_space<vmem>>, vector<1x2x32xf32>,
    %c1_87 = arith.constant 1 : index
    %c0_88 = arith.constant 0 : index
    %c0_89 = arith.constant 0 : index
    %485 = vector.load %arg7[%c1_87, %c0_88, %c0_89] : memref<2x2x32xf32, #tpu.memory_space<vmem>>, vector<1x2x32xf32>
    %486 = vector.shape_cast %485 : vector<1x2x32xf32> to vector<2x32xf32>
    %487 = vector.shape_cast %481 : vector<2x32xf32> to vector<1x2x32xf32>
    tpu.vector_store %arg7[%c1_87, %c0_88, %c0_89], %487 {strides = array<i32>} : memref<2x2x32xf32, #tpu.memory_space<vmem>>, vector<1x2x32xf32>,
    %c0_90 = arith.constant 0 : index
    %c0_91 = arith.constant 0 : index
    %c0_92 = arith.constant 0 : index
    %488 = vector.load %arg8[%c0_90, %c0_91, %c0_92] : memref<2x2x32xf32, #tpu.memory_space<vmem>>, vector<1x2x32xf32>
    %489 = vector.shape_cast %488 : vector<1x2x32xf32> to vector<2x32xf32>
    %490 = vector.shape_cast %454 : vector<2x32xf32> to vector<1x2x32xf32>
    tpu.vector_store %arg8[%c0_90, %c0_91, %c0_92], %490 {strides = array<i32>} : memref<2x2x32xf32, #tpu.memory_space<vmem>>, vector<1x2x32xf32>,
    %c1_93 = arith.constant 1 : index
    %c0_94 = arith.constant 0 : index
    %c0_95 = arith.constant 0 : index
    %491 = vector.load %arg8[%c1_93, %c0_94, %c0_95] : memref<2x2x32xf32, #tpu.memory_space<vmem>>, vector<1x2x32xf32>
    %492 = vector.shape_cast %491 : vector<1x2x32xf32> to vector<2x32xf32>
    %493 = vector.shape_cast %479 : vector<2x32xf32> to vector<1x2x32xf32>
    tpu.vector_store %arg8[%c1_93, %c0_94, %c0_95], %493 {strides = array<i32>} : memref<2x2x32xf32, #tpu.memory_space<vmem>>, vector<1x2x32xf32>,
    return
  }
}

module attributes {stable_mosaic.version = 11 : i64} {
  func.func @kernel(%arg0: memref<16x16xbf16, #tpu.memory_space<vmem>>, %arg1: memref<2x2x32xf32, #tpu.memory_space<vmem>>, %arg2: memref<2x2x32xf32, #tpu.memory_space<vmem>>, %arg3: memref<2x2x32xf32, #tpu.memory_space<vmem>>, %arg4: memref<64x32xbf16, #tpu.memory_space<vmem>>, %arg5: memref<1x32xf32, #tpu.memory_space<vmem>>, %arg6: memref<2x16xf32, #tpu.memory_space<vmem>>, %arg7: memref<16x128xbf16, #tpu.memory_space<vmem>>, %arg8: memref<16x128xbf16, #tpu.memory_space<vmem>>, %arg9: memref<1x128xf32, #tpu.memory_space<vmem>>, %arg10: memref<32x128xbf16, #tpu.memory_space<vmem>>, %arg11: memref<32x128xbf16, #tpu.memory_space<vmem>>, %arg12: memref<1x128xf32, #tpu.memory_space<vmem>>, %arg13: memref<32x128xbf16, #tpu.memory_space<vmem>>, %arg14: memref<2x256xbf16, #tpu.memory_space<vmem>>, %arg15: memref<2x2x32xf32, #tpu.memory_space<vmem>>, %arg16: memref<2x2x32xf32, #tpu.memory_space<vmem>>, %arg17: memref<2x16xf32, #tpu.memory_space<vmem>>, %arg18: memref<2x16xf32, #tpu.memory_space<vmem>>, %arg19: memref<1x1xf32, #tpu.memory_space<vmem>>) attributes {dimension_semantics = [], scalar_prefetch = 0 : i64, scratch_operands = 0 : i64, tpu.core_type = #tpu.core_type<tc>} {
    %c0 = arith.constant 0 : index
    %c0_0 = arith.constant 0 : index
    %c0_1 = arith.constant 0 : index
    %0 = vector.load %arg1[%c0, %c0_0, %c0_1] : memref<2x2x32xf32, #tpu.memory_space<vmem>>, vector<1x2x32xf32>
    %1 = vector.shape_cast %0 : vector<1x2x32xf32> to vector<2x32xf32>
    %c1 = arith.constant 1 : index
    %c0_2 = arith.constant 0 : index
    %c0_3 = arith.constant 0 : index
    %2 = vector.load %arg1[%c1, %c0_2, %c0_3] : memref<2x2x32xf32, #tpu.memory_space<vmem>>, vector<1x2x32xf32>
    %3 = vector.shape_cast %2 : vector<1x2x32xf32> to vector<2x32xf32>
    %4 = tpu.concatenate %1, %3 in 1 : vector<2x32xf32>, vector<2x32xf32> -> vector<2x64xf32>
    %5 = arith.truncf %4 : vector<2x64xf32> to vector<2x64xbf16>
    %c0_4 = arith.constant 0 : index
    %c0_5 = arith.constant 0 : index
    %6 = vector.load %arg4[%c0_4, %c0_5] : memref<64x32xbf16, #tpu.memory_space<vmem>>, vector<64x32xbf16>
    %cst = arith.constant dense<0.000000e+00> : vector<2x32xf32>
    %7 = tpu.matmul %5, %6, %cst {dimension_numbers = #tpu.dot_dimension_numbers<[1], [0], [0], [1], [0, 0, 1, 1], [], []>} : vector<2x64xbf16>, vector<64x32xbf16>, vector<2x32xf32> -> vector<2x32xf32>
    %c0_6 = arith.constant 0 : index
    %c0_7 = arith.constant 0 : index
    %8 = vector.load %arg5[%c0_6, %c0_7] : memref<1x32xf32, #tpu.memory_space<vmem>>, vector<1x32xf32>
    %9 = vector.broadcast %8 : vector<1x32xf32> to vector<2x32xf32>
    %10 = arith.addf %7, %9 : vector<2x32xf32>
    %11 = vector.extract_strided_slice %10 {offsets = [0, 0], sizes = [2, 16], strides = [1, 1]} : vector<2x32xf32> to vector<2x16xf32>
    %12 = vector.extract_strided_slice %10 {offsets = [0, 16], sizes = [2, 16], strides = [1, 1]} : vector<2x32xf32> to vector<2x16xf32>
    %cst_8 = arith.constant 5.000000e-01 : f32
    %13 = vector.broadcast %cst_8 : f32 to vector<2x16xf32>
    %14 = arith.mulf %13, %12 : vector<2x16xf32>
    %15 = math.exp %14 : vector<2x16xf32>
    %c0_9 = arith.constant 0 : index
    %c0_10 = arith.constant 0 : index
    %16 = vector.load %arg6[%c0_9, %c0_10] : memref<2x16xf32, #tpu.memory_space<vmem>>, vector<2x16xf32>
    %17 = arith.mulf %16, %15 : vector<2x16xf32>
    %18 = arith.addf %17, %11 : vector<2x16xf32>
    %c0_11 = arith.constant 0 : index
    %c0_12 = arith.constant 0 : index
    %19 = vector.load %arg17[%c0_11, %c0_12] : memref<2x16xf32, #tpu.memory_space<vmem>>, vector<2x16xf32>
    tpu.vector_store %arg17[%c0_11, %c0_12], %11 {strides = array<i32>} : memref<2x16xf32, #tpu.memory_space<vmem>>, vector<2x16xf32>,
    %c0_13 = arith.constant 0 : index
    %c0_14 = arith.constant 0 : index
    %20 = vector.load %arg18[%c0_13, %c0_14] : memref<2x16xf32, #tpu.memory_space<vmem>>, vector<2x16xf32>
    tpu.vector_store %arg18[%c0_13, %c0_14], %15 {strides = array<i32>} : memref<2x16xf32, #tpu.memory_space<vmem>>, vector<2x16xf32>,
    %21 = arith.mulf %11, %11 : vector<2x16xf32>
    %22 = arith.subf %12, %21 : vector<2x16xf32>
    %23 = math.exp %12 : vector<2x16xf32>
    %24 = arith.subf %22, %23 : vector<2x16xf32>
    %cst_15 = arith.constant 1.000000e+00 : f32
    %25 = vector.broadcast %cst_15 : f32 to vector<2x16xf32>
    %26 = arith.addf %24, %25 : vector<2x16xf32>
    %cst_16 = arith.constant dense<0.000000e+00> : vector<2xf32>
    %27 = vector.multi_reduction <add>, %26, %cst_16 [1] : vector<2x16xf32> to vector<2xf32>
    %28 = vector.shape_cast %27 : vector<2xf32> to vector<2x1xf32>
    %cst_17 = arith.constant dense<0.000000e+00> : vector<1xf32>
    %29 = vector.multi_reduction <add>, %28, %cst_17 [0] : vector<2x1xf32> to vector<1xf32>
    %30 = vector.shape_cast %29 : vector<1xf32> to vector<1x1xf32>
    %cst_18 = arith.constant 2.000000e+00 : f32
    %31 = vector.broadcast %cst_18 : f32 to vector<1x1xf32>
    %32 = arith.divf %30, %31 : vector<1x1xf32>
    %cst_19 = arith.constant -5.000000e-01 : f32
    %33 = vector.broadcast %cst_19 : f32 to vector<1x1xf32>
    %34 = arith.mulf %33, %32 : vector<1x1xf32>
    %c0_20 = arith.constant 0 : index
    %c0_21 = arith.constant 0 : index
    %35 = vector.load %arg19[%c0_20, %c0_21] : memref<1x1xf32, #tpu.memory_space<vmem>>, vector<1x1xf32>
    tpu.vector_store %arg19[%c0_20, %c0_21], %34 {strides = array<i32>} : memref<1x1xf32, #tpu.memory_space<vmem>>, vector<1x1xf32>,
    %c0_22 = arith.constant 0 : index
    %c0_23 = arith.constant 0 : index
    %36 = vector.load %arg0[%c0_22, %c0_23] : memref<16x16xbf16, #tpu.memory_space<vmem>>, vector<16x16xbf16>
    %c0_24 = arith.constant 0 : index
    %c0_25 = arith.constant 0 : index
    %37 = vector.load %arg7[%c0_24, %c0_25] : memref<16x128xbf16, #tpu.memory_space<vmem>>, vector<16x128xbf16>
    %cst_26 = arith.constant dense<0.000000e+00> : vector<16x128xf32>
    %38 = tpu.matmul %36, %37, %cst_26 {dimension_numbers = #tpu.dot_dimension_numbers<[1], [0], [0], [1], [0, 0, 1, 1], [], []>} : vector<16x16xbf16>, vector<16x128xbf16>, vector<16x128xf32> -> vector<16x128xf32>
    %39 = arith.truncf %18 : vector<2x16xf32> to vector<2x16xbf16>
    %c0_27 = arith.constant 0 : index
    %c0_28 = arith.constant 0 : index
    %40 = vector.load %arg8[%c0_27, %c0_28] : memref<16x128xbf16, #tpu.memory_space<vmem>>, vector<16x128xbf16>
    %cst_29 = arith.constant dense<0.000000e+00> : vector<2x128xf32>
    %41 = tpu.matmul %39, %40, %cst_29 {dimension_numbers = #tpu.dot_dimension_numbers<[1], [0], [0], [1], [0, 0, 1, 1], [], []>} : vector<2x16xbf16>, vector<16x128xbf16>, vector<2x128xf32> -> vector<2x128xf32>
    %c0_30 = arith.constant 0 : index
    %c0_31 = arith.constant 0 : index
    %42 = vector.load %arg9[%c0_30, %c0_31] : memref<1x128xf32, #tpu.memory_space<vmem>>, vector<1x128xf32>
    %43 = vector.broadcast %42 : vector<1x128xf32> to vector<2x128xf32>
    %44 = arith.addf %41, %43 : vector<2x128xf32>
    %c0_32 = arith.constant 0 : index
    %c0_33 = arith.constant 0 : index
    %45 = vector.load %arg10[%c0_32, %c0_33] : memref<32x128xbf16, #tpu.memory_space<vmem>>, vector<32x128xbf16>
    %c0_34 = arith.constant 0 : index
    %c0_35 = arith.constant 0 : index
    %46 = vector.load %arg11[%c0_34, %c0_35] : memref<32x128xbf16, #tpu.memory_space<vmem>>, vector<32x128xbf16>
    %c0_36 = arith.constant 0 : index
    %c0_37 = arith.constant 0 : index
    %47 = vector.load %arg13[%c0_36, %c0_37] : memref<32x128xbf16, #tpu.memory_space<vmem>>, vector<32x128xbf16>
    %c0_38 = arith.constant 0 : index
    %c0_39 = arith.constant 0 : index
    %48 = vector.load %arg12[%c0_38, %c0_39] : memref<1x128xf32, #tpu.memory_space<vmem>>, vector<1x128xf32>
    %c0_40 = arith.constant 0 : index
    %c0_41 = arith.constant 0 : index
    %c0_42 = arith.constant 0 : index
    %49 = vector.load %arg2[%c0_40, %c0_41, %c0_42] : memref<2x2x32xf32, #tpu.memory_space<vmem>>, vector<1x2x32xf32>
    %50 = vector.shape_cast %49 : vector<1x2x32xf32> to vector<2x32xf32>
    %c0_43 = arith.constant 0 : index
    %c0_44 = arith.constant 0 : index
    %c0_45 = arith.constant 0 : index
    %51 = vector.load %arg3[%c0_43, %c0_44, %c0_45] : memref<2x2x32xf32, #tpu.memory_space<vmem>>, vector<1x2x32xf32>
    %52 = vector.shape_cast %51 : vector<1x2x32xf32> to vector<2x32xf32>
    %c1_46 = arith.constant 1 : index
    %c0_47 = arith.constant 0 : index
    %c0_48 = arith.constant 0 : index
    %53 = vector.load %arg2[%c1_46, %c0_47, %c0_48] : memref<2x2x32xf32, #tpu.memory_space<vmem>>, vector<1x2x32xf32>
    %54 = vector.shape_cast %53 : vector<1x2x32xf32> to vector<2x32xf32>
    %c1_49 = arith.constant 1 : index
    %c0_50 = arith.constant 0 : index
    %c0_51 = arith.constant 0 : index
    %55 = vector.load %arg3[%c1_49, %c0_50, %c0_51] : memref<2x2x32xf32, #tpu.memory_space<vmem>>, vector<1x2x32xf32>
    %56 = vector.shape_cast %55 : vector<1x2x32xf32> to vector<2x32xf32>
    %57 = vector.extract_strided_slice %38 {offsets = [0, 0], sizes = [2, 128], strides = [1, 1]} : vector<16x128xf32> to vector<2x128xf32>
    %58 = arith.addf %57, %44 : vector<2x128xf32>
    %59 = arith.truncf %50 : vector<2x32xf32> to vector<2x32xbf16>
    %cst_52 = arith.constant dense<0.000000e+00> : vector<2x128xf32>
    %60 = tpu.matmul %59, %45, %cst_52 {dimension_numbers = #tpu.dot_dimension_numbers<[1], [0], [0], [1], [0, 0, 1, 1], [], []>} : vector<2x32xbf16>, vector<32x128xbf16>, vector<2x128xf32> -> vector<2x128xf32>
    %61 = arith.addf %58, %60 : vector<2x128xf32>
    %62 = vector.extract_strided_slice %61 {offsets = [0, 0], sizes = [2, 32], strides = [1, 1]} : vector<2x128xf32> to vector<2x32xf32>
    %63 = arith.negf %62 : vector<2x32xf32>
    %64 = math.exp %63 : vector<2x32xf32>
    %cst_53 = arith.constant 1.000000e+00 : f32
    %65 = vector.broadcast %cst_53 : f32 to vector<2x32xf32>
    %66 = arith.addf %65, %64 : vector<2x32xf32>
    %67 = arith.divf %65, %66 : vector<2x32xf32>
    %68 = vector.extract_strided_slice %61 {offsets = [0, 32], sizes = [2, 32], strides = [1, 1]} : vector<2x128xf32> to vector<2x32xf32>
    %69 = arith.negf %68 : vector<2x32xf32>
    %70 = math.exp %69 : vector<2x32xf32>
    %cst_54 = arith.constant 1.000000e+00 : f32
    %71 = vector.broadcast %cst_54 : f32 to vector<2x32xf32>
    %72 = arith.addf %71, %70 : vector<2x32xf32>
    %73 = arith.divf %71, %72 : vector<2x32xf32>
    %74 = vector.extract_strided_slice %61 {offsets = [0, 64], sizes = [2, 32], strides = [1, 1]} : vector<2x128xf32> to vector<2x32xf32>
    %75 = math.tanh %74 : vector<2x32xf32>
    %76 = vector.extract_strided_slice %61 {offsets = [0, 96], sizes = [2, 32], strides = [1, 1]} : vector<2x128xf32> to vector<2x32xf32>
    %77 = arith.negf %76 : vector<2x32xf32>
    %78 = math.exp %77 : vector<2x32xf32>
    %cst_55 = arith.constant 1.000000e+00 : f32
    %79 = vector.broadcast %cst_55 : f32 to vector<2x32xf32>
    %80 = arith.addf %79, %78 : vector<2x32xf32>
    %81 = arith.divf %79, %80 : vector<2x32xf32>
    %82 = arith.mulf %73, %52 : vector<2x32xf32>
    %83 = arith.mulf %67, %75 : vector<2x32xf32>
    %84 = arith.addf %82, %83 : vector<2x32xf32>
    %85 = math.tanh %84 : vector<2x32xf32>
    %86 = arith.mulf %81, %85 : vector<2x32xf32>
    %87 = arith.truncf %86 : vector<2x32xf32> to vector<2x32xbf16>
    %cst_56 = arith.constant dense<0.000000e+00> : vector<2x128xf32>
    %88 = tpu.matmul %87, %46, %cst_56 {dimension_numbers = #tpu.dot_dimension_numbers<[1], [0], [0], [1], [0, 0, 1, 1], [], []>} : vector<2x32xbf16>, vector<32x128xbf16>, vector<2x128xf32> -> vector<2x128xf32>
    %89 = vector.broadcast %48 : vector<1x128xf32> to vector<2x128xf32>
    %90 = arith.addf %89, %88 : vector<2x128xf32>
    %91 = arith.truncf %54 : vector<2x32xf32> to vector<2x32xbf16>
    %cst_57 = arith.constant dense<0.000000e+00> : vector<2x128xf32>
    %92 = tpu.matmul %91, %47, %cst_57 {dimension_numbers = #tpu.dot_dimension_numbers<[1], [0], [0], [1], [0, 0, 1, 1], [], []>} : vector<2x32xbf16>, vector<32x128xbf16>, vector<2x128xf32> -> vector<2x128xf32>
    %93 = arith.addf %90, %92 : vector<2x128xf32>
    %94 = vector.extract_strided_slice %93 {offsets = [0, 0], sizes = [2, 32], strides = [1, 1]} : vector<2x128xf32> to vector<2x32xf32>
    %95 = arith.negf %94 : vector<2x32xf32>
    %96 = math.exp %95 : vector<2x32xf32>
    %cst_58 = arith.constant 1.000000e+00 : f32
    %97 = vector.broadcast %cst_58 : f32 to vector<2x32xf32>
    %98 = arith.addf %97, %96 : vector<2x32xf32>
    %99 = arith.divf %97, %98 : vector<2x32xf32>
    %100 = vector.extract_strided_slice %93 {offsets = [0, 32], sizes = [2, 32], strides = [1, 1]} : vector<2x128xf32> to vector<2x32xf32>
    %101 = arith.negf %100 : vector<2x32xf32>
    %102 = math.exp %101 : vector<2x32xf32>
    %cst_59 = arith.constant 1.000000e+00 : f32
    %103 = vector.broadcast %cst_59 : f32 to vector<2x32xf32>
    %104 = arith.addf %103, %102 : vector<2x32xf32>
    %105 = arith.divf %103, %104 : vector<2x32xf32>
    %106 = vector.extract_strided_slice %93 {offsets = [0, 64], sizes = [2, 32], strides = [1, 1]} : vector<2x128xf32> to vector<2x32xf32>
    %107 = math.tanh %106 : vector<2x32xf32>
    %108 = vector.extract_strided_slice %93 {offsets = [0, 96], sizes = [2, 32], strides = [1, 1]} : vector<2x128xf32> to vector<2x32xf32>
    %109 = arith.negf %108 : vector<2x32xf32>
    %110 = math.exp %109 : vector<2x32xf32>
    %cst_60 = arith.constant 1.000000e+00 : f32
    %111 = vector.broadcast %cst_60 : f32 to vector<2x32xf32>
    %112 = arith.addf %111, %110 : vector<2x32xf32>
    %113 = arith.divf %111, %112 : vector<2x32xf32>
    %114 = arith.mulf %105, %56 : vector<2x32xf32>
    %115 = arith.mulf %99, %107 : vector<2x32xf32>
    %116 = arith.addf %114, %115 : vector<2x32xf32>
    %117 = math.tanh %116 : vector<2x32xf32>
    %118 = arith.mulf %113, %117 : vector<2x32xf32>
    %119 = vector.extract_strided_slice %38 {offsets = [2, 0], sizes = [2, 128], strides = [1, 1]} : vector<16x128xf32> to vector<2x128xf32>
    %120 = arith.addf %119, %44 : vector<2x128xf32>
    %121 = arith.truncf %86 : vector<2x32xf32> to vector<2x32xbf16>
    %cst_61 = arith.constant dense<0.000000e+00> : vector<2x128xf32>
    %122 = tpu.matmul %121, %45, %cst_61 {dimension_numbers = #tpu.dot_dimension_numbers<[1], [0], [0], [1], [0, 0, 1, 1], [], []>} : vector<2x32xbf16>, vector<32x128xbf16>, vector<2x128xf32> -> vector<2x128xf32>
    %123 = arith.addf %120, %122 : vector<2x128xf32>
    %124 = vector.extract_strided_slice %123 {offsets = [0, 0], sizes = [2, 32], strides = [1, 1]} : vector<2x128xf32> to vector<2x32xf32>
    %125 = arith.negf %124 : vector<2x32xf32>
    %126 = math.exp %125 : vector<2x32xf32>
    %cst_62 = arith.constant 1.000000e+00 : f32
    %127 = vector.broadcast %cst_62 : f32 to vector<2x32xf32>
    %128 = arith.addf %127, %126 : vector<2x32xf32>
    %129 = arith.divf %127, %128 : vector<2x32xf32>
    %130 = vector.extract_strided_slice %123 {offsets = [0, 32], sizes = [2, 32], strides = [1, 1]} : vector<2x128xf32> to vector<2x32xf32>
    %131 = arith.negf %130 : vector<2x32xf32>
    %132 = math.exp %131 : vector<2x32xf32>
    %cst_63 = arith.constant 1.000000e+00 : f32
    %133 = vector.broadcast %cst_63 : f32 to vector<2x32xf32>
    %134 = arith.addf %133, %132 : vector<2x32xf32>
    %135 = arith.divf %133, %134 : vector<2x32xf32>
    %136 = vector.extract_strided_slice %123 {offsets = [0, 64], sizes = [2, 32], strides = [1, 1]} : vector<2x128xf32> to vector<2x32xf32>
    %137 = math.tanh %136 : vector<2x32xf32>
    %138 = vector.extract_strided_slice %123 {offsets = [0, 96], sizes = [2, 32], strides = [1, 1]} : vector<2x128xf32> to vector<2x32xf32>
    %139 = arith.negf %138 : vector<2x32xf32>
    %140 = math.exp %139 : vector<2x32xf32>
    %cst_64 = arith.constant 1.000000e+00 : f32
    %141 = vector.broadcast %cst_64 : f32 to vector<2x32xf32>
    %142 = arith.addf %141, %140 : vector<2x32xf32>
    %143 = arith.divf %141, %142 : vector<2x32xf32>
    %144 = arith.mulf %135, %84 : vector<2x32xf32>
    %145 = arith.mulf %129, %137 : vector<2x32xf32>
    %146 = arith.addf %144, %145 : vector<2x32xf32>
    %147 = math.tanh %146 : vector<2x32xf32>
    %148 = arith.mulf %143, %147 : vector<2x32xf32>
    %149 = arith.truncf %148 : vector<2x32xf32> to vector<2x32xbf16>
    %cst_65 = arith.constant dense<0.000000e+00> : vector<2x128xf32>
    %150 = tpu.matmul %149, %46, %cst_65 {dimension_numbers = #tpu.dot_dimension_numbers<[1], [0], [0], [1], [0, 0, 1, 1], [], []>} : vector<2x32xbf16>, vector<32x128xbf16>, vector<2x128xf32> -> vector<2x128xf32>
    %151 = vector.broadcast %48 : vector<1x128xf32> to vector<2x128xf32>
    %152 = arith.addf %151, %150 : vector<2x128xf32>
    %153 = arith.truncf %118 : vector<2x32xf32> to vector<2x32xbf16>
    %cst_66 = arith.constant dense<0.000000e+00> : vector<2x128xf32>
    %154 = tpu.matmul %153, %47, %cst_66 {dimension_numbers = #tpu.dot_dimension_numbers<[1], [0], [0], [1], [0, 0, 1, 1], [], []>} : vector<2x32xbf16>, vector<32x128xbf16>, vector<2x128xf32> -> vector<2x128xf32>
    %155 = arith.addf %152, %154 : vector<2x128xf32>
    %156 = vector.extract_strided_slice %155 {offsets = [0, 0], sizes = [2, 32], strides = [1, 1]} : vector<2x128xf32> to vector<2x32xf32>
    %157 = arith.negf %156 : vector<2x32xf32>
    %158 = math.exp %157 : vector<2x32xf32>
    %cst_67 = arith.constant 1.000000e+00 : f32
    %159 = vector.broadcast %cst_67 : f32 to vector<2x32xf32>
    %160 = arith.addf %159, %158 : vector<2x32xf32>
    %161 = arith.divf %159, %160 : vector<2x32xf32>
    %162 = vector.extract_strided_slice %155 {offsets = [0, 32], sizes = [2, 32], strides = [1, 1]} : vector<2x128xf32> to vector<2x32xf32>
    %163 = arith.negf %162 : vector<2x32xf32>
    %164 = math.exp %163 : vector<2x32xf32>
    %cst_68 = arith.constant 1.000000e+00 : f32
    %165 = vector.broadcast %cst_68 : f32 to vector<2x32xf32>
    %166 = arith.addf %165, %164 : vector<2x32xf32>
    %167 = arith.divf %165, %166 : vector<2x32xf32>
    %168 = vector.extract_strided_slice %155 {offsets = [0, 64], sizes = [2, 32], strides = [1, 1]} : vector<2x128xf32> to vector<2x32xf32>
    %169 = math.tanh %168 : vector<2x32xf32>
    %170 = vector.extract_strided_slice %155 {offsets = [0, 96], sizes = [2, 32], strides = [1, 1]} : vector<2x128xf32> to vector<2x32xf32>
    %171 = arith.negf %170 : vector<2x32xf32>
    %172 = math.exp %171 : vector<2x32xf32>
    %cst_69 = arith.constant 1.000000e+00 : f32
    %173 = vector.broadcast %cst_69 : f32 to vector<2x32xf32>
    %174 = arith.addf %173, %172 : vector<2x32xf32>
    %175 = arith.divf %173, %174 : vector<2x32xf32>
    %176 = arith.mulf %167, %116 : vector<2x32xf32>
    %177 = arith.mulf %161, %169 : vector<2x32xf32>
    %178 = arith.addf %176, %177 : vector<2x32xf32>
    %179 = math.tanh %178 : vector<2x32xf32>
    %180 = arith.mulf %175, %179 : vector<2x32xf32>
    %181 = vector.extract_strided_slice %38 {offsets = [4, 0], sizes = [2, 128], strides = [1, 1]} : vector<16x128xf32> to vector<2x128xf32>
    %182 = arith.addf %181, %44 : vector<2x128xf32>
    %183 = arith.truncf %148 : vector<2x32xf32> to vector<2x32xbf16>
    %cst_70 = arith.constant dense<0.000000e+00> : vector<2x128xf32>
    %184 = tpu.matmul %183, %45, %cst_70 {dimension_numbers = #tpu.dot_dimension_numbers<[1], [0], [0], [1], [0, 0, 1, 1], [], []>} : vector<2x32xbf16>, vector<32x128xbf16>, vector<2x128xf32> -> vector<2x128xf32>
    %185 = arith.addf %182, %184 : vector<2x128xf32>
    %186 = vector.extract_strided_slice %185 {offsets = [0, 0], sizes = [2, 32], strides = [1, 1]} : vector<2x128xf32> to vector<2x32xf32>
    %187 = arith.negf %186 : vector<2x32xf32>
    %188 = math.exp %187 : vector<2x32xf32>
    %cst_71 = arith.constant 1.000000e+00 : f32
    %189 = vector.broadcast %cst_71 : f32 to vector<2x32xf32>
    %190 = arith.addf %189, %188 : vector<2x32xf32>
    %191 = arith.divf %189, %190 : vector<2x32xf32>
    %192 = vector.extract_strided_slice %185 {offsets = [0, 32], sizes = [2, 32], strides = [1, 1]} : vector<2x128xf32> to vector<2x32xf32>
    %193 = arith.negf %192 : vector<2x32xf32>
    %194 = math.exp %193 : vector<2x32xf32>
    %cst_72 = arith.constant 1.000000e+00 : f32
    %195 = vector.broadcast %cst_72 : f32 to vector<2x32xf32>
    %196 = arith.addf %195, %194 : vector<2x32xf32>
    %197 = arith.divf %195, %196 : vector<2x32xf32>
    %198 = vector.extract_strided_slice %185 {offsets = [0, 64], sizes = [2, 32], strides = [1, 1]} : vector<2x128xf32> to vector<2x32xf32>
    %199 = math.tanh %198 : vector<2x32xf32>
    %200 = vector.extract_strided_slice %185 {offsets = [0, 96], sizes = [2, 32], strides = [1, 1]} : vector<2x128xf32> to vector<2x32xf32>
    %201 = arith.negf %200 : vector<2x32xf32>
    %202 = math.exp %201 : vector<2x32xf32>
    %cst_73 = arith.constant 1.000000e+00 : f32
    %203 = vector.broadcast %cst_73 : f32 to vector<2x32xf32>
    %204 = arith.addf %203, %202 : vector<2x32xf32>
    %205 = arith.divf %203, %204 : vector<2x32xf32>
    %206 = arith.mulf %197, %146 : vector<2x32xf32>
    %207 = arith.mulf %191, %199 : vector<2x32xf32>
    %208 = arith.addf %206, %207 : vector<2x32xf32>
    %209 = math.tanh %208 : vector<2x32xf32>
    %210 = arith.mulf %205, %209 : vector<2x32xf32>
    %211 = arith.truncf %210 : vector<2x32xf32> to vector<2x32xbf16>
    %cst_74 = arith.constant dense<0.000000e+00> : vector<2x128xf32>
    %212 = tpu.matmul %211, %46, %cst_74 {dimension_numbers = #tpu.dot_dimension_numbers<[1], [0], [0], [1], [0, 0, 1, 1], [], []>} : vector<2x32xbf16>, vector<32x128xbf16>, vector<2x128xf32> -> vector<2x128xf32>
    %213 = vector.broadcast %48 : vector<1x128xf32> to vector<2x128xf32>
    %214 = arith.addf %213, %212 : vector<2x128xf32>
    %215 = arith.truncf %180 : vector<2x32xf32> to vector<2x32xbf16>
    %cst_75 = arith.constant dense<0.000000e+00> : vector<2x128xf32>
    %216 = tpu.matmul %215, %47, %cst_75 {dimension_numbers = #tpu.dot_dimension_numbers<[1], [0], [0], [1], [0, 0, 1, 1], [], []>} : vector<2x32xbf16>, vector<32x128xbf16>, vector<2x128xf32> -> vector<2x128xf32>
    %217 = arith.addf %214, %216 : vector<2x128xf32>
    %218 = vector.extract_strided_slice %217 {offsets = [0, 0], sizes = [2, 32], strides = [1, 1]} : vector<2x128xf32> to vector<2x32xf32>
    %219 = arith.negf %218 : vector<2x32xf32>
    %220 = math.exp %219 : vector<2x32xf32>
    %cst_76 = arith.constant 1.000000e+00 : f32
    %221 = vector.broadcast %cst_76 : f32 to vector<2x32xf32>
    %222 = arith.addf %221, %220 : vector<2x32xf32>
    %223 = arith.divf %221, %222 : vector<2x32xf32>
    %224 = vector.extract_strided_slice %217 {offsets = [0, 32], sizes = [2, 32], strides = [1, 1]} : vector<2x128xf32> to vector<2x32xf32>
    %225 = arith.negf %224 : vector<2x32xf32>
    %226 = math.exp %225 : vector<2x32xf32>
    %cst_77 = arith.constant 1.000000e+00 : f32
    %227 = vector.broadcast %cst_77 : f32 to vector<2x32xf32>
    %228 = arith.addf %227, %226 : vector<2x32xf32>
    %229 = arith.divf %227, %228 : vector<2x32xf32>
    %230 = vector.extract_strided_slice %217 {offsets = [0, 64], sizes = [2, 32], strides = [1, 1]} : vector<2x128xf32> to vector<2x32xf32>
    %231 = math.tanh %230 : vector<2x32xf32>
    %232 = vector.extract_strided_slice %217 {offsets = [0, 96], sizes = [2, 32], strides = [1, 1]} : vector<2x128xf32> to vector<2x32xf32>
    %233 = arith.negf %232 : vector<2x32xf32>
    %234 = math.exp %233 : vector<2x32xf32>
    %cst_78 = arith.constant 1.000000e+00 : f32
    %235 = vector.broadcast %cst_78 : f32 to vector<2x32xf32>
    %236 = arith.addf %235, %234 : vector<2x32xf32>
    %237 = arith.divf %235, %236 : vector<2x32xf32>
    %238 = arith.mulf %229, %178 : vector<2x32xf32>
    %239 = arith.mulf %223, %231 : vector<2x32xf32>
    %240 = arith.addf %238, %239 : vector<2x32xf32>
    %241 = math.tanh %240 : vector<2x32xf32>
    %242 = arith.mulf %237, %241 : vector<2x32xf32>
    %243 = vector.extract_strided_slice %38 {offsets = [6, 0], sizes = [2, 128], strides = [1, 1]} : vector<16x128xf32> to vector<2x128xf32>
    %244 = arith.addf %243, %44 : vector<2x128xf32>
    %245 = arith.truncf %210 : vector<2x32xf32> to vector<2x32xbf16>
    %cst_79 = arith.constant dense<0.000000e+00> : vector<2x128xf32>
    %246 = tpu.matmul %245, %45, %cst_79 {dimension_numbers = #tpu.dot_dimension_numbers<[1], [0], [0], [1], [0, 0, 1, 1], [], []>} : vector<2x32xbf16>, vector<32x128xbf16>, vector<2x128xf32> -> vector<2x128xf32>
    %247 = arith.addf %244, %246 : vector<2x128xf32>
    %248 = vector.extract_strided_slice %247 {offsets = [0, 0], sizes = [2, 32], strides = [1, 1]} : vector<2x128xf32> to vector<2x32xf32>
    %249 = arith.negf %248 : vector<2x32xf32>
    %250 = math.exp %249 : vector<2x32xf32>
    %cst_80 = arith.constant 1.000000e+00 : f32
    %251 = vector.broadcast %cst_80 : f32 to vector<2x32xf32>
    %252 = arith.addf %251, %250 : vector<2x32xf32>
    %253 = arith.divf %251, %252 : vector<2x32xf32>
    %254 = vector.extract_strided_slice %247 {offsets = [0, 32], sizes = [2, 32], strides = [1, 1]} : vector<2x128xf32> to vector<2x32xf32>
    %255 = arith.negf %254 : vector<2x32xf32>
    %256 = math.exp %255 : vector<2x32xf32>
    %cst_81 = arith.constant 1.000000e+00 : f32
    %257 = vector.broadcast %cst_81 : f32 to vector<2x32xf32>
    %258 = arith.addf %257, %256 : vector<2x32xf32>
    %259 = arith.divf %257, %258 : vector<2x32xf32>
    %260 = vector.extract_strided_slice %247 {offsets = [0, 64], sizes = [2, 32], strides = [1, 1]} : vector<2x128xf32> to vector<2x32xf32>
    %261 = math.tanh %260 : vector<2x32xf32>
    %262 = vector.extract_strided_slice %247 {offsets = [0, 96], sizes = [2, 32], strides = [1, 1]} : vector<2x128xf32> to vector<2x32xf32>
    %263 = arith.negf %262 : vector<2x32xf32>
    %264 = math.exp %263 : vector<2x32xf32>
    %cst_82 = arith.constant 1.000000e+00 : f32
    %265 = vector.broadcast %cst_82 : f32 to vector<2x32xf32>
    %266 = arith.addf %265, %264 : vector<2x32xf32>
    %267 = arith.divf %265, %266 : vector<2x32xf32>
    %268 = arith.mulf %259, %208 : vector<2x32xf32>
    %269 = arith.mulf %253, %261 : vector<2x32xf32>
    %270 = arith.addf %268, %269 : vector<2x32xf32>
    %271 = math.tanh %270 : vector<2x32xf32>
    %272 = arith.mulf %267, %271 : vector<2x32xf32>
    %273 = arith.truncf %272 : vector<2x32xf32> to vector<2x32xbf16>
    %cst_83 = arith.constant dense<0.000000e+00> : vector<2x128xf32>
    %274 = tpu.matmul %273, %46, %cst_83 {dimension_numbers = #tpu.dot_dimension_numbers<[1], [0], [0], [1], [0, 0, 1, 1], [], []>} : vector<2x32xbf16>, vector<32x128xbf16>, vector<2x128xf32> -> vector<2x128xf32>
    %275 = vector.broadcast %48 : vector<1x128xf32> to vector<2x128xf32>
    %276 = arith.addf %275, %274 : vector<2x128xf32>
    %277 = arith.truncf %242 : vector<2x32xf32> to vector<2x32xbf16>
    %cst_84 = arith.constant dense<0.000000e+00> : vector<2x128xf32>
    %278 = tpu.matmul %277, %47, %cst_84 {dimension_numbers = #tpu.dot_dimension_numbers<[1], [0], [0], [1], [0, 0, 1, 1], [], []>} : vector<2x32xbf16>, vector<32x128xbf16>, vector<2x128xf32> -> vector<2x128xf32>
    %279 = arith.addf %276, %278 : vector<2x128xf32>
    %280 = vector.extract_strided_slice %279 {offsets = [0, 0], sizes = [2, 32], strides = [1, 1]} : vector<2x128xf32> to vector<2x32xf32>
    %281 = arith.negf %280 : vector<2x32xf32>
    %282 = math.exp %281 : vector<2x32xf32>
    %cst_85 = arith.constant 1.000000e+00 : f32
    %283 = vector.broadcast %cst_85 : f32 to vector<2x32xf32>
    %284 = arith.addf %283, %282 : vector<2x32xf32>
    %285 = arith.divf %283, %284 : vector<2x32xf32>
    %286 = vector.extract_strided_slice %279 {offsets = [0, 32], sizes = [2, 32], strides = [1, 1]} : vector<2x128xf32> to vector<2x32xf32>
    %287 = arith.negf %286 : vector<2x32xf32>
    %288 = math.exp %287 : vector<2x32xf32>
    %cst_86 = arith.constant 1.000000e+00 : f32
    %289 = vector.broadcast %cst_86 : f32 to vector<2x32xf32>
    %290 = arith.addf %289, %288 : vector<2x32xf32>
    %291 = arith.divf %289, %290 : vector<2x32xf32>
    %292 = vector.extract_strided_slice %279 {offsets = [0, 64], sizes = [2, 32], strides = [1, 1]} : vector<2x128xf32> to vector<2x32xf32>
    %293 = math.tanh %292 : vector<2x32xf32>
    %294 = vector.extract_strided_slice %279 {offsets = [0, 96], sizes = [2, 32], strides = [1, 1]} : vector<2x128xf32> to vector<2x32xf32>
    %295 = arith.negf %294 : vector<2x32xf32>
    %296 = math.exp %295 : vector<2x32xf32>
    %cst_87 = arith.constant 1.000000e+00 : f32
    %297 = vector.broadcast %cst_87 : f32 to vector<2x32xf32>
    %298 = arith.addf %297, %296 : vector<2x32xf32>
    %299 = arith.divf %297, %298 : vector<2x32xf32>
    %300 = arith.mulf %291, %240 : vector<2x32xf32>
    %301 = arith.mulf %285, %293 : vector<2x32xf32>
    %302 = arith.addf %300, %301 : vector<2x32xf32>
    %303 = math.tanh %302 : vector<2x32xf32>
    %304 = arith.mulf %299, %303 : vector<2x32xf32>
    %305 = vector.extract_strided_slice %38 {offsets = [8, 0], sizes = [2, 128], strides = [1, 1]} : vector<16x128xf32> to vector<2x128xf32>
    %306 = arith.addf %305, %44 : vector<2x128xf32>
    %307 = arith.truncf %272 : vector<2x32xf32> to vector<2x32xbf16>
    %cst_88 = arith.constant dense<0.000000e+00> : vector<2x128xf32>
    %308 = tpu.matmul %307, %45, %cst_88 {dimension_numbers = #tpu.dot_dimension_numbers<[1], [0], [0], [1], [0, 0, 1, 1], [], []>} : vector<2x32xbf16>, vector<32x128xbf16>, vector<2x128xf32> -> vector<2x128xf32>
    %309 = arith.addf %306, %308 : vector<2x128xf32>
    %310 = vector.extract_strided_slice %309 {offsets = [0, 0], sizes = [2, 32], strides = [1, 1]} : vector<2x128xf32> to vector<2x32xf32>
    %311 = arith.negf %310 : vector<2x32xf32>
    %312 = math.exp %311 : vector<2x32xf32>
    %cst_89 = arith.constant 1.000000e+00 : f32
    %313 = vector.broadcast %cst_89 : f32 to vector<2x32xf32>
    %314 = arith.addf %313, %312 : vector<2x32xf32>
    %315 = arith.divf %313, %314 : vector<2x32xf32>
    %316 = vector.extract_strided_slice %309 {offsets = [0, 32], sizes = [2, 32], strides = [1, 1]} : vector<2x128xf32> to vector<2x32xf32>
    %317 = arith.negf %316 : vector<2x32xf32>
    %318 = math.exp %317 : vector<2x32xf32>
    %cst_90 = arith.constant 1.000000e+00 : f32
    %319 = vector.broadcast %cst_90 : f32 to vector<2x32xf32>
    %320 = arith.addf %319, %318 : vector<2x32xf32>
    %321 = arith.divf %319, %320 : vector<2x32xf32>
    %322 = vector.extract_strided_slice %309 {offsets = [0, 64], sizes = [2, 32], strides = [1, 1]} : vector<2x128xf32> to vector<2x32xf32>
    %323 = math.tanh %322 : vector<2x32xf32>
    %324 = vector.extract_strided_slice %309 {offsets = [0, 96], sizes = [2, 32], strides = [1, 1]} : vector<2x128xf32> to vector<2x32xf32>
    %325 = arith.negf %324 : vector<2x32xf32>
    %326 = math.exp %325 : vector<2x32xf32>
    %cst_91 = arith.constant 1.000000e+00 : f32
    %327 = vector.broadcast %cst_91 : f32 to vector<2x32xf32>
    %328 = arith.addf %327, %326 : vector<2x32xf32>
    %329 = arith.divf %327, %328 : vector<2x32xf32>
    %330 = arith.mulf %321, %270 : vector<2x32xf32>
    %331 = arith.mulf %315, %323 : vector<2x32xf32>
    %332 = arith.addf %330, %331 : vector<2x32xf32>
    %333 = math.tanh %332 : vector<2x32xf32>
    %334 = arith.mulf %329, %333 : vector<2x32xf32>
    %335 = arith.truncf %334 : vector<2x32xf32> to vector<2x32xbf16>
    %cst_92 = arith.constant dense<0.000000e+00> : vector<2x128xf32>
    %336 = tpu.matmul %335, %46, %cst_92 {dimension_numbers = #tpu.dot_dimension_numbers<[1], [0], [0], [1], [0, 0, 1, 1], [], []>} : vector<2x32xbf16>, vector<32x128xbf16>, vector<2x128xf32> -> vector<2x128xf32>
    %337 = vector.broadcast %48 : vector<1x128xf32> to vector<2x128xf32>
    %338 = arith.addf %337, %336 : vector<2x128xf32>
    %339 = arith.truncf %304 : vector<2x32xf32> to vector<2x32xbf16>
    %cst_93 = arith.constant dense<0.000000e+00> : vector<2x128xf32>
    %340 = tpu.matmul %339, %47, %cst_93 {dimension_numbers = #tpu.dot_dimension_numbers<[1], [0], [0], [1], [0, 0, 1, 1], [], []>} : vector<2x32xbf16>, vector<32x128xbf16>, vector<2x128xf32> -> vector<2x128xf32>
    %341 = arith.addf %338, %340 : vector<2x128xf32>
    %342 = vector.extract_strided_slice %341 {offsets = [0, 0], sizes = [2, 32], strides = [1, 1]} : vector<2x128xf32> to vector<2x32xf32>
    %343 = arith.negf %342 : vector<2x32xf32>
    %344 = math.exp %343 : vector<2x32xf32>
    %cst_94 = arith.constant 1.000000e+00 : f32
    %345 = vector.broadcast %cst_94 : f32 to vector<2x32xf32>
    %346 = arith.addf %345, %344 : vector<2x32xf32>
    %347 = arith.divf %345, %346 : vector<2x32xf32>
    %348 = vector.extract_strided_slice %341 {offsets = [0, 32], sizes = [2, 32], strides = [1, 1]} : vector<2x128xf32> to vector<2x32xf32>
    %349 = arith.negf %348 : vector<2x32xf32>
    %350 = math.exp %349 : vector<2x32xf32>
    %cst_95 = arith.constant 1.000000e+00 : f32
    %351 = vector.broadcast %cst_95 : f32 to vector<2x32xf32>
    %352 = arith.addf %351, %350 : vector<2x32xf32>
    %353 = arith.divf %351, %352 : vector<2x32xf32>
    %354 = vector.extract_strided_slice %341 {offsets = [0, 64], sizes = [2, 32], strides = [1, 1]} : vector<2x128xf32> to vector<2x32xf32>
    %355 = math.tanh %354 : vector<2x32xf32>
    %356 = vector.extract_strided_slice %341 {offsets = [0, 96], sizes = [2, 32], strides = [1, 1]} : vector<2x128xf32> to vector<2x32xf32>
    %357 = arith.negf %356 : vector<2x32xf32>
    %358 = math.exp %357 : vector<2x32xf32>
    %cst_96 = arith.constant 1.000000e+00 : f32
    %359 = vector.broadcast %cst_96 : f32 to vector<2x32xf32>
    %360 = arith.addf %359, %358 : vector<2x32xf32>
    %361 = arith.divf %359, %360 : vector<2x32xf32>
    %362 = arith.mulf %353, %302 : vector<2x32xf32>
    %363 = arith.mulf %347, %355 : vector<2x32xf32>
    %364 = arith.addf %362, %363 : vector<2x32xf32>
    %365 = math.tanh %364 : vector<2x32xf32>
    %366 = arith.mulf %361, %365 : vector<2x32xf32>
    %367 = vector.extract_strided_slice %38 {offsets = [10, 0], sizes = [2, 128], strides = [1, 1]} : vector<16x128xf32> to vector<2x128xf32>
    %368 = arith.addf %367, %44 : vector<2x128xf32>
    %369 = arith.truncf %334 : vector<2x32xf32> to vector<2x32xbf16>
    %cst_97 = arith.constant dense<0.000000e+00> : vector<2x128xf32>
    %370 = tpu.matmul %369, %45, %cst_97 {dimension_numbers = #tpu.dot_dimension_numbers<[1], [0], [0], [1], [0, 0, 1, 1], [], []>} : vector<2x32xbf16>, vector<32x128xbf16>, vector<2x128xf32> -> vector<2x128xf32>
    %371 = arith.addf %368, %370 : vector<2x128xf32>
    %372 = vector.extract_strided_slice %371 {offsets = [0, 0], sizes = [2, 32], strides = [1, 1]} : vector<2x128xf32> to vector<2x32xf32>
    %373 = arith.negf %372 : vector<2x32xf32>
    %374 = math.exp %373 : vector<2x32xf32>
    %cst_98 = arith.constant 1.000000e+00 : f32
    %375 = vector.broadcast %cst_98 : f32 to vector<2x32xf32>
    %376 = arith.addf %375, %374 : vector<2x32xf32>
    %377 = arith.divf %375, %376 : vector<2x32xf32>
    %378 = vector.extract_strided_slice %371 {offsets = [0, 32], sizes = [2, 32], strides = [1, 1]} : vector<2x128xf32> to vector<2x32xf32>
    %379 = arith.negf %378 : vector<2x32xf32>
    %380 = math.exp %379 : vector<2x32xf32>
    %cst_99 = arith.constant 1.000000e+00 : f32
    %381 = vector.broadcast %cst_99 : f32 to vector<2x32xf32>
    %382 = arith.addf %381, %380 : vector<2x32xf32>
    %383 = arith.divf %381, %382 : vector<2x32xf32>
    %384 = vector.extract_strided_slice %371 {offsets = [0, 64], sizes = [2, 32], strides = [1, 1]} : vector<2x128xf32> to vector<2x32xf32>
    %385 = math.tanh %384 : vector<2x32xf32>
    %386 = vector.extract_strided_slice %371 {offsets = [0, 96], sizes = [2, 32], strides = [1, 1]} : vector<2x128xf32> to vector<2x32xf32>
    %387 = arith.negf %386 : vector<2x32xf32>
    %388 = math.exp %387 : vector<2x32xf32>
    %cst_100 = arith.constant 1.000000e+00 : f32
    %389 = vector.broadcast %cst_100 : f32 to vector<2x32xf32>
    %390 = arith.addf %389, %388 : vector<2x32xf32>
    %391 = arith.divf %389, %390 : vector<2x32xf32>
    %392 = arith.mulf %383, %332 : vector<2x32xf32>
    %393 = arith.mulf %377, %385 : vector<2x32xf32>
    %394 = arith.addf %392, %393 : vector<2x32xf32>
    %395 = math.tanh %394 : vector<2x32xf32>
    %396 = arith.mulf %391, %395 : vector<2x32xf32>
    %397 = arith.truncf %396 : vector<2x32xf32> to vector<2x32xbf16>
    %cst_101 = arith.constant dense<0.000000e+00> : vector<2x128xf32>
    %398 = tpu.matmul %397, %46, %cst_101 {dimension_numbers = #tpu.dot_dimension_numbers<[1], [0], [0], [1], [0, 0, 1, 1], [], []>} : vector<2x32xbf16>, vector<32x128xbf16>, vector<2x128xf32> -> vector<2x128xf32>
    %399 = vector.broadcast %48 : vector<1x128xf32> to vector<2x128xf32>
    %400 = arith.addf %399, %398 : vector<2x128xf32>
    %401 = arith.truncf %366 : vector<2x32xf32> to vector<2x32xbf16>
    %cst_102 = arith.constant dense<0.000000e+00> : vector<2x128xf32>
    %402 = tpu.matmul %401, %47, %cst_102 {dimension_numbers = #tpu.dot_dimension_numbers<[1], [0], [0], [1], [0, 0, 1, 1], [], []>} : vector<2x32xbf16>, vector<32x128xbf16>, vector<2x128xf32> -> vector<2x128xf32>
    %403 = arith.addf %400, %402 : vector<2x128xf32>
    %404 = vector.extract_strided_slice %403 {offsets = [0, 0], sizes = [2, 32], strides = [1, 1]} : vector<2x128xf32> to vector<2x32xf32>
    %405 = arith.negf %404 : vector<2x32xf32>
    %406 = math.exp %405 : vector<2x32xf32>
    %cst_103 = arith.constant 1.000000e+00 : f32
    %407 = vector.broadcast %cst_103 : f32 to vector<2x32xf32>
    %408 = arith.addf %407, %406 : vector<2x32xf32>
    %409 = arith.divf %407, %408 : vector<2x32xf32>
    %410 = vector.extract_strided_slice %403 {offsets = [0, 32], sizes = [2, 32], strides = [1, 1]} : vector<2x128xf32> to vector<2x32xf32>
    %411 = arith.negf %410 : vector<2x32xf32>
    %412 = math.exp %411 : vector<2x32xf32>
    %cst_104 = arith.constant 1.000000e+00 : f32
    %413 = vector.broadcast %cst_104 : f32 to vector<2x32xf32>
    %414 = arith.addf %413, %412 : vector<2x32xf32>
    %415 = arith.divf %413, %414 : vector<2x32xf32>
    %416 = vector.extract_strided_slice %403 {offsets = [0, 64], sizes = [2, 32], strides = [1, 1]} : vector<2x128xf32> to vector<2x32xf32>
    %417 = math.tanh %416 : vector<2x32xf32>
    %418 = vector.extract_strided_slice %403 {offsets = [0, 96], sizes = [2, 32], strides = [1, 1]} : vector<2x128xf32> to vector<2x32xf32>
    %419 = arith.negf %418 : vector<2x32xf32>
    %420 = math.exp %419 : vector<2x32xf32>
    %cst_105 = arith.constant 1.000000e+00 : f32
    %421 = vector.broadcast %cst_105 : f32 to vector<2x32xf32>
    %422 = arith.addf %421, %420 : vector<2x32xf32>
    %423 = arith.divf %421, %422 : vector<2x32xf32>
    %424 = arith.mulf %415, %364 : vector<2x32xf32>
    %425 = arith.mulf %409, %417 : vector<2x32xf32>
    %426 = arith.addf %424, %425 : vector<2x32xf32>
    %427 = math.tanh %426 : vector<2x32xf32>
    %428 = arith.mulf %423, %427 : vector<2x32xf32>
    %429 = vector.extract_strided_slice %38 {offsets = [12, 0], sizes = [2, 128], strides = [1, 1]} : vector<16x128xf32> to vector<2x128xf32>
    %430 = arith.addf %429, %44 : vector<2x128xf32>
    %431 = arith.truncf %396 : vector<2x32xf32> to vector<2x32xbf16>
    %cst_106 = arith.constant dense<0.000000e+00> : vector<2x128xf32>
    %432 = tpu.matmul %431, %45, %cst_106 {dimension_numbers = #tpu.dot_dimension_numbers<[1], [0], [0], [1], [0, 0, 1, 1], [], []>} : vector<2x32xbf16>, vector<32x128xbf16>, vector<2x128xf32> -> vector<2x128xf32>
    %433 = arith.addf %430, %432 : vector<2x128xf32>
    %434 = vector.extract_strided_slice %433 {offsets = [0, 0], sizes = [2, 32], strides = [1, 1]} : vector<2x128xf32> to vector<2x32xf32>
    %435 = arith.negf %434 : vector<2x32xf32>
    %436 = math.exp %435 : vector<2x32xf32>
    %cst_107 = arith.constant 1.000000e+00 : f32
    %437 = vector.broadcast %cst_107 : f32 to vector<2x32xf32>
    %438 = arith.addf %437, %436 : vector<2x32xf32>
    %439 = arith.divf %437, %438 : vector<2x32xf32>
    %440 = vector.extract_strided_slice %433 {offsets = [0, 32], sizes = [2, 32], strides = [1, 1]} : vector<2x128xf32> to vector<2x32xf32>
    %441 = arith.negf %440 : vector<2x32xf32>
    %442 = math.exp %441 : vector<2x32xf32>
    %cst_108 = arith.constant 1.000000e+00 : f32
    %443 = vector.broadcast %cst_108 : f32 to vector<2x32xf32>
    %444 = arith.addf %443, %442 : vector<2x32xf32>
    %445 = arith.divf %443, %444 : vector<2x32xf32>
    %446 = vector.extract_strided_slice %433 {offsets = [0, 64], sizes = [2, 32], strides = [1, 1]} : vector<2x128xf32> to vector<2x32xf32>
    %447 = math.tanh %446 : vector<2x32xf32>
    %448 = vector.extract_strided_slice %433 {offsets = [0, 96], sizes = [2, 32], strides = [1, 1]} : vector<2x128xf32> to vector<2x32xf32>
    %449 = arith.negf %448 : vector<2x32xf32>
    %450 = math.exp %449 : vector<2x32xf32>
    %cst_109 = arith.constant 1.000000e+00 : f32
    %451 = vector.broadcast %cst_109 : f32 to vector<2x32xf32>
    %452 = arith.addf %451, %450 : vector<2x32xf32>
    %453 = arith.divf %451, %452 : vector<2x32xf32>
    %454 = arith.mulf %445, %394 : vector<2x32xf32>
    %455 = arith.mulf %439, %447 : vector<2x32xf32>
    %456 = arith.addf %454, %455 : vector<2x32xf32>
    %457 = math.tanh %456 : vector<2x32xf32>
    %458 = arith.mulf %453, %457 : vector<2x32xf32>
    %459 = arith.truncf %458 : vector<2x32xf32> to vector<2x32xbf16>
    %cst_110 = arith.constant dense<0.000000e+00> : vector<2x128xf32>
    %460 = tpu.matmul %459, %46, %cst_110 {dimension_numbers = #tpu.dot_dimension_numbers<[1], [0], [0], [1], [0, 0, 1, 1], [], []>} : vector<2x32xbf16>, vector<32x128xbf16>, vector<2x128xf32> -> vector<2x128xf32>
    %461 = vector.broadcast %48 : vector<1x128xf32> to vector<2x128xf32>
    %462 = arith.addf %461, %460 : vector<2x128xf32>
    %463 = arith.truncf %428 : vector<2x32xf32> to vector<2x32xbf16>
    %cst_111 = arith.constant dense<0.000000e+00> : vector<2x128xf32>
    %464 = tpu.matmul %463, %47, %cst_111 {dimension_numbers = #tpu.dot_dimension_numbers<[1], [0], [0], [1], [0, 0, 1, 1], [], []>} : vector<2x32xbf16>, vector<32x128xbf16>, vector<2x128xf32> -> vector<2x128xf32>
    %465 = arith.addf %462, %464 : vector<2x128xf32>
    %466 = vector.extract_strided_slice %465 {offsets = [0, 0], sizes = [2, 32], strides = [1, 1]} : vector<2x128xf32> to vector<2x32xf32>
    %467 = arith.negf %466 : vector<2x32xf32>
    %468 = math.exp %467 : vector<2x32xf32>
    %cst_112 = arith.constant 1.000000e+00 : f32
    %469 = vector.broadcast %cst_112 : f32 to vector<2x32xf32>
    %470 = arith.addf %469, %468 : vector<2x32xf32>
    %471 = arith.divf %469, %470 : vector<2x32xf32>
    %472 = vector.extract_strided_slice %465 {offsets = [0, 32], sizes = [2, 32], strides = [1, 1]} : vector<2x128xf32> to vector<2x32xf32>
    %473 = arith.negf %472 : vector<2x32xf32>
    %474 = math.exp %473 : vector<2x32xf32>
    %cst_113 = arith.constant 1.000000e+00 : f32
    %475 = vector.broadcast %cst_113 : f32 to vector<2x32xf32>
    %476 = arith.addf %475, %474 : vector<2x32xf32>
    %477 = arith.divf %475, %476 : vector<2x32xf32>
    %478 = vector.extract_strided_slice %465 {offsets = [0, 64], sizes = [2, 32], strides = [1, 1]} : vector<2x128xf32> to vector<2x32xf32>
    %479 = math.tanh %478 : vector<2x32xf32>
    %480 = vector.extract_strided_slice %465 {offsets = [0, 96], sizes = [2, 32], strides = [1, 1]} : vector<2x128xf32> to vector<2x32xf32>
    %481 = arith.negf %480 : vector<2x32xf32>
    %482 = math.exp %481 : vector<2x32xf32>
    %cst_114 = arith.constant 1.000000e+00 : f32
    %483 = vector.broadcast %cst_114 : f32 to vector<2x32xf32>
    %484 = arith.addf %483, %482 : vector<2x32xf32>
    %485 = arith.divf %483, %484 : vector<2x32xf32>
    %486 = arith.mulf %477, %426 : vector<2x32xf32>
    %487 = arith.mulf %471, %479 : vector<2x32xf32>
    %488 = arith.addf %486, %487 : vector<2x32xf32>
    %489 = math.tanh %488 : vector<2x32xf32>
    %490 = arith.mulf %485, %489 : vector<2x32xf32>
    %491 = vector.extract_strided_slice %38 {offsets = [14, 0], sizes = [2, 128], strides = [1, 1]} : vector<16x128xf32> to vector<2x128xf32>
    %492 = arith.addf %491, %44 : vector<2x128xf32>
    %493 = arith.truncf %458 : vector<2x32xf32> to vector<2x32xbf16>
    %cst_115 = arith.constant dense<0.000000e+00> : vector<2x128xf32>
    %494 = tpu.matmul %493, %45, %cst_115 {dimension_numbers = #tpu.dot_dimension_numbers<[1], [0], [0], [1], [0, 0, 1, 1], [], []>} : vector<2x32xbf16>, vector<32x128xbf16>, vector<2x128xf32> -> vector<2x128xf32>
    %495 = arith.addf %492, %494 : vector<2x128xf32>
    %496 = vector.extract_strided_slice %495 {offsets = [0, 0], sizes = [2, 32], strides = [1, 1]} : vector<2x128xf32> to vector<2x32xf32>
    %497 = arith.negf %496 : vector<2x32xf32>
    %498 = math.exp %497 : vector<2x32xf32>
    %cst_116 = arith.constant 1.000000e+00 : f32
    %499 = vector.broadcast %cst_116 : f32 to vector<2x32xf32>
    %500 = arith.addf %499, %498 : vector<2x32xf32>
    %501 = arith.divf %499, %500 : vector<2x32xf32>
    %502 = vector.extract_strided_slice %495 {offsets = [0, 32], sizes = [2, 32], strides = [1, 1]} : vector<2x128xf32> to vector<2x32xf32>
    %503 = arith.negf %502 : vector<2x32xf32>
    %504 = math.exp %503 : vector<2x32xf32>
    %cst_117 = arith.constant 1.000000e+00 : f32
    %505 = vector.broadcast %cst_117 : f32 to vector<2x32xf32>
    %506 = arith.addf %505, %504 : vector<2x32xf32>
    %507 = arith.divf %505, %506 : vector<2x32xf32>
    %508 = vector.extract_strided_slice %495 {offsets = [0, 64], sizes = [2, 32], strides = [1, 1]} : vector<2x128xf32> to vector<2x32xf32>
    %509 = math.tanh %508 : vector<2x32xf32>
    %510 = vector.extract_strided_slice %495 {offsets = [0, 96], sizes = [2, 32], strides = [1, 1]} : vector<2x128xf32> to vector<2x32xf32>
    %511 = arith.negf %510 : vector<2x32xf32>
    %512 = math.exp %511 : vector<2x32xf32>
    %cst_118 = arith.constant 1.000000e+00 : f32
    %513 = vector.broadcast %cst_118 : f32 to vector<2x32xf32>
    %514 = arith.addf %513, %512 : vector<2x32xf32>
    %515 = arith.divf %513, %514 : vector<2x32xf32>
    %516 = arith.mulf %507, %456 : vector<2x32xf32>
    %517 = arith.mulf %501, %509 : vector<2x32xf32>
    %518 = arith.addf %516, %517 : vector<2x32xf32>
    %519 = math.tanh %518 : vector<2x32xf32>
    %520 = arith.mulf %515, %519 : vector<2x32xf32>
    %521 = arith.truncf %520 : vector<2x32xf32> to vector<2x32xbf16>
    %cst_119 = arith.constant dense<0.000000e+00> : vector<2x128xf32>
    %522 = tpu.matmul %521, %46, %cst_119 {dimension_numbers = #tpu.dot_dimension_numbers<[1], [0], [0], [1], [0, 0, 1, 1], [], []>} : vector<2x32xbf16>, vector<32x128xbf16>, vector<2x128xf32> -> vector<2x128xf32>
    %523 = vector.broadcast %48 : vector<1x128xf32> to vector<2x128xf32>
    %524 = arith.addf %523, %522 : vector<2x128xf32>
    %525 = arith.truncf %490 : vector<2x32xf32> to vector<2x32xbf16>
    %cst_120 = arith.constant dense<0.000000e+00> : vector<2x128xf32>
    %526 = tpu.matmul %525, %47, %cst_120 {dimension_numbers = #tpu.dot_dimension_numbers<[1], [0], [0], [1], [0, 0, 1, 1], [], []>} : vector<2x32xbf16>, vector<32x128xbf16>, vector<2x128xf32> -> vector<2x128xf32>
    %527 = arith.addf %524, %526 : vector<2x128xf32>
    %528 = vector.extract_strided_slice %527 {offsets = [0, 0], sizes = [2, 32], strides = [1, 1]} : vector<2x128xf32> to vector<2x32xf32>
    %529 = arith.negf %528 : vector<2x32xf32>
    %530 = math.exp %529 : vector<2x32xf32>
    %cst_121 = arith.constant 1.000000e+00 : f32
    %531 = vector.broadcast %cst_121 : f32 to vector<2x32xf32>
    %532 = arith.addf %531, %530 : vector<2x32xf32>
    %533 = arith.divf %531, %532 : vector<2x32xf32>
    %534 = vector.extract_strided_slice %527 {offsets = [0, 32], sizes = [2, 32], strides = [1, 1]} : vector<2x128xf32> to vector<2x32xf32>
    %535 = arith.negf %534 : vector<2x32xf32>
    %536 = math.exp %535 : vector<2x32xf32>
    %cst_122 = arith.constant 1.000000e+00 : f32
    %537 = vector.broadcast %cst_122 : f32 to vector<2x32xf32>
    %538 = arith.addf %537, %536 : vector<2x32xf32>
    %539 = arith.divf %537, %538 : vector<2x32xf32>
    %540 = vector.extract_strided_slice %527 {offsets = [0, 64], sizes = [2, 32], strides = [1, 1]} : vector<2x128xf32> to vector<2x32xf32>
    %541 = math.tanh %540 : vector<2x32xf32>
    %542 = vector.extract_strided_slice %527 {offsets = [0, 96], sizes = [2, 32], strides = [1, 1]} : vector<2x128xf32> to vector<2x32xf32>
    %543 = arith.negf %542 : vector<2x32xf32>
    %544 = math.exp %543 : vector<2x32xf32>
    %cst_123 = arith.constant 1.000000e+00 : f32
    %545 = vector.broadcast %cst_123 : f32 to vector<2x32xf32>
    %546 = arith.addf %545, %544 : vector<2x32xf32>
    %547 = arith.divf %545, %546 : vector<2x32xf32>
    %548 = arith.mulf %539, %488 : vector<2x32xf32>
    %549 = arith.mulf %533, %541 : vector<2x32xf32>
    %550 = arith.addf %548, %549 : vector<2x32xf32>
    %551 = math.tanh %550 : vector<2x32xf32>
    %552 = arith.mulf %547, %551 : vector<2x32xf32>
    %553 = tpu.concatenate %118, %180, %242, %304, %366, %428, %490, %552 in 1 : vector<2x32xf32>, vector<2x32xf32>, vector<2x32xf32>, vector<2x32xf32>, vector<2x32xf32>, vector<2x32xf32>, vector<2x32xf32>, vector<2x32xf32> -> vector<2x256xf32>
    %554 = arith.truncf %553 : vector<2x256xf32> to vector<2x256xbf16>
    %c0_124 = arith.constant 0 : index
    %c0_125 = arith.constant 0 : index
    %555 = vector.load %arg14[%c0_124, %c0_125] : memref<2x256xbf16, #tpu.memory_space<vmem>>, vector<2x256xbf16>
    tpu.vector_store %arg14[%c0_124, %c0_125], %554 {strides = array<i32>} : memref<2x256xbf16, #tpu.memory_space<vmem>>, vector<2x256xbf16>,
    %c0_126 = arith.constant 0 : index
    %c0_127 = arith.constant 0 : index
    %c0_128 = arith.constant 0 : index
    %556 = vector.load %arg15[%c0_126, %c0_127, %c0_128] : memref<2x2x32xf32, #tpu.memory_space<vmem>>, vector<1x2x32xf32>
    %557 = vector.shape_cast %556 : vector<1x2x32xf32> to vector<2x32xf32>
    %558 = vector.shape_cast %520 : vector<2x32xf32> to vector<1x2x32xf32>
    tpu.vector_store %arg15[%c0_126, %c0_127, %c0_128], %558 {strides = array<i32>} : memref<2x2x32xf32, #tpu.memory_space<vmem>>, vector<1x2x32xf32>,
    %c1_129 = arith.constant 1 : index
    %c0_130 = arith.constant 0 : index
    %c0_131 = arith.constant 0 : index
    %559 = vector.load %arg15[%c1_129, %c0_130, %c0_131] : memref<2x2x32xf32, #tpu.memory_space<vmem>>, vector<1x2x32xf32>
    %560 = vector.shape_cast %559 : vector<1x2x32xf32> to vector<2x32xf32>
    %561 = vector.shape_cast %552 : vector<2x32xf32> to vector<1x2x32xf32>
    tpu.vector_store %arg15[%c1_129, %c0_130, %c0_131], %561 {strides = array<i32>} : memref<2x2x32xf32, #tpu.memory_space<vmem>>, vector<1x2x32xf32>,
    %c0_132 = arith.constant 0 : index
    %c0_133 = arith.constant 0 : index
    %c0_134 = arith.constant 0 : index
    %562 = vector.load %arg16[%c0_132, %c0_133, %c0_134] : memref<2x2x32xf32, #tpu.memory_space<vmem>>, vector<1x2x32xf32>
    %563 = vector.shape_cast %562 : vector<1x2x32xf32> to vector<2x32xf32>
    %564 = vector.shape_cast %518 : vector<2x32xf32> to vector<1x2x32xf32>
    tpu.vector_store %arg16[%c0_132, %c0_133, %c0_134], %564 {strides = array<i32>} : memref<2x2x32xf32, #tpu.memory_space<vmem>>, vector<1x2x32xf32>,
    %c1_135 = arith.constant 1 : index
    %c0_136 = arith.constant 0 : index
    %c0_137 = arith.constant 0 : index
    %565 = vector.load %arg16[%c1_135, %c0_136, %c0_137] : memref<2x2x32xf32, #tpu.memory_space<vmem>>, vector<1x2x32xf32>
    %566 = vector.shape_cast %565 : vector<1x2x32xf32> to vector<2x32xf32>
    %567 = vector.shape_cast %550 : vector<2x32xf32> to vector<1x2x32xf32>
    tpu.vector_store %arg16[%c1_135, %c0_136, %c0_137], %567 {strides = array<i32>} : memref<2x2x32xf32, #tpu.memory_space<vmem>>, vector<1x2x32xf32>,
    return
  }
}

module attributes {stable_mosaic.version = 11 : i64} {
  func.func @_linear_tiled_kernel(%arg0: i32, %arg1: memref<16x32xbf16, #tpu.memory_space<vmem>>, %arg2: memref<32x128xbf16, #tpu.memory_space<vmem>>, %arg3: memref<1x128xf32, #tpu.memory_space<vmem>>, %arg4: memref<16x128xf32, #tpu.memory_space<vmem>>) attributes {dimension_semantics = [#tpu.dimension_semantics<parallel>], iteration_bounds = array<i64: 1>, scalar_prefetch = 0 : i64, scratch_operands = 0 : i64, tpu.core_type = #tpu.core_type<tc>, window_params = [{pipeline_mode = #tpu.pipeline_mode<synchronous>, transform_indices = @transform_0, window_bounds = array<i64: 16, 32>}, {transform_indices = @transform_1, window_bounds = array<i64: 32, 128>}, {transform_indices = @transform_2, window_bounds = array<i64: 1, 128>}, {transform_indices = @transform_3, window_bounds = array<i64: 16, 128>}]} {
    %c0 = arith.constant 0 : index
    %c0_0 = arith.constant 0 : index
    %0 = vector.load %arg1[%c0, %c0_0] : memref<16x32xbf16, #tpu.memory_space<vmem>>, vector<16x32xbf16>
    %c0_1 = arith.constant 0 : index
    %c0_2 = arith.constant 0 : index
    %1 = vector.load %arg2[%c0_1, %c0_2] : memref<32x128xbf16, #tpu.memory_space<vmem>>, vector<32x128xbf16>
    %cst = arith.constant dense<0.000000e+00> : vector<16x128xf32>
    %2 = tpu.matmul %0, %1, %cst {dimension_numbers = #tpu.dot_dimension_numbers<[1], [0], [0], [1], [0, 0, 1, 1], [], []>} : vector<16x32xbf16>, vector<32x128xbf16>, vector<16x128xf32> -> vector<16x128xf32>
    %c0_3 = arith.constant 0 : index
    %c0_4 = arith.constant 0 : index
    %3 = vector.load %arg3[%c0_3, %c0_4] : memref<1x128xf32, #tpu.memory_space<vmem>>, vector<1x128xf32>
    %4 = vector.broadcast %3 : vector<1x128xf32> to vector<16x128xf32>
    %5 = arith.addf %2, %4 : vector<16x128xf32>
    %c0_5 = arith.constant 0 : index
    %c0_6 = arith.constant 0 : index
    %6 = vector.load %arg4[%c0_5, %c0_6] : memref<16x128xf32, #tpu.memory_space<vmem>>, vector<16x128xf32>
    tpu.vector_store %arg4[%c0_5, %c0_6], %5 {strides = array<i32>} : memref<16x128xf32, #tpu.memory_space<vmem>>, vector<16x128xf32>,
    return
  }
  func.func @transform_0(%arg0: i32) -> (i32, i32) {
    %c0_i32 = arith.constant 0 : i32
    %c0_i32_0 = arith.constant 0 : i32
    %c0_i32_1 = arith.constant 0 : i32
    return %c0_i32, %c0_i32_0 : i32, i32
  }
  func.func @transform_1(%arg0: i32) -> (i32, i32) {
    %c0_i32 = arith.constant 0 : i32
    %c0_i32_0 = arith.constant 0 : i32
    return %c0_i32, %arg0 : i32, i32
  }
  func.func @transform_2(%arg0: i32) -> (i32, i32) {
    %c0_i32 = arith.constant 0 : i32
    %c0_i32_0 = arith.constant 0 : i32
    return %c0_i32, %arg0 : i32, i32
  }
  func.func @transform_3(%arg0: i32) -> (i32, i32) {
    %c0_i32 = arith.constant 0 : i32
    %c0_i32_0 = arith.constant 0 : i32
    return %c0_i32, %arg0 : i32, i32
  }
}

</mosaic_0001>

<bundles_post_ra>
// kernel: fwd.6
= control target key start
LH: loop header
LB: loop body
LE: loop exit
PB: predicated region body
PF: predicated region fallthrough
CT: control target
= control target key end

     0   :  { %vm71_vm0 = vcmask 1043456   ;;  %v725_v0 = vmov 0.0   ;;  %vm726_vm1 = vmmov 0   ;;  %vm55_vm2 = vcmask 64512   ;;  %s852_s1 = inlined_call_operand.vmem [shape: bf16[2,8,4], index: 1, kind: input, shape index: {}]   ;;  %s853_s0 = inlined_call_operand.vmem [shape: bf16[96,8], index: 0, kind: input, shape index: {}]   ;;  %s854_s2 = inlined_call_operand.vmem [shape: bf16[3,8,6], index: 2, kind: input, shape index: {}]   ;;  %s855_s3 = inlined_call_operand.vmem [shape: f32[16,10], index: 3, kind: output, shape index: {}]  }
   0x1   :  { %601 = vmatprep.subr.bf16.mxu0 %v725_v0  ;;  %675 = vmatprep.subr.bf16.mxu1 %v725_v0  ;;  %v25_v1 = vld [vmem:[%s852_s1] sm:$0xf]  ;;  %v539_v2 = vld [vmem:[%s852_s1 + $0x4] sm:$0xf]  ;;  %v715_v4 = vld [vmem:[%s853_s0 + $0x8] sm:$0xff]   ;;  %vm529_vm3 = vcmask 31744  }
   0x2   :  { %v73_v3 = vsel %vm71_vm0, %v539_v2, 0  ;;  %603 = vmatprep.mubr.msk.bf16.mxu0 %vm726_vm1, %v725_v0  ;;  %615 = vmatprep.mubr.msk.bf16.mxu1 %vm726_vm1, %v725_v0  ;;  %v716_v5 = vld [vmem:[%s853_s0 + $0x20] sm:$0xff]   ;;  %v157_v8 = vsel %vm71_vm0, %v25_v1, 0  ;;  %v717_v10 = vld [vmem:[%s853_s0 + $0x10] sm:$0xff]   ;;  %v718_v11 = vld [vmem:[%s853_s0 + $0x28] sm:$0xff]   ;;  %vm532_vm4 = vcmask 80896  }
   0x3   :  { %602 = vmatpush3.bf16.msra.mxu0 %v73_v3  ;;  %676 = vmatpush3.bf16.msra.mxu1 %v73_v3  ;;  %v556_v6 = vld [vmem:[%s854_s2 + $0x4] sm:$0xf]  ;;  %v258_v9 = vld [vmem:[%s854_s2] sm:$0xf]  ;;  %v719_v12 = vld [vmem:[%s853_s0 + $0x18] sm:$0xff]  }
   0x4   :  { %709 = vmatprep.subr.msk.bf16.mxu1 %vm71_vm0, %v556_v6  ;;  %v262_v7 = vsel %vm71_vm0, %v556_v6, 0  ;;  %623 = vmatprep.subr.bf16.mxu0 %v725_v0  ;;  %v362_v13 = vsel %vm71_vm0, %v258_v9, 0  ;;  %v569_v14 = vld [vmem:[%s854_s2 + $0x8] sm:$0xf]  ;;  %v720_v15 = vld [vmem:[%s853_s0] sm:$0xff]   ;;  %v723_v19 = vld [vmem:[%s853_s0 + $0x10] sm:$0xff]  }
   0x5   :  { %v721_v16 = vld [vmem:[%s853_s0] sm:$0xff]   ;;  %v722_v17 = vld [vmem:[%s853_s0 + $0x8] sm:$0xff]   ;;  %v432_v18 = vsel %vm71_vm0, %v569_v14, 0  ;;  %v724_v20 = vld [vmem:[%s853_s0 + $0x18] sm:$0xff]   ;;  %s727_s0 = smov 4  }
   0x6   :  { %604 = vmatmul.mubr.msk.bf16.vlgmr.msra.gmra.mrb[0].mxu0 %vm55_vm2, %v715_v4  ;;  %616 = vmatmul.mubr.msk.bf16.vlgmr.msra.gmra.mrb[0].mxu1 %vm55_vm2, %v716_v5 }
   0x7   :  { %646 = vmatpush3.bf16.msra.mxu1 %v262_v7  ;;  %607 = vmatprep.mubr.msk.bf16.mxu0 %vm726_vm1, %v725_v0 }
   0x8   :  { %619 = vmatprep.mubr.msk.bf16.mxu1 %vm726_vm1, %v725_v0  ;;  %710 = vmatprep.subr.msk.bf16.mxu1 %vm71_vm0, %v258_v9 }
   0x9   :  { %624 = vmatpush3.bf16.msra.mxu0 %v157_v8 }
   0xe   :  { %608 = vmatmul.mubr.msk.bf16.gmra.mrb[4].mxu0 %vm55_vm2, %v717_v10  ;;  %620 = vmatmul.mubr.msk.bf16.gmra.mrb[4].mxu1 %vm55_vm2, %v718_v11 }
   0xf   :  { %611 = vmatprep.mubr.msk.bf16.mxu0 %vm726_vm1, %v725_v0  ;;  %647 = vmatprep.mubr.msk.bf16.mxu1 %vm55_vm2, %v715_v4 }
  0x16   :  { %612 = vmatmul.mubr.msk.bf16.gmra.mrb[8].mxu0 %vm55_vm2, %v719_v12  ;;  %648 = vmatmul.mubr.msk.bf16.vlgmr.msra.gmra.mrb[8].mxu1 %vm55_vm2, %v717_v10 }
  0x17   :  { %656 = vmatpush3.bf16.msra.mxu1 %v362_v13  ;;  %625 = vmatprep.mubr.msk.bf16.mxu0 %vm726_vm1, %v725_v0 }
  0x18   :  { %651 = vmatprep.mubr.msk.bf16.mxu1 %vm55_vm2, %v719_v12  ;;  %711 = vmatprep.subr.msk.bf16.mxu1 %vm71_vm0, %v569_v14 }
  0x1e   :  { %626 = vmatmul.mubr.msk.bf16.vlgmr.msra.gmra.mrb[0].mxu0 %vm55_vm2, %v720_v15  ;;  %652 = vmatmul.mubr.msk.bf16.gmra.mrb[12].mxu1 %vm55_vm2, %v716_v5 }
  0x1f   :  { %629 = vmatprep.mubr.msk.bf16.mxu0 %vm726_vm1, %v725_v0  ;;  %657 = vmatprep.mubr.msk.bf16.mxu1 %vm55_vm2, %v721_v16 }
  0x26   :  { %630 = vmatmul.mubr.msk.bf16.gmra.mrb[4].mxu0 %vm55_vm2, %v715_v4  ;;  %658 = vmatmul.mubr.msk.bf16.vlgmr.msra.gmra.mrb[8].mxu1 %vm55_vm2, %v722_v17 }
  0x27   :  { %666 = vmatpush3.bf16.msra.mxu1 %v432_v18  ;;  %633 = vmatprep.mubr.msk.bf16.mxu0 %vm726_vm1, %v725_v0 }
  0x28   :  { %661 = vmatprep.mubr.msk.bf16.mxu1 %vm55_vm2, %v723_v19 }
  0x2e   :  { %634 = vmatmul.mubr.msk.bf16.gmra.mrb[8].mxu0 %vm55_vm2, %v717_v10  ;;  %662 = vmatmul.mubr.msk.bf16.gmra.mrb[12].mxu1 %vm55_vm2, %v724_v20 }
  0x2f   :  { %637 = vmatprep.mubr.msk.bf16.mxu0 %vm726_vm1, %v725_v0  ;;  %667 = vmatprep.mubr.msk.bf16.mxu1 %vm55_vm2, %v717_v10 }
  0x36   :  { %638 = vmatmul.mubr.msk.bf16.gmra.mrb[12].mxu0 %vm55_vm2, %v719_v12  ;;  %668 = vmatmul.mubr.msk.bf16.vlgmr.msra.gmra.mrb[8].mxu1 %vm55_vm2, %v719_v12 }
  0x37   :  { %641 = vmatprep.mubr.msk.bf16.mxu0 %vm726_vm1, %v725_v0  ;;  %671 = vmatprep.mubr.msk.bf16.mxu1 %vm55_vm2, %v716_v5 }
  0x3e   :  { %642 = vmatmul.mubr.msk.bf16.gmra.mrb[16].mxu0 %vm55_vm2, %v716_v5  ;;  %672 = vmatmul.mubr.msk.bf16.gmra.mrb[12].mxu1 %vm55_vm2, %v718_v11 }
  0xd9   :  { %v133_v21 = vpop.f32.mrb[0].mxu1 }
  0xda   :  { %v617_v22 = vpop.f32.mrb[1].mxu1 }
  0xdb   :  { %v136_v23 = vpop.f32.mrb[2].mxu1 }
  0xdc   :  { %v618_v24 = vpop.f32.mrb[3].mxu1 }
  0xe1   :  { %v141_v25 = vpop.f32.mrb[4].mxu1 }
  0xe2   :  { %v621_v26 = vpop.f32.mrb[5].mxu1 }
  0xe3   :  { %v144_v27 = vpop.f32.mrb[6].mxu1 }
  0xe4   :  { %v622_v28 = vpop.f32.mrb[7].mxu1 }
  0xf1   :  { %v193_v29 = vpop.f32.mrb[0].mxu0 }
  0xf2   :  { %v627_v30 = vpop.f32.mrb[1].mxu0  ;;  %v232_v33 = vmax.f32 %v193_v29, 0.0 }
  0xf3   :  { %v196_v31 = vpop.f32.mrb[2].mxu0 }
  0xf4   :  { %v628_v32 = vpop.f32.mrb[3].mxu0  ;;  %v233_v35 = vmax.f32 %v196_v31, 0.0 }
  0xf9   :  { %v201_v34 = vpop.f32.mrb[4].mxu0 }
  0xfa   :  { %v234_v36 = vmax.f32 %v201_v34, 0.0  ;;  %v631_v37 = vpop.f32.mrb[5].mxu0 }
  0xfb   :  { %v204_v38 = vpop.f32.mrb[6].mxu0 }
  0xfc   :  { %v242_v39 = vmax.f32 %v232_v33, %v234_v36  ;;  %v235_v40 = vmax.f32 %v204_v38, 0.0  ;;  %v632_v41 = vpop.f32.mrb[7].mxu0 }
  0xfe   :  { %v243_v42 = vmax.f32 %v233_v35, %v235_v40 }
 0x101   :  { %v209_v43 = vpop.f32.mrb[8].mxu0 }
 0x102   :  { %v236_v44 = vmax.f32 %v209_v43, 0.0  ;;  %v635_v45 = vpop.f32.mrb[9].mxu0 }
 0x103   :  { %v212_v46 = vpop.f32.mrb[10].mxu0 }
 0x104   :  { %v244_v47 = vmax.f32 %v242_v39, %v236_v44  ;;  %v237_v48 = vmax.f32 %v212_v46, 0.0  ;;  %v636_v49 = vpop.f32.mrb[11].mxu0 }
 0x106   :  { %v245_v50 = vmax.f32 %v243_v42, %v237_v48 }
 0x109   :  { %v217_v51 = vpop.f32.mrb[12].mxu0  ;;  %v669_v52 = vpop.f32.mrb[8].mxu1 }
 0x10a   :  { %v218_v53 = vadd.f32 %v217_v51, %v133_v21  ;;  %v509_v54 = vmax.f32 %v669_v52, 0.0  ;;  %v639_v55 = vpop.f32.mrb[13].mxu0  ;;  %v468_v56 = vpop.f32.mrb[9].mxu1 }
 0x10b   :  { %v507_v57 = vmax.f32 %v468_v56, 0.0  ;;  %v220_v58 = vpop.f32.mrb[14].mxu0  ;;  %v670_v59 = vpop.f32.mrb[10].mxu1 }
 0x10c   :  { %v238_v60 = vmax.f32 %v218_v53, 0.0  ;;  %v221_v61 = vadd.f32 %v220_v58, %v136_v23  ;;  %v510_v62 = vmax.f32 %v670_v59, 0.0  ;;  %v471_v63 = vpop.f32.mrb[11].mxu1  ;;  %v640_v0 = vpop.f32.mrb[15].mxu0 }
 0x10d   :  { %v515_v1 = vmax.f32 %v507_v57, %v509_v54  ;;  %v508_v2 = vmax.f32 %v471_v63, 0.0 }
 0x10e   :  { %v246_v3 = vmax.f32 %v244_v47, %v238_v60  ;;  %v239_v4 = vmax.f32 %v221_v61, 0.0 }
 0x10f   :  { %v516_v5 = vmax.f32 %v508_v2, %v510_v62 }
 0x110   :  { %v247_v6 = vmax.f32 %v245_v50, %v239_v4 }
 0x111   :  { %v225_v7 = vpop.f32.mrb[16].mxu0  ;;  %v673_v8 = vpop.f32.mrb[12].mxu1 }
 0x112   :  { %v226_v9 = vadd.f32 %v225_v7, %v141_v25  ;;  %v643_v10 = vpop.f32.mrb[17].mxu0  ;;  %v484_v11 = vpop.f32.mrb[13].mxu1  ;;  %v513_v19 = vmax.f32 %v673_v8, 0.0 }
 0x113   :  { %v511_v12 = vmax.f32 %v484_v11, 0.0  ;;  %v228_v13 = vpop.f32.mrb[18].mxu0  ;;  %v674_v14 = vpop.f32.mrb[14].mxu1 }
 0x114   :  { %v240_v15 = vmax.f32 %v226_v9, 0.0  ;;  %v229_v16 = vadd.f32 %v228_v13, %v144_v27  ;;  %v487_v17 = vpop.f32.mrb[15].mxu1  ;;  %v644_v18 = vpop.f32.mrb[19].mxu0  ;;  %v514_v24 = vmax.f32 %v674_v14, 0.0 }
 0x115   :  { %v517_v20 = vmax.f32 %v515_v1, %v511_v12  ;;  %v512_v21 = vmax.f32 %v487_v17, 0.0 }
 0x116   :  { %v248_v22 = vmax.f32 %v246_v3, %v240_v15  ;;  %v241_v23 = vmax.f32 %v229_v16, 0.0 }
 0x117   :  { %v518_v26 = vmax.f32 %v516_v5, %v512_v21  ;;  %v519_v28 = vmax.f32 %v517_v20, %v513_v19 }
 0x118   :  { %v249_v29 = vmax.f32 %v247_v6, %v241_v23 }
 0x119   :  { %v520_v30 = vmax.f32 %v518_v26, %v514_v24  ;;  %523 = vrot.lane.b32.xlu0 %v519_v28, %s727_s0 }
 0x11d   :  { %525 = vrot.lane.b32.xlu0 %v520_v30, %s727_s0 }
 0x18b   :  { %v524_v25 = vpop.permute.xlu0 %523 }
 0x18c   :  { %v530_v31 = vsel %vm529_vm3, %v248_v22, %v524_v25 }
 0x18d   :  { %533 = vst.msk [vmem:[%s855_s3] sm:$0xff] %vm532_vm4, %v530_v31 }
 0x18f   :  { %v526_v27 = vpop.permute.xlu0 %525 }
 0x190   :  { %v531_v32 = vsel %vm529_vm3, %v249_v29, %v526_v27 }
 0x191   :  { %534 = vst.msk [vmem:[%s855_s3 + $0x8] sm:$0xff] %vm532_vm4, %v531_v32 }

// kernel: fwd.11
= control target key start
LH: loop header
LB: loop body
LE: loop exit
PB: predicated region body
PF: predicated region fallthrough
CT: control target
= control target key end

     0   :  { %v157_v1 = vmov 0.0   ;;  %vm158_vm0 = vmmov 0   ;;  %s206_s0 = inlined_call_operand.vmem [shape: bf16[16,32], index: 0, kind: input, shape index: {}]   ;;  %s207_s1 = inlined_call_operand.vmem [shape: bf16[32,128], index: 1, kind: input, shape index: {}]   ;;  %s208_s2 = inlined_call_operand.vmem [shape: f32[1,128], index: 2, kind: input, shape index: {}]   ;;  %s209_s3 = inlined_call_operand.hbm [shape: f32[16,128], index: 3, kind: output, shape index: {}]  }
   0x1   :  { %v130_v0 = vld [vmem:[%s207_s1] sm:$0xff]   ;;  %117 = vmatprep.subr.bf16.mxu0 %v157_v1  ;;  %v131_v2 = vld [vmem:[%s207_s1 + $0x8] sm:$0xff]   ;;  %121 = vmatprep.mubr.msk.bf16.mxu0 %vm158_vm0, %v157_v1 }
   0x2   :  { %118 = vmatpush3.bf16.msra.mxu0 %v130_v0 }
   0x3   :  { %119 = vmatprep.subr.bf16.mxu0 %v157_v1 }
   0x4   :  { %8 = vsyncpa [#allocation3], 0  ;;  %v132_v3 = vld [vmem:[%s206_s0] sm:$0xff]   ;;  %vm46_vm1 = vcmask 261120   ;;  %s159_s20 = smov [#allocation2]  }
   0x5   :  { %v109_v4 = vld [vmem:[%s208_s2] ss:$0 sm:$0xff]  ;;  %s98_s21 = sshll.u32 %s159_s20, 4  ;;  %s99_s21 = int_to_ptr.vmem [resolvable:$true] %s98_s21 }
   0x6   :  { %120 = vmatpush3.bf16.msra.mxu0 %v131_v2  ;;  %s133_s1 = scalar_lea.vmem %s99_s21, 256  ;;  %p138_p1 = scmp.lt.s32.totalorder %s99_s21, %s99_s21 }
   0x7   :  { %p134_p0 = scmp.ne.s32.totalorder %s99_s21, %s133_s1  ;;  %p139_p2 = scmp.lt.s32.totalorder %s133_s1, %s133_s1 }
   0x9   :  { %122 = vmatmul.mubr.msk.bf16.vlgmr.msra.gmra.mrb[0].mxu0 %vm46_vm1, %v132_v3  ;;  %p140_p3 = por %p139_p2, %p138_p1 }
   0xb   :  { %p141_p4 = pnand %p140_p3, %p134_p0 }
  0xdc   :  { %v84_v5 = vpop.f32.mrb[0].mxu0 }
  0xdd   :  { %v85_v6 = vadd.f32 %v109_v4, %v84_v5  ;;  %v123_v7 = vpop.f32.mrb[1].mxu0 }
  0xde   :  { %v87_v8 = vpop.f32.mrb[2].mxu0 }
  0xdf   :  { %91 = vst [vmem:[#allocation2] sm:$0xff] %v85_v6  ;;  %v88_v9 = vadd.f32 %v109_v4, %v87_v8  ;;  %v124_v10 = vpop.f32.mrb[3].mxu0 }
  0xe1   :  { %92 = vst [vmem:[#allocation2 + $0x8] sm:$0xff] %v88_v9 }
  0xe2   :  { %144 = shalt.err (!%p141_p4)
}
  0xe3   :  { %s145_s22 = scalar_lea.hbm %s209_s3, 256 }
  0xe4   :  { %p146_p5 = scmp.ne.s32.totalorder %s209_s3, %s145_s22  ;;  %p149_p6 = scmp.lt.u32.totalorder %s145_s22, %s209_s3 }
  0xe6   :  { %p151_p7 = pnand %p149_p6, %p146_p5 }
  0xe8   :  { %154 = shalt.err (!%p151_p7)
}
  0xe9   :  { %s160_s27 = smov 128   ;;  %s161_s28 = smov 8  }
  0xea   :  { %104 = dma.vmem_to_hbm [thread:$0]  %s99_s21, 256, %s209_s3, [#allocation3], %s160_s27, %s160_s27, %s161_s28  }
  0xeb   :  { %155 = dma.done.wait [#allocation3], 256  }
  0xec   :  { %156 = vsyncadd [#allocation3], 4294967040 }
  0xed   :  { %108 = vsyncpa [#allocation3], 1 }

// kernel: fwd.8
= control target key start
LH: loop header
LB: loop body
LE: loop exit
PB: predicated region body
PF: predicated region fallthrough
CT: control target
= control target key end

     0   :  { %v1807_v1 = vmov 0.0   ;;  %v1808_v2 = vmov 0   ;;  %vm1809_vm0 = vmmov 0   ;;  %vm74_vm1 = vcmask 1044480   ;;  %s1810_s24 = smov 32   ;;  %s2170_s3 = inlined_call_operand.vmem [shape: bf16[26,256], index: 3, kind: input, shape index: {}]   ;;  %s2171_s4 = inlined_call_operand.vmem [shape: bf16[32,128], index: 4, kind: input, shape index: {}]   ;;  %s2172_s0 = inlined_call_operand.vmem [shape: bf16[16,26], index: 0, kind: input, shape index: {}]   ;;  %s2173_s5 = inlined_call_operand.vmem [shape: bf16[32,128], index: 5, kind: input, shape index: {}]   ;;  %s2174_s1 = inlined_call_operand.vmem [shape: f32[2,2,32], index: 1, kind: input, shape index: {}, may-alias: {1,2}]   ;;  %s2175_s2 = inlined_call_operand.vmem [shape: f32[2,2,32], index: 2, kind: input, shape index: {}, may-alias: {1,2}]   ;;  %s2176_s6 = inlined_call_operand.vmem [shape: f32[1,256], index: 6, kind: input, shape index: {}]   ;;  %s2177_s7 = inlined_call_operand.vmem [shape: f32[2,2,32], index: 7, kind: output, shape index: {0}]   ;;  %s2178_s8 = inlined_call_operand.vmem [shape: f32[2,2,32], index: 8, kind: output, shape index: {1}]  }
   0x1   :  { %v1668_v0 = vld [vmem:[%s2170_s3 + $0x4] ss:$8 sps:$4 sm:$0xff]   ;;  %1534 = vmatprep.subr.bf16.mxu1 %v1807_v1  ;;  %113 = vmatprep.mubr.bf16.mxu0 %v1808_v2  ;;  %v1670_v3 = vld [vmem:[%s2170_s3] ss:$8 sps:$4 sm:$0xff]   ;;  %vm70_vm2 = vcmask 211968   ;;  %vm151_vm3 = vcmask 261120   ;;  %v37_v19 = vlaneseq }
   0x2   :  { %1538 = vmatprep.mubr.msk.bf16.mxu1 %vm1809_vm0, %v1807_v1  ;;  %81 = vmatprep.subr.bf16.mxu0 %v1668_v0  ;;  %v1870_v4 = vld [vmem:[%s2171_s4] sm:$0xff]   ;;  %v1672_v5 = vld [vmem:[%s2170_s3 + $0x14] ss:$8 sps:$4 sm:$0x1f]   ;;  %v1882_v7 = vld [vmem:[%s2171_s4 + $0x8] sm:$0xff]   ;;  %vm1411_vm4 = vcmask 261126  }
   0x3   :  { %82 = vmatpush1.bf16.msra.mxu0 %v1670_v3  ;;  %v1674_v6 = vld [vmem:[%s2170_s3 + $0x10] ss:$8 sps:$4 sm:$0x1f]   ;;  %1535 = vmatpush3.bf16.msra.mxu1 %v1870_v4  ;;  %v1676_v9 = vld [vmem:[%s2172_s0] sm:$0xff]   ;;  %v1914_v17 = vld [vmem:[%s2173_s5 + $0x8] sm:$0xff]   ;;  %v38_v20 = vshrl.u32 %v37_v19, 7 }
   0x4   :  { %1444 = vmatprep.subr.msk.bf16.mxu0 %vm74_vm1, %v1672_v5  ;;  %v76_v8 = vsel %vm74_vm1, %v1674_v6, 0  ;;  %1536 = vmatprep.subr.bf16.mxu1 %v1807_v1  ;;  %v1891_v10 = vld [vmem:[%s2173_s5] sm:$0xff]   ;;  %s1811_s5 = smov 64   ;;  %vm1418_vm5 = vcmask 254976  }
   0x5   :  { %v132_v11 = vld [vmem:[%s2174_s1] sm:$0x3]  ;;  %v1447_v14 = vld [vmem:[%s2175_s2 + $0x2] sm:$0x3]  ;;  %v39_v21 = vsub.s32 0, %v38_v20  ;;  %v43_v23 = vsub.s32 1, %v38_v20 }
   0x6   :  { %v138_v12 = vpack.c.bf16 %v132_v11, %v132_v11  ;;  %v133_v13 = vld [vmem:[%s2175_s2] sm:$0x3]  ;;  %v292_v15 = vrot.slane %v1447_v14, 2  ;;  %v1446_v16 = vld [vmem:[%s2174_s1 + $0x2] sm:$0x3] }
   0x7   :  { %84 = vmatpush1.bf16.msra.mxu0 %v76_v8  ;;  %1537 = vmatpush3.bf16.msra.mxu1 %v1882_v7  ;;  %v196_v18 = vpack.c.bf16 %v1446_v16, %v1446_v16  ;;  %v35_v22 = vld [vmem:[%s2176_s6] sm:$0x3]  ;;  %s1812_s6 = smov 96  }
   0x8   :  { %1542 = vmatprep.subr.bf16.mxu0 %v1807_v1  ;;  %264 = vrot.lane.b32.xlu1 %v133_v13, %s1810_s24  ;;  %v40_v24 = vrot.slane %v35_v22, %v39_v21  ;;  %v44_v25 = vrot.slane %v35_v22, %v43_v23 }
   0x9   :  { %1550 = vmatprep.subr.bf16.mxu1 %v1807_v1 }
   0xa   :  { %1445 = vmatmul.mubr.msk.bf16.vlgmr.msra.gmra.mrb[0].mxu0 %vm70_vm2, %v1676_v9  ;;  %1539 = vmatmul.mubr.msk.bf16.vlgmr.msra.gmra.mrb[0].mxu1 %vm151_vm3, %v138_v12 }
   0xb   :  { %1543 = vmatpush3.bf16.msra.mxu0 %v1891_v10  ;;  %1546 = vmatprep.mubr.msk.bf16.mxu0 %vm1809_vm0, %v1807_v1 }
   0xc   :  { %1544 = vmatprep.subr.bf16.mxu0 %v1807_v1  ;;  %293 = vrot.lane.b32.xlu1 %v292_v15, %s1810_s24 }
   0xd   :  { %1551 = vmatpush3.bf16.msra.mxu1 %v1870_v4  ;;  %1554 = vmatprep.mubr.msk.bf16.mxu1 %vm1809_vm0, %v1807_v1 }
   0xe   :  { %1552 = vmatprep.subr.bf16.mxu1 %v1807_v1 }
   0xf   :  { %1545 = vmatpush3.bf16.msra.mxu0 %v1914_v17 }
  0x10   :  { %1558 = vmatprep.subr.bf16.mxu0 %v1807_v1 }
  0x11   :  { %1553 = vmatpush3.bf16.msra.mxu1 %v1882_v7 }
  0x12   :  { %1547 = vmatmul.mubr.msk.bf16.vlgmr.msra.gmra.mrb[4].mxu0 %vm151_vm3, %v196_v18  ;;  %1566 = vmatprep.subr.bf16.mxu1 %v1807_v1 }
  0x13   :  { %1559 = vmatpush3.bf16.msra.mxu0 %v1891_v10  ;;  %1562 = vmatprep.mubr.msk.bf16.mxu0 %vm1809_vm0, %v1807_v1 }
  0x14   :  { %1560 = vmatprep.subr.bf16.mxu0 %v1807_v1 }
  0x17   :  { %1561 = vmatpush3.bf16.msra.mxu0 %v1914_v17 }
  0x18   :  { %1574 = vmatprep.subr.bf16.mxu0 %v1807_v1 }
  0x7a   :  { %v265_v59 = vpop.permute.xlu1 %264 }
  0x7e   :  { %v294_v63 = vpop.permute.xlu1 %293 }
  0xdd   :  { %v115_v26 = vpop.f32.mrb[0].mxu0  ;;  %v189_v29 = vpop.f32.mrb[0].mxu1 }
  0xde   :  { %v1938_v27 = vadd.f32 %v115_v26, %v40_v24  ;;  %v117_v28 = vpop.f32.mrb[1].mxu0  ;;  %v1540_v32 = vpop.f32.mrb[1].mxu1 }
  0xdf   :  { %v1940_v30 = vadd.f32 %v117_v28, %v44_v25  ;;  %v119_v31 = vpop.f32.mrb[2].mxu0  ;;  %v192_v36 = vpop.f32.mrb[2].mxu1 }
  0xe0   :  { %v1942_v33 = vadd.f32 %v119_v31, %v40_v24  ;;  %v195_v34 = vadd.f32 %v189_v29, %v1938_v27  ;;  %v121_v35 = vpop.f32.mrb[3].mxu0  ;;  %v1541_v37 = vpop.f32.mrb[3].mxu1 }
  0xe1   :  { %v1945_v39 = vadd.f32 %v121_v35, %v44_v25 }
  0xe2   :  { %1679 = vtanh.f32 %v195_v34  ;;  %v1454_v47 = vmul.f32 -1.442695, %v195_v34 }
  0xe5   :  { %v246_v38 = vpop.f32.mrb[4].mxu0 }
  0xe6   :  { %v253_v40 = vrot.slane %v246_v38, 2  ;;  %v1548_v41 = vpop.f32.mrb[5].mxu0 }
  0xe7   :  { %v249_v42 = vpop.f32.mrb[6].mxu0 }
  0xe8   :  { %v255_v43 = vadd.f32 %v253_v40, %v1945_v39  ;;  %v1549_v44 = vpop.f32.mrb[7].mxu0 }
  0xea   :  { %1681 = vtanh.f32 %v255_v43  ;;  %v1455_v48 = vmul.f32 -1.442695, %v255_v43 }
  0xeb   :  { %1683 = vpow2.f32 %v1454_v47 }
  0xec   :  { %v1680_v45 = vpop.eup %1679  ;;  %1685 = vpow2.f32 %v1455_v48 }
  0xed   :  { %269 = vrot.lane.b32.xlu0 %v1680_v45, %s1811_s5 }
  0xf4   :  { %v1682_v46 = vpop.eup %1681 }
  0xf5   :  { %298 = vrot.lane.b32.xlu0 %v1682_v46, %s1811_s5  ;;  %v1684_v49 = vpop.eup %1683 }
  0xf6   :  { %v259_v50 = vadd.f32 1.0, %v1684_v49  ;;  %v1686_v51 = vpop.eup %1685 }
  0xf7   :  { %v287_v52 = vadd.f32 1.0, %v1686_v51 }
  0xf8   :  { %1687 = vrcp.f32 %v259_v50 }
  0xf9   :  { %1689 = vrcp.f32 %v287_v52 }
 0x102   :  { %v1688_v53 = vpop.eup %1687 }
 0x103   :  { %v1690_v56 = vpop.eup %1689  ;;  %v267_v60 = vmul.f32 %v1688_v53, %v265_v59 }
 0x104   :  { %v296_v0 = vmul.f32 %v1690_v56, %v294_v63 }
 0x15f   :  { %v270_v54 = vpop.permute.xlu0 %269 }
 0x160   :  { %v272_v55 = vmul.f32 %v1688_v53, %v270_v54 }
 0x162   :  { %274 = vrot.lane.b32.xlu0 %v272_v55, %s1810_s24 }
 0x167   :  { %v299_v57 = vpop.permute.xlu0 %298 }
 0x168   :  { %v301_v58 = vmul.f32 %v1690_v56, %v299_v57 }
 0x16a   :  { %303 = vrot.lane.b32.xlu1 %v301_v58, %s1810_s24 }
 0x1d4   :  { %v275_v61 = vpop.permute.xlu0 %274 }
 0x1d5   :  { %v1952_v62 = vadd.f32 %v275_v61, %v267_v60 }
 0x1d7   :  { %1691 = vtanh.f32 %v1952_v62  ;;  %v424_v49 = vrot.slane %v1952_v62, 6 }
 0x1dc   :  { %v304_v2 = vpop.permute.xlu1 %303 }
 0x1dd   :  { %v1955_v3 = vadd.f32 %v304_v2, %v296_v0 }
 0x1df   :  { %1693 = vtanh.f32 %v1955_v3 }
 0x1e1   :  { %v1692_v5 = vpop.eup %1691 }
 0x1e2   :  { %280 = vrot.lane.b32.xlu0 %v1692_v5, %s1811_s5 }
 0x1e9   :  { %v1694_v6 = vpop.eup %1693 }
 0x1ea   :  { %309 = vrot.lane.b32.xlu1 %v1694_v6, %s1811_s5 }
 0x254   :  { %v281_v8 = vpop.permute.xlu0 %280 }
 0x255   :  { %v283_v9 = vmul.f32 %v1688_v53, %v281_v8  ;;  %v451_v53 = vrot.slane %v1955_v3, 2 }
 0x257   :  { %v313_v11 = vpack.c.bf16 %v283_v9, %v283_v9 }
 0x259   :  { %315 = vrot.lane.b32.xlu0 %v313_v11, %s1810_s24 }
 0x25c   :  { %v310_v12 = vpop.permute.xlu1 %309 }
 0x25d   :  { %v312_v13 = vmul.f32 %v1690_v56, %v310_v12 }
 0x25f   :  { %v364_v14 = vpack.c.bf16 %v312_v13, %v312_v13 }
 0x261   :  { %v366_v15 = vrot.slane %v364_v14, 3 }
 0x263   :  { %367 = vrot.lane.b32.xlu1 %v366_v15, %s1810_s24 }
 0x2cb   :  { %v316_v16 = vpop.permute.xlu0 %315 }
 0x2cc   :  { %1555 = vmatmul.mubr.msk.bf16.vlgmr.msra.gmra.mrb[4].mxu1 %vm151_vm3, %v316_v16 }
 0x2cd   :  { %1567 = vmatpush3.bf16.msra.mxu1 %v1870_v4  ;;  %1570 = vmatprep.mubr.msk.bf16.mxu1 %vm1809_vm0, %v1807_v1 }
 0x2ce   :  { %1568 = vmatprep.subr.bf16.mxu1 %v1807_v1 }
 0x2d1   :  { %1569 = vmatpush3.bf16.msra.mxu1 %v1882_v7 }
 0x2d2   :  { %1582 = vmatprep.subr.bf16.mxu1 %v1807_v1 }
 0x2d5   :  { %v368_v18 = vpop.permute.xlu1 %367 }
 0x2d6   :  { %1563 = vmatmul.mubr.msk.bf16.vlgmr.msra.gmra.mrb[8].mxu0 %vm151_vm3, %v368_v18 }
 0x2d7   :  { %1575 = vmatpush3.bf16.msra.mxu0 %v1891_v10  ;;  %1578 = vmatprep.mubr.msk.bf16.mxu0 %vm1809_vm0, %v1807_v1 }
 0x2d8   :  { %1576 = vmatprep.subr.bf16.mxu0 %v1807_v1 }
 0x2db   :  { %1577 = vmatpush3.bf16.msra.mxu0 %v1914_v17 }
 0x2dc   :  { %1590 = vmatprep.subr.bf16.mxu0 %v1807_v1 }
 0x39f   :  { %v354_v19 = vpop.f32.mrb[4].mxu1 }
 0x3a0   :  { %v361_v20 = vrot.slane %v354_v19, 6  ;;  %v1556_v21 = vpop.f32.mrb[5].mxu1 }
 0x3a1   :  { %v357_v22 = vpop.f32.mrb[6].mxu1 }
 0x3a2   :  { %v363_v23 = vadd.f32 %v361_v20, %v1938_v27  ;;  %v1557_v24 = vpop.f32.mrb[7].mxu1 }
 0x3a4   :  { %1695 = vtanh.f32 %v363_v23  ;;  %v1458_v36 = vmul.f32 -1.442695, %v363_v23 }
 0x3a9   :  { %v406_v25 = vpop.f32.mrb[8].mxu0 }
 0x3aa   :  { %v413_v26 = vrot.slane %v406_v25, 4  ;;  %v1564_v28 = vpop.f32.mrb[9].mxu0 }
 0x3ab   :  { %v409_v29 = vpop.f32.mrb[10].mxu0 }
 0x3ac   :  { %v415_v31 = vadd.f32 %v413_v26, %v1945_v39  ;;  %v1565_v32 = vpop.f32.mrb[11].mxu0 }
 0x3ae   :  { %v1696_v34 = vpop.eup %1695  ;;  %1697 = vtanh.f32 %v415_v31  ;;  %v1459_v37 = vmul.f32 -1.442695, %v415_v31 }
 0x3af   :  { %428 = vrot.lane.b32.xlu0 %v1696_v34, %s1811_s5  ;;  %1699 = vpow2.f32 %v1458_v36 }
 0x3b0   :  { %1701 = vpow2.f32 %v1459_v37 }
 0x3b8   :  { %v1698_v35 = vpop.eup %1697 }
 0x3b9   :  { %455 = vrot.lane.b32.xlu1 %v1698_v35, %s1811_s5  ;;  %v1700_v38 = vpop.eup %1699 }
 0x3ba   :  { %v419_v40 = vadd.f32 1.0, %v1700_v38  ;;  %v1702_v41 = vpop.eup %1701 }
 0x3bb   :  { %v446_v42 = vadd.f32 1.0, %v1702_v41 }
 0x3bc   :  { %1703 = vrcp.f32 %v419_v40 }
 0x3bd   :  { %1705 = vrcp.f32 %v446_v42 }
 0x3c6   :  { %v1704_v43 = vpop.eup %1703 }
 0x3c7   :  { %v1706_v46 = vpop.eup %1705  ;;  %v426_v50 = vmul.f32 %v1704_v43, %v424_v49 }
 0x3c8   :  { %v453_v54 = vmul.f32 %v1706_v46, %v451_v53 }
 0x421   :  { %v429_v44 = vpop.permute.xlu0 %428 }
 0x422   :  { %v431_v45 = vmul.f32 %v1704_v43, %v429_v44 }
 0x424   :  { %433 = vrot.lane.b32.xlu0 %v431_v45, %s1810_s24 }
 0x42b   :  { %v456_v47 = vpop.permute.xlu1 %455 }
 0x42c   :  { %v458_v48 = vmul.f32 %v1706_v46, %v456_v47 }
 0x42e   :  { %460 = vrot.lane.b32.xlu1 %v458_v48, %s1810_s24 }
 0x496   :  { %v434_v51 = vpop.permute.xlu0 %433 }
 0x497   :  { %v1983_v52 = vadd.f32 %v434_v51, %v426_v50 }
 0x499   :  { %1707 = vtanh.f32 %v1983_v52  ;;  %v582_v40 = vrot.slane %v1983_v52, 6 }
 0x4a0   :  { %v461_v55 = vpop.permute.xlu1 %460 }
 0x4a1   :  { %v1987_v56 = vadd.f32 %v461_v55, %v453_v54 }
 0x4a3   :  { %v1708_v57 = vpop.eup %1707  ;;  %1709 = vtanh.f32 %v1987_v56  ;;  %v609_v44 = vrot.slane %v1987_v56, 2 }
 0x4a4   :  { %439 = vrot.lane.b32.xlu0 %v1708_v57, %s1811_s5 }
 0x4ad   :  { %v1710_v58 = vpop.eup %1709 }
 0x4ae   :  { %466 = vrot.lane.b32.xlu1 %v1710_v58, %s1811_s5 }
 0x516   :  { %v440_v59 = vpop.permute.xlu0 %439 }
 0x517   :  { %v442_v60 = vmul.f32 %v1704_v43, %v440_v59 }
 0x519   :  { %v470_v61 = vpack.c.bf16 %v442_v60, %v442_v60 }
 0x51b   :  { %v472_v62 = vrot.slane %v470_v61, 1 }
 0x51d   :  { %473 = vrot.lane.b32.xlu0 %v472_v62, %s1810_s24 }
 0x520   :  { %v467_v63 = vpop.permute.xlu1 %466 }
 0x521   :  { %v469_v0 = vmul.f32 %v1706_v46, %v467_v63 }
 0x523   :  { %v522_v2 = vpack.c.bf16 %v469_v0, %v469_v0 }
 0x525   :  { %v524_v3 = vrot.slane %v522_v2, 2 }
 0x527   :  { %525 = vrot.lane.b32.xlu1 %v524_v3, %s1810_s24 }
 0x58f   :  { %v474_v5 = vpop.permute.xlu0 %473 }
 0x590   :  { %1571 = vmatmul.mubr.msk.bf16.vlgmr.msra.gmra.mrb[8].mxu1 %vm151_vm3, %v474_v5 }
 0x591   :  { %1583 = vmatpush3.bf16.msra.mxu1 %v1870_v4  ;;  %1586 = vmatprep.mubr.msk.bf16.mxu1 %vm1809_vm0, %v1807_v1 }
 0x592   :  { %1584 = vmatprep.subr.bf16.mxu1 %v1807_v1 }
 0x595   :  { %1585 = vmatpush3.bf16.msra.mxu1 %v1882_v7 }
 0x596   :  { %1598 = vmatprep.subr.bf16.mxu1 %v1807_v1 }
 0x599   :  { %v526_v6 = vpop.permute.xlu1 %525 }
 0x59a   :  { %1579 = vmatmul.mubr.msk.bf16.vlgmr.msra.gmra.mrb[12].mxu0 %vm151_vm3, %v526_v6 }
 0x59b   :  { %1591 = vmatpush3.bf16.msra.mxu0 %v1891_v10  ;;  %1594 = vmatprep.mubr.msk.bf16.mxu0 %vm1809_vm0, %v1807_v1 }
 0x59c   :  { %1592 = vmatprep.subr.bf16.mxu0 %v1807_v1 }
 0x59f   :  { %1593 = vmatpush3.bf16.msra.mxu0 %v1914_v17 }
 0x5a0   :  { %1606 = vmatprep.subr.bf16.mxu0 %v1807_v1 }
 0x663   :  { %v512_v8 = vpop.f32.mrb[8].mxu1 }
 0x664   :  { %v519_v9 = vrot.slane %v512_v8, 4  ;;  %v1572_v11 = vpop.f32.mrb[9].mxu1 }
 0x665   :  { %v515_v12 = vpop.f32.mrb[10].mxu1 }
 0x666   :  { %v521_v13 = vadd.f32 %v519_v9, %v1938_v27  ;;  %v1573_v14 = vpop.f32.mrb[11].mxu1 }
 0x668   :  { %1711 = vtanh.f32 %v521_v13  ;;  %v1462_v24 = vmul.f32 -1.442695, %v521_v13 }
 0x66d   :  { %v564_v15 = vpop.f32.mrb[12].mxu0 }
 0x66e   :  { %v571_v16 = vrot.slane %v564_v15, 6  ;;  %v1580_v18 = vpop.f32.mrb[13].mxu0 }
 0x66f   :  { %v567_v19 = vpop.f32.mrb[14].mxu0 }
 0x670   :  { %v573_v20 = vadd.f32 %v571_v16, %v1945_v39  ;;  %v1581_v21 = vpop.f32.mrb[15].mxu0 }
 0x672   :  { %v1712_v22 = vpop.eup %1711  ;;  %1713 = vtanh.f32 %v573_v20  ;;  %v1463_v25 = vmul.f32 -1.442695, %v573_v20 }
 0x673   :  { %586 = vrot.lane.b32.xlu0 %v1712_v22, %s1811_s5  ;;  %1715 = vpow2.f32 %v1462_v24 }
 0x674   :  { %1717 = vpow2.f32 %v1463_v25 }
 0x67c   :  { %v1714_v23 = vpop.eup %1713 }
 0x67d   :  { %613 = vrot.lane.b32.xlu1 %v1714_v23, %s1811_s5  ;;  %v1716_v26 = vpop.eup %1715 }
 0x67e   :  { %v577_v28 = vadd.f32 1.0, %v1716_v26  ;;  %v1718_v29 = vpop.eup %1717 }
 0x67f   :  { %v604_v31 = vadd.f32 1.0, %v1718_v29 }
 0x680   :  { %1719 = vrcp.f32 %v577_v28 }
 0x681   :  { %1721 = vrcp.f32 %v604_v31 }
 0x68a   :  { %v1720_v32 = vpop.eup %1719 }
 0x68b   :  { %v1722_v36 = vpop.eup %1721  ;;  %v584_v41 = vmul.f32 %v1720_v32, %v582_v40 }
 0x68c   :  { %v611_v45 = vmul.f32 %v1722_v36, %v609_v44 }
 0x6e5   :  { %v587_v34 = vpop.permute.xlu0 %586 }
 0x6e6   :  { %v589_v35 = vmul.f32 %v1720_v32, %v587_v34 }
 0x6e8   :  { %591 = vrot.lane.b32.xlu0 %v589_v35, %s1810_s24 }
 0x6ef   :  { %v614_v37 = vpop.permute.xlu1 %613 }
 0x6f0   :  { %v616_v38 = vmul.f32 %v1722_v36, %v614_v37 }
 0x6f2   :  { %618 = vrot.lane.b32.xlu1 %v616_v38, %s1810_s24 }
 0x75a   :  { %v592_v42 = vpop.permute.xlu0 %591 }
 0x75b   :  { %v2015_v43 = vadd.f32 %v592_v42, %v584_v41 }
 0x75d   :  { %1723 = vtanh.f32 %v2015_v43  ;;  %v737_v24 = vrot.slane %v2015_v43, 6 }
 0x764   :  { %v619_v46 = vpop.permute.xlu1 %618 }
 0x765   :  { %v2019_v47 = vadd.f32 %v619_v46, %v611_v45 }
 0x767   :  { %v1724_v48 = vpop.eup %1723  ;;  %1725 = vtanh.f32 %v2019_v47  ;;  %v764_v29 = vrot.slane %v2019_v47, 2 }
 0x768   :  { %597 = vrot.lane.b32.xlu0 %v1724_v48, %s1811_s5 }
 0x771   :  { %v1726_v49 = vpop.eup %1725 }
 0x772   :  { %624 = vrot.lane.b32.xlu1 %v1726_v49, %s1811_s5 }
 0x7da   :  { %v598_v50 = vpop.permute.xlu0 %597 }
 0x7db   :  { %v600_v51 = vmul.f32 %v1720_v32, %v598_v50 }
 0x7dd   :  { %v628_v52 = vpack.c.bf16 %v600_v51, %v600_v51 }
 0x7df   :  { %v630_v53 = vrot.slane %v628_v52, 2 }
 0x7e1   :  { %631 = vrot.lane.b32.xlu0 %v630_v53, %s1810_s24 }
 0x7e4   :  { %v625_v54 = vpop.permute.xlu1 %624 }
 0x7e5   :  { %v627_v55 = vmul.f32 %v1722_v36, %v625_v54 }
 0x7e7   :  { %v680_v56 = vpack.c.bf16 %v627_v55, %v627_v55 }
 0x7e9   :  { %v682_v57 = vrot.slane %v680_v56, 1 }
 0x7eb   :  { %683 = vrot.lane.b32.xlu1 %v682_v57, %s1810_s24 }
 0x853   :  { %v632_v58 = vpop.permute.xlu0 %631 }
 0x854   :  { %1587 = vmatmul.mubr.msk.bf16.vlgmr.msra.gmra.mrb[12].mxu1 %vm151_vm3, %v632_v58 }
 0x855   :  { %1599 = vmatpush3.bf16.msra.mxu1 %v1870_v4  ;;  %1602 = vmatprep.mubr.msk.bf16.mxu1 %vm1809_vm0, %v1807_v1 }
 0x856   :  { %1600 = vmatprep.subr.bf16.mxu1 %v1807_v1 }
 0x859   :  { %1601 = vmatpush3.bf16.msra.mxu1 %v1882_v7 }
 0x85a   :  { %1614 = vmatprep.subr.bf16.mxu1 %v1807_v1 }
 0x85d   :  { %v684_v59 = vpop.permute.xlu1 %683 }
 0x85e   :  { %1595 = vmatmul.mubr.msk.bf16.vlgmr.msra.gmra.mrb[16].mxu0 %vm151_vm3, %v684_v59 }
 0x85f   :  { %1607 = vmatpush3.bf16.msra.mxu0 %v1891_v10  ;;  %1610 = vmatprep.mubr.msk.bf16.mxu0 %vm1809_vm0, %v1807_v1 }
 0x860   :  { %1608 = vmatprep.subr.bf16.mxu0 %v1807_v1 }
 0x863   :  { %1609 = vmatpush3.bf16.msra.mxu0 %v1914_v17 }
 0x864   :  { %1622 = vmatprep.subr.bf16.mxu0 %v1807_v1 }
 0x927   :  { %v670_v60 = vpop.f32.mrb[12].mxu1 }
 0x928   :  { %v677_v61 = vrot.slane %v670_v60, 2  ;;  %v1588_v62 = vpop.f32.mrb[13].mxu1 }
 0x929   :  { %v673_v63 = vpop.f32.mrb[14].mxu1 }
 0x92a   :  { %v679_v0 = vadd.f32 %v677_v61, %v1938_v27  ;;  %v1589_v2 = vpop.f32.mrb[15].mxu1 }
 0x92c   :  { %1727 = vtanh.f32 %v679_v0  ;;  %v1466_v13 = vmul.f32 -1.442695, %v679_v0 }
 0x931   :  { %v722_v3 = vpop.f32.mrb[16].mxu0 }
 0x932   :  { %v728_v5 = vadd.f32 %v722_v3, %v1945_v39  ;;  %v1596_v6 = vpop.f32.mrb[17].mxu0 }
 0x933   :  { %v725_v8 = vpop.f32.mrb[18].mxu0 }
 0x934   :  { %1729 = vtanh.f32 %v728_v5  ;;  %v1597_v9 = vpop.f32.mrb[19].mxu0  ;;  %v1467_v14 = vmul.f32 -1.442695, %v728_v5 }
 0x935   :  { %1731 = vpow2.f32 %v1466_v13 }
 0x936   :  { %v1728_v11 = vpop.eup %1727  ;;  %1733 = vpow2.f32 %v1467_v14 }
 0x937   :  { %741 = vrot.lane.b32.xlu0 %v1728_v11, %s1811_s5 }
 0x93e   :  { %v1730_v12 = vpop.eup %1729 }
 0x93f   :  { %768 = vrot.lane.b32.xlu1 %v1730_v12, %s1811_s5  ;;  %v1732_v27 = vpop.eup %1731 }
 0x940   :  { %v732_v15 = vadd.f32 1.0, %v1732_v27  ;;  %v1734_v16 = vpop.eup %1733 }
 0x941   :  { %v759_v18 = vadd.f32 1.0, %v1734_v16 }
 0x942   :  { %1735 = vrcp.f32 %v732_v15 }
 0x943   :  { %1737 = vrcp.f32 %v759_v18 }
 0x94c   :  { %v1736_v39 = vpop.eup %1735 }
 0x94d   :  { %v1738_v21 = vpop.eup %1737  ;;  %v739_v25 = vmul.f32 %v1736_v39, %v737_v24 }
 0x94e   :  { %v766_v31 = vmul.f32 %v1738_v21, %v764_v29 }
 0x9a9   :  { %v742_v19 = vpop.permute.xlu0 %741 }
 0x9aa   :  { %v744_v20 = vmul.f32 %v1736_v39, %v742_v19 }
 0x9ac   :  { %746 = vrot.lane.b32.xlu0 %v744_v20, %s1810_s24 }
 0x9b1   :  { %v769_v22 = vpop.permute.xlu1 %768 }
 0x9b2   :  { %v771_v23 = vmul.f32 %v1738_v21, %v769_v22 }
 0x9b4   :  { %773 = vrot.lane.b32.xlu1 %v771_v23, %s1810_s24 }
 0xa1e   :  { %v747_v26 = vpop.permute.xlu0 %746 }
 0xa1f   :  { %v2047_v28 = vadd.f32 %v747_v26, %v739_v25 }
 0xa21   :  { %1739 = vtanh.f32 %v2047_v28  ;;  %v891_v12 = vrot.slane %v2047_v28, 6 }
 0xa26   :  { %v774_v32 = vpop.permute.xlu1 %773 }
 0xa27   :  { %v2051_v34 = vadd.f32 %v774_v32, %v766_v31 }
 0xa29   :  { %1741 = vtanh.f32 %v2051_v34  ;;  %v918_v15 = vrot.slane %v2051_v34, 2 }
 0xa2b   :  { %v1740_v35 = vpop.eup %1739 }
 0xa2c   :  { %752 = vrot.lane.b32.xlu0 %v1740_v35, %s1811_s5 }
 0xa33   :  { %v1742_v36 = vpop.eup %1741 }
 0xa34   :  { %779 = vrot.lane.b32.xlu1 %v1742_v36, %s1811_s5 }
 0xa9e   :  { %v753_v37 = vpop.permute.xlu0 %752 }
 0xa9f   :  { %v755_v38 = vmul.f32 %v1736_v39, %v753_v37 }
 0xaa1   :  { %v783_v40 = vpack.c.bf16 %v755_v38, %v755_v38 }
 0xaa3   :  { %v785_v41 = vrot.slane %v783_v40, 3 }
 0xaa5   :  { %786 = vrot.lane.b32.xlu1 %v785_v41, %s1810_s24 }
 0xaa6   :  { %v780_v42 = vpop.permute.xlu1 %779 }
 0xaa7   :  { %v782_v43 = vmul.f32 %v1738_v21, %v780_v42 }
 0xaa9   :  { %v832_v44 = vpack.c.bf16 %v782_v43, %v782_v43 }
 0xaab   :  { %834 = vrot.lane.b32.xlu0 %v832_v44, %s1810_s24 }
 0xb17   :  { %v787_v45 = vpop.permute.xlu1 %786 }
 0xb18   :  { %1603 = vmatmul.mubr.msk.bf16.vlgmr.msra.gmra.mrb[16].mxu1 %vm151_vm3, %v787_v45 }
 0xb19   :  { %1615 = vmatpush3.bf16.msra.mxu1 %v1870_v4  ;;  %1618 = vmatprep.mubr.msk.bf16.mxu1 %vm1809_vm0, %v1807_v1 }
 0xb1a   :  { %1616 = vmatprep.subr.bf16.mxu1 %v1807_v1 }
 0xb1d   :  { %v835_v46 = vpop.permute.xlu0 %834  ;;  %1617 = vmatpush3.bf16.msra.mxu1 %v1882_v7 }
 0xb1e   :  { %1611 = vmatmul.mubr.msk.bf16.vlgmr.msra.gmra.mrb[20].mxu0 %vm151_vm3, %v835_v46  ;;  %1630 = vmatprep.subr.bf16.mxu1 %v1807_v1 }
 0xb1f   :  { %1623 = vmatpush3.bf16.msra.mxu0 %v1891_v10  ;;  %1626 = vmatprep.mubr.msk.bf16.mxu0 %vm1809_vm0, %v1807_v1 }
 0xb20   :  { %1624 = vmatprep.subr.bf16.mxu0 %v1807_v1 }
 0xb23   :  { %1625 = vmatpush3.bf16.msra.mxu0 %v1914_v17 }
 0xb24   :  { %1638 = vmatprep.subr.bf16.mxu0 %v1807_v1 }
 0xbeb   :  { %v825_v47 = vpop.f32.mrb[16].mxu1 }
 0xbec   :  { %v831_v48 = vadd.f32 %v825_v47, %v1942_v33  ;;  %v1604_v49 = vpop.f32.mrb[17].mxu1 }
 0xbed   :  { %v828_v50 = vpop.f32.mrb[18].mxu1 }
 0xbee   :  { %1743 = vtanh.f32 %v831_v48  ;;  %v1605_v51 = vpop.f32.mrb[19].mxu1  ;;  %v1470_v60 = vmul.f32 -1.442695, %v831_v48 }
 0xbf1   :  { %v873_v52 = vpop.f32.mrb[20].mxu0 }
 0xbf2   :  { %v880_v53 = vrot.slane %v873_v52, 2  ;;  %v1612_v54 = vpop.f32.mrb[21].mxu0 }
 0xbf3   :  { %v876_v55 = vpop.f32.mrb[22].mxu0 }
 0xbf4   :  { %v882_v56 = vadd.f32 %v880_v53, %v1940_v30  ;;  %v1613_v57 = vpop.f32.mrb[23].mxu0 }
 0xbf6   :  { %1745 = vtanh.f32 %v882_v56  ;;  %v1471_v61 = vmul.f32 -1.442695, %v882_v56 }
 0xbf7   :  { %1747 = vpow2.f32 %v1470_v60 }
 0xbf8   :  { %v1744_v58 = vpop.eup %1743  ;;  %1749 = vpow2.f32 %v1471_v61 }
 0xbf9   :  { %895 = vrot.lane.b32.xlu0 %v1744_v58, %s1811_s5 }
 0xc00   :  { %v1746_v59 = vpop.eup %1745 }
 0xc01   :  { %922 = vrot.lane.b32.xlu1 %v1746_v59, %s1811_s5  ;;  %v1748_v62 = vpop.eup %1747 }
 0xc02   :  { %v886_v63 = vadd.f32 1.0, %v1748_v62  ;;  %v1750_v0 = vpop.eup %1749 }
 0xc03   :  { %v913_v2 = vadd.f32 1.0, %v1750_v0 }
 0xc04   :  { %1751 = vrcp.f32 %v886_v63 }
 0xc05   :  { %1753 = vrcp.f32 %v913_v2 }
 0xc0e   :  { %v1752_v3 = vpop.eup %1751 }
 0xc0f   :  { %v1754_v8 = vpop.eup %1753  ;;  %v893_v13 = vmul.f32 %v1752_v3, %v891_v12 }
 0xc10   :  { %v920_v16 = vmul.f32 %v1754_v8, %v918_v15 }
 0xc6b   :  { %v896_v5 = vpop.permute.xlu0 %895 }
 0xc6c   :  { %v898_v6 = vmul.f32 %v1752_v3, %v896_v5 }
 0xc6e   :  { %900 = vrot.lane.b32.xlu0 %v898_v6, %s1810_s24 }
 0xc73   :  { %v923_v9 = vpop.permute.xlu1 %922 }
 0xc74   :  { %v925_v11 = vmul.f32 %v1754_v8, %v923_v9 }
 0xc76   :  { %927 = vrot.lane.b32.xlu1 %v925_v11, %s1810_s24 }
 0xce0   :  { %v901_v14 = vpop.permute.xlu0 %900 }
 0xce1   :  { %v2079_v27 = vadd.f32 %v901_v14, %v893_v13 }
 0xce3   :  { %1755 = vtanh.f32 %v2079_v27  ;;  %v1048_v60 = vrot.slane %v2079_v27, 6 }
 0xce8   :  { %v928_v18 = vpop.permute.xlu1 %927 }
 0xce9   :  { %v2083_v39 = vadd.f32 %v928_v18, %v920_v16 }
 0xceb   :  { %1757 = vtanh.f32 %v2083_v39  ;;  %v1075_v0 = vrot.slane %v2083_v39, 2 }
 0xced   :  { %v1756_v19 = vpop.eup %1755 }
 0xcee   :  { %906 = vrot.lane.b32.xlu0 %v1756_v19, %s1811_s5 }
 0xcf5   :  { %v1758_v20 = vpop.eup %1757 }
 0xcf6   :  { %933 = vrot.lane.b32.xlu1 %v1758_v20, %s1811_s5 }
 0xd60   :  { %v907_v21 = vpop.permute.xlu0 %906 }
 0xd61   :  { %v909_v22 = vmul.f32 %v1752_v3, %v907_v21 }
 0xd63   :  { %v937_v23 = vpack.c.bf16 %v909_v22, %v909_v22 }
 0xd65   :  { %939 = vrot.lane.b32.xlu0 %v937_v23, %s1810_s24 }
 0xd68   :  { %v934_v24 = vpop.permute.xlu1 %933 }
 0xd69   :  { %v936_v25 = vmul.f32 %v1754_v8, %v934_v24 }
 0xd6b   :  { %v988_v26 = vpack.c.bf16 %v936_v25, %v936_v25 }
 0xd6d   :  { %v990_v28 = vrot.slane %v988_v26, 3 }
 0xd6f   :  { %991 = vrot.lane.b32.xlu1 %v990_v28, %s1810_s24 }
 0xdd7   :  { %v940_v29 = vpop.permute.xlu0 %939 }
 0xdd8   :  { %1619 = vmatmul.mubr.msk.bf16.vlgmr.msra.gmra.mrb[20].mxu1 %vm151_vm3, %v940_v29 }
 0xdd9   :  { %1631 = vmatpush3.bf16.msra.mxu1 %v1870_v4  ;;  %1634 = vmatprep.mubr.msk.bf16.mxu1 %vm1809_vm0, %v1807_v1 }
 0xdda   :  { %1632 = vmatprep.subr.bf16.mxu1 %v1807_v1 }
 0xddd   :  { %1633 = vmatpush3.bf16.msra.mxu1 %v1882_v7 }
 0xdde   :  { %1646 = vmatprep.subr.bf16.mxu1 %v1807_v1 }
 0xde1   :  { %v992_v31 = vpop.permute.xlu1 %991 }
 0xde2   :  { %1627 = vmatmul.mubr.msk.bf16.vlgmr.msra.gmra.mrb[24].mxu0 %vm151_vm3, %v992_v31 }
 0xde3   :  { %1639 = vmatpush3.bf16.msra.mxu0 %v1891_v10  ;;  %1642 = vmatprep.mubr.msk.bf16.mxu0 %vm1809_vm0, %v1807_v1 }
 0xde4   :  { %1640 = vmatprep.subr.bf16.mxu0 %v1807_v1 }
 0xde7   :  { %1641 = vmatpush3.bf16.msra.mxu0 %v1914_v17 }
 0xde8   :  { %1654 = vmatprep.subr.bf16.mxu0 %v1807_v1 }
 0xeab   :  { %v978_v32 = vpop.f32.mrb[20].mxu1 }
 0xeac   :  { %v985_v34 = vrot.slane %v978_v32, 6  ;;  %v1620_v35 = vpop.f32.mrb[21].mxu1 }
 0xead   :  { %v981_v36 = vpop.f32.mrb[22].mxu1 }
 0xeae   :  { %v987_v37 = vadd.f32 %v985_v34, %v1942_v33  ;;  %v1621_v38 = vpop.f32.mrb[23].mxu1 }
 0xeb0   :  { %1759 = vtanh.f32 %v987_v37  ;;  %v1474_v48 = vmul.f32 -1.442695, %v987_v37 }
 0xeb5   :  { %v1030_v40 = vpop.f32.mrb[24].mxu0 }
 0xeb6   :  { %v1037_v41 = vrot.slane %v1030_v40, 4  ;;  %v1628_v42 = vpop.f32.mrb[25].mxu0 }
 0xeb7   :  { %v1033_v43 = vpop.f32.mrb[26].mxu0 }
 0xeb8   :  { %v1039_v44 = vadd.f32 %v1037_v41, %v1940_v30  ;;  %v1629_v45 = vpop.f32.mrb[27].mxu0 }
 0xeba   :  { %v1760_v46 = vpop.eup %1759  ;;  %1761 = vtanh.f32 %v1039_v44  ;;  %v1475_v49 = vmul.f32 -1.442695, %v1039_v44 }
 0xebb   :  { %1052 = vrot.lane.b32.xlu0 %v1760_v46, %s1811_s5  ;;  %1763 = vpow2.f32 %v1474_v48 }
 0xebc   :  { %1765 = vpow2.f32 %v1475_v49 }
 0xec4   :  { %v1762_v47 = vpop.eup %1761 }
 0xec5   :  { %1079 = vrot.lane.b32.xlu1 %v1762_v47, %s1811_s5  ;;  %v1764_v50 = vpop.eup %1763 }
 0xec6   :  { %v1043_v51 = vadd.f32 1.0, %v1764_v50  ;;  %v1766_v52 = vpop.eup %1765 }
 0xec7   :  { %v1070_v53 = vadd.f32 1.0, %v1766_v52 }
 0xec8   :  { %1767 = vrcp.f32 %v1043_v51 }
 0xec9   :  { %1769 = vrcp.f32 %v1070_v53 }
 0xed2   :  { %v1768_v54 = vpop.eup %1767 }
 0xed3   :  { %v1770_v57 = vpop.eup %1769  ;;  %v1050_v61 = vmul.f32 %v1768_v54, %v1048_v60 }
 0xed4   :  { %v1077_v2 = vmul.f32 %v1770_v57, %v1075_v0 }
 0xf2d   :  { %v1053_v55 = vpop.permute.xlu0 %1052 }
 0xf2e   :  { %v1055_v56 = vmul.f32 %v1768_v54, %v1053_v55 }
 0xf30   :  { %1057 = vrot.lane.b32.xlu0 %v1055_v56, %s1810_s24 }
 0xf37   :  { %v1080_v58 = vpop.permute.xlu1 %1079 }
 0xf38   :  { %v1082_v59 = vmul.f32 %v1770_v57, %v1080_v58 }
 0xf3a   :  { %1084 = vrot.lane.b32.xlu1 %v1082_v59, %s1810_s24 }
 0xfa2   :  { %v1058_v62 = vpop.permute.xlu0 %1057 }
 0xfa3   :  { %v2111_v63 = vadd.f32 %v1058_v62, %v1050_v61 }
 0xfa5   :  { %1771 = vtanh.f32 %v2111_v63  ;;  %v1206_v44 = vrot.slane %v2111_v63, 6 }
 0xfac   :  { %v1085_v3 = vpop.permute.xlu1 %1084 }
 0xfad   :  { %v2115_v5 = vadd.f32 %v1085_v3, %v1077_v2 }
 0xfaf   :  { %v1772_v6 = vpop.eup %1771  ;;  %1773 = vtanh.f32 %v2115_v5  ;;  %v1233_v48 = vrot.slane %v2115_v5, 2 }
 0xfb0   :  { %1063 = vrot.lane.b32.xlu0 %v1772_v6, %s1811_s5 }
 0xfb9   :  { %v1774_v8 = vpop.eup %1773 }
 0xfba   :  { %1090 = vrot.lane.b32.xlu1 %v1774_v8, %s1811_s5 }
0x1022   :  { %v1064_v9 = vpop.permute.xlu0 %1063 }
0x1023   :  { %v1066_v11 = vmul.f32 %v1768_v54, %v1064_v9 }
0x1025   :  { %v1094_v12 = vpack.c.bf16 %v1066_v11, %v1066_v11 }
0x1027   :  { %v1096_v13 = vrot.slane %v1094_v12, 1 }
0x1029   :  { %1097 = vrot.lane.b32.xlu0 %v1096_v13, %s1810_s24 }
0x102c   :  { %v1091_v14 = vpop.permute.xlu1 %1090 }
0x102d   :  { %v1093_v27 = vmul.f32 %v1770_v57, %v1091_v14 }
0x102f   :  { %v1146_v15 = vpack.c.bf16 %v1093_v27, %v1093_v27 }
0x1031   :  { %v1148_v16 = vrot.slane %v1146_v15, 2 }
0x1033   :  { %1149 = vrot.lane.b32.xlu1 %v1148_v16, %s1810_s24 }
0x109b   :  { %v1098_v18 = vpop.permute.xlu0 %1097 }
0x109c   :  { %1635 = vmatmul.mubr.msk.bf16.vlgmr.msra.gmra.mrb[24].mxu1 %vm151_vm3, %v1098_v18 }
0x109d   :  { %1647 = vmatpush3.bf16.msra.mxu1 %v1870_v4  ;;  %1650 = vmatprep.mubr.msk.bf16.mxu1 %vm1809_vm0, %v1807_v1 }
0x109e   :  { %1648 = vmatprep.subr.bf16.mxu1 %v1807_v1 }
0x10a1   :  { %1649 = vmatpush3.bf16.msra.mxu1 %v1882_v7 }
0x10a5   :  { %v1150_v39 = vpop.permute.xlu1 %1149 }
0x10a6   :  { %1643 = vmatmul.mubr.msk.bf16.vlgmr.msra.gmra.mrb[28].mxu0 %vm151_vm3, %v1150_v39 }
0x10a7   :  { %1655 = vmatpush3.bf16.msra.mxu0 %v1891_v10  ;;  %1658 = vmatprep.mubr.msk.bf16.mxu0 %vm1809_vm0, %v1807_v1 }
0x10a8   :  { %1656 = vmatprep.subr.bf16.mxu0 %v1807_v1 }
0x10ab   :  { %1657 = vmatpush3.bf16.msra.mxu0 %v1914_v17 }
0x116f   :  { %v1136_v4 = vpop.f32.mrb[24].mxu1 }
0x1170   :  { %v1143_v19 = vrot.slane %v1136_v4, 4  ;;  %v1636_v20 = vpop.f32.mrb[25].mxu1 }
0x1171   :  { %v1139_v21 = vpop.f32.mrb[26].mxu1 }
0x1172   :  { %v1145_v22 = vadd.f32 %v1143_v19, %v1942_v33  ;;  %v1637_v23 = vpop.f32.mrb[27].mxu1 }
0x1174   :  { %1775 = vtanh.f32 %v1145_v22  ;;  %v1478_v17 = vmul.f32 -1.442695, %v1145_v22 }
0x1179   :  { %v1188_v7 = vpop.f32.mrb[28].mxu0 }
0x117a   :  { %v1195_v24 = vrot.slane %v1188_v7, 6  ;;  %v1644_v25 = vpop.f32.mrb[29].mxu0 }
0x117b   :  { %v1191_v26 = vpop.f32.mrb[30].mxu0 }
0x117c   :  { %v1197_v10 = vadd.f32 %v1195_v24, %v1940_v30  ;;  %v1645_v28 = vpop.f32.mrb[31].mxu0 }
0x117e   :  { %v1776_v29 = vpop.eup %1775  ;;  %1777 = vtanh.f32 %v1197_v10  ;;  %v1479_v31 = vmul.f32 -1.442695, %v1197_v10 }
0x117f   :  { %1210 = vrot.lane.b32.xlu0 %v1776_v29, %s1811_s5  ;;  %1779 = vpow2.f32 %v1478_v17 }
0x1180   :  { %1781 = vpow2.f32 %v1479_v31 }
0x1188   :  { %v1778_v1 = vpop.eup %1777 }
0x1189   :  { %1237 = vrot.lane.b32.xlu1 %v1778_v1, %s1811_s5  ;;  %v1780_v32 = vpop.eup %1779 }
0x118a   :  { %v1201_v34 = vadd.f32 1.0, %v1780_v32  ;;  %v1782_v35 = vpop.eup %1781 }
0x118b   :  { %v1228_v36 = vadd.f32 1.0, %v1782_v35 }
0x118c   :  { %1783 = vrcp.f32 %v1201_v34 }
0x118d   :  { %1785 = vrcp.f32 %v1228_v36 }
0x1196   :  { %v1784_v37 = vpop.eup %1783 }
0x1197   :  { %v1786_v41 = vpop.eup %1785  ;;  %v1208_v45 = vmul.f32 %v1784_v37, %v1206_v44 }
0x1198   :  { %v1235_v49 = vmul.f32 %v1786_v41, %v1233_v48 }
0x11f1   :  { %v1211_v38 = vpop.permute.xlu0 %1210 }
0x11f2   :  { %v1213_v40 = vmul.f32 %v1784_v37, %v1211_v38 }
0x11f4   :  { %1215 = vrot.lane.b32.xlu0 %v1213_v40, %s1810_s24 }
0x11fb   :  { %v1238_v42 = vpop.permute.xlu1 %1237 }
0x11fc   :  { %v1240_v43 = vmul.f32 %v1786_v41, %v1238_v42 }
0x11fe   :  { %1242 = vrot.lane.b32.xlu1 %v1240_v43, %s1810_s24 }
0x1266   :  { %v1216_v46 = vpop.permute.xlu0 %1215 }
0x1267   :  { %v1218_v47 = vadd.f32 %v1216_v46, %v1208_v45 }
0x1269   :  { %1787 = vtanh.f32 %v1218_v47  ;;  %v1361_v24 = vrot.slane %v1218_v47, 6 }
0x1270   :  { %v1243_v50 = vpop.permute.xlu1 %1242 }
0x1271   :  { %v1245_v51 = vadd.f32 %v1243_v50, %v1235_v49 }
0x1273   :  { %v1788_v52 = vpop.eup %1787  ;;  %1789 = vtanh.f32 %v1245_v51  ;;  %v1388_v28 = vrot.slane %v1245_v51, 2 }
0x1274   :  { %1221 = vrot.lane.b32.xlu0 %v1788_v52, %s1811_s5 }
0x127d   :  { %v1790_v53 = vpop.eup %1789 }
0x127e   :  { %1248 = vrot.lane.b32.xlu1 %v1790_v53, %s1811_s5 }
0x12e6   :  { %v1222_v54 = vpop.permute.xlu0 %1221 }
0x12e7   :  { %v1224_v55 = vmul.f32 %v1784_v37, %v1222_v54 }
0x12e9   :  { %v1252_v56 = vpack.c.bf16 %v1224_v55, %v1224_v55 }
0x12eb   :  { %v1254_v57 = vrot.slane %v1252_v56, 2 }
0x12ed   :  { %1255 = vrot.lane.b32.xlu0 %v1254_v57, %s1810_s24 }
0x12f0   :  { %v1249_v58 = vpop.permute.xlu1 %1248 }
0x12f1   :  { %v1251_v59 = vmul.f32 %v1786_v41, %v1249_v58 }
0x12f3   :  { %v1304_v60 = vpack.c.bf16 %v1251_v59, %v1251_v59 }
0x12f5   :  { %v1306_v61 = vrot.slane %v1304_v60, 1 }
0x12f7   :  { %1307 = vrot.lane.b32.xlu1 %v1306_v61, %s1810_s24 }
0x135f   :  { %v1256_v62 = vpop.permute.xlu0 %1255 }
0x1360   :  { %1651 = vmatmul.mubr.msk.bf16.vlgmr.msra.gmra.mrb[28].mxu1 %vm151_vm3, %v1256_v62 }
0x1369   :  { %v1308_v63 = vpop.permute.xlu1 %1307 }
0x136a   :  { %1659 = vmatmul.mubr.msk.bf16.vlgmr.msra.gmra.mrb[32].mxu0 %vm151_vm3, %v1308_v63 }
0x1433   :  { %v1294_v0 = vpop.f32.mrb[28].mxu1 }
0x1434   :  { %v1301_v2 = vrot.slane %v1294_v0, 2  ;;  %v1652_v3 = vpop.f32.mrb[29].mxu1 }
0x1435   :  { %v1297_v5 = vpop.f32.mrb[30].mxu1 }
0x1436   :  { %v1303_v6 = vadd.f32 %v1301_v2, %v1942_v33  ;;  %v1653_v8 = vpop.f32.mrb[31].mxu1 }
0x1438   :  { %1791 = vtanh.f32 %v1303_v6  ;;  %v1482_v16 = vmul.f32 -1.442695, %v1303_v6 }
0x143d   :  { %v1346_v9 = vpop.f32.mrb[32].mxu0 }
0x143e   :  { %v1352_v11 = vadd.f32 %v1346_v9, %v1940_v30  ;;  %v1660_v12 = vpop.f32.mrb[33].mxu0 }
0x143f   :  { %v1349_v13 = vpop.f32.mrb[34].mxu0 }
0x1440   :  { %1793 = vtanh.f32 %v1352_v11  ;;  %v1661_v14 = vpop.f32.mrb[35].mxu0  ;;  %v1483_v18 = vmul.f32 -1.442695, %v1352_v11 }
0x1441   :  { %1795 = vpow2.f32 %v1482_v16 }
0x1442   :  { %v1792_v27 = vpop.eup %1791  ;;  %1797 = vpow2.f32 %v1483_v18 }
0x1443   :  { %1365 = vrot.lane.b32.xlu0 %v1792_v27, %s1811_s5 }
0x144a   :  { %v1794_v15 = vpop.eup %1793 }
0x144b   :  { %1392 = vrot.lane.b32.xlu1 %v1794_v15, %s1811_s5  ;;  %v1796_v33 = vpop.eup %1795 }
0x144c   :  { %v1356_v39 = vadd.f32 1.0, %v1796_v33  ;;  %v1798_v4 = vpop.eup %1797 }
0x144d   :  { %v1383_v19 = vadd.f32 1.0, %v1798_v4 }
0x144e   :  { %1799 = vrcp.f32 %v1356_v39 }
0x144f   :  { %1801 = vrcp.f32 %v1383_v19 }
0x1458   :  { %v1800_v30 = vpop.eup %1799 }
0x1459   :  { %v1802_v22 = vpop.eup %1801  ;;  %v1363_v25 = vmul.f32 %v1800_v30, %v1361_v24 }
0x145a   :  { %v1390_v29 = vmul.f32 %v1802_v22, %v1388_v28 }
0x14b5   :  { %v1366_v20 = vpop.permute.xlu0 %1365 }
0x14b6   :  { %v1368_v21 = vmul.f32 %v1800_v30, %v1366_v20 }
0x14b8   :  { %1370 = vrot.lane.b32.xlu0 %v1368_v21, %s1810_s24 }
0x14bd   :  { %v1393_v23 = vpop.permute.xlu1 %1392 }
0x14be   :  { %v1395_v7 = vmul.f32 %v1802_v22, %v1393_v23 }
0x14c0   :  { %1397 = vrot.lane.b32.xlu1 %v1395_v7, %s1810_s24 }
0x152a   :  { %v1371_v26 = vpop.permute.xlu0 %1370 }
0x152b   :  { %v1373_v10 = vadd.f32 %v1371_v26, %v1363_v25 }
0x152d   :  { %1803 = vtanh.f32 %v1373_v10 }
0x1532   :  { %v1398_v1 = vpop.permute.xlu1 %1397 }
0x1533   :  { %v1400_v17 = vadd.f32 %v1398_v1, %v1390_v29 }
0x1535   :  { %1805 = vtanh.f32 %v1400_v17 }
0x1537   :  { %v1804_v31 = vpop.eup %1803 }
0x1538   :  { %1376 = vrot.lane.b32.xlu0 %v1804_v31, %s1811_s5 }
0x153f   :  { %v1806_v32 = vpop.eup %1805 }
0x1540   :  { %1403 = vrot.lane.b32.xlu1 %v1806_v32, %s1811_s5 }
0x15aa   :  { %v1377_v34 = vpop.permute.xlu0 %1376 }
0x15ab   :  { %v1379_v35 = vmul.f32 %v1800_v30, %v1377_v34 }
0x15ad   :  { %1408 = vrot.lane.b32.xlu0 %v1379_v35, %s1810_s24 }
0x15b1   :  { %1421 = vrot.lane.b32.xlu0 %v1373_v10, %s1812_s6 }
0x15b2   :  { %v1404_v36 = vpop.permute.xlu1 %1403 }
0x15b3   :  { %v1406_v37 = vmul.f32 %v1802_v22, %v1404_v36 }
0x15b5   :  { %1414 = vrot.lane.b32.xlu1 %v1406_v37, %s1810_s24 }
0x15b9   :  { %1426 = vrot.lane.b32.xlu1 %v1400_v17, %s1812_s6 }
0x161f   :  { %v1409_v38 = vpop.permute.xlu0 %1408 }
0x1620   :  { %1412 = vst.msk [vmem:[%s2177_s7 - $0x6] sm:$0xc0] %vm1411_vm4, %v1409_v38 }
0x1623   :  { %v1422_v40 = vpop.permute.xlu0 %1421 }
0x1624   :  { %1424 = vst.msk [vmem:[%s2178_s8 - $0x6] sm:$0xc0] %vm1411_vm4, %v1422_v40 }
0x1627   :  { %v1415_v41 = vpop.permute.xlu1 %1414 }
0x1628   :  { %1484 = vst.msk [vmem:[%s2177_s7 + $0x2] sm:$0x3] %vm1418_vm5, %v1415_v41 }
0x162b   :  { %v1427_v42 = vpop.permute.xlu1 %1426 }
0x162c   :  { %1485 = vst.msk [vmem:[%s2178_s8 + $0x2] sm:$0x3] %vm1418_vm5, %v1427_v42 }

// kernel: fwd.9
= control target key start
LH: loop header
LB: loop body
LE: loop exit
PB: predicated region body
PF: predicated region fallthrough
CT: control target
= control target key end

     0   :  { %v1845_v2 = vmov 0.0   ;;  %vm75_vm0 = vcmask 1044480   ;;  %v1846_v6 = vmov 0   ;;  %vm71_vm1 = vcmask 211968   ;;  %s1848_s22 = smov 32   ;;  %s2222_s0 = inlined_call_operand.vmem [shape: bf16[16,26], index: 0, kind: input, shape index: {}]   ;;  %s2223_s1 = inlined_call_operand.vmem [shape: f32[2,2,32], index: 1, kind: input, shape index: {}]   ;;  %s2224_s2 = inlined_call_operand.vmem [shape: f32[2,2,32], index: 2, kind: input, shape index: {}]   ;;  %s2225_s3 = inlined_call_operand.vmem [shape: bf16[26,256], index: 3, kind: input, shape index: {}]   ;;  %s2226_s4 = inlined_call_operand.vmem [shape: bf16[32,128], index: 4, kind: input, shape index: {}]   ;;  %s2227_s5 = inlined_call_operand.vmem [shape: bf16[32,128], index: 5, kind: input, shape index: {}]   ;;  %s2228_s6 = inlined_call_operand.vmem [shape: f32[1,256], index: 6, kind: input, shape index: {}]   ;;  %s2229_s7 = inlined_call_operand.vmem [shape: f32[2,2,32], index: 7, kind: output, shape index: {0}]   ;;  %s2230_s8 = inlined_call_operand.hbm [shape: f32[2,2,32], index: 8, kind: output, shape index: {1}]  }
   0x1   :  { %v1682_v0 = vld [vmem:[%s2225_s3 + $0x4] ss:$8 sps:$4 sm:$0xff]   ;;  %v1684_v1 = vld [vmem:[%s2225_s3] ss:$8 sps:$4 sm:$0xff]   ;;  %1546 = vmatprep.subr.bf16.mxu1 %v1845_v2  ;;  %114 = vmatprep.mubr.bf16.mxu0 %v1846_v6  ;;  %vm1847_vm2 = vmmov 0   ;;  %vm152_vm3 = vcmask 261120  }
   0x2   :  { %82 = vmatprep.subr.bf16.mxu0 %v1682_v0  ;;  %v1908_v3 = vld [vmem:[%s2226_s4] sm:$0xff]   ;;  %v1686_v4 = vld [vmem:[%s2225_s3 + $0x14] ss:$8 sps:$4 sm:$0x1f]   ;;  %v1920_v7 = vld [vmem:[%s2226_s4 + $0x8] sm:$0xff]   ;;  %1550 = vmatprep.mubr.msk.bf16.mxu1 %vm1847_vm2, %v1845_v2 }
   0x3   :  { %83 = vmatpush1.bf16.msra.mxu0 %v1684_v1  ;;  %v1688_v5 = vld [vmem:[%s2225_s3 + $0x10] ss:$8 sps:$4 sm:$0x1f]   ;;  %1547 = vmatpush3.bf16.msra.mxu1 %v1908_v3  ;;  %v1690_v9 = vld [vmem:[%s2222_s0] sm:$0xff]  }
   0x4   :  { %1457 = vmatprep.subr.msk.bf16.mxu0 %vm75_vm0, %v1686_v4  ;;  %v77_v8 = vsel %vm75_vm0, %v1688_v5, 0  ;;  %1548 = vmatprep.subr.bf16.mxu1 %v1845_v2  ;;  %v1931_v10 = vld [vmem:[%s2227_s5] sm:$0xff]  }
   0x5   :  { %v133_v11 = vld [vmem:[%s2223_s1] sm:$0x3]  ;;  %v1460_v14 = vld [vmem:[%s2224_s2 + $0x2] sm:$0x3] }
   0x6   :  { %v139_v12 = vpack.c.bf16 %v133_v11, %v133_v11  ;;  %v134_v13 = vld [vmem:[%s2224_s2] sm:$0x3]  ;;  %v293_v15 = vrot.slane %v1460_v14, 2 }
   0x7   :  { %85 = vmatpush1.bf16.msra.mxu0 %v77_v8  ;;  %1549 = vmatpush3.bf16.msra.mxu1 %v1920_v7 }
   0x8   :  { %1554 = vmatprep.subr.bf16.mxu0 %v1845_v2  ;;  %265 = vrot.lane.b32.xlu1 %v134_v13, %s1848_s22 }
   0x9   :  { %1562 = vmatprep.subr.bf16.mxu1 %v1845_v2 }
   0xa   :  { %1458 = vmatmul.mubr.msk.bf16.vlgmr.msra.gmra.mrb[0].mxu0 %vm71_vm1, %v1690_v9 }
   0xb   :  { %14 = vsyncpa [#allocation3], 0  ;;  %1555 = vmatpush3.bf16.msra.mxu0 %v1931_v10  ;;  %1551 = vmatmul.mubr.msk.bf16.vlgmr.msra.gmra.mrb[0].mxu1 %vm152_vm3, %v139_v12  ;;  %v1951_v16 = vld [vmem:[%s2227_s5 + $0x8] sm:$0xff]   ;;  %v1459_v17 = vld [vmem:[%s2223_s1 + $0x2] sm:$0x3]  ;;  %v38_v19 = vlaneseq  ;;  %s1849_s5 = smov 64  }
   0xc   :  { %1556 = vmatprep.subr.bf16.mxu0 %v1845_v2  ;;  %1558 = vmatprep.mubr.msk.bf16.mxu0 %vm1847_vm2, %v1845_v2  ;;  %v197_v18 = vpack.c.bf16 %v1459_v17, %v1459_v17  ;;  %v36_v22 = vld [vmem:[%s2228_s6] sm:$0x3]  ;;  %s1850_s6 = smov 96   ;;  %vm1412_vm4 = vcmask 261126   ;;  %s1851_s29 = smov [#allocation2]   ;;  %vm1419_vm5 = vcmask 254976  }
   0xd   :  { %294 = vrot.lane.b32.xlu1 %v293_v15, %s1848_s22  ;;  %1563 = vmatpush3.bf16.msra.mxu1 %v1908_v3  ;;  %v39_v20 = vshrl.u32 %v38_v19, 7  ;;  %s1439_s30 = sshll.u32 %s1851_s29, 4  ;;  %s1440_s30 = int_to_ptr.vmem [resolvable:$true] %s1439_s30 }
   0xe   :  { %1564 = vmatprep.subr.bf16.mxu1 %v1845_v2  ;;  %1566 = vmatprep.mubr.msk.bf16.mxu1 %vm1847_vm2, %v1845_v2  ;;  %s1821_s9 = scalar_lea.vmem %s1440_s30, 64  ;;  %p1826_p1 = scmp.lt.s32.totalorder %s1440_s30, %s1440_s30 }
   0xf   :  { %1557 = vmatpush3.bf16.msra.mxu0 %v1951_v16  ;;  %v40_v21 = vsub.s32 0, %v39_v20  ;;  %v44_v23 = vsub.s32 1, %v39_v20  ;;  %p1822_p0 = scmp.ne.s32.totalorder %s1440_s30, %s1821_s9  ;;  %p1827_p2 = scmp.lt.s32.totalorder %s1821_s9, %s1821_s9 }
  0x10   :  { %1570 = vmatprep.subr.bf16.mxu0 %v1845_v2 }
  0x11   :  { %1565 = vmatpush3.bf16.msra.mxu1 %v1920_v7  ;;  %v41_v24 = vrot.slane %v36_v22, %v40_v21  ;;  %v45_v25 = vrot.slane %v36_v22, %v44_v23  ;;  %p1828_p3 = por %p1827_p2, %p1826_p1 }
  0x12   :  { %1559 = vmatmul.mubr.msk.bf16.vlgmr.msra.gmra.mrb[4].mxu0 %vm152_vm3, %v197_v18  ;;  %1578 = vmatprep.subr.bf16.mxu1 %v1845_v2 }
  0x13   :  { %1571 = vmatpush3.bf16.msra.mxu0 %v1931_v10  ;;  %1574 = vmatprep.mubr.msk.bf16.mxu0 %vm1847_vm2, %v1845_v2  ;;  %p1829_p4 = pnand %p1828_p3, %p1822_p0 }
  0x14   :  { %1572 = vmatprep.subr.bf16.mxu0 %v1845_v2 }
  0x17   :  { %1573 = vmatpush3.bf16.msra.mxu0 %v1951_v16 }
  0x18   :  { %1586 = vmatprep.subr.bf16.mxu0 %v1845_v2 }
  0x7a   :  { %v266_v59 = vpop.permute.xlu1 %265 }
  0x7f   :  { %v295_v63 = vpop.permute.xlu1 %294 }
  0xdd   :  { %v116_v26 = vpop.f32.mrb[0].mxu0 }
  0xde   :  { %v1978_v27 = vadd.f32 %v116_v26, %v41_v24  ;;  %v118_v28 = vpop.f32.mrb[1].mxu0  ;;  %v190_v29 = vpop.f32.mrb[0].mxu1 }
  0xdf   :  { %v1980_v30 = vadd.f32 %v118_v28, %v45_v25  ;;  %v120_v31 = vpop.f32.mrb[2].mxu0  ;;  %v1552_v32 = vpop.f32.mrb[1].mxu1 }
  0xe0   :  { %v1982_v33 = vadd.f32 %v120_v31, %v41_v24  ;;  %v196_v34 = vadd.f32 %v190_v29, %v1978_v27  ;;  %v122_v35 = vpop.f32.mrb[3].mxu0  ;;  %v193_v36 = vpop.f32.mrb[2].mxu1 }
  0xe1   :  { %v1553_v37 = vpop.f32.mrb[3].mxu1  ;;  %v1985_v39 = vadd.f32 %v122_v35, %v45_v25 }
  0xe2   :  { %1693 = vtanh.f32 %v196_v34  ;;  %v1467_v47 = vmul.f32 -1.442695, %v196_v34 }
  0xe5   :  { %v247_v38 = vpop.f32.mrb[4].mxu0 }
  0xe6   :  { %v254_v40 = vrot.slane %v247_v38, 2  ;;  %v1560_v41 = vpop.f32.mrb[5].mxu0 }
  0xe7   :  { %v250_v42 = vpop.f32.mrb[6].mxu0 }
  0xe8   :  { %v256_v43 = vadd.f32 %v254_v40, %v1985_v39  ;;  %v1561_v44 = vpop.f32.mrb[7].mxu0 }
  0xea   :  { %1695 = vtanh.f32 %v256_v43  ;;  %v1468_v48 = vmul.f32 -1.442695, %v256_v43 }
  0xeb   :  { %1697 = vpow2.f32 %v1467_v47 }
  0xec   :  { %v1694_v45 = vpop.eup %1693  ;;  %1699 = vpow2.f32 %v1468_v48 }
  0xed   :  { %270 = vrot.lane.b32.xlu0 %v1694_v45, %s1849_s5 }
  0xf4   :  { %v1696_v46 = vpop.eup %1695 }
  0xf5   :  { %299 = vrot.lane.b32.xlu0 %v1696_v46, %s1849_s5  ;;  %v1698_v49 = vpop.eup %1697 }
  0xf6   :  { %v260_v50 = vadd.f32 1.0, %v1698_v49  ;;  %v1700_v51 = vpop.eup %1699 }
  0xf7   :  { %v288_v52 = vadd.f32 1.0, %v1700_v51 }
  0xf8   :  { %1701 = vrcp.f32 %v260_v50 }
  0xf9   :  { %1703 = vrcp.f32 %v288_v52 }
 0x102   :  { %v1702_v53 = vpop.eup %1701 }
 0x103   :  { %v1704_v56 = vpop.eup %1703  ;;  %v268_v60 = vmul.f32 %v1702_v53, %v266_v59 }
 0x104   :  { %v297_v0 = vmul.f32 %v1704_v56, %v295_v63 }
 0x15f   :  { %v271_v54 = vpop.permute.xlu0 %270 }
 0x160   :  { %v273_v55 = vmul.f32 %v1702_v53, %v271_v54 }
 0x162   :  { %275 = vrot.lane.b32.xlu0 %v273_v55, %s1848_s22 }
 0x167   :  { %v300_v57 = vpop.permute.xlu0 %299 }
 0x168   :  { %v302_v58 = vmul.f32 %v1704_v56, %v300_v57 }
 0x16a   :  { %304 = vrot.lane.b32.xlu1 %v302_v58, %s1848_s22 }
 0x1d4   :  { %v276_v61 = vpop.permute.xlu0 %275 }
 0x1d5   :  { %v1992_v62 = vadd.f32 %v276_v61, %v268_v60 }
 0x1d7   :  { %1705 = vtanh.f32 %v1992_v62  ;;  %v425_v49 = vrot.slane %v1992_v62, 6 }
 0x1dc   :  { %v305_v1 = vpop.permute.xlu1 %304 }
 0x1dd   :  { %v1995_v4 = vadd.f32 %v305_v1, %v297_v0 }
 0x1df   :  { %1707 = vtanh.f32 %v1995_v4 }
 0x1e1   :  { %v1706_v5 = vpop.eup %1705 }
 0x1e2   :  { %281 = vrot.lane.b32.xlu0 %v1706_v5, %s1849_s5 }
 0x1e9   :  { %v1708_v6 = vpop.eup %1707 }
 0x1ea   :  { %310 = vrot.lane.b32.xlu1 %v1708_v6, %s1849_s5 }
 0x254   :  { %v282_v8 = vpop.permute.xlu0 %281 }
 0x255   :  { %v284_v9 = vmul.f32 %v1702_v53, %v282_v8  ;;  %v452_v53 = vrot.slane %v1995_v4, 2 }
 0x257   :  { %v314_v11 = vpack.c.bf16 %v284_v9, %v284_v9 }
 0x259   :  { %316 = vrot.lane.b32.xlu0 %v314_v11, %s1848_s22 }
 0x25c   :  { %v311_v12 = vpop.permute.xlu1 %310 }
 0x25d   :  { %v313_v13 = vmul.f32 %v1704_v56, %v311_v12 }
 0x25f   :  { %v365_v14 = vpack.c.bf16 %v313_v13, %v313_v13 }
 0x261   :  { %v367_v15 = vrot.slane %v365_v14, 3 }
 0x263   :  { %368 = vrot.lane.b32.xlu1 %v367_v15, %s1848_s22 }
 0x2cb   :  { %v317_v17 = vpop.permute.xlu0 %316 }
 0x2cc   :  { %1567 = vmatmul.mubr.msk.bf16.vlgmr.msra.gmra.mrb[4].mxu1 %vm152_vm3, %v317_v17 }
 0x2cd   :  { %1579 = vmatpush3.bf16.msra.mxu1 %v1908_v3  ;;  %1582 = vmatprep.mubr.msk.bf16.mxu1 %vm1847_vm2, %v1845_v2 }
 0x2ce   :  { %1580 = vmatprep.subr.bf16.mxu1 %v1845_v2 }
 0x2d1   :  { %1581 = vmatpush3.bf16.msra.mxu1 %v1920_v7 }
 0x2d2   :  { %1594 = vmatprep.subr.bf16.mxu1 %v1845_v2 }
 0x2d5   :  { %v369_v18 = vpop.permute.xlu1 %368 }
 0x2d6   :  { %1575 = vmatmul.mubr.msk.bf16.vlgmr.msra.gmra.mrb[8].mxu0 %vm152_vm3, %v369_v18 }
 0x2d7   :  { %1587 = vmatpush3.bf16.msra.mxu0 %v1931_v10  ;;  %1590 = vmatprep.mubr.msk.bf16.mxu0 %vm1847_vm2, %v1845_v2 }
 0x2d8   :  { %1588 = vmatprep.subr.bf16.mxu0 %v1845_v2 }
 0x2db   :  { %1589 = vmatpush3.bf16.msra.mxu0 %v1951_v16 }
 0x2dc   :  { %1602 = vmatprep.subr.bf16.mxu0 %v1845_v2 }
 0x39f   :  { %v355_v19 = vpop.f32.mrb[4].mxu1 }
 0x3a0   :  { %v362_v20 = vrot.slane %v355_v19, 6  ;;  %v1568_v21 = vpop.f32.mrb[5].mxu1 }
 0x3a1   :  { %v358_v22 = vpop.f32.mrb[6].mxu1 }
 0x3a2   :  { %v364_v23 = vadd.f32 %v362_v20, %v1978_v27  ;;  %v1569_v24 = vpop.f32.mrb[7].mxu1 }
 0x3a4   :  { %1709 = vtanh.f32 %v364_v23  ;;  %v1471_v36 = vmul.f32 -1.442695, %v364_v23 }
 0x3a9   :  { %v407_v25 = vpop.f32.mrb[8].mxu0 }
 0x3aa   :  { %v414_v26 = vrot.slane %v407_v25, 4  ;;  %v1576_v28 = vpop.f32.mrb[9].mxu0 }
 0x3ab   :  { %v410_v29 = vpop.f32.mrb[10].mxu0 }
 0x3ac   :  { %v416_v31 = vadd.f32 %v414_v26, %v1985_v39  ;;  %v1577_v32 = vpop.f32.mrb[11].mxu0 }
 0x3ae   :  { %v1710_v34 = vpop.eup %1709  ;;  %1711 = vtanh.f32 %v416_v31  ;;  %v1472_v37 = vmul.f32 -1.442695, %v416_v31 }
 0x3af   :  { %429 = vrot.lane.b32.xlu0 %v1710_v34, %s1849_s5  ;;  %1713 = vpow2.f32 %v1471_v36 }
 0x3b0   :  { %1715 = vpow2.f32 %v1472_v37 }
 0x3b8   :  { %v1712_v35 = vpop.eup %1711 }
 0x3b9   :  { %456 = vrot.lane.b32.xlu1 %v1712_v35, %s1849_s5  ;;  %v1714_v38 = vpop.eup %1713 }
 0x3ba   :  { %v420_v40 = vadd.f32 1.0, %v1714_v38  ;;  %v1716_v41 = vpop.eup %1715 }
 0x3bb   :  { %v447_v42 = vadd.f32 1.0, %v1716_v41 }
 0x3bc   :  { %1717 = vrcp.f32 %v420_v40 }
 0x3bd   :  { %1719 = vrcp.f32 %v447_v42 }
 0x3c6   :  { %v1718_v43 = vpop.eup %1717 }
 0x3c7   :  { %v1720_v46 = vpop.eup %1719  ;;  %v427_v50 = vmul.f32 %v1718_v43, %v425_v49 }
 0x3c8   :  { %v454_v54 = vmul.f32 %v1720_v46, %v452_v53 }
 0x421   :  { %v430_v44 = vpop.permute.xlu0 %429 }
 0x422   :  { %v432_v45 = vmul.f32 %v1718_v43, %v430_v44 }
 0x424   :  { %434 = vrot.lane.b32.xlu0 %v432_v45, %s1848_s22 }
 0x42b   :  { %v457_v47 = vpop.permute.xlu1 %456 }
 0x42c   :  { %v459_v48 = vmul.f32 %v1720_v46, %v457_v47 }
 0x42e   :  { %461 = vrot.lane.b32.xlu1 %v459_v48, %s1848_s22 }
 0x496   :  { %v435_v51 = vpop.permute.xlu0 %434 }
 0x497   :  { %v2023_v52 = vadd.f32 %v435_v51, %v427_v50 }
 0x499   :  { %1721 = vtanh.f32 %v2023_v52  ;;  %v583_v40 = vrot.slane %v2023_v52, 6 }
 0x4a0   :  { %v462_v55 = vpop.permute.xlu1 %461 }
 0x4a1   :  { %v2027_v56 = vadd.f32 %v462_v55, %v454_v54 }
 0x4a3   :  { %v1722_v57 = vpop.eup %1721  ;;  %1723 = vtanh.f32 %v2027_v56  ;;  %v610_v44 = vrot.slane %v2027_v56, 2 }
 0x4a4   :  { %440 = vrot.lane.b32.xlu0 %v1722_v57, %s1849_s5 }
 0x4ad   :  { %v1724_v58 = vpop.eup %1723 }
 0x4ae   :  { %467 = vrot.lane.b32.xlu1 %v1724_v58, %s1849_s5 }
 0x516   :  { %v441_v59 = vpop.permute.xlu0 %440 }
 0x517   :  { %v443_v60 = vmul.f32 %v1718_v43, %v441_v59 }
 0x519   :  { %v471_v61 = vpack.c.bf16 %v443_v60, %v443_v60 }
 0x51b   :  { %v473_v62 = vrot.slane %v471_v61, 1 }
 0x51d   :  { %474 = vrot.lane.b32.xlu0 %v473_v62, %s1848_s22 }
 0x520   :  { %v468_v63 = vpop.permute.xlu1 %467 }
 0x521   :  { %v470_v0 = vmul.f32 %v1720_v46, %v468_v63 }
 0x523   :  { %v523_v1 = vpack.c.bf16 %v470_v0, %v470_v0 }
 0x525   :  { %v525_v4 = vrot.slane %v523_v1, 2 }
 0x527   :  { %526 = vrot.lane.b32.xlu1 %v525_v4, %s1848_s22 }
 0x58f   :  { %v475_v5 = vpop.permute.xlu0 %474 }
 0x590   :  { %1583 = vmatmul.mubr.msk.bf16.vlgmr.msra.gmra.mrb[8].mxu1 %vm152_vm3, %v475_v5 }
 0x591   :  { %1595 = vmatpush3.bf16.msra.mxu1 %v1908_v3  ;;  %1598 = vmatprep.mubr.msk.bf16.mxu1 %vm1847_vm2, %v1845_v2 }
 0x592   :  { %1596 = vmatprep.subr.bf16.mxu1 %v1845_v2 }
 0x595   :  { %1597 = vmatpush3.bf16.msra.mxu1 %v1920_v7 }
 0x596   :  { %1610 = vmatprep.subr.bf16.mxu1 %v1845_v2 }
 0x599   :  { %v527_v6 = vpop.permute.xlu1 %526 }
 0x59a   :  { %1591 = vmatmul.mubr.msk.bf16.vlgmr.msra.gmra.mrb[12].mxu0 %vm152_vm3, %v527_v6 }
 0x59b   :  { %1603 = vmatpush3.bf16.msra.mxu0 %v1931_v10  ;;  %1606 = vmatprep.mubr.msk.bf16.mxu0 %vm1847_vm2, %v1845_v2 }
 0x59c   :  { %1604 = vmatprep.subr.bf16.mxu0 %v1845_v2 }
 0x59f   :  { %1605 = vmatpush3.bf16.msra.mxu0 %v1951_v16 }
 0x5a0   :  { %1618 = vmatprep.subr.bf16.mxu0 %v1845_v2 }
 0x663   :  { %v513_v8 = vpop.f32.mrb[8].mxu1 }
 0x664   :  { %v520_v9 = vrot.slane %v513_v8, 4  ;;  %v1584_v11 = vpop.f32.mrb[9].mxu1 }
 0x665   :  { %v516_v12 = vpop.f32.mrb[10].mxu1 }
 0x666   :  { %v522_v13 = vadd.f32 %v520_v9, %v1978_v27  ;;  %v1585_v14 = vpop.f32.mrb[11].mxu1 }
 0x668   :  { %1725 = vtanh.f32 %v522_v13  ;;  %v1475_v24 = vmul.f32 -1.442695, %v522_v13 }
 0x66d   :  { %v565_v15 = vpop.f32.mrb[12].mxu0 }
 0x66e   :  { %v572_v17 = vrot.slane %v565_v15, 6  ;;  %v1592_v18 = vpop.f32.mrb[13].mxu0 }
 0x66f   :  { %v568_v19 = vpop.f32.mrb[14].mxu0 }
 0x670   :  { %v574_v20 = vadd.f32 %v572_v17, %v1985_v39  ;;  %v1593_v21 = vpop.f32.mrb[15].mxu0 }
 0x672   :  { %v1726_v22 = vpop.eup %1725  ;;  %1727 = vtanh.f32 %v574_v20  ;;  %v1476_v25 = vmul.f32 -1.442695, %v574_v20 }
 0x673   :  { %587 = vrot.lane.b32.xlu0 %v1726_v22, %s1849_s5  ;;  %1729 = vpow2.f32 %v1475_v24 }
 0x674   :  { %1731 = vpow2.f32 %v1476_v25 }
 0x67c   :  { %v1728_v23 = vpop.eup %1727 }
 0x67d   :  { %614 = vrot.lane.b32.xlu1 %v1728_v23, %s1849_s5  ;;  %v1730_v26 = vpop.eup %1729 }
 0x67e   :  { %v578_v28 = vadd.f32 1.0, %v1730_v26  ;;  %v1732_v29 = vpop.eup %1731 }
 0x67f   :  { %v605_v31 = vadd.f32 1.0, %v1732_v29 }
 0x680   :  { %1733 = vrcp.f32 %v578_v28 }
 0x681   :  { %1735 = vrcp.f32 %v605_v31 }
 0x68a   :  { %v1734_v32 = vpop.eup %1733 }
 0x68b   :  { %v1736_v36 = vpop.eup %1735  ;;  %v585_v41 = vmul.f32 %v1734_v32, %v583_v40 }
 0x68c   :  { %v612_v45 = vmul.f32 %v1736_v36, %v610_v44 }
 0x6e5   :  { %v588_v34 = vpop.permute.xlu0 %587 }
 0x6e6   :  { %v590_v35 = vmul.f32 %v1734_v32, %v588_v34 }
 0x6e8   :  { %592 = vrot.lane.b32.xlu0 %v590_v35, %s1848_s22 }
 0x6ef   :  { %v615_v37 = vpop.permute.xlu1 %614 }
 0x6f0   :  { %v617_v38 = vmul.f32 %v1736_v36, %v615_v37 }
 0x6f2   :  { %619 = vrot.lane.b32.xlu1 %v617_v38, %s1848_s22 }
 0x75a   :  { %v593_v42 = vpop.permute.xlu0 %592 }
 0x75b   :  { %v2055_v43 = vadd.f32 %v593_v42, %v585_v41 }
 0x75d   :  { %1737 = vtanh.f32 %v2055_v43  ;;  %v738_v24 = vrot.slane %v2055_v43, 6 }
 0x764   :  { %v620_v46 = vpop.permute.xlu1 %619 }
 0x765   :  { %v2059_v47 = vadd.f32 %v620_v46, %v612_v45 }
 0x767   :  { %v1738_v48 = vpop.eup %1737  ;;  %1739 = vtanh.f32 %v2059_v47  ;;  %v765_v29 = vrot.slane %v2059_v47, 2 }
 0x768   :  { %598 = vrot.lane.b32.xlu0 %v1738_v48, %s1849_s5 }
 0x771   :  { %v1740_v49 = vpop.eup %1739 }
 0x772   :  { %625 = vrot.lane.b32.xlu1 %v1740_v49, %s1849_s5 }
 0x7da   :  { %v599_v50 = vpop.permute.xlu0 %598 }
 0x7db   :  { %v601_v51 = vmul.f32 %v1734_v32, %v599_v50 }
 0x7dd   :  { %v629_v52 = vpack.c.bf16 %v601_v51, %v601_v51 }
 0x7df   :  { %v631_v53 = vrot.slane %v629_v52, 2 }
 0x7e1   :  { %632 = vrot.lane.b32.xlu0 %v631_v53, %s1848_s22 }
 0x7e4   :  { %v626_v54 = vpop.permute.xlu1 %625 }
 0x7e5   :  { %v628_v55 = vmul.f32 %v1736_v36, %v626_v54 }
 0x7e7   :  { %v681_v56 = vpack.c.bf16 %v628_v55, %v628_v55 }
 0x7e9   :  { %v683_v57 = vrot.slane %v681_v56, 1 }
 0x7eb   :  { %684 = vrot.lane.b32.xlu1 %v683_v57, %s1848_s22 }
 0x853   :  { %v633_v58 = vpop.permute.xlu0 %632 }
 0x854   :  { %1599 = vmatmul.mubr.msk.bf16.vlgmr.msra.gmra.mrb[12].mxu1 %vm152_vm3, %v633_v58 }
 0x855   :  { %1611 = vmatpush3.bf16.msra.mxu1 %v1908_v3  ;;  %1614 = vmatprep.mubr.msk.bf16.mxu1 %vm1847_vm2, %v1845_v2 }
 0x856   :  { %1612 = vmatprep.subr.bf16.mxu1 %v1845_v2 }
 0x859   :  { %1613 = vmatpush3.bf16.msra.mxu1 %v1920_v7 }
 0x85a   :  { %1626 = vmatprep.subr.bf16.mxu1 %v1845_v2 }
 0x85d   :  { %v685_v59 = vpop.permute.xlu1 %684 }
 0x85e   :  { %1607 = vmatmul.mubr.msk.bf16.vlgmr.msra.gmra.mrb[16].mxu0 %vm152_vm3, %v685_v59 }
 0x85f   :  { %1619 = vmatpush3.bf16.msra.mxu0 %v1931_v10  ;;  %1622 = vmatprep.mubr.msk.bf16.mxu0 %vm1847_vm2, %v1845_v2 }
 0x860   :  { %1620 = vmatprep.subr.bf16.mxu0 %v1845_v2 }
 0x863   :  { %1621 = vmatpush3.bf16.msra.mxu0 %v1951_v16 }
 0x864   :  { %1634 = vmatprep.subr.bf16.mxu0 %v1845_v2 }
 0x927   :  { %v671_v60 = vpop.f32.mrb[12].mxu1 }
 0x928   :  { %v678_v61 = vrot.slane %v671_v60, 2  ;;  %v1600_v62 = vpop.f32.mrb[13].mxu1 }
 0x929   :  { %v674_v63 = vpop.f32.mrb[14].mxu1 }
 0x92a   :  { %v680_v0 = vadd.f32 %v678_v61, %v1978_v27  ;;  %v1601_v1 = vpop.f32.mrb[15].mxu1 }
 0x92c   :  { %1741 = vtanh.f32 %v680_v0  ;;  %v1479_v13 = vmul.f32 -1.442695, %v680_v0 }
 0x931   :  { %v723_v4 = vpop.f32.mrb[16].mxu0 }
 0x932   :  { %v729_v5 = vadd.f32 %v723_v4, %v1985_v39  ;;  %v1608_v6 = vpop.f32.mrb[17].mxu0 }
 0x933   :  { %v726_v8 = vpop.f32.mrb[18].mxu0 }
 0x934   :  { %1743 = vtanh.f32 %v729_v5  ;;  %v1609_v9 = vpop.f32.mrb[19].mxu0  ;;  %v1480_v14 = vmul.f32 -1.442695, %v729_v5 }
 0x935   :  { %1745 = vpow2.f32 %v1479_v13 }
 0x936   :  { %v1742_v11 = vpop.eup %1741  ;;  %1747 = vpow2.f32 %v1480_v14 }
 0x937   :  { %742 = vrot.lane.b32.xlu0 %v1742_v11, %s1849_s5 }
 0x93e   :  { %v1744_v12 = vpop.eup %1743 }
 0x93f   :  { %769 = vrot.lane.b32.xlu1 %v1744_v12, %s1849_s5  ;;  %v1746_v27 = vpop.eup %1745 }
 0x940   :  { %v733_v15 = vadd.f32 1.0, %v1746_v27  ;;  %v1748_v17 = vpop.eup %1747 }
 0x941   :  { %v760_v18 = vadd.f32 1.0, %v1748_v17 }
 0x942   :  { %1749 = vrcp.f32 %v733_v15 }
 0x943   :  { %1751 = vrcp.f32 %v760_v18 }
 0x94c   :  { %v1750_v39 = vpop.eup %1749 }
 0x94d   :  { %v1752_v21 = vpop.eup %1751  ;;  %v740_v25 = vmul.f32 %v1750_v39, %v738_v24 }
 0x94e   :  { %v767_v31 = vmul.f32 %v1752_v21, %v765_v29 }
 0x9a9   :  { %v743_v19 = vpop.permute.xlu0 %742 }
 0x9aa   :  { %v745_v20 = vmul.f32 %v1750_v39, %v743_v19 }
 0x9ac   :  { %747 = vrot.lane.b32.xlu0 %v745_v20, %s1848_s22 }
 0x9b1   :  { %v770_v22 = vpop.permute.xlu1 %769 }
 0x9b2   :  { %v772_v23 = vmul.f32 %v1752_v21, %v770_v22 }
 0x9b4   :  { %774 = vrot.lane.b32.xlu1 %v772_v23, %s1848_s22 }
 0xa1e   :  { %v748_v26 = vpop.permute.xlu0 %747 }
 0xa1f   :  { %v2087_v28 = vadd.f32 %v748_v26, %v740_v25 }
 0xa21   :  { %1753 = vtanh.f32 %v2087_v28  ;;  %v892_v12 = vrot.slane %v2087_v28, 6 }
 0xa26   :  { %v775_v32 = vpop.permute.xlu1 %774 }
 0xa27   :  { %v2091_v34 = vadd.f32 %v775_v32, %v767_v31 }
 0xa29   :  { %1755 = vtanh.f32 %v2091_v34  ;;  %v919_v15 = vrot.slane %v2091_v34, 2 }
 0xa2b   :  { %v1754_v35 = vpop.eup %1753 }
 0xa2c   :  { %753 = vrot.lane.b32.xlu0 %v1754_v35, %s1849_s5 }
 0xa33   :  { %v1756_v36 = vpop.eup %1755 }
 0xa34   :  { %780 = vrot.lane.b32.xlu1 %v1756_v36, %s1849_s5 }
 0xa9e   :  { %v754_v37 = vpop.permute.xlu0 %753 }
 0xa9f   :  { %v756_v38 = vmul.f32 %v1750_v39, %v754_v37 }
 0xaa1   :  { %v784_v40 = vpack.c.bf16 %v756_v38, %v756_v38 }
 0xaa3   :  { %v786_v41 = vrot.slane %v784_v40, 3 }
 0xaa5   :  { %787 = vrot.lane.b32.xlu1 %v786_v41, %s1848_s22 }
 0xaa6   :  { %v781_v42 = vpop.permute.xlu1 %780 }
 0xaa7   :  { %v783_v43 = vmul.f32 %v1752_v21, %v781_v42 }
 0xaa9   :  { %v833_v44 = vpack.c.bf16 %v783_v43, %v783_v43 }
 0xaab   :  { %835 = vrot.lane.b32.xlu0 %v833_v44, %s1848_s22 }
 0xb17   :  { %v788_v45 = vpop.permute.xlu1 %787 }
 0xb18   :  { %1615 = vmatmul.mubr.msk.bf16.vlgmr.msra.gmra.mrb[16].mxu1 %vm152_vm3, %v788_v45 }
 0xb19   :  { %1627 = vmatpush3.bf16.msra.mxu1 %v1908_v3  ;;  %1630 = vmatprep.mubr.msk.bf16.mxu1 %vm1847_vm2, %v1845_v2 }
 0xb1a   :  { %1628 = vmatprep.subr.bf16.mxu1 %v1845_v2 }
 0xb1d   :  { %v836_v46 = vpop.permute.xlu0 %835  ;;  %1629 = vmatpush3.bf16.msra.mxu1 %v1920_v7 }
 0xb1e   :  { %1623 = vmatmul.mubr.msk.bf16.vlgmr.msra.gmra.mrb[20].mxu0 %vm152_vm3, %v836_v46  ;;  %1642 = vmatprep.subr.bf16.mxu1 %v1845_v2 }
 0xb1f   :  { %1635 = vmatpush3.bf16.msra.mxu0 %v1931_v10  ;;  %1638 = vmatprep.mubr.msk.bf16.mxu0 %vm1847_vm2, %v1845_v2 }
 0xb20   :  { %1636 = vmatprep.subr.bf16.mxu0 %v1845_v2 }
 0xb23   :  { %1637 = vmatpush3.bf16.msra.mxu0 %v1951_v16 }
 0xb24   :  { %1650 = vmatprep.subr.bf16.mxu0 %v1845_v2 }
 0xbeb   :  { %v826_v47 = vpop.f32.mrb[16].mxu1 }
 0xbec   :  { %v832_v48 = vadd.f32 %v826_v47, %v1982_v33  ;;  %v1616_v49 = vpop.f32.mrb[17].mxu1 }
 0xbed   :  { %v829_v50 = vpop.f32.mrb[18].mxu1 }
 0xbee   :  { %1757 = vtanh.f32 %v832_v48  ;;  %v1617_v51 = vpop.f32.mrb[19].mxu1  ;;  %v1483_v60 = vmul.f32 -1.442695, %v832_v48 }
 0xbf1   :  { %v874_v52 = vpop.f32.mrb[20].mxu0 }
 0xbf2   :  { %v881_v53 = vrot.slane %v874_v52, 2  ;;  %v1624_v54 = vpop.f32.mrb[21].mxu0 }
 0xbf3   :  { %v877_v55 = vpop.f32.mrb[22].mxu0 }
 0xbf4   :  { %v883_v56 = vadd.f32 %v881_v53, %v1980_v30  ;;  %v1625_v57 = vpop.f32.mrb[23].mxu0 }
 0xbf6   :  { %1759 = vtanh.f32 %v883_v56  ;;  %v1484_v61 = vmul.f32 -1.442695, %v883_v56 }
 0xbf7   :  { %1761 = vpow2.f32 %v1483_v60 }
 0xbf8   :  { %v1758_v58 = vpop.eup %1757  ;;  %1763 = vpow2.f32 %v1484_v61 }
 0xbf9   :  { %896 = vrot.lane.b32.xlu0 %v1758_v58, %s1849_s5 }
 0xc00   :  { %v1760_v59 = vpop.eup %1759 }
 0xc01   :  { %923 = vrot.lane.b32.xlu1 %v1760_v59, %s1849_s5  ;;  %v1762_v62 = vpop.eup %1761 }
 0xc02   :  { %v887_v63 = vadd.f32 1.0, %v1762_v62  ;;  %v1764_v0 = vpop.eup %1763 }
 0xc03   :  { %v914_v1 = vadd.f32 1.0, %v1764_v0 }
 0xc04   :  { %1765 = vrcp.f32 %v887_v63 }
 0xc05   :  { %1767 = vrcp.f32 %v914_v1 }
 0xc0e   :  { %v1766_v4 = vpop.eup %1765 }
 0xc0f   :  { %v1768_v8 = vpop.eup %1767  ;;  %v894_v13 = vmul.f32 %v1766_v4, %v892_v12 }
 0xc10   :  { %v921_v17 = vmul.f32 %v1768_v8, %v919_v15 }
 0xc6b   :  { %v897_v5 = vpop.permute.xlu0 %896 }
 0xc6c   :  { %v899_v6 = vmul.f32 %v1766_v4, %v897_v5 }
 0xc6e   :  { %901 = vrot.lane.b32.xlu0 %v899_v6, %s1848_s22 }
 0xc73   :  { %v924_v9 = vpop.permute.xlu1 %923 }
 0xc74   :  { %v926_v11 = vmul.f32 %v1768_v8, %v924_v9 }
 0xc76   :  { %928 = vrot.lane.b32.xlu1 %v926_v11, %s1848_s22 }
 0xce0   :  { %v902_v14 = vpop.permute.xlu0 %901 }
 0xce1   :  { %v2119_v27 = vadd.f32 %v902_v14, %v894_v13 }
 0xce3   :  { %1769 = vtanh.f32 %v2119_v27  ;;  %v1049_v60 = vrot.slane %v2119_v27, 6 }
 0xce8   :  { %v929_v18 = vpop.permute.xlu1 %928 }
 0xce9   :  { %v2123_v39 = vadd.f32 %v929_v18, %v921_v17 }
 0xceb   :  { %1771 = vtanh.f32 %v2123_v39  ;;  %v1076_v0 = vrot.slane %v2123_v39, 2 }
 0xced   :  { %v1770_v19 = vpop.eup %1769 }
 0xcee   :  { %907 = vrot.lane.b32.xlu0 %v1770_v19, %s1849_s5 }
 0xcf5   :  { %v1772_v20 = vpop.eup %1771 }
 0xcf6   :  { %934 = vrot.lane.b32.xlu1 %v1772_v20, %s1849_s5 }
 0xd60   :  { %v908_v21 = vpop.permute.xlu0 %907 }
 0xd61   :  { %v910_v22 = vmul.f32 %v1766_v4, %v908_v21 }
 0xd63   :  { %v938_v23 = vpack.c.bf16 %v910_v22, %v910_v22 }
 0xd65   :  { %940 = vrot.lane.b32.xlu0 %v938_v23, %s1848_s22 }
 0xd68   :  { %v935_v24 = vpop.permute.xlu1 %934 }
 0xd69   :  { %v937_v25 = vmul.f32 %v1768_v8, %v935_v24 }
 0xd6b   :  { %v989_v26 = vpack.c.bf16 %v937_v25, %v937_v25 }
 0xd6d   :  { %v991_v28 = vrot.slane %v989_v26, 3 }
 0xd6f   :  { %992 = vrot.lane.b32.xlu1 %v991_v28, %s1848_s22 }
 0xdd7   :  { %v941_v29 = vpop.permute.xlu0 %940 }
 0xdd8   :  { %1631 = vmatmul.mubr.msk.bf16.vlgmr.msra.gmra.mrb[20].mxu1 %vm152_vm3, %v941_v29 }
 0xdd9   :  { %1643 = vmatpush3.bf16.msra.mxu1 %v1908_v3  ;;  %1646 = vmatprep.mubr.msk.bf16.mxu1 %vm1847_vm2, %v1845_v2 }
 0xdda   :  { %1644 = vmatprep.subr.bf16.mxu1 %v1845_v2 }
 0xddd   :  { %1645 = vmatpush3.bf16.msra.mxu1 %v1920_v7 }
 0xdde   :  { %1658 = vmatprep.subr.bf16.mxu1 %v1845_v2 }
 0xde1   :  { %v993_v31 = vpop.permute.xlu1 %992 }
 0xde2   :  { %1639 = vmatmul.mubr.msk.bf16.vlgmr.msra.gmra.mrb[24].mxu0 %vm152_vm3, %v993_v31 }
 0xde3   :  { %1651 = vmatpush3.bf16.msra.mxu0 %v1931_v10  ;;  %1654 = vmatprep.mubr.msk.bf16.mxu0 %vm1847_vm2, %v1845_v2 }
 0xde4   :  { %1652 = vmatprep.subr.bf16.mxu0 %v1845_v2 }
 0xde7   :  { %1653 = vmatpush3.bf16.msra.mxu0 %v1951_v16 }
 0xde8   :  { %1666 = vmatprep.subr.bf16.mxu0 %v1845_v2 }
 0xeab   :  { %v979_v32 = vpop.f32.mrb[20].mxu1 }
 0xeac   :  { %v986_v34 = vrot.slane %v979_v32, 6  ;;  %v1632_v35 = vpop.f32.mrb[21].mxu1 }
 0xead   :  { %v982_v36 = vpop.f32.mrb[22].mxu1 }
 0xeae   :  { %v988_v37 = vadd.f32 %v986_v34, %v1982_v33  ;;  %v1633_v38 = vpop.f32.mrb[23].mxu1 }
 0xeb0   :  { %1773 = vtanh.f32 %v988_v37  ;;  %v1487_v48 = vmul.f32 -1.442695, %v988_v37 }
 0xeb5   :  { %v1031_v40 = vpop.f32.mrb[24].mxu0 }
 0xeb6   :  { %v1038_v41 = vrot.slane %v1031_v40, 4  ;;  %v1640_v42 = vpop.f32.mrb[25].mxu0 }
 0xeb7   :  { %v1034_v43 = vpop.f32.mrb[26].mxu0 }
 0xeb8   :  { %v1040_v44 = vadd.f32 %v1038_v41, %v1980_v30  ;;  %v1641_v45 = vpop.f32.mrb[27].mxu0 }
 0xeba   :  { %v1774_v46 = vpop.eup %1773  ;;  %1775 = vtanh.f32 %v1040_v44  ;;  %v1488_v49 = vmul.f32 -1.442695, %v1040_v44 }
 0xebb   :  { %1053 = vrot.lane.b32.xlu0 %v1774_v46, %s1849_s5  ;;  %1777 = vpow2.f32 %v1487_v48 }
 0xebc   :  { %1779 = vpow2.f32 %v1488_v49 }
 0xec4   :  { %v1776_v47 = vpop.eup %1775 }
 0xec5   :  { %1080 = vrot.lane.b32.xlu1 %v1776_v47, %s1849_s5  ;;  %v1778_v50 = vpop.eup %1777 }
 0xec6   :  { %v1044_v51 = vadd.f32 1.0, %v1778_v50  ;;  %v1780_v52 = vpop.eup %1779 }
 0xec7   :  { %v1071_v53 = vadd.f32 1.0, %v1780_v52 }
 0xec8   :  { %1781 = vrcp.f32 %v1044_v51 }
 0xec9   :  { %1783 = vrcp.f32 %v1071_v53 }
 0xed2   :  { %v1782_v54 = vpop.eup %1781 }
 0xed3   :  { %v1784_v57 = vpop.eup %1783  ;;  %v1051_v61 = vmul.f32 %v1782_v54, %v1049_v60 }
 0xed4   :  { %v1078_v1 = vmul.f32 %v1784_v57, %v1076_v0 }
 0xf2d   :  { %v1054_v55 = vpop.permute.xlu0 %1053 }
 0xf2e   :  { %v1056_v56 = vmul.f32 %v1782_v54, %v1054_v55 }
 0xf30   :  { %1058 = vrot.lane.b32.xlu0 %v1056_v56, %s1848_s22 }
 0xf37   :  { %v1081_v58 = vpop.permute.xlu1 %1080 }
 0xf38   :  { %v1083_v59 = vmul.f32 %v1784_v57, %v1081_v58 }
 0xf3a   :  { %1085 = vrot.lane.b32.xlu1 %v1083_v59, %s1848_s22 }
 0xfa2   :  { %v1059_v62 = vpop.permute.xlu0 %1058 }
 0xfa3   :  { %v2151_v63 = vadd.f32 %v1059_v62, %v1051_v61 }
 0xfa5   :  { %1785 = vtanh.f32 %v2151_v63  ;;  %v1207_v44 = vrot.slane %v2151_v63, 6 }
 0xfac   :  { %v1086_v4 = vpop.permute.xlu1 %1085 }
 0xfad   :  { %v2155_v5 = vadd.f32 %v1086_v4, %v1078_v1 }
 0xfaf   :  { %v1786_v6 = vpop.eup %1785  ;;  %1787 = vtanh.f32 %v2155_v5  ;;  %v1234_v48 = vrot.slane %v2155_v5, 2 }
 0xfb0   :  { %1064 = vrot.lane.b32.xlu0 %v1786_v6, %s1849_s5 }
 0xfb9   :  { %v1788_v8 = vpop.eup %1787 }
 0xfba   :  { %1091 = vrot.lane.b32.xlu1 %v1788_v8, %s1849_s5 }
0x1022   :  { %v1065_v9 = vpop.permute.xlu0 %1064 }
0x1023   :  { %v1067_v11 = vmul.f32 %v1782_v54, %v1065_v9 }
0x1025   :  { %v1095_v12 = vpack.c.bf16 %v1067_v11, %v1067_v11 }
0x1027   :  { %v1097_v13 = vrot.slane %v1095_v12, 1 }
0x1029   :  { %1098 = vrot.lane.b32.xlu0 %v1097_v13, %s1848_s22 }
0x102c   :  { %v1092_v14 = vpop.permute.xlu1 %1091 }
0x102d   :  { %v1094_v27 = vmul.f32 %v1784_v57, %v1092_v14 }
0x102f   :  { %v1147_v15 = vpack.c.bf16 %v1094_v27, %v1094_v27 }
0x1031   :  { %v1149_v17 = vrot.slane %v1147_v15, 2 }
0x1033   :  { %1150 = vrot.lane.b32.xlu1 %v1149_v17, %s1848_s22 }
0x109b   :  { %v1099_v18 = vpop.permute.xlu0 %1098 }
0x109c   :  { %1647 = vmatmul.mubr.msk.bf16.vlgmr.msra.gmra.mrb[24].mxu1 %vm152_vm3, %v1099_v18 }
0x109d   :  { %1659 = vmatpush3.bf16.msra.mxu1 %v1908_v3  ;;  %1662 = vmatprep.mubr.msk.bf16.mxu1 %vm1847_vm2, %v1845_v2 }
0x109e   :  { %1660 = vmatprep.subr.bf16.mxu1 %v1845_v2 }
0x10a1   :  { %1661 = vmatpush3.bf16.msra.mxu1 %v1920_v7 }
0x10a5   :  { %v1151_v39 = vpop.permute.xlu1 %1150 }
0x10a6   :  { %1655 = vmatmul.mubr.msk.bf16.vlgmr.msra.gmra.mrb[28].mxu0 %vm152_vm3, %v1151_v39 }
0x10a7   :  { %1667 = vmatpush3.bf16.msra.mxu0 %v1931_v10  ;;  %1670 = vmatprep.mubr.msk.bf16.mxu0 %vm1847_vm2, %v1845_v2 }
0x10a8   :  { %1668 = vmatprep.subr.bf16.mxu0 %v1845_v2 }
0x10ab   :  { %1669 = vmatpush3.bf16.msra.mxu0 %v1951_v16 }
0x116f   :  { %v1137_v3 = vpop.f32.mrb[24].mxu1 }
0x1170   :  { %v1144_v19 = vrot.slane %v1137_v3, 4  ;;  %v1648_v20 = vpop.f32.mrb[25].mxu1 }
0x1171   :  { %v1140_v21 = vpop.f32.mrb[26].mxu1 }
0x1172   :  { %v1146_v22 = vadd.f32 %v1144_v19, %v1982_v33  ;;  %v1649_v23 = vpop.f32.mrb[27].mxu1 }
0x1174   :  { %1789 = vtanh.f32 %v1146_v22  ;;  %v1491_v16 = vmul.f32 -1.442695, %v1146_v22 }
0x1179   :  { %v1189_v7 = vpop.f32.mrb[28].mxu0 }
0x117a   :  { %v1196_v24 = vrot.slane %v1189_v7, 6  ;;  %v1656_v25 = vpop.f32.mrb[29].mxu0 }
0x117b   :  { %v1192_v26 = vpop.f32.mrb[30].mxu0 }
0x117c   :  { %v1198_v10 = vadd.f32 %v1196_v24, %v1980_v30  ;;  %v1657_v28 = vpop.f32.mrb[31].mxu0 }
0x117e   :  { %v1790_v29 = vpop.eup %1789  ;;  %1791 = vtanh.f32 %v1198_v10  ;;  %v1492_v31 = vmul.f32 -1.442695, %v1198_v10 }
0x117f   :  { %1211 = vrot.lane.b32.xlu0 %v1790_v29, %s1849_s5  ;;  %1793 = vpow2.f32 %v1491_v16 }
0x1180   :  { %1795 = vpow2.f32 %v1492_v31 }
0x1188   :  { %v1792_v2 = vpop.eup %1791 }
0x1189   :  { %1238 = vrot.lane.b32.xlu1 %v1792_v2, %s1849_s5  ;;  %v1794_v32 = vpop.eup %1793 }
0x118a   :  { %v1202_v34 = vadd.f32 1.0, %v1794_v32  ;;  %v1796_v35 = vpop.eup %1795 }
0x118b   :  { %v1229_v36 = vadd.f32 1.0, %v1796_v35 }
0x118c   :  { %1797 = vrcp.f32 %v1202_v34 }
0x118d   :  { %1799 = vrcp.f32 %v1229_v36 }
0x1196   :  { %v1798_v37 = vpop.eup %1797 }
0x1197   :  { %v1800_v41 = vpop.eup %1799  ;;  %v1209_v45 = vmul.f32 %v1798_v37, %v1207_v44 }
0x1198   :  { %v1236_v49 = vmul.f32 %v1800_v41, %v1234_v48 }
0x11f1   :  { %v1212_v38 = vpop.permute.xlu0 %1211 }
0x11f2   :  { %v1214_v40 = vmul.f32 %v1798_v37, %v1212_v38 }
0x11f4   :  { %1216 = vrot.lane.b32.xlu0 %v1214_v40, %s1848_s22 }
0x11fb   :  { %v1239_v42 = vpop.permute.xlu1 %1238 }
0x11fc   :  { %v1241_v43 = vmul.f32 %v1800_v41, %v1239_v42 }
0x11fe   :  { %1243 = vrot.lane.b32.xlu1 %v1241_v43, %s1848_s22 }
0x1266   :  { %v1217_v46 = vpop.permute.xlu0 %1216 }
0x1267   :  { %v1219_v47 = vadd.f32 %v1217_v46, %v1209_v45 }
0x1269   :  { %1801 = vtanh.f32 %v1219_v47  ;;  %v1362_v24 = vrot.slane %v1219_v47, 6 }
0x1270   :  { %v1244_v50 = vpop.permute.xlu1 %1243 }
0x1271   :  { %v1246_v51 = vadd.f32 %v1244_v50, %v1236_v49 }
0x1273   :  { %v1802_v52 = vpop.eup %1801  ;;  %1803 = vtanh.f32 %v1246_v51  ;;  %v1389_v28 = vrot.slane %v1246_v51, 2 }
0x1274   :  { %1222 = vrot.lane.b32.xlu0 %v1802_v52, %s1849_s5 }
0x127d   :  { %v1804_v53 = vpop.eup %1803 }
0x127e   :  { %1249 = vrot.lane.b32.xlu1 %v1804_v53, %s1849_s5 }
0x12e6   :  { %v1223_v54 = vpop.permute.xlu0 %1222 }
0x12e7   :  { %v1225_v55 = vmul.f32 %v1798_v37, %v1223_v54 }
0x12e9   :  { %v1253_v56 = vpack.c.bf16 %v1225_v55, %v1225_v55 }
0x12eb   :  { %v1255_v57 = vrot.slane %v1253_v56, 2 }
0x12ed   :  { %1256 = vrot.lane.b32.xlu0 %v1255_v57, %s1848_s22 }
0x12f0   :  { %v1250_v58 = vpop.permute.xlu1 %1249 }
0x12f1   :  { %v1252_v59 = vmul.f32 %v1800_v41, %v1250_v58 }
0x12f3   :  { %v1305_v60 = vpack.c.bf16 %v1252_v59, %v1252_v59 }
0x12f5   :  { %v1307_v61 = vrot.slane %v1305_v60, 1 }
0x12f7   :  { %1308 = vrot.lane.b32.xlu1 %v1307_v61, %s1848_s22 }
0x135f   :  { %v1257_v62 = vpop.permute.xlu0 %1256 }
0x1360   :  { %1663 = vmatmul.mubr.msk.bf16.vlgmr.msra.gmra.mrb[28].mxu1 %vm152_vm3, %v1257_v62 }
0x1369   :  { %v1309_v63 = vpop.permute.xlu1 %1308 }
0x136a   :  { %1671 = vmatmul.mubr.msk.bf16.vlgmr.msra.gmra.mrb[32].mxu0 %vm152_vm3, %v1309_v63 }
0x1433   :  { %v1295_v0 = vpop.f32.mrb[28].mxu1 }
0x1434   :  { %v1302_v1 = vrot.slane %v1295_v0, 2  ;;  %v1664_v4 = vpop.f32.mrb[29].mxu1 }
0x1435   :  { %v1298_v5 = vpop.f32.mrb[30].mxu1 }
0x1436   :  { %v1304_v6 = vadd.f32 %v1302_v1, %v1982_v33  ;;  %v1665_v8 = vpop.f32.mrb[31].mxu1 }
0x1438   :  { %1805 = vtanh.f32 %v1304_v6  ;;  %v1495_v17 = vmul.f32 -1.442695, %v1304_v6 }
0x143d   :  { %v1347_v9 = vpop.f32.mrb[32].mxu0 }
0x143e   :  { %v1353_v11 = vadd.f32 %v1347_v9, %v1980_v30  ;;  %v1672_v12 = vpop.f32.mrb[33].mxu0 }
0x143f   :  { %v1350_v13 = vpop.f32.mrb[34].mxu0 }
0x1440   :  { %1807 = vtanh.f32 %v1353_v11  ;;  %v1673_v14 = vpop.f32.mrb[35].mxu0  ;;  %v1496_v18 = vmul.f32 -1.442695, %v1353_v11 }
0x1441   :  { %1809 = vpow2.f32 %v1495_v17 }
0x1442   :  { %v1806_v27 = vpop.eup %1805  ;;  %1811 = vpow2.f32 %v1496_v18 }
0x1443   :  { %1366 = vrot.lane.b32.xlu0 %v1806_v27, %s1849_s5 }
0x144a   :  { %v1808_v15 = vpop.eup %1807 }
0x144b   :  { %1393 = vrot.lane.b32.xlu1 %v1808_v15, %s1849_s5  ;;  %v1810_v33 = vpop.eup %1809 }
0x144c   :  { %v1357_v39 = vadd.f32 1.0, %v1810_v33  ;;  %v1812_v3 = vpop.eup %1811 }
0x144d   :  { %v1384_v19 = vadd.f32 1.0, %v1812_v3 }
0x144e   :  { %1813 = vrcp.f32 %v1357_v39 }
0x144f   :  { %1815 = vrcp.f32 %v1384_v19 }
0x1458   :  { %v1814_v30 = vpop.eup %1813 }
0x1459   :  { %v1816_v22 = vpop.eup %1815  ;;  %v1364_v25 = vmul.f32 %v1814_v30, %v1362_v24 }
0x145a   :  { %v1391_v29 = vmul.f32 %v1816_v22, %v1389_v28 }
0x14b5   :  { %v1367_v20 = vpop.permute.xlu0 %1366 }
0x14b6   :  { %v1369_v21 = vmul.f32 %v1814_v30, %v1367_v20 }
0x14b8   :  { %1371 = vrot.lane.b32.xlu0 %v1369_v21, %s1848_s22 }
0x14bd   :  { %v1394_v23 = vpop.permute.xlu1 %1393 }
0x14be   :  { %v1396_v7 = vmul.f32 %v1816_v22, %v1394_v23 }
0x14c0   :  { %1398 = vrot.lane.b32.xlu1 %v1396_v7, %s1848_s22 }
0x152a   :  { %v1372_v26 = vpop.permute.xlu0 %1371 }
0x152b   :  { %v1374_v10 = vadd.f32 %v1372_v26, %v1364_v25 }
0x152d   :  { %1817 = vtanh.f32 %v1374_v10 }
0x1532   :  { %v1399_v2 = vpop.permute.xlu1 %1398 }
0x1533   :  { %v1401_v16 = vadd.f32 %v1399_v2, %v1391_v29 }
0x1535   :  { %1819 = vtanh.f32 %v1401_v16 }
0x1537   :  { %v1818_v31 = vpop.eup %1817 }
0x1538   :  { %1377 = vrot.lane.b32.xlu0 %v1818_v31, %s1849_s5 }
0x153c   :  { %1422 = vrot.lane.b32.xlu0 %v1374_v10, %s1850_s6 }
0x153f   :  { %v1820_v32 = vpop.eup %1819 }
0x1540   :  { %1404 = vrot.lane.b32.xlu1 %v1820_v32, %s1849_s5 }
0x1544   :  { %1427 = vrot.lane.b32.xlu1 %v1401_v16, %s1850_s6 }
0x15aa   :  { %v1378_v34 = vpop.permute.xlu0 %1377 }
0x15ab   :  { %v1380_v35 = vmul.f32 %v1814_v30, %v1378_v34 }
0x15ad   :  { %1409 = vrot.lane.b32.xlu0 %v1380_v35, %s1848_s22 }
0x15ae   :  { %v1423_v36 = vpop.permute.xlu0 %1422 }
0x15af   :  { %1425 = vst.msk [vmem:[#allocation2 - $0x6] sm:$0xc0] %vm1412_vm4, %v1423_v36 }
0x15b2   :  { %v1405_v37 = vpop.permute.xlu1 %1404 }
0x15b3   :  { %v1407_v38 = vmul.f32 %v1816_v22, %v1405_v37 }
0x15b5   :  { %1415 = vrot.lane.b32.xlu1 %v1407_v38, %s1848_s22 }
0x15b6   :  { %v1428_v40 = vpop.permute.xlu1 %1427 }
0x15b7   :  { %1431 = vst.msk [vmem:[#allocation2 + $0x2] sm:$0x3] %vm1419_vm5, %v1428_v40 }
0x15b8   :  { %1832 = shalt.err (!%p1829_p4)
}
0x15b9   :  { %s1833_s12 = scalar_lea.hbm %s2230_s8, 64 }
0x15ba   :  { %p1834_p5 = scmp.ne.s32.totalorder %s2230_s8, %s1833_s12  ;;  %p1837_p6 = scmp.lt.u32.totalorder %s1833_s12, %s2230_s8 }
0x15bc   :  { %p1839_p7 = pnand %p1837_p6, %p1834_p5 }
0x15be   :  { %1842 = shalt.err (!%p1839_p7)
}
0x15bf   :  { %s1852_s17 = smov 2  }
0x15c0   :  { %1445 = dma.vmem_to_hbm [thread:$0]  %s1440_s30, 64, %s2230_s8, [#allocation3], %s1848_s22, %s1848_s22, %s1852_s17  }
0x161f   :  { %v1410_v41 = vpop.permute.xlu0 %1409 }
0x1620   :  { %1413 = vst.msk [vmem:[%s2229_s7 - $0x6] sm:$0xc0] %vm1412_vm4, %v1410_v41 }
0x1627   :  { %v1416_v42 = vpop.permute.xlu1 %1415 }
0x1628   :  { %1497 = vst.msk [vmem:[%s2229_s7 + $0x2] sm:$0x3] %vm1419_vm5, %v1416_v42 }
0x1629   :  { %1843 = dma.done.wait [#allocation3], 64  }
0x162a   :  { %1844 = vsyncadd [#allocation3], 4294967232 }
0x162b   :  { %1451 = vsyncpa [#allocation3], 1 }

// kernel: fwd.10
= control target key start
LH: loop header
LB: loop body
LE: loop exit
PB: predicated region body
PF: predicated region fallthrough
CT: control target
= control target key end

     0   :  { %s3450_s0 = inlined_call_operand.vmem [shape: bf16[16,16], index: 0, kind: input, shape index: {}]   ;;  %s3451_s1 = inlined_call_operand.vmem [shape: f32[2,2,32], index: 1, kind: input, shape index: {}]   ;;  %s3452_s2 = inlined_call_operand.vmem [shape: f32[2,2,32], index: 2, kind: input, shape index: {}]   ;;  %s3453_s3 = inlined_call_operand.vmem [shape: f32[2,2,32], index: 3, kind: input, shape index: {}]   ;;  %s3454_s4 = inlined_call_operand.vmem [shape: bf16[64,32], index: 4, kind: input, shape index: {}]   ;;  %s3455_s5 = inlined_call_operand.vmem [shape: f32[1,32], index: 5, kind: input, shape index: {}]   ;;  %s3456_s6 = inlined_call_operand.vmem [shape: f32[2,16], index: 6, kind: input, shape index: {}]   ;;  %s3457_s7 = inlined_call_operand.vmem [shape: bf16[16,128], index: 7, kind: input, shape index: {}]   ;;  %s3458_s8 = inlined_call_operand.vmem [shape: bf16[16,128], index: 8, kind: input, shape index: {}]   ;;  %s3459_s9 = inlined_call_operand.vmem [shape: f32[1,128], index: 9, kind: input, shape index: {}]   ;;  %s3460_s10 = inlined_call_operand.vmem [shape: bf16[32,128], index: 10, kind: input, shape index: {}]   ;;  %s3461_s11 = inlined_call_operand.vmem [shape: bf16[32,128], index: 11, kind: input, shape index: {}]   ;;  %s3462_s12 = inlined_call_operand.vmem [shape: f32[1,128], index: 12, kind: input, shape index: {}]   ;;  %s3463_s13 = inlined_call_operand.vmem [shape: bf16[32,128], index: 13, kind: input, shape index: {}]   ;;  %s3464_s14 = inlined_call_operand.vmem [shape: bf16[2,256], index: 14, kind: output, shape index: {0}]   ;;  %s3465_s15 = inlined_call_operand.hbm [shape: f32[2,2,32], index: 15, kind: output, shape index: {1}]   ;;  %s3466_s16 = inlined_call_operand.hbm [shape: f32[2,2,32], index: 16, kind: output, shape index: {2}]   ;;  %s3467_s17 = inlined_call_operand.hbm [shape: f32[2,16], index: 17, kind: output, shape index: {3}]   ;;  %s3468_s18 = inlined_call_operand.hbm [shape: f32[2,16], index: 18, kind: output, shape index: {4}]   ;;  %s3469_s19 = inlined_call_operand.hbm [shape: f32[1,1], index: 19, kind: output, shape index: {5}]  }
   0x1   :  { %3473 = sst [smem:[#allocation13_spill]] %s3450_s0 }
   0x2   :  { %3474 = sst [smem:[#allocation14_spill]] %s3451_s1 }
   0x3   :  { %3475 = sst [smem:[#allocation15_spill]] %s3452_s2 }
   0x4   :  { %3476 = sst [smem:[#allocation16_spill]] %s3453_s3 }
   0x5   :  { %25 = vsyncpa [#allocation3], 0 }
   0x6   :  { %26 = vsyncpa [#allocation5], 0  ;;  %s3477_s20 = sld [smem:[#allocation14_spill]]  ;;  %s2768_s21 = smov 32   ;;  %v2769_v1 = vmov 0.0   ;;  %v2504_v2 = vld [vmem:[%s3454_s4] sm:$0xff]  }
   0x7   :  { %2219 = vmatprep.subr.bf16.mxu0 %v2769_v1  ;;  %2237 = vmatprep.subr.bf16.mxu1 %v2769_v1  ;;  %v2505_v3 = vld [vmem:[%s3454_s4 + $0x8] sm:$0xff]   ;;  %vm2770_vm0 = vmmov 0   ;;  %v2506_v4 = vld [vmem:[%s3454_s4 + $0x10] sm:$0xff]   ;;  %v2507_v5 = vld [vmem:[%s3454_s4 + $0x18] sm:$0xff]  }
   0x8   :  { %2220 = vmatpush3.bf16.msra.mxu0 %v2504_v2  ;;  %2227 = vmatprep.mubr.msk.bf16.mxu0 %vm2770_vm0, %v2769_v1 }
   0x9   :  { %2221 = vmatprep.subr.bf16.mxu0 %v2769_v1  ;;  %2239 = vmatprep.mubr.msk.bf16.mxu1 %vm2770_vm0, %v2769_v1 }
   0xc   :  { %v2074_v0 = vld [vmem:[%s3477_s20 + $0x2] sm:$0x3]  ;;  %2222 = vmatpush3.bf16.msra.mxu0 %v2505_v3 }
   0xd   :  { %61 = vrot.lane.b32.xlu0 %v2074_v0, %s2768_s21  ;;  %2223 = vmatprep.subr.bf16.mxu0 %v2769_v1 }
  0x10   :  { %2224 = vmatpush3.bf16.msra.mxu0 %v2506_v4 }
  0x11   :  { %27 = vsyncpa [#allocation8], 0  ;;  %2225 = vmatprep.subr.bf16.mxu0 %v2769_v1  ;;  %vm64_vm1 = vcmask 261120   ;;  %v57_v6 = vld [vmem:[%s3477_s20] sm:$0x3]  ;;  %vm106_vm2 = vcmask 523264  }
  0x12   :  { %v2075_v10 = vld [vmem:[%s3455_s5] ss:$0 sm:$0xff]  ;;  %vm160_vm3 = vcmask 123904   ;;  %s3478_s2 = sld [smem:[#allocation13_spill]]  ;;  %vm208_vm4 = vcmask 130048   ;;  %v2951_v28 = vld [vmem:[%s3460_s10 + $0x8] sm:$0xff]  }
  0x13   :  { %v2508_v18 = vld [vmem:[%s3458_s8] sm:$0xff]   ;;  %s2771_s8 = smov 112   ;;  %s3479_s28 = sld [smem:[#allocation15_spill]]  ;;  %vm180_vm5 = vcmask 1041408   ;;  %vm191_vm6 = vcmask 0  }
  0x14   :  { %2226 = vmatpush3.bf16.msra.mxu0 %v2507_v5  ;;  %v2509_v19 = vld [vmem:[%s3457_s7] sm:$0xff]   ;;  %2238 = vmatpush3.bf16.msra.mxu1 %v2508_v18  ;;  %s3480_s30 = sld [smem:[#allocation16_spill]] }
  0x15   :  { %2231 = vmatprep.subr.bf16.mxu0 %v2769_v1  ;;  %2243 = vmatprep.subr.bf16.mxu1 %v2769_v1  ;;  %v153_v22 = vld [vmem:[%s3456_s6] sm:$0x3] }
  0x16   :  { %v2945_v26 = vld [vmem:[%s3460_s10] sm:$0xff]  }
  0x17   :  { %v2084_v35 = vld [vmem:[%s3459_s9] ss:$0 sm:$0xff]  ;;  %s2772_s9 = smov 64  }
  0x18   :  { %v2510_v20 = vld [vmem:[%s3478_s2] sm:$0xff]  }
  0x19   :  { %v325_v29 = vld [vmem:[%s3479_s28] sm:$0x3] }
  0x1a   :  { %v332_v30 = vpack.c.bf16 %v325_v29, %v325_v29  ;;  %v326_v58 = vld [vmem:[%s3480_s30] sm:$0x3] }
  0x7f   :  { %v62_v7 = vpop.permute.xlu0 %61 }
  0x80   :  { %v65_v8 = vsel %vm64_vm1, %v57_v6, %v62_v7  ;;  %v2997_v6 = vld [vmem:[%s3461_s11] sm:$0xff]   ;;  %v3003_v7 = vld [vmem:[%s3461_s11 + $0x8] sm:$0xff]  }
  0x81   :  { %v66_v9 = vpack.c.bf16 %v65_v8, %v65_v8 }
  0x83   :  { %2228 = vmatmul.mubr.msk.bf16.vlgmr.msra.gmra.mrb[0].mxu0 %vm106_vm2, %v66_v9 }
  0x84   :  { %2233 = vmatprep.mubr.msk.bf16.mxu0 %vm2770_vm0, %v2769_v1  ;;  %2232 = vmatpush3.bf16.msra.mxu0 %v2509_v19 }
  0x85   :  { %2251 = vmatprep.subr.bf16.mxu0 %v2769_v1 }
  0x8b   :  { %2234 = vmatmul.mubr.msk.bf16.vlgmr.msra.gmra.mrb[4].mxu0 %vm208_vm4, %v2510_v20 }
  0x8c   :  { %2255 = vmatprep.mubr.msk.bf16.mxu0 %vm2770_vm0, %v2769_v1  ;;  %2252 = vmatpush3.bf16.msra.mxu0 %v2997_v6 }
  0x8d   :  { %2253 = vmatprep.subr.bf16.mxu0 %v2769_v1 }
  0x90   :  { %2254 = vmatpush3.bf16.msra.mxu0 %v3003_v7 }
  0x91   :  { %2259 = vmatprep.subr.bf16.mxu0 %v2769_v1 }
 0x156   :  { %v144_v11 = vpop.f32.mrb[0].mxu0 }
 0x157   :  { %v2918_v12 = vadd.f32 %v2075_v10, %v144_v11  ;;  %v2229_v13 = vpop.f32.mrb[1].mxu0 }
 0x158   :  { %v147_v14 = vpop.f32.mrb[2].mxu0  ;;  %v3013_v13 = vld [vmem:[%s3463_s13] sm:$0xff]  }
 0x159   :  { %v150_v15 = vmul.f32 0.5, %v2918_v12  ;;  %v2230_v16 = vpop.f32.mrb[3].mxu0  ;;  %161 = vst.msk [vmem:[#allocation6] sm:$0x3] %vm160_vm3, %v2918_v12 }
 0x15a   :  { %v2087_v16 = vld [vmem:[%s3479_s28 + $0x2] sm:$0x3]  ;;  %s2773_s28 = smov 16  }
 0x15b   :  { %v151_v17 = vmul.f32 1.442695, %v150_v15  ;;  %v3021_v15 = vld [vmem:[%s3463_s13 + $0x8] sm:$0xff]  }
 0x15d   :  { %2517 = vpow2.f32 %v151_v17  ;;  %v483_v17 = vpack.c.bf16 %v2087_v16, %v2087_v16 }
 0x15e   :  { %v246_v31 = vpop.f32.mrb[4].mxu0 }
 0x15f   :  { %v2235_v32 = vpop.f32.mrb[5].mxu0 }
 0x160   :  { %v249_v33 = vpop.f32.mrb[6].mxu0 }
 0x161   :  { %v2236_v34 = vpop.f32.mrb[7].mxu0 }
 0x162   :  { %v2088_v34 = vld [vmem:[%s3480_s30 + $0x2] sm:$0x3] }
 0x167   :  { %v2518_v21 = vpop.eup %2517 }
 0x168   :  { %155 = vrot.lane.b32.xlu0 %v2518_v21, %s2771_s8 }
 0x1da   :  { %v156_v23 = vpop.permute.xlu0 %155 }
 0x1db   :  { %v158_v24 = vmul.f32 %v156_v23, %v153_v22  ;;  %162 = vst.msk [vmem:[#allocation7] sm:$0x3] %vm160_vm3, %v156_v23 }
 0x1dd   :  { %v159_v25 = vadd.f32 %v158_v24, %v2918_v12  ;;  %v3048_v24 = vld [vmem:[%s3462_s12] ss:$0 sm:$0xff] }
 0x1df   :  { %v253_v27 = vpack.c.bf16 %v159_v25, %v159_v25 }
 0x1e1   :  { %2240 = vmatmul.mubr.msk.bf16.vlgmr.msra.gmra.mrb[0].mxu1 %vm208_vm4, %v253_v27 }
 0x1e2   :  { %2244 = vmatpush3.bf16.msra.mxu1 %v2945_v26  ;;  %2247 = vmatprep.mubr.msk.bf16.mxu1 %vm2770_vm0, %v2769_v1 }
 0x1e3   :  { %2245 = vmatprep.subr.bf16.mxu1 %v2769_v1 }
 0x1e6   :  { %2246 = vmatpush3.bf16.msra.mxu1 %v2951_v28 }
 0x1e7   :  { %2267 = vmatprep.subr.bf16.mxu1 %v2769_v1 }
 0x1e9   :  { %2248 = vmatmul.mubr.msk.bf16.vlgmr.msra.gmra.mrb[4].mxu1 %vm64_vm1, %v332_v30 }
 0x1ea   :  { %2268 = vmatpush3.bf16.msra.mxu1 %v2945_v26  ;;  %2271 = vmatprep.mubr.msk.bf16.mxu1 %vm2770_vm0, %v2769_v1 }
 0x1eb   :  { %2269 = vmatprep.subr.bf16.mxu1 %v2769_v1 }
 0x1ee   :  { %2270 = vmatpush3.bf16.msra.mxu1 %v2951_v28 }
 0x1ef   :  { %2275 = vmatprep.subr.bf16.mxu1 %v2769_v1 }
 0x2b4   :  { %v306_v36 = vpop.f32.mrb[0].mxu1 }
 0x2b5   :  { %v307_v37 = vadd.f32 %v2084_v35, %v306_v36  ;;  %v2241_v38 = vpop.f32.mrb[1].mxu1 }
 0x2b6   :  { %v309_v39 = vpop.f32.mrb[2].mxu1 }
 0x2b7   :  { %v2242_v40 = vpop.f32.mrb[3].mxu1  ;;  %v331_v41 = vadd.f32 %v307_v37, %v246_v31  ;;  %v569_v42 = vrot.slane %v307_v37, 6  ;;  %v764_v43 = vrot.slane %v307_v37, 4  ;;  %v959_v44 = vrot.slane %v307_v37, 2 }
 0x2b8   :  { %v2971_v45 = vadd.f32 %v307_v37, %v249_v33 }
 0x2b9   :  { %v2973_v46 = vadd.f32 %v569_v42, %v246_v31  ;;  %v2975_v47 = vadd.f32 %v764_v43, %v246_v31  ;;  %v2977_v48 = vadd.f32 %v959_v44, %v246_v31  ;;  %v2979_v49 = vadd.f32 %v569_v42, %v249_v33 }
 0x2ba   :  { %v2981_v50 = vadd.f32 %v764_v43, %v249_v33  ;;  %v2983_v51 = vadd.f32 %v959_v44, %v249_v33 }
 0x2bc   :  { %v382_v52 = vpop.f32.mrb[4].mxu1 }
 0x2bd   :  { %v388_v53 = vadd.f32 %v382_v52, %v331_v41  ;;  %v2249_v54 = vpop.f32.mrb[5].mxu1 }
 0x2be   :  { %v385_v55 = vpop.f32.mrb[6].mxu1 }
 0x2bf   :  { %2519 = vtanh.f32 %v388_v53  ;;  %v2250_v56 = vpop.f32.mrb[7].mxu1  ;;  %v2092_v59 = vmul.f32 -1.442695, %v388_v53 }
 0x2c1   :  { %2521 = vpow2.f32 %v2092_v59 }
 0x2c9   :  { %v2520_v57 = vpop.eup %2519 }
 0x2ca   :  { %402 = vrot.lane.b32.xlu1 %v2520_v57, %s2772_s9 }
 0x2cb   :  { %v2522_v60 = vpop.eup %2521 }
 0x2cc   :  { %v392_v61 = vadd.f32 1.0, %v2522_v60 }
 0x2ce   :  { %397 = vrot.lane.b32.xlu1 %v326_v58, %s2768_s21  ;;  %2523 = vrcp.f32 %v392_v61 }
 0x2d8   :  { %v2524_v62 = vpop.eup %2523 }
 0x33c   :  { %v403_v63 = vpop.permute.xlu1 %402 }
 0x33d   :  { %v405_v0 = vmul.f32 %v2524_v62, %v403_v63 }
 0x33f   :  { %407 = vrot.lane.b32.xlu0 %v405_v0, %s2768_s21 }
 0x340   :  { %v398_v2 = vpop.permute.xlu1 %397 }
 0x341   :  { %v400_v3 = vmul.f32 %v2524_v62, %v398_v2 }
 0x3b1   :  { %v408_v4 = vpop.permute.xlu0 %407 }
 0x3b2   :  { %v2991_v5 = vadd.f32 %v408_v4, %v400_v3 }
 0x3b4   :  { %2525 = vtanh.f32 %v2991_v5  ;;  %v624_v53 = vrot.slane %v2991_v5, 6 }
 0x3be   :  { %v2526_v8 = vpop.eup %2525 }
 0x3bf   :  { %413 = vrot.lane.b32.xlu1 %v2526_v8, %s2772_s9 }
 0x431   :  { %v414_v9 = vpop.permute.xlu1 %413 }
 0x432   :  { %v416_v10 = vmul.f32 %v2524_v62, %v414_v9 }
 0x434   :  { %v417_v11 = vpack.c.bf16 %v416_v10, %v416_v10 }
 0x436   :  { %419 = vrot.lane.b32.xlu0 %v417_v11, %s2768_s21 }
 0x4a8   :  { %v420_v14 = vpop.permute.xlu0 %419 }
 0x4a9   :  { %2256 = vmatmul.mubr.msk.bf16.vlgmr.msra.gmra.mrb[8].mxu0 %vm64_vm1, %v420_v14  ;;  %2272 = vmatmul.mubr.msk.bf16.vlgmr.msra.gmra.mrb[8].mxu1 %vm64_vm1, %v420_v14 }
 0x4aa   :  { %2260 = vmatpush3.bf16.msra.mxu0 %v3013_v13  ;;  %2263 = vmatprep.mubr.msk.bf16.mxu0 %vm2770_vm0, %v2769_v1 }
 0x4ab   :  { %2261 = vmatprep.subr.bf16.mxu0 %v2769_v1  ;;  %2276 = vmatpush3.bf16.msra.mxu1 %v2997_v6 }
 0x4ac   :  { %2277 = vmatprep.subr.bf16.mxu1 %v2769_v1  ;;  %2279 = vmatprep.mubr.msk.bf16.mxu1 %vm2770_vm0, %v2769_v1 }
 0x4ae   :  { %2262 = vmatpush3.bf16.msra.mxu0 %v3021_v15 }
 0x4af   :  { %2291 = vmatprep.subr.bf16.mxu0 %v2769_v1  ;;  %2278 = vmatpush3.bf16.msra.mxu1 %v3003_v7 }
 0x4b0   :  { %2283 = vmatprep.subr.bf16.mxu1 %v2769_v1 }
 0x4b5   :  { %2264 = vmatmul.mubr.msk.bf16.vlgmr.msra.gmra.mrb[8].mxu0 %vm64_vm1, %v483_v17 }
 0x4b6   :  { %2292 = vmatpush3.bf16.msra.mxu0 %v2945_v26  ;;  %2295 = vmatprep.mubr.msk.bf16.mxu0 %vm2770_vm0, %v2769_v1 }
 0x4b7   :  { %2293 = vmatprep.subr.bf16.mxu0 %v2769_v1 }
 0x4ba   :  { %2294 = vmatpush3.bf16.msra.mxu0 %v2951_v28 }
 0x4bb   :  { %2299 = vmatprep.subr.bf16.mxu0 %v2769_v1 }
 0x57c   :  { %v606_v18 = vpop.f32.mrb[8].mxu1 }
 0x57d   :  { %v613_v19 = vrot.slane %v606_v18, 6  ;;  %v2273_v20 = vpop.f32.mrb[9].mxu1 }
 0x57e   :  { %v609_v21 = vpop.f32.mrb[10].mxu1 }
 0x57f   :  { %v615_v22 = vadd.f32 %v613_v19, %v2973_v46  ;;  %v2274_v23 = vpop.f32.mrb[11].mxu1 }
 0x581   :  { %2527 = vtanh.f32 %v615_v22  ;;  %v2102_v35 = vmul.f32 -1.442695, %v615_v22 }
 0x588   :  { %v533_v25 = vpop.f32.mrb[8].mxu0 }
 0x589   :  { %v2435_v27 = vadd.f32 %v3048_v24, %v533_v25  ;;  %v2265_v29 = vpop.f32.mrb[9].mxu0 }
 0x58a   :  { %v536_v30 = vpop.f32.mrb[10].mxu0 }
 0x58b   :  { %v2528_v31 = vpop.eup %2527  ;;  %2529 = vtanh.f32 %v2435_v27  ;;  %v2266_v32 = vpop.f32.mrb[11].mxu0  ;;  %v2100_v36 = vmul.f32 -1.442695, %v2435_v27 }
 0x58c   :  { %628 = vrot.lane.b32.xlu1 %v2528_v31, %s2772_s9  ;;  %2531 = vpow2.f32 %v2102_v35 }
 0x58d   :  { %2533 = vpow2.f32 %v2100_v36 }
 0x595   :  { %v2530_v33 = vpop.eup %2529 }
 0x596   :  { %553 = vrot.lane.b32.xlu0 %v2530_v33, %s2772_s9  ;;  %v2532_v37 = vpop.eup %2531 }
 0x597   :  { %v619_v38 = vadd.f32 1.0, %v2532_v37  ;;  %v2534_v39 = vpop.eup %2533 }
 0x598   :  { %v543_v40 = vadd.f32 1.0, %v2534_v39 }
 0x599   :  { %2535 = vrcp.f32 %v619_v38 }
 0x59a   :  { %548 = vrot.lane.b32.xlu0 %v2088_v34, %s2768_s21  ;;  %2537 = vrcp.f32 %v543_v40 }
 0x5a3   :  { %v2536_v41 = vpop.eup %2535 }
 0x5a4   :  { %v2538_v44 = vpop.eup %2537  ;;  %v626_v54 = vmul.f32 %v2536_v41, %v624_v53 }
 0x5fe   :  { %v629_v42 = vpop.permute.xlu1 %628 }
 0x5ff   :  { %v631_v43 = vmul.f32 %v2536_v41, %v629_v42 }
 0x601   :  { %633 = vrot.lane.b32.xlu1 %v631_v43, %s2768_s21 }
 0x608   :  { %v554_v46 = vpop.permute.xlu0 %553 }
 0x609   :  { %v556_v52 = vmul.f32 %v2538_v44, %v554_v46 }
 0x60b   :  { %558 = vrot.lane.b32.xlu1 %v556_v52, %s2768_s21 }
 0x60c   :  { %v549_v57 = vpop.permute.xlu0 %548 }
 0x60d   :  { %v551_v58 = vmul.f32 %v2538_v44, %v549_v57 }
 0x673   :  { %v634_v55 = vpop.permute.xlu1 %633 }
 0x674   :  { %v3060_v56 = vadd.f32 %v634_v55, %v626_v54 }
 0x676   :  { %2539 = vtanh.f32 %v3060_v56 }
 0x67d   :  { %v559_v59 = vpop.permute.xlu1 %558 }
 0x67e   :  { %v3063_v60 = vadd.f32 %v559_v59, %v551_v58 }
 0x680   :  { %v2540_v61 = vpop.eup %2539  ;;  %2541 = vtanh.f32 %v3063_v60 }
 0x681   :  { %639 = vrot.lane.b32.xlu0 %v2540_v61, %s2772_s9 }
 0x68a   :  { %v2542_v62 = vpop.eup %2541 }
 0x68b   :  { %564 = vrot.lane.b32.xlu1 %v2542_v62, %s2772_s9 }
 0x6f3   :  { %v640_v63 = vpop.permute.xlu0 %639 }
 0x6f4   :  { %v642_v0 = vmul.f32 %v2536_v41, %v640_v63  ;;  %v819_v41 = vrot.slane %v3060_v56, 6 }
 0x6f6   :  { %v643_v2 = vpack.c.bf16 %v642_v0, %v642_v0 }
 0x6f8   :  { %v645_v3 = vrot.slane %v643_v2, 1 }
 0x6fa   :  { %646 = vrot.lane.b32.xlu0 %v645_v3, %s2768_s21 }
 0x6fd   :  { %v565_v4 = vpop.permute.xlu1 %564 }
 0x6fe   :  { %v3069_v5 = vmul.f32 %v2538_v44, %v565_v4 }
 0x700   :  { %v692_v8 = vpack.c.bf16 %v3069_v5, %v3069_v5 }
 0x702   :  { %694 = vrot.lane.b32.xlu1 %v692_v8, %s2768_s21 }
 0x76c   :  { %v647_v9 = vpop.permute.xlu0 %646 }
 0x76d   :  { %2280 = vmatmul.mubr.msk.bf16.vlgmr.msra.gmra.mrb[12].mxu1 %vm64_vm1, %v647_v9  ;;  %2296 = vmatmul.mubr.msk.bf16.vlgmr.msra.gmra.mrb[12].mxu0 %vm64_vm1, %v647_v9 }
 0x76e   :  { %2284 = vmatpush3.bf16.msra.mxu1 %v3013_v13  ;;  %2287 = vmatprep.mubr.msk.bf16.mxu1 %vm2770_vm0, %v2769_v1 }
 0x76f   :  { %2285 = vmatprep.subr.bf16.mxu1 %v2769_v1  ;;  %2300 = vmatpush3.bf16.msra.mxu0 %v2997_v6 }
 0x770   :  { %2301 = vmatprep.subr.bf16.mxu0 %v2769_v1  ;;  %2303 = vmatprep.mubr.msk.bf16.mxu0 %vm2770_vm0, %v2769_v1 }
 0x772   :  { %2286 = vmatpush3.bf16.msra.mxu1 %v3021_v15 }
 0x773   :  { %2315 = vmatprep.subr.bf16.mxu1 %v2769_v1  ;;  %2302 = vmatpush3.bf16.msra.mxu0 %v3003_v7 }
 0x774   :  { %2307 = vmatprep.subr.bf16.mxu0 %v2769_v1  ;;  %v695_v10 = vpop.permute.xlu1 %694 }
 0x779   :  { %2288 = vmatmul.mubr.msk.bf16.vlgmr.msra.gmra.mrb[12].mxu1 %vm64_vm1, %v695_v10 }
 0x77a   :  { %2316 = vmatpush3.bf16.msra.mxu1 %v2945_v26  ;;  %2319 = vmatprep.mubr.msk.bf16.mxu1 %vm2770_vm0, %v2769_v1 }
 0x77b   :  { %2317 = vmatprep.subr.bf16.mxu1 %v2769_v1 }
 0x77e   :  { %2318 = vmatpush3.bf16.msra.mxu1 %v2951_v28 }
 0x77f   :  { %2323 = vmatprep.subr.bf16.mxu1 %v2769_v1 }
 0x840   :  { %v801_v11 = vpop.f32.mrb[12].mxu0 }
 0x841   :  { %v808_v14 = vrot.slane %v801_v11, 4  ;;  %v2297_v16 = vpop.f32.mrb[13].mxu0 }
 0x842   :  { %v804_v17 = vpop.f32.mrb[14].mxu0 }
 0x843   :  { %v810_v18 = vadd.f32 %v808_v14, %v2975_v47  ;;  %v2298_v19 = vpop.f32.mrb[15].mxu0 }
 0x845   :  { %2543 = vtanh.f32 %v810_v18  ;;  %v2107_v30 = vmul.f32 -1.442695, %v810_v18 }
 0x84c   :  { %v733_v20 = vpop.f32.mrb[12].mxu1 }
 0x84d   :  { %v2436_v21 = vadd.f32 %v3048_v24, %v733_v20  ;;  %v2289_v22 = vpop.f32.mrb[13].mxu1 }
 0x84e   :  { %v736_v23 = vpop.f32.mrb[14].mxu1 }
 0x84f   :  { %v2544_v25 = vpop.eup %2543  ;;  %2545 = vtanh.f32 %v2436_v21  ;;  %v2290_v27 = vpop.f32.mrb[15].mxu1  ;;  %v2105_v31 = vmul.f32 -1.442695, %v2436_v21 }
 0x850   :  { %823 = vrot.lane.b32.xlu0 %v2544_v25, %s2772_s9  ;;  %2547 = vpow2.f32 %v2107_v30 }
 0x851   :  { %2549 = vpow2.f32 %v2105_v31 }
 0x859   :  { %v2546_v29 = vpop.eup %2545 }
 0x85a   :  { %749 = vrot.lane.b32.xlu1 %v2546_v29, %s2772_s9  ;;  %v2548_v32 = vpop.eup %2547 }
 0x85b   :  { %v814_v47 = vadd.f32 1.0, %v2548_v32  ;;  %v2550_v33 = vpop.eup %2549 }
 0x85c   :  { %v743_v34 = vadd.f32 1.0, %v2550_v33 }
 0x85d   :  { %2551 = vrcp.f32 %v814_v47 }
 0x85e   :  { %2553 = vrcp.f32 %v743_v34 }
 0x867   :  { %v2552_v35 = vpop.eup %2551 }
 0x868   :  { %v2554_v38 = vpop.eup %2553  ;;  %v821_v42 = vmul.f32 %v2552_v35, %v819_v41 }
 0x869   :  { %v747_v46 = vmul.f32 %v2554_v38, %v3063_v60 }
 0x8c2   :  { %v824_v36 = vpop.permute.xlu0 %823 }
 0x8c3   :  { %v826_v37 = vmul.f32 %v2552_v35, %v824_v36 }
 0x8c5   :  { %828 = vrot.lane.b32.xlu0 %v826_v37, %s2768_s21 }
 0x8cc   :  { %v750_v39 = vpop.permute.xlu1 %749 }
 0x8cd   :  { %v752_v40 = vmul.f32 %v2554_v38, %v750_v39 }
 0x8cf   :  { %754 = vrot.lane.b32.xlu1 %v752_v40, %s2768_s21 }
 0x937   :  { %v829_v43 = vpop.permute.xlu0 %828 }
 0x938   :  { %v3102_v44 = vadd.f32 %v829_v43, %v821_v42 }
 0x93a   :  { %2555 = vtanh.f32 %v3102_v44  ;;  %v1014_v34 = vrot.slane %v3102_v44, 6 }
 0x941   :  { %v755_v52 = vpop.permute.xlu1 %754 }
 0x942   :  { %v3106_v53 = vadd.f32 %v755_v52, %v747_v46 }
 0x944   :  { %v2556_v54 = vpop.eup %2555  ;;  %2557 = vtanh.f32 %v3106_v53 }
 0x945   :  { %834 = vrot.lane.b32.xlu0 %v2556_v54, %s2772_s9 }
 0x94e   :  { %v2558_v55 = vpop.eup %2557 }
 0x94f   :  { %760 = vrot.lane.b32.xlu1 %v2558_v55, %s2772_s9 }
 0x9b7   :  { %v835_v56 = vpop.permute.xlu0 %834 }
 0x9b8   :  { %v837_v57 = vmul.f32 %v2552_v35, %v835_v56 }
 0x9ba   :  { %v838_v58 = vpack.c.bf16 %v837_v57, %v837_v57 }
 0x9bc   :  { %v840_v59 = vrot.slane %v838_v58, 2 }
 0x9be   :  { %841 = vrot.lane.b32.xlu0 %v840_v59, %s2768_s21 }
 0x9c1   :  { %v761_v61 = vpop.permute.xlu1 %760 }
 0x9c2   :  { %v3112_v62 = vmul.f32 %v2554_v38, %v761_v61 }
 0x9c4   :  { %v887_v60 = vpack.c.bf16 %v3112_v62, %v3112_v62 }
 0x9c6   :  { %889 = vrot.lane.b32.xlu1 %v887_v60, %s2768_s21 }
 0xa30   :  { %v842_v63 = vpop.permute.xlu0 %841 }
 0xa31   :  { %2304 = vmatmul.mubr.msk.bf16.vlgmr.msra.gmra.mrb[16].mxu0 %vm64_vm1, %v842_v63  ;;  %2320 = vmatmul.mubr.msk.bf16.vlgmr.msra.gmra.mrb[16].mxu1 %vm64_vm1, %v842_v63 }
 0xa32   :  { %2308 = vmatpush3.bf16.msra.mxu0 %v3013_v13  ;;  %2311 = vmatprep.mubr.msk.bf16.mxu0 %vm2770_vm0, %v2769_v1 }
 0xa33   :  { %2309 = vmatprep.subr.bf16.mxu0 %v2769_v1  ;;  %2324 = vmatpush3.bf16.msra.mxu1 %v2997_v6 }
 0xa34   :  { %2325 = vmatprep.subr.bf16.mxu1 %v2769_v1  ;;  %2327 = vmatprep.mubr.msk.bf16.mxu1 %vm2770_vm0, %v2769_v1 }
 0xa36   :  { %2310 = vmatpush3.bf16.msra.mxu0 %v3021_v15 }
 0xa37   :  { %2339 = vmatprep.subr.bf16.mxu0 %v2769_v1  ;;  %2326 = vmatpush3.bf16.msra.mxu1 %v3003_v7 }
 0xa38   :  { %2331 = vmatprep.subr.bf16.mxu1 %v2769_v1  ;;  %v890_v0 = vpop.permute.xlu1 %889 }
 0xa3d   :  { %2312 = vmatmul.mubr.msk.bf16.vlgmr.msra.gmra.mrb[16].mxu0 %vm64_vm1, %v890_v0 }
 0xa3e   :  { %2340 = vmatpush3.bf16.msra.mxu0 %v2945_v26  ;;  %2343 = vmatprep.mubr.msk.bf16.mxu0 %vm2770_vm0, %v2769_v1 }
 0xa3f   :  { %2341 = vmatprep.subr.bf16.mxu0 %v2769_v1 }
 0xa42   :  { %2342 = vmatpush3.bf16.msra.mxu0 %v2951_v28 }
 0xa43   :  { %2347 = vmatprep.subr.bf16.mxu0 %v2769_v1 }
 0xb04   :  { %v996_v2 = vpop.f32.mrb[16].mxu1 }
 0xb05   :  { %v1003_v3 = vrot.slane %v996_v2, 2  ;;  %v2321_v4 = vpop.f32.mrb[17].mxu1 }
 0xb06   :  { %v999_v8 = vpop.f32.mrb[18].mxu1 }
 0xb07   :  { %v1005_v9 = vadd.f32 %v1003_v3, %v2977_v48  ;;  %v2322_v10 = vpop.f32.mrb[19].mxu1 }
 0xb09   :  { %2559 = vtanh.f32 %v1005_v9  ;;  %v2112_v21 = vmul.f32 -1.442695, %v1005_v9 }
 0xb10   :  { %v928_v11 = vpop.f32.mrb[16].mxu0 }
 0xb11   :  { %v2437_v14 = vadd.f32 %v3048_v24, %v928_v11  ;;  %v2313_v16 = vpop.f32.mrb[17].mxu0 }
 0xb12   :  { %v931_v17 = vpop.f32.mrb[18].mxu0 }
 0xb13   :  { %v2560_v18 = vpop.eup %2559  ;;  %2561 = vtanh.f32 %v2437_v14  ;;  %v2314_v19 = vpop.f32.mrb[19].mxu0  ;;  %v2110_v22 = vmul.f32 -1.442695, %v2437_v14 }
 0xb14   :  { %1018 = vrot.lane.b32.xlu0 %v2560_v18, %s2772_s9  ;;  %2563 = vpow2.f32 %v2112_v21 }
 0xb15   :  { %2565 = vpow2.f32 %v2110_v22 }
 0xb1d   :  { %v2562_v20 = vpop.eup %2561 }
 0xb1e   :  { %944 = vrot.lane.b32.xlu1 %v2562_v20, %s2772_s9  ;;  %v2564_v23 = vpop.eup %2563 }
 0xb1f   :  { %v1009_v48 = vadd.f32 1.0, %v2564_v23  ;;  %v2566_v25 = vpop.eup %2565 }
 0xb20   :  { %v938_v27 = vadd.f32 1.0, %v2566_v25 }
 0xb21   :  { %2567 = vrcp.f32 %v1009_v48 }
 0xb22   :  { %2569 = vrcp.f32 %v938_v27 }
 0xb2b   :  { %v2568_v29 = vpop.eup %2567 }
 0xb2c   :  { %v2570_v32 = vpop.eup %2569  ;;  %v1016_v35 = vmul.f32 %v2568_v29, %v1014_v34 }
 0xb2d   :  { %v942_v38 = vmul.f32 %v2570_v32, %v3106_v53 }
 0xb86   :  { %v1019_v30 = vpop.permute.xlu0 %1018 }
 0xb87   :  { %v1021_v31 = vmul.f32 %v2568_v29, %v1019_v30 }
 0xb89   :  { %1023 = vrot.lane.b32.xlu0 %v1021_v31, %s2768_s21 }
 0xb90   :  { %v945_v47 = vpop.permute.xlu1 %944 }
 0xb91   :  { %v947_v33 = vmul.f32 %v2570_v32, %v945_v47 }
 0xb93   :  { %949 = vrot.lane.b32.xlu1 %v947_v33, %s2768_s21 }
 0xbfb   :  { %v1024_v36 = vpop.permute.xlu0 %1023 }
 0xbfc   :  { %v3145_v37 = vadd.f32 %v1024_v36, %v1016_v35 }
 0xbfe   :  { %2571 = vtanh.f32 %v3145_v37  ;;  %v1204_v25 = vrot.slane %v3145_v37, 6 }
 0xc05   :  { %v950_v39 = vpop.permute.xlu1 %949 }
 0xc06   :  { %v3149_v40 = vadd.f32 %v950_v39, %v942_v38 }
 0xc08   :  { %v2572_v41 = vpop.eup %2571  ;;  %2573 = vtanh.f32 %v3149_v40 }
 0xc09   :  { %1029 = vrot.lane.b32.xlu0 %v2572_v41, %s2772_s9 }
 0xc12   :  { %v2574_v42 = vpop.eup %2573 }
 0xc13   :  { %955 = vrot.lane.b32.xlu1 %v2574_v42, %s2772_s9 }
 0xc7b   :  { %v1030_v43 = vpop.permute.xlu0 %1029 }
 0xc7c   :  { %v1032_v44 = vmul.f32 %v2568_v29, %v1030_v43 }
 0xc7e   :  { %v1033_v46 = vpack.c.bf16 %v1032_v44, %v1032_v44 }
 0xc80   :  { %v1035_v52 = vrot.slane %v1033_v46, 3 }
 0xc82   :  { %1036 = vrot.lane.b32.xlu0 %v1035_v52, %s2768_s21 }
 0xc85   :  { %v956_v54 = vpop.permute.xlu1 %955 }
 0xc86   :  { %v3155_v55 = vmul.f32 %v2570_v32, %v956_v54 }
 0xc88   :  { %v1082_v53 = vpack.c.bf16 %v3155_v55, %v3155_v55 }
 0xc8a   :  { %1084 = vrot.lane.b32.xlu1 %v1082_v53, %s2768_s21 }
 0xcf4   :  { %v1037_v56 = vpop.permute.xlu0 %1036 }
 0xcf5   :  { %2328 = vmatmul.mubr.msk.bf16.vlgmr.msra.gmra.mrb[20].mxu1 %vm64_vm1, %v1037_v56  ;;  %2344 = vmatmul.mubr.msk.bf16.vlgmr.msra.gmra.mrb[20].mxu0 %vm64_vm1, %v1037_v56 }
 0xcf6   :  { %2332 = vmatpush3.bf16.msra.mxu1 %v3013_v13  ;;  %2335 = vmatprep.mubr.msk.bf16.mxu1 %vm2770_vm0, %v2769_v1 }
 0xcf7   :  { %2333 = vmatprep.subr.bf16.mxu1 %v2769_v1  ;;  %2348 = vmatpush3.bf16.msra.mxu0 %v2997_v6 }
 0xcf8   :  { %2349 = vmatprep.subr.bf16.mxu0 %v2769_v1  ;;  %2351 = vmatprep.mubr.msk.bf16.mxu0 %vm2770_vm0, %v2769_v1 }
 0xcfa   :  { %2334 = vmatpush3.bf16.msra.mxu1 %v3021_v15 }
 0xcfb   :  { %2363 = vmatprep.subr.bf16.mxu1 %v2769_v1  ;;  %2350 = vmatpush3.bf16.msra.mxu0 %v3003_v7 }
 0xcfc   :  { %2355 = vmatprep.subr.bf16.mxu0 %v2769_v1  ;;  %v1085_v57 = vpop.permute.xlu1 %1084 }
 0xd01   :  { %2336 = vmatmul.mubr.msk.bf16.vlgmr.msra.gmra.mrb[20].mxu1 %vm64_vm1, %v1085_v57 }
 0xd02   :  { %2364 = vmatpush3.bf16.msra.mxu1 %v2945_v26  ;;  %2367 = vmatprep.mubr.msk.bf16.mxu1 %vm2770_vm0, %v2769_v1 }
 0xd03   :  { %2365 = vmatprep.subr.bf16.mxu1 %v2769_v1 }
 0xd06   :  { %2366 = vmatpush3.bf16.msra.mxu1 %v2951_v28 }
 0xd07   :  { %2371 = vmatprep.subr.bf16.mxu1 %v2769_v1 }
 0xdc8   :  { %v1189_v58 = vpop.f32.mrb[20].mxu0 }
 0xdc9   :  { %v1195_v59 = vadd.f32 %v1189_v58, %v2971_v45  ;;  %v2345_v61 = vpop.f32.mrb[21].mxu0 }
 0xdca   :  { %v1192_v60 = vpop.f32.mrb[22].mxu0 }
 0xdcb   :  { %2575 = vtanh.f32 %v1195_v59  ;;  %v2346_v63 = vpop.f32.mrb[23].mxu0  ;;  %v2117_v11 = vmul.f32 -1.442695, %v1195_v59 }
 0xdd4   :  { %v1123_v0 = vpop.f32.mrb[20].mxu1 }
 0xdd5   :  { %v2576_v2 = vpop.eup %2575  ;;  %v2438_v3 = vadd.f32 %v3048_v24, %v1123_v0  ;;  %v2337_v4 = vpop.f32.mrb[21].mxu1 }
 0xdd6   :  { %v1126_v8 = vpop.f32.mrb[22].mxu1  ;;  %1208 = vrot.lane.b32.xlu0 %v2576_v2, %s2772_s9 }
 0xdd7   :  { %2577 = vtanh.f32 %v2438_v3  ;;  %v2338_v9 = vpop.f32.mrb[23].mxu1  ;;  %v2115_v45 = vmul.f32 -1.442695, %v2438_v3 }
 0xdd8   :  { %2579 = vpow2.f32 %v2117_v11 }
 0xdd9   :  { %2581 = vpow2.f32 %v2115_v45 }
 0xde1   :  { %v2578_v10 = vpop.eup %2577 }
 0xde2   :  { %1139 = vrot.lane.b32.xlu1 %v2578_v10, %s2772_s9  ;;  %v2580_v14 = vpop.eup %2579 }
 0xde3   :  { %v1199_v16 = vadd.f32 1.0, %v2580_v14  ;;  %v2582_v17 = vpop.eup %2581 }
 0xde4   :  { %v1133_v18 = vadd.f32 1.0, %v2582_v17 }
 0xde5   :  { %2583 = vrcp.f32 %v1199_v16 }
 0xde6   :  { %2585 = vrcp.f32 %v1133_v18 }
 0xdef   :  { %v2584_v19 = vpop.eup %2583 }
 0xdf0   :  { %v2586_v22 = vpop.eup %2585  ;;  %v1206_v27 = vmul.f32 %v2584_v19, %v1204_v25 }
 0xdf1   :  { %v1137_v31 = vmul.f32 %v2586_v22, %v3149_v40 }
 0xe48   :  { %v1209_v20 = vpop.permute.xlu0 %1208 }
 0xe49   :  { %v1211_v21 = vmul.f32 %v2584_v19, %v1209_v20 }
 0xe4b   :  { %1213 = vrot.lane.b32.xlu0 %v1211_v21, %s2768_s21 }
 0xe54   :  { %v1140_v23 = vpop.permute.xlu1 %1139 }
 0xe55   :  { %v1142_v48 = vmul.f32 %v2586_v22, %v1140_v23 }
 0xe57   :  { %1144 = vrot.lane.b32.xlu1 %v1142_v48, %s2768_s21 }
 0xebd   :  { %v1214_v29 = vpop.permute.xlu0 %1213 }
 0xebe   :  { %v3188_v30 = vadd.f32 %v1214_v29, %v1206_v27 }
 0xec0   :  { %2587 = vtanh.f32 %v3188_v30  ;;  %v1396_v17 = vrot.slane %v3188_v30, 6 }
 0xec9   :  { %v1145_v32 = vpop.permute.xlu1 %1144 }
 0xeca   :  { %v2588_v47 = vpop.eup %2587  ;;  %v3192_v33 = vadd.f32 %v1145_v32, %v1137_v31 }
 0xecb   :  { %1219 = vrot.lane.b32.xlu0 %v2588_v47, %s2772_s9 }
 0xecc   :  { %2589 = vtanh.f32 %v3192_v33 }
 0xed6   :  { %v2590_v34 = vpop.eup %2589 }
 0xed7   :  { %1150 = vrot.lane.b32.xlu1 %v2590_v34, %s2772_s9 }
 0xf3d   :  { %v1220_v35 = vpop.permute.xlu0 %1219 }
 0xf3e   :  { %v1222_v36 = vmul.f32 %v2584_v19, %v1220_v35 }
 0xf40   :  { %v1223_v37 = vpack.c.bf16 %v1222_v36, %v1222_v36 }
 0xf42   :  { %1225 = vrot.lane.b32.xlu0 %v1223_v37, %s2768_s21 }
 0xf49   :  { %v1151_v38 = vpop.permute.xlu1 %1150 }
 0xf4a   :  { %v3198_v39 = vmul.f32 %v2586_v22, %v1151_v38 }
 0xf4c   :  { %v1271_v40 = vpack.c.bf16 %v3198_v39, %v3198_v39 }
 0xf4e   :  { %1273 = vrot.lane.b32.xlu1 %v1271_v40, %s2768_s21 }
 0xfb4   :  { %v1226_v41 = vpop.permute.xlu0 %1225 }
 0xfb5   :  { %2352 = vmatmul.mubr.msk.bf16.vlgmr.msra.gmra.mrb[24].mxu0 %vm64_vm1, %v1226_v41  ;;  %2368 = vmatmul.mubr.msk.bf16.vlgmr.msra.gmra.mrb[24].mxu1 %vm64_vm1, %v1226_v41 }
 0xfb6   :  { %2356 = vmatpush3.bf16.msra.mxu0 %v3013_v13  ;;  %2359 = vmatprep.mubr.msk.bf16.mxu0 %vm2770_vm0, %v2769_v1 }
 0xfb7   :  { %2357 = vmatprep.subr.bf16.mxu0 %v2769_v1  ;;  %2372 = vmatpush3.bf16.msra.mxu1 %v2997_v6 }
 0xfb8   :  { %2373 = vmatprep.subr.bf16.mxu1 %v2769_v1  ;;  %2375 = vmatprep.mubr.msk.bf16.mxu1 %vm2770_vm0, %v2769_v1 }
 0xfba   :  { %2358 = vmatpush3.bf16.msra.mxu0 %v3021_v15 }
 0xfbb   :  { %2387 = vmatprep.subr.bf16.mxu0 %v2769_v1  ;;  %2374 = vmatpush3.bf16.msra.mxu1 %v3003_v7 }
 0xfbc   :  { %2379 = vmatprep.subr.bf16.mxu1 %v2769_v1 }
 0xfc0   :  { %v1274_v42 = vpop.permute.xlu1 %1273 }
 0xfc1   :  { %2360 = vmatmul.mubr.msk.bf16.vlgmr.msra.gmra.mrb[24].mxu0 %vm64_vm1, %v1274_v42 }
 0xfc2   :  { %2388 = vmatpush3.bf16.msra.mxu0 %v2945_v26  ;;  %2391 = vmatprep.mubr.msk.bf16.mxu0 %vm2770_vm0, %v2769_v1 }
 0xfc3   :  { %2389 = vmatprep.subr.bf16.mxu0 %v2769_v1 }
 0xfc6   :  { %2390 = vmatpush3.bf16.msra.mxu0 %v2951_v28 }
 0xfc7   :  { %2395 = vmatprep.subr.bf16.mxu0 %v2769_v1 }
0x1088   :  { %v1378_v43 = vpop.f32.mrb[24].mxu1 }
0x1089   :  { %v1385_v44 = vrot.slane %v1378_v43, 6  ;;  %v2369_v46 = vpop.f32.mrb[25].mxu1 }
0x108a   :  { %v1381_v52 = vpop.f32.mrb[26].mxu1 }
0x108b   :  { %v1387_v54 = vadd.f32 %v1385_v44, %v2979_v49  ;;  %v2370_v53 = vpop.f32.mrb[27].mxu1 }
0x108d   :  { %2591 = vtanh.f32 %v1387_v54  ;;  %v2122_v0 = vmul.f32 -1.442695, %v1387_v54 }
0x1094   :  { %v1312_v56 = vpop.f32.mrb[24].mxu0 }
0x1095   :  { %v2439_v57 = vadd.f32 %v3048_v24, %v1312_v56  ;;  %v2361_v58 = vpop.f32.mrb[25].mxu0 }
0x1096   :  { %v1315_v59 = vpop.f32.mrb[26].mxu0 }
0x1097   :  { %v2592_v61 = vpop.eup %2591  ;;  %2593 = vtanh.f32 %v2439_v57  ;;  %v2362_v60 = vpop.f32.mrb[27].mxu0  ;;  %v2120_v2 = vmul.f32 -1.442695, %v2439_v57 }
0x1098   :  { %1400 = vrot.lane.b32.xlu0 %v2592_v61, %s2772_s9  ;;  %2595 = vpow2.f32 %v2122_v0 }
0x1099   :  { %2597 = vpow2.f32 %v2120_v2 }
0x10a1   :  { %v2594_v63 = vpop.eup %2593 }
0x10a2   :  { %1328 = vrot.lane.b32.xlu1 %v2594_v63, %s2772_s9  ;;  %v2596_v3 = vpop.eup %2595 }
0x10a3   :  { %v1391_v49 = vadd.f32 1.0, %v2596_v3  ;;  %v2598_v4 = vpop.eup %2597 }
0x10a4   :  { %v1322_v8 = vadd.f32 1.0, %v2598_v4 }
0x10a5   :  { %2599 = vrcp.f32 %v1391_v49 }
0x10a6   :  { %2601 = vrcp.f32 %v1322_v8 }
0x10af   :  { %v2600_v9 = vpop.eup %2599 }
0x10b0   :  { %v2602_v45 = vpop.eup %2601  ;;  %v1398_v18 = vmul.f32 %v2600_v9, %v1396_v17 }
0x10b1   :  { %v1326_v21 = vmul.f32 %v2602_v45, %v3192_v33 }
0x110a   :  { %v1401_v10 = vpop.permute.xlu0 %1400 }
0x110b   :  { %v1403_v11 = vmul.f32 %v2600_v9, %v1401_v10 }
0x110d   :  { %1405 = vrot.lane.b32.xlu0 %v1403_v11, %s2768_s21 }
0x1114   :  { %v1329_v14 = vpop.permute.xlu1 %1328 }
0x1115   :  { %v1331_v16 = vmul.f32 %v2602_v45, %v1329_v14 }
0x1117   :  { %1333 = vrot.lane.b32.xlu1 %v1331_v16, %s2768_s21 }
0x117f   :  { %v1406_v19 = vpop.permute.xlu0 %1405 }
0x1180   :  { %v3231_v20 = vadd.f32 %v1406_v19, %v1398_v18 }
0x1182   :  { %2603 = vtanh.f32 %v3231_v20  ;;  %v1589_v49 = vrot.slane %v3231_v20, 6 }
0x1189   :  { %v1334_v22 = vpop.permute.xlu1 %1333 }
0x118a   :  { %v3235_v23 = vadd.f32 %v1334_v22, %v1326_v21 }
0x118c   :  { %v2604_v48 = vpop.eup %2603  ;;  %2605 = vtanh.f32 %v3235_v23 }
0x118d   :  { %1411 = vrot.lane.b32.xlu0 %v2604_v48, %s2772_s9 }
0x1196   :  { %v2606_v25 = vpop.eup %2605 }
0x1197   :  { %1339 = vrot.lane.b32.xlu1 %v2606_v25, %s2772_s9 }
0x11ff   :  { %v1412_v27 = vpop.permute.xlu0 %1411 }
0x1200   :  { %v1414_v29 = vmul.f32 %v2600_v9, %v1412_v27 }
0x1202   :  { %v1415_v30 = vpack.c.bf16 %v1414_v29, %v1414_v29 }
0x1204   :  { %v1417_v31 = vrot.slane %v1415_v30, 1 }
0x1206   :  { %1418 = vrot.lane.b32.xlu0 %v1417_v31, %s2768_s21 }
0x1209   :  { %v1340_v32 = vpop.permute.xlu1 %1339 }
0x120a   :  { %v3241_v47 = vmul.f32 %v2602_v45, %v1340_v32 }
0x120c   :  { %v1464_v33 = vpack.c.bf16 %v3241_v47, %v3241_v47 }
0x120e   :  { %1466 = vrot.lane.b32.xlu1 %v1464_v33, %s2768_s21 }
0x1278   :  { %v1419_v34 = vpop.permute.xlu0 %1418 }
0x1279   :  { %2376 = vmatmul.mubr.msk.bf16.vlgmr.msra.gmra.mrb[28].mxu1 %vm64_vm1, %v1419_v34  ;;  %2392 = vmatmul.mubr.msk.bf16.vlgmr.msra.gmra.mrb[28].mxu0 %vm64_vm1, %v1419_v34 }
0x127a   :  { %2380 = vmatpush3.bf16.msra.mxu1 %v3013_v13  ;;  %2383 = vmatprep.mubr.msk.bf16.mxu1 %vm2770_vm0, %v2769_v1 }
0x127b   :  { %2381 = vmatprep.subr.bf16.mxu1 %v2769_v1  ;;  %2396 = vmatpush3.bf16.msra.mxu0 %v2997_v6 }
0x127c   :  { %2397 = vmatprep.subr.bf16.mxu0 %v2769_v1  ;;  %2399 = vmatprep.mubr.msk.bf16.mxu0 %vm2770_vm0, %v2769_v1 }
0x127e   :  { %2382 = vmatpush3.bf16.msra.mxu1 %v3021_v15 }
0x127f   :  { %2411 = vmatprep.subr.bf16.mxu1 %v2769_v1  ;;  %2398 = vmatpush3.bf16.msra.mxu0 %v3003_v7 }
0x1280   :  { %2403 = vmatprep.subr.bf16.mxu0 %v2769_v1  ;;  %v1467_v35 = vpop.permute.xlu1 %1466 }
0x1285   :  { %2384 = vmatmul.mubr.msk.bf16.vlgmr.msra.gmra.mrb[28].mxu1 %vm64_vm1, %v1467_v35 }
0x1286   :  { %2412 = vmatpush3.bf16.msra.mxu1 %v2945_v26  ;;  %2415 = vmatprep.mubr.msk.bf16.mxu1 %vm2770_vm0, %v2769_v1 }
0x1287   :  { %2413 = vmatprep.subr.bf16.mxu1 %v2769_v1 }
0x128a   :  { %2414 = vmatpush3.bf16.msra.mxu1 %v2951_v28 }
0x128b   :  { %2419 = vmatprep.subr.bf16.mxu1 %v2769_v1 }
0x134c   :  { %v1571_v36 = vpop.f32.mrb[28].mxu0 }
0x134d   :  { %v1578_v37 = vrot.slane %v1571_v36, 4  ;;  %v2393_v38 = vpop.f32.mrb[29].mxu0 }
0x134e   :  { %v1574_v40 = vpop.f32.mrb[30].mxu0 }
0x134f   :  { %v1580_v41 = vadd.f32 %v1578_v37, %v2981_v50  ;;  %v2394_v42 = vpop.f32.mrb[31].mxu0 }
0x1351   :  { %2607 = vtanh.f32 %v1580_v41  ;;  %v2127_v53 = vmul.f32 -1.442695, %v1580_v41 }
0x1358   :  { %v1505_v43 = vpop.f32.mrb[28].mxu1 }
0x1359   :  { %v2440_v26 = vadd.f32 %v3048_v24, %v1505_v43  ;;  %v2385_v44 = vpop.f32.mrb[29].mxu1 }
0x135a   :  { %v1508_v46 = vpop.f32.mrb[30].mxu1 }
0x135b   :  { %v2608_v52 = vpop.eup %2607  ;;  %2609 = vtanh.f32 %v2440_v26  ;;  %v2386_v54 = vpop.f32.mrb[31].mxu1  ;;  %v2125_v56 = vmul.f32 -1.442695, %v2440_v26 }
0x135c   :  { %1593 = vrot.lane.b32.xlu0 %v2608_v52, %s2772_s9  ;;  %2611 = vpow2.f32 %v2127_v53 }
0x135d   :  { %2613 = vpow2.f32 %v2125_v56 }
0x1365   :  { %v2610_v28 = vpop.eup %2609 }
0x1366   :  { %1521 = vrot.lane.b32.xlu1 %v2610_v28, %s2772_s9  ;;  %v2612_v57 = vpop.eup %2611 }
0x1367   :  { %v1584_v50 = vadd.f32 1.0, %v2612_v57  ;;  %v2614_v58 = vpop.eup %2613 }
0x1368   :  { %v1515_v59 = vadd.f32 1.0, %v2614_v58 }
0x1369   :  { %2615 = vrcp.f32 %v1584_v50 }
0x136a   :  { %2617 = vrcp.f32 %v1515_v59 }
0x1373   :  { %v2616_v61 = vpop.eup %2615 }
0x1374   :  { %v2618_v0 = vpop.eup %2617  ;;  %v1591_v4 = vmul.f32 %v2616_v61, %v1589_v49 }
0x1375   :  { %v1519_v10 = vmul.f32 %v2618_v0, %v3235_v23 }
0x13ce   :  { %v1594_v60 = vpop.permute.xlu0 %1593 }
0x13cf   :  { %v1596_v63 = vmul.f32 %v2616_v61, %v1594_v60 }
0x13d1   :  { %1598 = vrot.lane.b32.xlu0 %v1596_v63, %s2768_s21 }
0x13d8   :  { %v1522_v2 = vpop.permute.xlu1 %1521 }
0x13d9   :  { %v1524_v3 = vmul.f32 %v2618_v0, %v1522_v2 }
0x13db   :  { %1526 = vrot.lane.b32.xlu1 %v1524_v3, %s2768_s21 }
0x1443   :  { %v1599_v8 = vpop.permute.xlu0 %1598 }
0x1444   :  { %v3274_v9 = vadd.f32 %v1599_v8, %v1591_v4  ;;  %v163_v8 = vmul.f32 %v2918_v12, %v2918_v12 }
0x1446   :  { %2619 = vtanh.f32 %v3274_v9  ;;  %v1782_v54 = vrot.slane %v3274_v9, 6 }
0x144d   :  { %v1527_v11 = vpop.permute.xlu1 %1526 }
0x144e   :  { %v3278_v45 = vadd.f32 %v1527_v11, %v1519_v10  ;;  %v169_v10 = vmul.f32 1.442695, %v2918_v12  ;;  %v2649_v11 = vld [vmem:[%s3463_s13] sm:$0xff]  }
0x1450   :  { %v2620_v14 = vpop.eup %2619  ;;  %2621 = vtanh.f32 %v3278_v45 }
0x1451   :  { %1604 = vrot.lane.b32.xlu0 %v2620_v14, %s2772_s9 }
0x145a   :  { %v2622_v16 = vpop.eup %2621 }
0x145b   :  { %1532 = vrot.lane.b32.xlu1 %v2622_v16, %s2772_s9 }
0x14c3   :  { %v1605_v17 = vpop.permute.xlu0 %1604 }
0x14c4   :  { %v1607_v18 = vmul.f32 %v2616_v61, %v1605_v17 }
0x14c6   :  { %v1608_v19 = vpack.c.bf16 %v1607_v18, %v1607_v18 }
0x14c8   :  { %v1610_v20 = vrot.slane %v1608_v19, 2 }
0x14ca   :  { %1611 = vrot.lane.b32.xlu0 %v1610_v20, %s2768_s21 }
0x14cd   :  { %v1533_v21 = vpop.permute.xlu1 %1532 }
0x14ce   :  { %v3284_v22 = vmul.f32 %v2618_v0, %v1533_v21 }
0x14d0   :  { %v1657_v23 = vpack.c.bf16 %v3284_v22, %v3284_v22 }
0x14d2   :  { %1659 = vrot.lane.b32.xlu1 %v1657_v23, %s2768_s21 }
0x153c   :  { %v1612_v48 = vpop.permute.xlu0 %1611 }
0x153d   :  { %2400 = vmatmul.mubr.msk.bf16.vlgmr.msra.gmra.mrb[32].mxu0 %vm64_vm1, %v1612_v48  ;;  %2416 = vmatmul.mubr.msk.bf16.vlgmr.msra.gmra.mrb[32].mxu1 %vm64_vm1, %v1612_v48  ;;  %v2651_v48 = vld [vmem:[%s3462_s12] ss:$0 sm:$0xff]  ;;  %s2774_s12 = smov 96  }
0x153e   :  { %2404 = vmatpush3.bf16.msra.mxu0 %v3013_v13  ;;  %2407 = vmatprep.mubr.msk.bf16.mxu0 %vm2770_vm0, %v2769_v1 }
0x153f   :  { %2405 = vmatprep.subr.bf16.mxu0 %v2769_v1  ;;  %2420 = vmatpush3.bf16.msra.mxu1 %v2997_v6 }
0x1540   :  { %2421 = vmatprep.subr.bf16.mxu1 %v2769_v1  ;;  %2423 = vmatprep.mubr.msk.bf16.mxu1 %vm2770_vm0, %v2769_v1 }
0x1542   :  { %2406 = vmatpush3.bf16.msra.mxu0 %v3021_v15 }
0x1543   :  { %2422 = vmatpush3.bf16.msra.mxu1 %v3003_v7 }
0x1544   :  { %2427 = vmatprep.subr.bf16.mxu1 %v2769_v1  ;;  %v1660_v25 = vpop.permute.xlu1 %1659 }
0x1549   :  { %2408 = vmatmul.mubr.msk.bf16.vlgmr.msra.gmra.mrb[32].mxu0 %vm64_vm1, %v1660_v25 }
0x1610   :  { %v1764_v13 = vpop.f32.mrb[32].mxu1 }
0x1611   :  { %v1771_v27 = vrot.slane %v1764_v13, 2  ;;  %v2417_v29 = vpop.f32.mrb[33].mxu1 }
0x1612   :  { %v1767_v30 = vpop.f32.mrb[34].mxu1 }
0x1613   :  { %v1773_v6 = vadd.f32 %v1771_v27, %v2983_v51  ;;  %v2418_v31 = vpop.f32.mrb[35].mxu1 }
0x1615   :  { %2623 = vtanh.f32 %v1773_v6  ;;  %v2132_v37 = vmul.f32 -1.442695, %v1773_v6 }
0x161c   :  { %v1698_v32 = vpop.f32.mrb[32].mxu0 }
0x161d   :  { %v2441_v33 = vadd.f32 %v3048_v24, %v1698_v32  ;;  %v2409_v34 = vpop.f32.mrb[33].mxu0 }
0x161e   :  { %v1701_v15 = vpop.f32.mrb[34].mxu0 }
0x161f   :  { %v2624_v35 = vpop.eup %2623  ;;  %2625 = vtanh.f32 %v2441_v33  ;;  %v2410_v7 = vpop.f32.mrb[35].mxu0  ;;  %v2130_v38 = vmul.f32 -1.442695, %v2441_v33 }
0x1620   :  { %1786 = vrot.lane.b32.xlu0 %v2624_v35, %s2772_s9  ;;  %2627 = vpow2.f32 %v2132_v37 }
0x1621   :  { %2629 = vpow2.f32 %v2130_v38 }
0x1629   :  { %v2626_v36 = vpop.eup %2625 }
0x162a   :  { %1714 = vrot.lane.b32.xlu1 %v2626_v36, %s2772_s9  ;;  %v2628_v40 = vpop.eup %2627 }
0x162b   :  { %v1777_v51 = vadd.f32 1.0, %v2628_v40  ;;  %v2630_v41 = vpop.eup %2629 }
0x162c   :  { %v1708_v42 = vadd.f32 1.0, %v2630_v41 }
0x162d   :  { %2631 = vrcp.f32 %v1777_v51 }
0x162e   :  { %2633 = vrcp.f32 %v1708_v42 }
0x1637   :  { %v2632_v24 = vpop.eup %2631 }
0x1638   :  { %v2634_v44 = vpop.eup %2633  ;;  %v1784_v28 = vmul.f32 %v2632_v24, %v1782_v54 }
0x1639   :  { %v1712_v57 = vmul.f32 %v2634_v44, %v3278_v45  ;;  %v2650_v45 = vld [vmem:[%s3463_s13 + $0x8] sm:$0xff]   ;;  %s2775_s13 = smov [#allocation7]  }
0x1692   :  { %v1787_v43 = vpop.permute.xlu0 %1786 }
0x1693   :  { %v1789_v26 = vmul.f32 %v2632_v24, %v1787_v43 }
0x1695   :  { %1791 = vrot.lane.b32.xlu0 %v1789_v26, %s2768_s21 }
0x169c   :  { %v1715_v46 = vpop.permute.xlu1 %1714 }
0x169d   :  { %v1717_v52 = vmul.f32 %v2634_v44, %v1715_v46  ;;  %v2489_v46 = vpack.i.bf16 %v3241_v47, %v3069_v5 }
0x169f   :  { %1719 = vrot.lane.b32.xlu1 %v1717_v52, %s2768_s21  ;;  %v2494_v52 = vpack.i.bf16 %v3284_v22, %v3112_v62 }
0x1707   :  { %v1792_v53 = vpop.permute.xlu0 %1791 }
0x1708   :  { %v3310_v56 = vadd.f32 %v1792_v53, %v1784_v28 }
0x170a   :  { %2635 = vtanh.f32 %v3310_v56 }
0x1711   :  { %v1720_v50 = vpop.permute.xlu1 %1719 }
0x1712   :  { %v3314_v58 = vadd.f32 %v1720_v50, %v1712_v57 }
0x1714   :  { %v2636_v59 = vpop.eup %2635  ;;  %2637 = vtanh.f32 %v3314_v58 }
0x1715   :  { %1797 = vrot.lane.b32.xlu0 %v2636_v59, %s2772_s9  ;;  %2639 = vpow2.f32 %v169_v10 }
0x171e   :  { %v2638_v61 = vpop.eup %2637 }
0x171f   :  { %1725 = vrot.lane.b32.xlu1 %v2638_v61, %s2772_s9  ;;  %v2640_v18 = vpop.eup %2639 }
0x1787   :  { %v1798_v60 = vpop.permute.xlu0 %1797 }
0x1788   :  { %v3319_v63 = vmul.f32 %v2632_v24, %v1798_v60 }
0x178a   :  { %v1801_v0 = vpack.c.bf16 %v3319_v63, %v3319_v63 }
0x178c   :  { %v1803_v2 = vrot.slane %v1801_v0, 3 }
0x178e   :  { %1804 = vrot.lane.b32.xlu0 %v1803_v2, %s2768_s21 }
0x1791   :  { %v1726_v3 = vpop.permute.xlu1 %1725 }
0x1792   :  { %v3324_v49 = vmul.f32 %v2634_v44, %v1726_v3 }
0x1794   :  { %v1850_v4 = vpack.c.bf16 %v3324_v49, %v3324_v49  ;;  %v2499_v54 = vpack.i.bf16 %v3324_v49, %v3155_v55 }
0x1796   :  { %1852 = vrot.lane.b32.xlu1 %v1850_v4, %s2768_s21 }
0x179a   :  { %165 = vrot.lane.b32.xlu1 %v163_v8, %s2773_s28 }
0x1800   :  { %v1805_v9 = vpop.permute.xlu0 %1804 }
0x1801   :  { %2424 = vmatmul.mubr.msk.bf16.vlgmr.msra.gmra.mrb[36].mxu1 %vm64_vm1, %v1805_v9 }
0x1802   :  { %2428 = vmatpush3.bf16.msra.mxu1 %v2649_v11  ;;  %2431 = vmatprep.mubr.msk.bf16.mxu1 %vm2770_vm0, %v2769_v1 }
0x1803   :  { %2429 = vmatprep.subr.bf16.mxu1 %v2769_v1 }
0x1806   :  { %2430 = vmatpush3.bf16.msra.mxu1 %v2650_v45 }
0x1808   :  { %v1853_v14 = vpop.permute.xlu1 %1852 }
0x180c   :  { %v166_v16 = vpop.permute.xlu1 %165 }
0x180d   :  { %v168_v17 = vsub.f32 %v2918_v12, %v166_v16  ;;  %2432 = vmatmul.mubr.msk.bf16.vlgmr.msra.gmra.mrb[36].mxu1 %vm64_vm1, %v1853_v14 }
0x180f   :  { %v171_v19 = vsub.f32 %v168_v17, %v2640_v18 }
0x1811   :  { %v172_v20 = vadd.f32 1.0, %v171_v19 }
0x1813   :  { %174 = vrot.lane.b32.xlu1 %v172_v20, %s2771_s8  ;;  %s2040_s8 = sshll.u32 %s2775_s13, 4  ;;  %s2041_s8 = int_to_ptr.vmem [resolvable:$true] %s2040_s8 }
0x1814   :  { %s2652_s1 = scalar_lea.vmem %s2041_s8, 32  ;;  %p2657_p1 = scmp.lt.s32.totalorder %s2041_s8, %s2041_s8 }
0x1815   :  { %p2653_p0 = scmp.ne.s32.totalorder %s2041_s8, %s2652_s1  ;;  %p2658_p2 = scmp.lt.s32.totalorder %s2652_s1, %s2652_s1 }
0x1817   :  { %p2659_p3 = por %p2658_p2, %p2657_p1 }
0x1819   :  { %p2660_p4 = pnand %p2659_p3, %p2653_p0 }
0x1885   :  { %v175_v21 = vpop.permute.xlu1 %174 }
0x1886   :  { %v177_v1 = vsel %vm160_vm3, %v175_v21, 0.0 }
0x1887   :  { %178 = vadd.xlane.f32.xlu1 %v177_v1 }
0x18e0   :  { %v1891_v23 = vpop.f32.mrb[36].mxu1 }
0x18e1   :  { %v2442_v25 = vadd.f32 %v2651_v48, %v1891_v23  ;;  %v2433_v13 = vpop.f32.mrb[37].mxu1 }
0x18e2   :  { %v1894_v27 = vpop.f32.mrb[38].mxu1 }
0x18e3   :  { %2641 = vtanh.f32 %v2442_v25  ;;  %v2434_v12 = vpop.f32.mrb[39].mxu1  ;;  %v2135_v37 = vmul.f32 -1.442695, %v2442_v25 }
0x18e5   :  { %2643 = vpow2.f32 %v2135_v37 }
0x18ed   :  { %v2642_v29 = vpop.eup %2641 }
0x18ee   :  { %1907 = vrot.lane.b32.xlu0 %v2642_v29, %s2772_s9 }
0x18ef   :  { %v2644_v38 = vpop.eup %2643 }
0x18f0   :  { %v1901_v40 = vadd.f32 1.0, %v2644_v38 }
0x18f2   :  { %2645 = vrcp.f32 %v1901_v40 }
0x18fc   :  { %v2646_v51 = vpop.eup %2645 }
0x18fd   :  { %v1905_v24 = vmul.f32 %v2646_v51, %v3314_v58 }
0x1914   :  { %v179_v30 = vpop.xlane.xlu1 %178 }
0x1915   :  { %v181_v6 = vsel %vm180_vm5, %v179_v30, 0.0 }
0x1916   :  { %v182_v31 = vrot.slane %v181_v6, 4 }
0x1918   :  { %v183_v32 = vadd.f32 %v182_v31, %v181_v6 }
0x191a   :  { %v184_v33 = vrot.slane %v183_v32, 2 }
0x191c   :  { %v185_v34 = vadd.f32 %v184_v33, %v183_v32 }
0x191e   :  { %v186_v15 = vrot.slane %v185_v34, 1 }
0x1920   :  { %v187_v35 = vadd.f32 %v186_v15, %v185_v34 }
0x1922   :  { %v189_v7 = vmul.f32 0.5, %v187_v35 }
0x1924   :  { %v190_v36 = vmul.f32 -0.5, %v189_v7 }
0x1926   :  { %192 = vst.msk [vmem:[#allocation9] sm:$0x1] %vm191_vm6, %v190_v36 }
0x1960   :  { %v1908_v41 = vpop.permute.xlu0 %1907 }
0x1961   :  { %v1910_v42 = vmul.f32 %v2646_v51, %v1908_v41 }
0x1963   :  { %1912 = vrot.lane.b32.xlu0 %v1910_v42, %s2768_s21 }
0x19d5   :  { %v1913_v43 = vpop.permute.xlu0 %1912 }
0x19d6   :  { %v1915_v26 = vadd.f32 %v1913_v43, %v1905_v24 }
0x19d8   :  { %2647 = vtanh.f32 %v1915_v26 }
0x19e2   :  { %v2648_v44 = vpop.eup %2647 }
0x19e3   :  { %1918 = vrot.lane.b32.xlu0 %v2648_v44, %s2772_s9 }
0x19e7   :  { %2490 = vrot.lane.b32.xlu0 %v2489_v46, %s2768_s21 }
0x19eb   :  { %2495 = vrot.lane.b32.xlu0 %v2494_v52, %s2772_s9 }
0x19ef   :  { %2500 = vrot.lane.b32.xlu0 %v2499_v54, %s2774_s12 }
0x19f3   :  { %1988 = vrot.lane.b32.xlu0 %v3310_v56, %s2774_s12 }
0x19f7   :  { %1993 = vrot.lane.b32.xlu0 %v1915_v26, %s2774_s12 }
0x19fb   :  { %1975 = vrot.lane.b32.xlu0 %v3319_v63, %s2768_s21 }
0x19fc   :  { %2663 = shalt.err (!%p2660_p4)
}
0x19fd   :  { %s2664_s22 = scalar_lea.hbm %s3468_s18, 32 }
0x19fe   :  { %p2665_p5 = scmp.ne.s32.totalorder %s3468_s18, %s2664_s22  ;;  %p2668_p6 = scmp.lt.u32.totalorder %s2664_s22, %s3468_s18 }
0x1a00   :  { %p2670_p7 = pnand %p2668_p6, %p2665_p5 }
0x1a02   :  { %2673 = shalt.err (!%p2670_p7)
}
0x1a03   :  { %2043 = dma.vmem_to_hbm [thread:$0]  %s2041_s8, 32, %s3468_s18, [#allocation8]  }
0x1a04   :  { %s2776_s3 = smov [#allocation9]  }
0x1a05   :  { %s2050_s26 = sshll.u32 %s2776_s3, 4  ;;  %s2051_s26 = int_to_ptr.vmem [resolvable:$true] %s2050_s26 }
0x1a06   :  { %s2674_s6 = scalar_lea.vmem %s2051_s26, 16  ;;  %s2678_s27 = scalar_lea.vmem %s2051_s26, 32 }
0x1a07   :  { %p2675_p8 = scmp.ne.s32.totalorder %s2051_s26, %s2674_s6  ;;  %p2679_p9 = scmp.lt.s32.totalorder %s2051_s26, %s2051_s26 }
0x1a08   :  { %p2680_p10 = scmp.lt.s32.totalorder %s2678_s27, %s2674_s6 }
0x1a0a   :  { %p2681_p11 = por %p2680_p10, %p2679_p9 }
0x1a0c   :  { %p2682_p12 = pnand %p2681_p11, %p2675_p8 }
0x1a0e   :  { %2685 = shalt.err (!%p2682_p12)
}
0x1a0f   :  { %s2686_s4 = scalar_lea.hbm %s3469_s19, 16 }
0x1a10   :  { %p2687_p13 = scmp.ne.s32.totalorder %s3469_s19, %s2686_s4  ;;  %p2690_p0 = scmp.lt.u32.totalorder %s2686_s4, %s3469_s19 }
0x1a12   :  { %p2692_p1 = pnand %p2690_p0, %p2687_p13 }
0x1a14   :  { %2695 = shalt.err (!%p2692_p1)
}
0x1a15   :  { %2053 = dma.vmem_to_hbm [thread:$0]  %s2051_s26, 16, %s3469_s19, [#allocation8]   ;;  %v2777_v47 = vmov 1966171168   ;;  %v1961_v28 = vlaneseq  ;;  %vm1948_vm7 = vcmask 785408   ;;  %vm1978_vm8 = vcmask 261126  }
0x1a16   :  { %v1959_v22 = vunpack.c.l.s4 %v2777_v47  ;;  %s2778_s19 = smov [#allocation4]   ;;  %s2779_s8 = smov [#allocation6]   ;;  %vm1985_vm9 = vcmask 254976  }
0x1a17   :  { %v1962_v58 = vshrl.u32 %v1961_v28, 7  ;;  %s2017_s13 = sshll.u32 %s2778_s19, 4  ;;  %s2030_s1 = sshll.u32 %s2779_s8, 4  ;;  %s2018_s13 = int_to_ptr.vmem [resolvable:$true] %s2017_s13  ;;  %s3395_s1 = int_to_ptr.vmem [resolvable:$true] %s2030_s1 }
0x1a18   :  { %v1960_v50 = vunpack.c.0.s8 %v1959_v22  ;;  %s2696_s22 = scalar_lea.vmem %s2018_s13, 64  ;;  %p2701_p3 = scmp.lt.s32.totalorder %s2018_s13, %s2018_s13 }
0x1a19   :  { %p2697_p2 = scmp.ne.s32.totalorder %s2018_s13, %s2696_s22  ;;  %p2702_p4 = scmp.lt.s32.totalorder %s2696_s22, %s2696_s22 }
0x1a1a   :  { %v1963_v49 = vsub.s32 %v1960_v50, %v1962_v58 }
0x1a1b   :  { %p2703_p5 = por %p2702_p4, %p2701_p3 }
0x1a1d   :  { %p2704_p6 = pnand %p2703_p5, %p2697_p2 }
0x1a55   :  { %v1919_v5 = vpop.permute.xlu0 %1918 }
0x1a56   :  { %v1921_v62 = vmul.f32 %v2646_v51, %v1919_v5 }
0x1a58   :  { %1981 = vrot.lane.b32.xlu0 %v1921_v62, %s2768_s21 }
0x1a59   :  { %v2491_v55 = vpop.permute.xlu0 %2490 }
0x1a5a   :  { %v2493_v59 = vunpack.i.h.bf16 %v2491_v55  ;;  %v2492_v61 = vunpack.i.l.bf16 %v2491_v55 }
0x1a5d   :  { %v2496_v53 = vpop.permute.xlu0 %2495 }
0x1a5e   :  { %v2498_v56 = vunpack.i.h.bf16 %v2496_v53  ;;  %v2497_v57 = vunpack.i.l.bf16 %v2496_v53 }
0x1a60   :  { %v1946_v2 = vsel %vm64_vm1, %v2492_v61, %v2497_v57  ;;  %v1950_v3 = vsel %vm64_vm1, %v2493_v59, %v2498_v56 }
0x1a61   :  { %v2501_v60 = vpop.permute.xlu0 %2500 }
0x1a62   :  { %v2503_v63 = vunpack.i.h.bf16 %v2501_v60  ;;  %v2502_v0 = vunpack.i.l.bf16 %v2501_v60 }
0x1a64   :  { %v1947_v4 = vsel %vm106_vm2, %v1946_v2, %v2502_v0  ;;  %v1951_v8 = vsel %vm106_vm2, %v1950_v3, %v2503_v63 }
0x1a65   :  { %v1949_v9 = vsel %vm1948_vm7, %v1947_v4, %v3198_v39  ;;  %v1952_v10 = vsel %vm1948_vm7, %v1951_v8, %v1921_v62  ;;  %v1989_v11 = vpop.permute.xlu0 %1988 }
0x1a66   :  { %v2136_v45 = vpack.c.bf16 %v1952_v10, %v1949_v9  ;;  %1991 = vst.msk [vmem:[#allocation4 - $0x6] sm:$0xc0] %vm1978_vm8, %v1989_v11 }
0x1a68   :  { %v1964_v14 = vrot.slane %v2136_v45, %v1963_v49 }
0x1a69   :  { %v1994_v16 = vpop.permute.xlu0 %1993 }
0x1a6a   :  { %2137 = vst.sshfl [vmem:[%s3464_s14] sm:$0x5 pattern:$0x73625140] %v1964_v14  ;;  %1997 = vst.msk [vmem:[#allocation4 + $0x2] sm:$0x3] %vm1985_vm9, %v1994_v16 }
0x1a6b   :  { %2707 = shalt.err (!%p2704_p6)
}
0x1a6c   :  { %s2708_s11 = scalar_lea.hbm %s3466_s16, 64 }
0x1a6d   :  { %p2709_p7 = scmp.ne.s32.totalorder %s3466_s16, %s2708_s11  ;;  %p2712_p8 = scmp.lt.u32.totalorder %s2708_s11, %s3466_s16 }
0x1a6f   :  { %p2714_p9 = pnand %p2712_p8, %p2709_p7 }
0x1a71   :  { %2717 = shalt.err (!%p2714_p9)
}
0x1a72   :  { %s2780_s14 = smov 2   ;;  %s2718_s27 = scalar_lea.vmem %s3395_s1, 32 }
0x1a73   :  { %2023 = dma.vmem_to_hbm [thread:$0]  %s2018_s13, 64, %s3466_s16, [#allocation5], %s2768_s21, %s2768_s21, %s2780_s14  }
0x1a74   :  { %p2719_p10 = scmp.ne.s32.totalorder %s3395_s1, %s2718_s27  ;;  %p2723_p11 = scmp.lt.s32.totalorder %s3395_s1, %s3395_s1 }
0x1a75   :  { %p2724_p12 = scmp.lt.s32.totalorder %s2718_s27, %s2718_s27 }
0x1a77   :  { %p2725_p13 = por %p2724_p12, %p2723_p11 }
0x1a79   :  { %p2726_p0 = pnand %p2725_p13, %p2719_p10 }
0x1a7b   :  { %2729 = shalt.err (!%p2726_p0)
}
0x1a7c   :  { %s2730_s4 = scalar_lea.hbm %s3467_s17, 32 }
0x1a7d   :  { %p2731_p1 = scmp.ne.s32.totalorder %s3467_s17, %s2730_s4  ;;  %p2734_p2 = scmp.lt.u32.totalorder %s2730_s4, %s3467_s17 }
0x1a7f   :  { %p2736_p3 = pnand %p2734_p2, %p2731_p1 }
0x1a81   :  { %2739 = shalt.err (!%p2736_p3)
}
0x1a82   :  { %2033 = dma.vmem_to_hbm [thread:$0]  %s3395_s1, 32, %s3467_s17, [#allocation5]   ;;  %v1976_v39 = vpop.permute.xlu0 %1975 }
0x1a83   :  { %1979 = vst.msk [vmem:[#allocation2 - $0x6] sm:$0xc0] %vm1978_vm8, %v1976_v39  ;;  %s2781_s12 = smov [#allocation2]  }
0x1a84   :  { %s2005_s19 = sshll.u32 %s2781_s12, 4  ;;  %s2006_s19 = int_to_ptr.vmem [resolvable:$true] %s2005_s19 }
0x1a85   :  { %s2740_s13 = scalar_lea.vmem %s2006_s19, 64  ;;  %p2745_p5 = scmp.lt.s32.totalorder %s2006_s19, %s2006_s19 }
0x1a86   :  { %p2741_p4 = scmp.ne.s32.totalorder %s2006_s19, %s2740_s13  ;;  %p2746_p6 = scmp.lt.s32.totalorder %s2740_s13, %s2740_s13 }
0x1a88   :  { %p2747_p7 = por %p2746_p6, %p2745_p5 }
0x1a8a   :  { %p2748_p8 = pnand %p2747_p7, %p2741_p4 }
0x1aca   :  { %v1982_v17 = vpop.permute.xlu0 %1981 }
0x1acb   :  { %1986 = vst.msk [vmem:[#allocation2 + $0x2] sm:$0x3] %vm1985_vm9, %v1982_v17 }
0x1acc   :  { %2751 = shalt.err (!%p2748_p8)
}
0x1acd   :  { %s2752_s17 = scalar_lea.hbm %s3465_s15, 64 }
0x1ace   :  { %p2753_p9 = scmp.ne.s32.totalorder %s3465_s15, %s2752_s17  ;;  %p2756_p10 = scmp.lt.u32.totalorder %s2752_s17, %s3465_s15 }
0x1ad0   :  { %p2758_p11 = pnand %p2756_p10, %p2753_p9 }
0x1ad2   :  { %2761 = shalt.err (!%p2758_p11)
}
0x1ad3   :  { %2011 = dma.vmem_to_hbm [thread:$0]  %s2006_s19, 64, %s3465_s15, [#allocation3], %s2768_s21, %s2768_s21, %s2780_s14  }
0x1ad4   :  { %2762 = dma.done.wait [#allocation3], 64  }
0x1ad5   :  { %2763 = vsyncadd [#allocation3], 4294967232 }
0x1ad6   :  { %2764 = dma.done.wait [#allocation5], 96  }
0x1ad7   :  { %2765 = vsyncadd [#allocation5], 4294967200 }
0x1ad8   :  { %2766 = dma.done.wait [#allocation8], 48  }
0x1ad9   :  { %2767 = vsyncadd [#allocation8], 4294967248 }
0x1ada   :  { %2071 = vsyncpa [#allocation3], 1 }
0x1adb   :  { %2072 = vsyncpa [#allocation5], 1 }
0x1adc   :  { %2073 = vsyncpa [#allocation8], 1 }

</bundles_post_ra>
